<compile_context>
chip_gen: v7x
topology: tpu7x:2x2x1
jax: 0.10.0
libtpu: 0.0.40
codegen_flags: <defaults>
</compile_context>

<pallas_src>
import functools

import numpy as np
import jax
import jax.numpy as jnp
from jax import lax
from jax.experimental import pallas as pl
from jax.experimental.pallas import tpu as pltpu


# ----------------------------------------------------------------------------
# Fully fused forward kernel
# ----------------------------------------------------------------------------
def _g_fmnist_kernel(x_ref, w1_ref, b1_ref, a2_ref, b2_ref, a3_ref, b3_ref,
                     a4_ref, b4_ref, o_ref,
                     x2_ref, r2_ref, x3_ref, r3_ref, x4_ref, r4_ref,
                     *, Bp, hd):
    C1 = 4 * hd
    WC1 = 4 * C1            # lane width of one spatial row after the Linear
    K1 = 4 * C1             # conv2 contraction size (Win=4  * Cin=4hd)
    K2 = 7 * (2 * hd)       # conv3 contraction size (Win=7  * Cin=2hd)
    K3 = 11 * hd            # conv4 contraction size (Win=11 * Cin=hd)

    # ---- preprocess: Linear + ReLU (weight cols pre-permuted to (h,w,c)) ----
    h1 = jnp.dot(x_ref[...], w1_ref[...], preferred_element_type=jnp.float32)
    h1 = jnp.maximum(h1 + b1_ref[...], 0.0)                       # (Bp, 16*C1)

    # rearrange to conv layout x2[h*Bp + b, w*C1 + c]; all offsets vreg-aligned
    for h in range(4):
        x2_ref[h * Bp:(h + 1) * Bp, :] = h1[:, h * WC1:(h + 1) * WC1]

    # ---- block1: ConvTranspose2d(4hd, 2hd, 5) + ReLU, crop to 7x7 ----------
    x2 = x2_ref[...]                                              # (4*Bp, K1)
    for a in range(5):                                            # kernel row a
        r2_ref[a * 4 * Bp:(a + 1) * 4 * Bp, :] = jnp.dot(
            x2, a2_ref[a * K1:(a + 1) * K1, :],
            preferred_element_type=jnp.float32)
    b2 = b2_ref[...]
    for ho in range(7):                                           # cropped rows only
        acc = None
        for j in range(max(0, ho - 4), min(3, ho) + 1):           # a = ho - j
            blk = (ho - j) * 4 + j
            t = r2_ref[blk * Bp:(blk + 1) * Bp, :]
            acc = t if acc is None else acc + t
        x3_ref[ho * Bp:(ho + 1) * Bp, :] = jnp.maximum(acc + b2, 0.0)

    # ---- block2a: ConvTranspose2d(2hd, hd, 5) + ReLU ------------------------
    x3 = x3_ref[...]                                              # (7*Bp, K2)
    for a in range(5):
        r3_ref[a * 7 * Bp:(a + 1) * 7 * Bp, :] = jnp.dot(
            x3, a3_ref[a * K2:(a + 1) * K2, :],
            preferred_element_type=jnp.float32)
    b3 = b3_ref[...]
    for ho in range(11):
        acc = None
        for j in range(max(0, ho - 4), min(6, ho) + 1):           # a = ho - j
            blk = (ho - j) * 7 + j
            t = r3_ref[blk * Bp:(blk + 1) * Bp, :]
            acc = t if acc is None else acc + t
        x4_ref[ho * Bp:(ho + 1) * Bp, :] = jnp.maximum(acc + b3, 0.0)

    # ---- block2b: ConvTranspose2d(hd, 1, 8, stride=2) + Sigmoid -------------
    x4 = x4_ref[...]                                              # (11*Bp, K3)
    for a in range(8):
        r4_ref[a * 11 * Bp:(a + 1) * 11 * Bp, :] = jnp.dot(
            x4, a4_ref[a * K3:(a + 1) * K3, :],
            preferred_element_type=jnp.float32)
    b4 = b4_ref[...]
    for ho in range(28):                                          # out row = 2*j + a
        acc = None
        jlo = max(0, -(-(ho - 7) // 2))                           # ceil((ho-7)/2)
        jhi = min(10, ho // 2)
        for j in range(jlo, jhi + 1):                             # a = ho - 2*j
            blk = (ho - 2 * j) * 11 + j
            t = r4_ref[blk * Bp:(blk + 1) * Bp, :]
            acc = t if acc is None else acc + t
        y = acc + b4
        o_ref[ho * Bp:(ho + 1) * Bp, :] = 1.0 / (1.0 + jnp.exp(-y))


def g_fmnist_forward(prep, x, hidden_dim):
    """x: (B, input_dim) f32, prep: output of prepare_params -> (B, 1, 28, 28)."""
    B, input_dim = x.shape
    hd = hidden_dim
    C1, C2, C3 = 4 * hd, 2 * hd, hd
    Bp = ((B + 7) // 8) * 8                    # pad batch to a sublane multiple
    xp = jnp.zeros((Bp, input_dim), jnp.float32).at[:B, :].set(x.astype(jnp.float32))

    kernel = functools.partial(_g_fmnist_kernel, Bp=Bp, hd=hd)
    vmem = pl.BlockSpec(memory_space=pltpu.MemorySpace.VMEM)

    out = pl.pallas_call(
        kernel,
        out_shape=jax.ShapeDtypeStruct((28 * Bp, 28), jnp.float32),
        in_specs=[vmem] * 9,
        out_specs=vmem,
        scratch_shapes=[
            pltpu.VMEM((4 * Bp, 4 * C1), jnp.float32),        # x2  (linear, conv layout)
            pltpu.VMEM((5 * 4 * Bp, 7 * C2), jnp.float32),    # r2  (per-kernel-row products)
            pltpu.VMEM((7 * Bp, 7 * C2), jnp.float32),        # x3
            pltpu.VMEM((5 * 7 * Bp, 11 * C3), jnp.float32),   # r3
            pltpu.VMEM((11 * Bp, 11 * C3), jnp.float32),      # x4
            pltpu.VMEM((8 * 11 * Bp, 28), jnp.float32),       # r4
        ],
        compiler_params=pltpu.CompilerParams(vmem_limit_bytes=32 * 1024 * 1024),
    )(xp, prep["w1"], prep["b1"], prep["a2"], prep["b2"],
      prep["a3"], prep["b3"], prep["a4"], prep["b4"])

    # (28*Bp, 28) rows are (h, b); drop batch padding + move batch out front.
    img = out.reshape(28, Bp, 28)[:, :B, :].transpose(1, 0, 2).reshape(B, 1, 28, 28)
    return img


# ----------------------------------------------------------------------------
# One-time (hoisted) weight preparation
# ----------------------------------------------------------------------------
def prepare_params(params, input_dim, hidden_dim):
    hd = hidden_dim
    C1, C2, C3 = 4 * hd, 2 * hd, hd

    # Linear: permute output columns from PyTorch (c,h,w) ordering to (h,w,c).
    w1 = np.asarray(params["w1"], np.float32)
    b1 = np.asarray(params["b1"], np.float32)
    w1k = w1.reshape(input_dim, C1, 4, 4).transpose(0, 2, 3, 1).reshape(input_dim, 16 * C1)
    b1k = b1.reshape(C1, 4, 4).transpose(1, 2, 0).reshape(1, 16 * C1)

    def conv_row_mats(w, win, wout, stride):
        # ConvTranspose2d weight (Cin, Cout, K, K) -> per-kernel-row GEMM mats:
        #   A[a, j*Cin + ci, wo*Cout + co] = w[ci, co, a, wo - stride*j]
        # so out_row(stride*j + a) += X_row(j) @ A[a].  Flattened to 2-D.
        cin, cout, K, _ = w.shape
        A = np.zeros((K, win * cin, wout * cout), np.float32)
        for a in range(K):
            for j in range(win):
                for wo in range(wout):
                    kw = wo - stride * j
                    if 0 <= kw < K:
                        A[a, j * cin:(j + 1) * cin, wo * cout:(wo + 1) * cout] = w[:, :, a, kw]
        return A.reshape(K * win * cin, wout * cout)

    # wout=7 for block1 folds the column crop x[:, :, :, :7] into the matrix.
    a2 = conv_row_mats(np.asarray(params["w2"], np.float32), win=4, wout=7, stride=1)
    a3 = conv_row_mats(np.asarray(params["w3"], np.float32), win=7, wout=11, stride=1)
    a4 = conv_row_mats(np.asarray(params["w4"], np.float32), win=11, wout=28, stride=2)

    b2t = np.tile(np.asarray(params["b2"], np.float32), 7).reshape(1, 7 * C2)
    b3t = np.tile(np.asarray(params["b3"], np.float32), 11).reshape(1, 11 * C3)
    b4t = np.full((1, 28), float(np.asarray(params["b4"])[0]), np.float32)

    prepared = dict(w1=w1k, b1=b1k, a2=a2, b2=b2t, a3=a3, b3=b3t, a4=a4, b4=b4t)
    return {k: jnp.asarray(v) for k, v in prepared.items()}


# ----------------------------------------------------------------------------
# Pure-JAX reference (correctness check) — direct ConvTranspose scatter form
# ----------------------------------------------------------------------------
def _ref_conv_transpose2d(x, w, b, stride):
    B, Cin, Hin, Win = x.shape
    _, Cout, K, _ = w.shape
    Hout = (Hin - 1) * stride + K
    Wout = (Win - 1) * stride + K
    y = jnp.zeros((B, Cout, Hout, Wout), jnp.float32)
    for kh in range(K):
        for kw in range(K):
            contrib = jnp.einsum('bchw,cd->bdhw', x, w[:, :, kh, kw],
                                 precision=lax.Precision.HIGHEST)
            y = y.at[:, :, kh:kh + stride * Hin:stride,
                     kw:kw + stride * Win:stride].add(contrib)
    return y + b.reshape(1, -1, 1, 1)


def g_fmnist_reference(params, x, hidden_dim):
    hd = hidden_dim
    B = x.shape[0]
    h = jnp.dot(x, params["w1"], precision=lax.Precision.HIGHEST) + params["b1"]
    h = jnp.maximum(h, 0.0).reshape(B, 4 * hd, 4, 4)
    h = jnp.maximum(_ref_conv_transpose2d(h, params["w2"], params["b2"], 1), 0.0)
    h = h[:, :, :7, :7]
    h = jnp.maximum(_ref_conv_transpose2d(h, params["w3"], params["b3"], 1), 0.0)
    h = jax.nn.sigmoid(_ref_conv_transpose2d(h, params["w4"], params["b4"], 2))
    return h.reshape(B, 1, 28, 28)


# ----------------------------------------------------------------------------
# Deterministic parameter init (PyTorch module layout)
# ----------------------------------------------------------------------------
def init_params(key, input_dim, hidden_dim):
    hd = hidden_dim
    ks = jax.random.split(key, 8)

    def w(k, shape, fan_in):
        return jax.random.normal(k, shape, jnp.float32) / jnp.sqrt(float(fan_in))

    return {
        # Linear(input_dim, 4*4*4*hd), stored pre-transposed as (in, out)
        "w1": w(ks[0], (input_dim, 4 * 4 * 4 * hd), input_dim),
        "b1": 0.01 * jax.random.normal(ks[1], (4 * 4 * 4 * hd,), jnp.float32),
        # ConvTranspose2d(4*hd, 2*hd, 5): (Cin, Cout, K, K)
        "w2": w(ks[2], (4 * hd, 2 * hd, 5, 5), 4 * hd * 25),
        "b2": 0.01 * jax.random.normal(ks[3], (2 * hd,), jnp.float32),
        # ConvTranspose2d(2*hd, hd, 5)
        "w3": w(ks[4], (2 * hd, hd, 5, 5), 2 * hd * 25),
        "b3": 0.01 * jax.random.normal(ks[5], (hd,), jnp.float32),
        # ConvTranspose2d(hd, 1, 8, stride=2)
        "w4": w(ks[6], (hd, 1, 8, 8), hd * 64),
        "b4": 0.01 * jax.random.normal(ks[7], (1,), jnp.float32),
    }


if __name__ == "__main__":
    B, input_dim, hidden_dim = 2, 64, 16     # small shapes consistent with the module
    key = jax.random.PRNGKey(0)
    pkey, xkey = jax.random.split(key)
    params = init_params(pkey, input_dim, hidden_dim)
    x = jax.random.normal(xkey, (B, input_dim), jnp.float32)

    prep = prepare_params(params, input_dim, hidden_dim)   # hoisted, one-time

    fwd = jax.jit(functools.partial(g_fmnist_forward, hidden_dim=hidden_dim))
    out = jax.block_until_ready(fwd(prep, x))
    assert out.shape == (B, 1, 28, 28), out.shape
    assert out.dtype == jnp.float32

    ref_fn = jax.jit(functools.partial(g_fmnist_reference, hidden_dim=hidden_dim))
    ref = jax.block_until_ready(ref_fn(params, x))
    err = float(jnp.max(jnp.abs(out - ref)))
    assert err < 2e-3, f"max abs err {err}"

    print("KERNEL_OK")
</pallas_src>

<mosaic_0001>
module attributes {stable_mosaic.version = 11 : i64} {
  func.func @_g_fmnist_kernel(%arg0: memref<8x64xf32, #tpu.memory_space<vmem>>, %arg1: memref<64x1024xf32, #tpu.memory_space<vmem>>, %arg2: memref<1x1024xf32, #tpu.memory_space<vmem>>, %arg3: memref<1280x224xf32, #tpu.memory_space<vmem>>, %arg4: memref<1x224xf32, #tpu.memory_space<vmem>>, %arg5: memref<1120x176xf32, #tpu.memory_space<vmem>>, %arg6: memref<1x176xf32, #tpu.memory_space<vmem>>, %arg7: memref<1408x28xf32, #tpu.memory_space<vmem>>, %arg8: memref<1x28xf32, #tpu.memory_space<vmem>>, %arg9: memref<224x28xf32, #tpu.memory_space<vmem>>, %arg10: memref<32x256xf32, #tpu.memory_space<vmem>>, %arg11: memref<160x224xf32, #tpu.memory_space<vmem>>, %arg12: memref<56x224xf32, #tpu.memory_space<vmem>>, %arg13: memref<280x176xf32, #tpu.memory_space<vmem>>, %arg14: memref<88x176xf32, #tpu.memory_space<vmem>>, %arg15: memref<704x28xf32, #tpu.memory_space<vmem>>) attributes {dimension_semantics = [], scalar_prefetch = 0 : i64, scratch_operands = 6 : i64, tpu.core_type = #tpu.core_type<tc>} {
    %c0 = arith.constant 0 : index
    %c0_0 = arith.constant 0 : index
    %0 = vector.load %arg0[%c0, %c0_0] : memref<8x64xf32, #tpu.memory_space<vmem>>, vector<8x64xf32>
    %c0_1 = arith.constant 0 : index
    %c0_2 = arith.constant 0 : index
    %1 = vector.load %arg1[%c0_1, %c0_2] : memref<64x1024xf32, #tpu.memory_space<vmem>>, vector<64x1024xf32>
    %cst = arith.constant dense<0.000000e+00> : vector<8x1024xf32>
    %2 = tpu.matmul %0, %1, %cst {dimension_numbers = #tpu.dot_dimension_numbers<[1], [0], [0], [1], [0, 0, 1, 1], [], []>} : vector<8x64xf32>, vector<64x1024xf32>, vector<8x1024xf32> -> vector<8x1024xf32>
    %c0_3 = arith.constant 0 : index
    %c0_4 = arith.constant 0 : index
    %3 = vector.load %arg2[%c0_3, %c0_4] : memref<1x1024xf32, #tpu.memory_space<vmem>>, vector<1x1024xf32>
    %4 = vector.broadcast %3 : vector<1x1024xf32> to vector<8x1024xf32>
    %5 = arith.addf %2, %4 : vector<8x1024xf32>
    %cst_5 = arith.constant 0.000000e+00 : f32
    %6 = vector.broadcast %cst_5 : f32 to vector<8x1024xf32>
    %7 = arith.maximumf %5, %6 : vector<8x1024xf32>
    %8 = vector.extract_strided_slice %7 {offsets = [0, 0], sizes = [8, 256], strides = [1, 1]} : vector<8x1024xf32> to vector<8x256xf32>
    %c0_6 = arith.constant 0 : index
    %c0_7 = arith.constant 0 : index
    %9 = vector.load %arg10[%c0_6, %c0_7] : memref<32x256xf32, #tpu.memory_space<vmem>>, vector<8x256xf32>
    tpu.vector_store %arg10[%c0_6, %c0_7], %8 {strides = array<i32>} : memref<32x256xf32, #tpu.memory_space<vmem>>, vector<8x256xf32>,
    %10 = vector.extract_strided_slice %7 {offsets = [0, 256], sizes = [8, 256], strides = [1, 1]} : vector<8x1024xf32> to vector<8x256xf32>
    %c8 = arith.constant 8 : index
    %c0_8 = arith.constant 0 : index
    %11 = vector.load %arg10[%c8, %c0_8] : memref<32x256xf32, #tpu.memory_space<vmem>>, vector<8x256xf32>
    tpu.vector_store %arg10[%c8, %c0_8], %10 {strides = array<i32>} : memref<32x256xf32, #tpu.memory_space<vmem>>, vector<8x256xf32>,
    %12 = vector.extract_strided_slice %7 {offsets = [0, 512], sizes = [8, 256], strides = [1, 1]} : vector<8x1024xf32> to vector<8x256xf32>
    %c16 = arith.constant 16 : index
    %c0_9 = arith.constant 0 : index
    %13 = vector.load %arg10[%c16, %c0_9] : memref<32x256xf32, #tpu.memory_space<vmem>>, vector<8x256xf32>
    tpu.vector_store %arg10[%c16, %c0_9], %12 {strides = array<i32>} : memref<32x256xf32, #tpu.memory_space<vmem>>, vector<8x256xf32>,
    %14 = vector.extract_strided_slice %7 {offsets = [0, 768], sizes = [8, 256], strides = [1, 1]} : vector<8x1024xf32> to vector<8x256xf32>
    %c24 = arith.constant 24 : index
    %c0_10 = arith.constant 0 : index
    %15 = vector.load %arg10[%c24, %c0_10] : memref<32x256xf32, #tpu.memory_space<vmem>>, vector<8x256xf32>
    tpu.vector_store %arg10[%c24, %c0_10], %14 {strides = array<i32>} : memref<32x256xf32, #tpu.memory_space<vmem>>, vector<8x256xf32>,
    %c0_11 = arith.constant 0 : index
    %c0_12 = arith.constant 0 : index
    %16 = vector.load %arg10[%c0_11, %c0_12] : memref<32x256xf32, #tpu.memory_space<vmem>>, vector<32x256xf32>
    %c0_13 = arith.constant 0 : index
    %c0_14 = arith.constant 0 : index
    %17 = vector.load %arg3[%c0_13, %c0_14] : memref<1280x224xf32, #tpu.memory_space<vmem>>, vector<256x224xf32>
    %cst_15 = arith.constant dense<0.000000e+00> : vector<32x224xf32>
    %18 = tpu.matmul %16, %17, %cst_15 {dimension_numbers = #tpu.dot_dimension_numbers<[1], [0], [0], [1], [0, 0, 1, 1], [], []>} : vector<32x256xf32>, vector<256x224xf32>, vector<32x224xf32> -> vector<32x224xf32>
    %c0_16 = arith.constant 0 : index
    %c0_17 = arith.constant 0 : index
    %19 = vector.load %arg11[%c0_16, %c0_17] : memref<160x224xf32, #tpu.memory_space<vmem>>, vector<32x224xf32>
    tpu.vector_store %arg11[%c0_16, %c0_17], %18 {strides = array<i32>} : memref<160x224xf32, #tpu.memory_space<vmem>>, vector<32x224xf32>,
    %c256 = arith.constant 256 : index
    %c0_18 = arith.constant 0 : index
    %20 = vector.load %arg3[%c256, %c0_18] : memref<1280x224xf32, #tpu.memory_space<vmem>>, vector<256x224xf32>
    %cst_19 = arith.constant dense<0.000000e+00> : vector<32x224xf32>
    %21 = tpu.matmul %16, %20, %cst_19 {dimension_numbers = #tpu.dot_dimension_numbers<[1], [0], [0], [1], [0, 0, 1, 1], [], []>} : vector<32x256xf32>, vector<256x224xf32>, vector<32x224xf32> -> vector<32x224xf32>
    %c32 = arith.constant 32 : index
    %c0_20 = arith.constant 0 : index
    %22 = vector.load %arg11[%c32, %c0_20] : memref<160x224xf32, #tpu.memory_space<vmem>>, vector<32x224xf32>
    tpu.vector_store %arg11[%c32, %c0_20], %21 {strides = array<i32>} : memref<160x224xf32, #tpu.memory_space<vmem>>, vector<32x224xf32>,
    %c512 = arith.constant 512 : index
    %c0_21 = arith.constant 0 : index
    %23 = vector.load %arg3[%c512, %c0_21] : memref<1280x224xf32, #tpu.memory_space<vmem>>, vector<256x224xf32>
    %cst_22 = arith.constant dense<0.000000e+00> : vector<32x224xf32>
    %24 = tpu.matmul %16, %23, %cst_22 {dimension_numbers = #tpu.dot_dimension_numbers<[1], [0], [0], [1], [0, 0, 1, 1], [], []>} : vector<32x256xf32>, vector<256x224xf32>, vector<32x224xf32> -> vector<32x224xf32>
    %c64 = arith.constant 64 : index
    %c0_23 = arith.constant 0 : index
    %25 = vector.load %arg11[%c64, %c0_23] : memref<160x224xf32, #tpu.memory_space<vmem>>, vector<32x224xf32>
    tpu.vector_store %arg11[%c64, %c0_23], %24 {strides = array<i32>} : memref<160x224xf32, #tpu.memory_space<vmem>>, vector<32x224xf32>,
    %c768 = arith.constant 768 : index
    %c0_24 = arith.constant 0 : index
    %26 = vector.load %arg3[%c768, %c0_24] : memref<1280x224xf32, #tpu.memory_space<vmem>>, vector<256x224xf32>
    %cst_25 = arith.constant dense<0.000000e+00> : vector<32x224xf32>
    %27 = tpu.matmul %16, %26, %cst_25 {dimension_numbers = #tpu.dot_dimension_numbers<[1], [0], [0], [1], [0, 0, 1, 1], [], []>} : vector<32x256xf32>, vector<256x224xf32>, vector<32x224xf32> -> vector<32x224xf32>
    %c96 = arith.constant 96 : index
    %c0_26 = arith.constant 0 : index
    %28 = vector.load %arg11[%c96, %c0_26] : memref<160x224xf32, #tpu.memory_space<vmem>>, vector<32x224xf32>
    tpu.vector_store %arg11[%c96, %c0_26], %27 {strides = array<i32>} : memref<160x224xf32, #tpu.memory_space<vmem>>, vector<32x224xf32>,
    %c1024 = arith.constant 1024 : index
    %c0_27 = arith.constant 0 : index
    %29 = vector.load %arg3[%c1024, %c0_27] : memref<1280x224xf32, #tpu.memory_space<vmem>>, vector<256x224xf32>
    %cst_28 = arith.constant dense<0.000000e+00> : vector<32x224xf32>
    %30 = tpu.matmul %16, %29, %cst_28 {dimension_numbers = #tpu.dot_dimension_numbers<[1], [0], [0], [1], [0, 0, 1, 1], [], []>} : vector<32x256xf32>, vector<256x224xf32>, vector<32x224xf32> -> vector<32x224xf32>
    %c128 = arith.constant 128 : index
    %c0_29 = arith.constant 0 : index
    %31 = vector.load %arg11[%c128, %c0_29] : memref<160x224xf32, #tpu.memory_space<vmem>>, vector<32x224xf32>
    tpu.vector_store %arg11[%c128, %c0_29], %30 {strides = array<i32>} : memref<160x224xf32, #tpu.memory_space<vmem>>, vector<32x224xf32>,
    %c0_30 = arith.constant 0 : index
    %c0_31 = arith.constant 0 : index
    %32 = vector.load %arg4[%c0_30, %c0_31] : memref<1x224xf32, #tpu.memory_space<vmem>>, vector<1x224xf32>
    %c0_32 = arith.constant 0 : index
    %c0_33 = arith.constant 0 : index
    %33 = vector.load %arg11[%c0_32, %c0_33] : memref<160x224xf32, #tpu.memory_space<vmem>>, vector<8x224xf32>
    %34 = vector.broadcast %32 : vector<1x224xf32> to vector<8x224xf32>
    %35 = arith.addf %33, %34 : vector<8x224xf32>
    %cst_34 = arith.constant 0.000000e+00 : f32
    %36 = vector.broadcast %cst_34 : f32 to vector<8x224xf32>
    %37 = arith.maximumf %35, %36 : vector<8x224xf32>
    %c0_35 = arith.constant 0 : index
    %c0_36 = arith.constant 0 : index
    %38 = vector.load %arg12[%c0_35, %c0_36] : memref<56x224xf32, #tpu.memory_space<vmem>>, vector<8x224xf32>
    tpu.vector_store %arg12[%c0_35, %c0_36], %37 {strides = array<i32>} : memref<56x224xf32, #tpu.memory_space<vmem>>, vector<8x224xf32>,
    %c32_37 = arith.constant 32 : index
    %c0_38 = arith.constant 0 : index
    %39 = vector.load %arg11[%c32_37, %c0_38] : memref<160x224xf32, #tpu.memory_space<vmem>>, vector<8x224xf32>
    %c8_39 = arith.constant 8 : index
    %c0_40 = arith.constant 0 : index
    %40 = vector.load %arg11[%c8_39, %c0_40] : memref<160x224xf32, #tpu.memory_space<vmem>>, vector<8x224xf32>
    %41 = arith.addf %39, %40 : vector<8x224xf32>
    %42 = vector.broadcast %32 : vector<1x224xf32> to vector<8x224xf32>
    %43 = arith.addf %41, %42 : vector<8x224xf32>
    %cst_41 = arith.constant 0.000000e+00 : f32
    %44 = vector.broadcast %cst_41 : f32 to vector<8x224xf32>
    %45 = arith.maximumf %43, %44 : vector<8x224xf32>
    %c8_42 = arith.constant 8 : index
    %c0_43 = arith.constant 0 : index
    %46 = vector.load %arg12[%c8_42, %c0_43] : memref<56x224xf32, #tpu.memory_space<vmem>>, vector<8x224xf32>
    tpu.vector_store %arg12[%c8_42, %c0_43], %45 {strides = array<i32>} : memref<56x224xf32, #tpu.memory_space<vmem>>, vector<8x224xf32>,
    %c64_44 = arith.constant 64 : index
    %c0_45 = arith.constant 0 : index
    %47 = vector.load %arg11[%c64_44, %c0_45] : memref<160x224xf32, #tpu.memory_space<vmem>>, vector<8x224xf32>
    %c40 = arith.constant 40 : index
    %c0_46 = arith.constant 0 : index
    %48 = vector.load %arg11[%c40, %c0_46] : memref<160x224xf32, #tpu.memory_space<vmem>>, vector<8x224xf32>
    %49 = arith.addf %47, %48 : vector<8x224xf32>
    %c16_47 = arith.constant 16 : index
    %c0_48 = arith.constant 0 : index
    %50 = vector.load %arg11[%c16_47, %c0_48] : memref<160x224xf32, #tpu.memory_space<vmem>>, vector<8x224xf32>
    %51 = arith.addf %49, %50 : vector<8x224xf32>
    %52 = vector.broadcast %32 : vector<1x224xf32> to vector<8x224xf32>
    %53 = arith.addf %51, %52 : vector<8x224xf32>
    %cst_49 = arith.constant 0.000000e+00 : f32
    %54 = vector.broadcast %cst_49 : f32 to vector<8x224xf32>
    %55 = arith.maximumf %53, %54 : vector<8x224xf32>
    %c16_50 = arith.constant 16 : index
    %c0_51 = arith.constant 0 : index
    %56 = vector.load %arg12[%c16_50, %c0_51] : memref<56x224xf32, #tpu.memory_space<vmem>>, vector<8x224xf32>
    tpu.vector_store %arg12[%c16_50, %c0_51], %55 {strides = array<i32>} : memref<56x224xf32, #tpu.memory_space<vmem>>, vector<8x224xf32>,
    %c96_52 = arith.constant 96 : index
    %c0_53 = arith.constant 0 : index
    %57 = vector.load %arg11[%c96_52, %c0_53] : memref<160x224xf32, #tpu.memory_space<vmem>>, vector<8x224xf32>
    %c72 = arith.constant 72 : index
    %c0_54 = arith.constant 0 : index
    %58 = vector.load %arg11[%c72, %c0_54] : memref<160x224xf32, #tpu.memory_space<vmem>>, vector<8x224xf32>
    %59 = arith.addf %57, %58 : vector<8x224xf32>
    %c48 = arith.constant 48 : index
    %c0_55 = arith.constant 0 : index
    %60 = vector.load %arg11[%c48, %c0_55] : memref<160x224xf32, #tpu.memory_space<vmem>>, vector<8x224xf32>
    %61 = arith.addf %59, %60 : vector<8x224xf32>
    %c24_56 = arith.constant 24 : index
    %c0_57 = arith.constant 0 : index
    %62 = vector.load %arg11[%c24_56, %c0_57] : memref<160x224xf32, #tpu.memory_space<vmem>>, vector<8x224xf32>
    %63 = arith.addf %61, %62 : vector<8x224xf32>
    %64 = vector.broadcast %32 : vector<1x224xf32> to vector<8x224xf32>
    %65 = arith.addf %63, %64 : vector<8x224xf32>
    %cst_58 = arith.constant 0.000000e+00 : f32
    %66 = vector.broadcast %cst_58 : f32 to vector<8x224xf32>
    %67 = arith.maximumf %65, %66 : vector<8x224xf32>
    %c24_59 = arith.constant 24 : index
    %c0_60 = arith.constant 0 : index
    %68 = vector.load %arg12[%c24_59, %c0_60] : memref<56x224xf32, #tpu.memory_space<vmem>>, vector<8x224xf32>
    tpu.vector_store %arg12[%c24_59, %c0_60], %67 {strides = array<i32>} : memref<56x224xf32, #tpu.memory_space<vmem>>, vector<8x224xf32>,
    %c128_61 = arith.constant 128 : index
    %c0_62 = arith.constant 0 : index
    %69 = vector.load %arg11[%c128_61, %c0_62] : memref<160x224xf32, #tpu.memory_space<vmem>>, vector<8x224xf32>
    %c104 = arith.constant 104 : index
    %c0_63 = arith.constant 0 : index
    %70 = vector.load %arg11[%c104, %c0_63] : memref<160x224xf32, #tpu.memory_space<vmem>>, vector<8x224xf32>
    %71 = arith.addf %69, %70 : vector<8x224xf32>
    %c80 = arith.constant 80 : index
    %c0_64 = arith.constant 0 : index
    %72 = vector.load %arg11[%c80, %c0_64] : memref<160x224xf32, #tpu.memory_space<vmem>>, vector<8x224xf32>
    %73 = arith.addf %71, %72 : vector<8x224xf32>
    %c56 = arith.constant 56 : index
    %c0_65 = arith.constant 0 : index
    %74 = vector.load %arg11[%c56, %c0_65] : memref<160x224xf32, #tpu.memory_space<vmem>>, vector<8x224xf32>
    %75 = arith.addf %73, %74 : vector<8x224xf32>
    %76 = vector.broadcast %32 : vector<1x224xf32> to vector<8x224xf32>
    %77 = arith.addf %75, %76 : vector<8x224xf32>
    %cst_66 = arith.constant 0.000000e+00 : f32
    %78 = vector.broadcast %cst_66 : f32 to vector<8x224xf32>
    %79 = arith.maximumf %77, %78 : vector<8x224xf32>
    %c32_67 = arith.constant 32 : index
    %c0_68 = arith.constant 0 : index
    %80 = vector.load %arg12[%c32_67, %c0_68] : memref<56x224xf32, #tpu.memory_space<vmem>>, vector<8x224xf32>
    tpu.vector_store %arg12[%c32_67, %c0_68], %79 {strides = array<i32>} : memref<56x224xf32, #tpu.memory_space<vmem>>, vector<8x224xf32>,
    %c136 = arith.constant 136 : index
    %c0_69 = arith.constant 0 : index
    %81 = vector.load %arg11[%c136, %c0_69] : memref<160x224xf32, #tpu.memory_space<vmem>>, vector<8x224xf32>
    %c112 = arith.constant 112 : index
    %c0_70 = arith.constant 0 : index
    %82 = vector.load %arg11[%c112, %c0_70] : memref<160x224xf32, #tpu.memory_space<vmem>>, vector<8x224xf32>
    %83 = arith.addf %81, %82 : vector<8x224xf32>
    %c88 = arith.constant 88 : index
    %c0_71 = arith.constant 0 : index
    %84 = vector.load %arg11[%c88, %c0_71] : memref<160x224xf32, #tpu.memory_space<vmem>>, vector<8x224xf32>
    %85 = arith.addf %83, %84 : vector<8x224xf32>
    %86 = vector.broadcast %32 : vector<1x224xf32> to vector<8x224xf32>
    %87 = arith.addf %85, %86 : vector<8x224xf32>
    %cst_72 = arith.constant 0.000000e+00 : f32
    %88 = vector.broadcast %cst_72 : f32 to vector<8x224xf32>
    %89 = arith.maximumf %87, %88 : vector<8x224xf32>
    %c40_73 = arith.constant 40 : index
    %c0_74 = arith.constant 0 : index
    %90 = vector.load %arg12[%c40_73, %c0_74] : memref<56x224xf32, #tpu.memory_space<vmem>>, vector<8x224xf32>
    tpu.vector_store %arg12[%c40_73, %c0_74], %89 {strides = array<i32>} : memref<56x224xf32, #tpu.memory_space<vmem>>, vector<8x224xf32>,
    %c144 = arith.constant 144 : index
    %c0_75 = arith.constant 0 : index
    %91 = vector.load %arg11[%c144, %c0_75] : memref<160x224xf32, #tpu.memory_space<vmem>>, vector<8x224xf32>
    %c120 = arith.constant 120 : index
    %c0_76 = arith.constant 0 : index
    %92 = vector.load %arg11[%c120, %c0_76] : memref<160x224xf32, #tpu.memory_space<vmem>>, vector<8x224xf32>
    %93 = arith.addf %91, %92 : vector<8x224xf32>
    %94 = vector.broadcast %32 : vector<1x224xf32> to vector<8x224xf32>
    %95 = arith.addf %93, %94 : vector<8x224xf32>
    %cst_77 = arith.constant 0.000000e+00 : f32
    %96 = vector.broadcast %cst_77 : f32 to vector<8x224xf32>
    %97 = arith.maximumf %95, %96 : vector<8x224xf32>
    %c48_78 = arith.constant 48 : index
    %c0_79 = arith.constant 0 : index
    %98 = vector.load %arg12[%c48_78, %c0_79] : memref<56x224xf32, #tpu.memory_space<vmem>>, vector<8x224xf32>
    tpu.vector_store %arg12[%c48_78, %c0_79], %97 {strides = array<i32>} : memref<56x224xf32, #tpu.memory_space<vmem>>, vector<8x224xf32>,
    %c0_80 = arith.constant 0 : index
    %c0_81 = arith.constant 0 : index
    %99 = vector.load %arg12[%c0_80, %c0_81] : memref<56x224xf32, #tpu.memory_space<vmem>>, vector<56x224xf32>
    %c0_82 = arith.constant 0 : index
    %c0_83 = arith.constant 0 : index
    %100 = vector.load %arg5[%c0_82, %c0_83] : memref<1120x176xf32, #tpu.memory_space<vmem>>, vector<224x176xf32>
    %cst_84 = arith.constant dense<0.000000e+00> : vector<56x176xf32>
    %101 = tpu.matmul %99, %100, %cst_84 {dimension_numbers = #tpu.dot_dimension_numbers<[1], [0], [0], [1], [0, 0, 1, 1], [], []>} : vector<56x224xf32>, vector<224x176xf32>, vector<56x176xf32> -> vector<56x176xf32>
    %c0_85 = arith.constant 0 : index
    %c0_86 = arith.constant 0 : index
    %102 = vector.load %arg13[%c0_85, %c0_86] : memref<280x176xf32, #tpu.memory_space<vmem>>, vector<56x176xf32>
    tpu.vector_store %arg13[%c0_85, %c0_86], %101 {strides = array<i32>} : memref<280x176xf32, #tpu.memory_space<vmem>>, vector<56x176xf32>,
    %c224 = arith.constant 224 : index
    %c0_87 = arith.constant 0 : index
    %103 = vector.load %arg5[%c224, %c0_87] : memref<1120x176xf32, #tpu.memory_space<vmem>>, vector<224x176xf32>
    %cst_88 = arith.constant dense<0.000000e+00> : vector<56x176xf32>
    %104 = tpu.matmul %99, %103, %cst_88 {dimension_numbers = #tpu.dot_dimension_numbers<[1], [0], [0], [1], [0, 0, 1, 1], [], []>} : vector<56x224xf32>, vector<224x176xf32>, vector<56x176xf32> -> vector<56x176xf32>
    %c56_89 = arith.constant 56 : index
    %c0_90 = arith.constant 0 : index
    %105 = vector.load %arg13[%c56_89, %c0_90] : memref<280x176xf32, #tpu.memory_space<vmem>>, vector<56x176xf32>
    tpu.vector_store %arg13[%c56_89, %c0_90], %104 {strides = array<i32>} : memref<280x176xf32, #tpu.memory_space<vmem>>, vector<56x176xf32>,
    %c448 = arith.constant 448 : index
    %c0_91 = arith.constant 0 : index
    %106 = vector.load %arg5[%c448, %c0_91] : memref<1120x176xf32, #tpu.memory_space<vmem>>, vector<224x176xf32>
    %cst_92 = arith.constant dense<0.000000e+00> : vector<56x176xf32>
    %107 = tpu.matmul %99, %106, %cst_92 {dimension_numbers = #tpu.dot_dimension_numbers<[1], [0], [0], [1], [0, 0, 1, 1], [], []>} : vector<56x224xf32>, vector<224x176xf32>, vector<56x176xf32> -> vector<56x176xf32>
    %c112_93 = arith.constant 112 : index
    %c0_94 = arith.constant 0 : index
    %108 = vector.load %arg13[%c112_93, %c0_94] : memref<280x176xf32, #tpu.memory_space<vmem>>, vector<56x176xf32>
    tpu.vector_store %arg13[%c112_93, %c0_94], %107 {strides = array<i32>} : memref<280x176xf32, #tpu.memory_space<vmem>>, vector<56x176xf32>,
    %c672 = arith.constant 672 : index
    %c0_95 = arith.constant 0 : index
    %109 = vector.load %arg5[%c672, %c0_95] : memref<1120x176xf32, #tpu.memory_space<vmem>>, vector<224x176xf32>
    %cst_96 = arith.constant dense<0.000000e+00> : vector<56x176xf32>
    %110 = tpu.matmul %99, %109, %cst_96 {dimension_numbers = #tpu.dot_dimension_numbers<[1], [0], [0], [1], [0, 0, 1, 1], [], []>} : vector<56x224xf32>, vector<224x176xf32>, vector<56x176xf32> -> vector<56x176xf32>
    %c168 = arith.constant 168 : index
    %c0_97 = arith.constant 0 : index
    %111 = vector.load %arg13[%c168, %c0_97] : memref<280x176xf32, #tpu.memory_space<vmem>>, vector<56x176xf32>
    tpu.vector_store %arg13[%c168, %c0_97], %110 {strides = array<i32>} : memref<280x176xf32, #tpu.memory_space<vmem>>, vector<56x176xf32>,
    %c896 = arith.constant 896 : index
    %c0_98 = arith.constant 0 : index
    %112 = vector.load %arg5[%c896, %c0_98] : memref<1120x176xf32, #tpu.memory_space<vmem>>, vector<224x176xf32>
    %cst_99 = arith.constant dense<0.000000e+00> : vector<56x176xf32>
    %113 = tpu.matmul %99, %112, %cst_99 {dimension_numbers = #tpu.dot_dimension_numbers<[1], [0], [0], [1], [0, 0, 1, 1], [], []>} : vector<56x224xf32>, vector<224x176xf32>, vector<56x176xf32> -> vector<56x176xf32>
    %c224_100 = arith.constant 224 : index
    %c0_101 = arith.constant 0 : index
    %114 = vector.load %arg13[%c224_100, %c0_101] : memref<280x176xf32, #tpu.memory_space<vmem>>, vector<56x176xf32>
    tpu.vector_store %arg13[%c224_100, %c0_101], %113 {strides = array<i32>} : memref<280x176xf32, #tpu.memory_space<vmem>>, vector<56x176xf32>,
    %c0_102 = arith.constant 0 : index
    %c0_103 = arith.constant 0 : index
    %115 = vector.load %arg6[%c0_102, %c0_103] : memref<1x176xf32, #tpu.memory_space<vmem>>, vector<1x176xf32>
    %c0_104 = arith.constant 0 : index
    %c0_105 = arith.constant 0 : index
    %116 = vector.load %arg13[%c0_104, %c0_105] : memref<280x176xf32, #tpu.memory_space<vmem>>, vector<8x176xf32>
    %117 = vector.broadcast %115 : vector<1x176xf32> to vector<8x176xf32>
    %118 = arith.addf %116, %117 : vector<8x176xf32>
    %cst_106 = arith.constant 0.000000e+00 : f32
    %119 = vector.broadcast %cst_106 : f32 to vector<8x176xf32>
    %120 = arith.maximumf %118, %119 : vector<8x176xf32>
    %c0_107 = arith.constant 0 : index
    %c0_108 = arith.constant 0 : index
    %121 = vector.load %arg14[%c0_107, %c0_108] : memref<88x176xf32, #tpu.memory_space<vmem>>, vector<8x176xf32>
    tpu.vector_store %arg14[%c0_107, %c0_108], %120 {strides = array<i32>} : memref<88x176xf32, #tpu.memory_space<vmem>>, vector<8x176xf32>,
    %c56_109 = arith.constant 56 : index
    %c0_110 = arith.constant 0 : index
    %122 = vector.load %arg13[%c56_109, %c0_110] : memref<280x176xf32, #tpu.memory_space<vmem>>, vector<8x176xf32>
    %c8_111 = arith.constant 8 : index
    %c0_112 = arith.constant 0 : index
    %123 = vector.load %arg13[%c8_111, %c0_112] : memref<280x176xf32, #tpu.memory_space<vmem>>, vector<8x176xf32>
    %124 = arith.addf %122, %123 : vector<8x176xf32>
    %125 = vector.broadcast %115 : vector<1x176xf32> to vector<8x176xf32>
    %126 = arith.addf %124, %125 : vector<8x176xf32>
    %cst_113 = arith.constant 0.000000e+00 : f32
    %127 = vector.broadcast %cst_113 : f32 to vector<8x176xf32>
    %128 = arith.maximumf %126, %127 : vector<8x176xf32>
    %c8_114 = arith.constant 8 : index
    %c0_115 = arith.constant 0 : index
    %129 = vector.load %arg14[%c8_114, %c0_115] : memref<88x176xf32, #tpu.memory_space<vmem>>, vector<8x176xf32>
    tpu.vector_store %arg14[%c8_114, %c0_115], %128 {strides = array<i32>} : memref<88x176xf32, #tpu.memory_space<vmem>>, vector<8x176xf32>,
    %c112_116 = arith.constant 112 : index
    %c0_117 = arith.constant 0 : index
    %130 = vector.load %arg13[%c112_116, %c0_117] : memref<280x176xf32, #tpu.memory_space<vmem>>, vector<8x176xf32>
    %c64_118 = arith.constant 64 : index
    %c0_119 = arith.constant 0 : index
    %131 = vector.load %arg13[%c64_118, %c0_119] : memref<280x176xf32, #tpu.memory_space<vmem>>, vector<8x176xf32>
    %132 = arith.addf %130, %131 : vector<8x176xf32>
    %c16_120 = arith.constant 16 : index
    %c0_121 = arith.constant 0 : index
    %133 = vector.load %arg13[%c16_120, %c0_121] : memref<280x176xf32, #tpu.memory_space<vmem>>, vector<8x176xf32>
    %134 = arith.addf %132, %133 : vector<8x176xf32>
    %135 = vector.broadcast %115 : vector<1x176xf32> to vector<8x176xf32>
    %136 = arith.addf %134, %135 : vector<8x176xf32>
    %cst_122 = arith.constant 0.000000e+00 : f32
    %137 = vector.broadcast %cst_122 : f32 to vector<8x176xf32>
    %138 = arith.maximumf %136, %137 : vector<8x176xf32>
    %c16_123 = arith.constant 16 : index
    %c0_124 = arith.constant 0 : index
    %139 = vector.load %arg14[%c16_123, %c0_124] : memref<88x176xf32, #tpu.memory_space<vmem>>, vector<8x176xf32>
    tpu.vector_store %arg14[%c16_123, %c0_124], %138 {strides = array<i32>} : memref<88x176xf32, #tpu.memory_space<vmem>>, vector<8x176xf32>,
    %c168_125 = arith.constant 168 : index
    %c0_126 = arith.constant 0 : index
    %140 = vector.load %arg13[%c168_125, %c0_126] : memref<280x176xf32, #tpu.memory_space<vmem>>, vector<8x176xf32>
    %c120_127 = arith.constant 120 : index
    %c0_128 = arith.constant 0 : index
    %141 = vector.load %arg13[%c120_127, %c0_128] : memref<280x176xf32, #tpu.memory_space<vmem>>, vector<8x176xf32>
    %142 = arith.addf %140, %141 : vector<8x176xf32>
    %c72_129 = arith.constant 72 : index
    %c0_130 = arith.constant 0 : index
    %143 = vector.load %arg13[%c72_129, %c0_130] : memref<280x176xf32, #tpu.memory_space<vmem>>, vector<8x176xf32>
    %144 = arith.addf %142, %143 : vector<8x176xf32>
    %c24_131 = arith.constant 24 : index
    %c0_132 = arith.constant 0 : index
    %145 = vector.load %arg13[%c24_131, %c0_132] : memref<280x176xf32, #tpu.memory_space<vmem>>, vector<8x176xf32>
    %146 = arith.addf %144, %145 : vector<8x176xf32>
    %147 = vector.broadcast %115 : vector<1x176xf32> to vector<8x176xf32>
    %148 = arith.addf %146, %147 : vector<8x176xf32>
    %cst_133 = arith.constant 0.000000e+00 : f32
    %149 = vector.broadcast %cst_133 : f32 to vector<8x176xf32>
    %150 = arith.maximumf %148, %149 : vector<8x176xf32>
    %c24_134 = arith.constant 24 : index
    %c0_135 = arith.constant 0 : index
    %151 = vector.load %arg14[%c24_134, %c0_135] : memref<88x176xf32, #tpu.memory_space<vmem>>, vector<8x176xf32>
    tpu.vector_store %arg14[%c24_134, %c0_135], %150 {strides = array<i32>} : memref<88x176xf32, #tpu.memory_space<vmem>>, vector<8x176xf32>,
    %c224_136 = arith.constant 224 : index
    %c0_137 = arith.constant 0 : index
    %152 = vector.load %arg13[%c224_136, %c0_137] : memref<280x176xf32, #tpu.memory_space<vmem>>, vector<8x176xf32>
    %c176 = arith.constant 176 : index
    %c0_138 = arith.constant 0 : index
    %153 = vector.load %arg13[%c176, %c0_138] : memref<280x176xf32, #tpu.memory_space<vmem>>, vector<8x176xf32>
    %154 = arith.addf %152, %153 : vector<8x176xf32>
    %c128_139 = arith.constant 128 : index
    %c0_140 = arith.constant 0 : index
    %155 = vector.load %arg13[%c128_139, %c0_140] : memref<280x176xf32, #tpu.memory_space<vmem>>, vector<8x176xf32>
    %156 = arith.addf %154, %155 : vector<8x176xf32>
    %c80_141 = arith.constant 80 : index
    %c0_142 = arith.constant 0 : index
    %157 = vector.load %arg13[%c80_141, %c0_142] : memref<280x176xf32, #tpu.memory_space<vmem>>, vector<8x176xf32>
    %158 = arith.addf %156, %157 : vector<8x176xf32>
    %c32_143 = arith.constant 32 : index
    %c0_144 = arith.constant 0 : index
    %159 = vector.load %arg13[%c32_143, %c0_144] : memref<280x176xf32, #tpu.memory_space<vmem>>, vector<8x176xf32>
    %160 = arith.addf %158, %159 : vector<8x176xf32>
    %161 = vector.broadcast %115 : vector<1x176xf32> to vector<8x176xf32>
    %162 = arith.addf %160, %161 : vector<8x176xf32>
    %cst_145 = arith.constant 0.000000e+00 : f32
    %163 = vector.broadcast %cst_145 : f32 to vector<8x176xf32>
    %164 = arith.maximumf %162, %163 : vector<8x176xf32>
    %c32_146 = arith.constant 32 : index
    %c0_147 = arith.constant 0 : index
    %165 = vector.load %arg14[%c32_146, %c0_147] : memref<88x176xf32, #tpu.memory_space<vmem>>, vector<8x176xf32>
    tpu.vector_store %arg14[%c32_146, %c0_147], %164 {strides = array<i32>} : memref<88x176xf32, #tpu.memory_space<vmem>>, vector<8x176xf32>,
    %c232 = arith.constant 232 : index
    %c0_148 = arith.constant 0 : index
    %166 = vector.load %arg13[%c232, %c0_148] : memref<280x176xf32, #tpu.memory_space<vmem>>, vector<8x176xf32>
    %c184 = arith.constant 184 : index
    %c0_149 = arith.constant 0 : index
    %167 = vector.load %arg13[%c184, %c0_149] : memref<280x176xf32, #tpu.memory_space<vmem>>, vector<8x176xf32>
    %168 = arith.addf %166, %167 : vector<8x176xf32>
    %c136_150 = arith.constant 136 : index
    %c0_151 = arith.constant 0 : index
    %169 = vector.load %arg13[%c136_150, %c0_151] : memref<280x176xf32, #tpu.memory_space<vmem>>, vector<8x176xf32>
    %170 = arith.addf %168, %169 : vector<8x176xf32>
    %c88_152 = arith.constant 88 : index
    %c0_153 = arith.constant 0 : index
    %171 = vector.load %arg13[%c88_152, %c0_153] : memref<280x176xf32, #tpu.memory_space<vmem>>, vector<8x176xf32>
    %172 = arith.addf %170, %171 : vector<8x176xf32>
    %c40_154 = arith.constant 40 : index
    %c0_155 = arith.constant 0 : index
    %173 = vector.load %arg13[%c40_154, %c0_155] : memref<280x176xf32, #tpu.memory_space<vmem>>, vector<8x176xf32>
    %174 = arith.addf %172, %173 : vector<8x176xf32>
    %175 = vector.broadcast %115 : vector<1x176xf32> to vector<8x176xf32>
    %176 = arith.addf %174, %175 : vector<8x176xf32>
    %cst_156 = arith.constant 0.000000e+00 : f32
    %177 = vector.broadcast %cst_156 : f32 to vector<8x176xf32>
    %178 = arith.maximumf %176, %177 : vector<8x176xf32>
    %c40_157 = arith.constant 40 : index
    %c0_158 = arith.constant 0 : index
    %179 = vector.load %arg14[%c40_157, %c0_158] : memref<88x176xf32, #tpu.memory_space<vmem>>, vector<8x176xf32>
    tpu.vector_store %arg14[%c40_157, %c0_158], %178 {strides = array<i32>} : memref<88x176xf32, #tpu.memory_space<vmem>>, vector<8x176xf32>,
    %c240 = arith.constant 240 : index
    %c0_159 = arith.constant 0 : index
    %180 = vector.load %arg13[%c240, %c0_159] : memref<280x176xf32, #tpu.memory_space<vmem>>, vector<8x176xf32>
    %c192 = arith.constant 192 : index
    %c0_160 = arith.constant 0 : index
    %181 = vector.load %arg13[%c192, %c0_160] : memref<280x176xf32, #tpu.memory_space<vmem>>, vector<8x176xf32>
    %182 = arith.addf %180, %181 : vector<8x176xf32>
    %c144_161 = arith.constant 144 : index
    %c0_162 = arith.constant 0 : index
    %183 = vector.load %arg13[%c144_161, %c0_162] : memref<280x176xf32, #tpu.memory_space<vmem>>, vector<8x176xf32>
    %184 = arith.addf %182, %183 : vector<8x176xf32>
    %c96_163 = arith.constant 96 : index
    %c0_164 = arith.constant 0 : index
    %185 = vector.load %arg13[%c96_163, %c0_164] : memref<280x176xf32, #tpu.memory_space<vmem>>, vector<8x176xf32>
    %186 = arith.addf %184, %185 : vector<8x176xf32>
    %c48_165 = arith.constant 48 : index
    %c0_166 = arith.constant 0 : index
    %187 = vector.load %arg13[%c48_165, %c0_166] : memref<280x176xf32, #tpu.memory_space<vmem>>, vector<8x176xf32>
    %188 = arith.addf %186, %187 : vector<8x176xf32>
    %189 = vector.broadcast %115 : vector<1x176xf32> to vector<8x176xf32>
    %190 = arith.addf %188, %189 : vector<8x176xf32>
    %cst_167 = arith.constant 0.000000e+00 : f32
    %191 = vector.broadcast %cst_167 : f32 to vector<8x176xf32>
    %192 = arith.maximumf %190, %191 : vector<8x176xf32>
    %c48_168 = arith.constant 48 : index
    %c0_169 = arith.constant 0 : index
    %193 = vector.load %arg14[%c48_168, %c0_169] : memref<88x176xf32, #tpu.memory_space<vmem>>, vector<8x176xf32>
    tpu.vector_store %arg14[%c48_168, %c0_169], %192 {strides = array<i32>} : memref<88x176xf32, #tpu.memory_space<vmem>>, vector<8x176xf32>,
    %c248 = arith.constant 248 : index
    %c0_170 = arith.constant 0 : index
    %194 = vector.load %arg13[%c248, %c0_170] : memref<280x176xf32, #tpu.memory_space<vmem>>, vector<8x176xf32>
    %c200 = arith.constant 200 : index
    %c0_171 = arith.constant 0 : index
    %195 = vector.load %arg13[%c200, %c0_171] : memref<280x176xf32, #tpu.memory_space<vmem>>, vector<8x176xf32>
    %196 = arith.addf %194, %195 : vector<8x176xf32>
    %c152 = arith.constant 152 : index
    %c0_172 = arith.constant 0 : index
    %197 = vector.load %arg13[%c152, %c0_172] : memref<280x176xf32, #tpu.memory_space<vmem>>, vector<8x176xf32>
    %198 = arith.addf %196, %197 : vector<8x176xf32>
    %c104_173 = arith.constant 104 : index
    %c0_174 = arith.constant 0 : index
    %199 = vector.load %arg13[%c104_173, %c0_174] : memref<280x176xf32, #tpu.memory_space<vmem>>, vector<8x176xf32>
    %200 = arith.addf %198, %199 : vector<8x176xf32>
    %201 = vector.broadcast %115 : vector<1x176xf32> to vector<8x176xf32>
    %202 = arith.addf %200, %201 : vector<8x176xf32>
    %cst_175 = arith.constant 0.000000e+00 : f32
    %203 = vector.broadcast %cst_175 : f32 to vector<8x176xf32>
    %204 = arith.maximumf %202, %203 : vector<8x176xf32>
    %c56_176 = arith.constant 56 : index
    %c0_177 = arith.constant 0 : index
    %205 = vector.load %arg14[%c56_176, %c0_177] : memref<88x176xf32, #tpu.memory_space<vmem>>, vector<8x176xf32>
    tpu.vector_store %arg14[%c56_176, %c0_177], %204 {strides = array<i32>} : memref<88x176xf32, #tpu.memory_space<vmem>>, vector<8x176xf32>,
    %c256_178 = arith.constant 256 : index
    %c0_179 = arith.constant 0 : index
    %206 = vector.load %arg13[%c256_178, %c0_179] : memref<280x176xf32, #tpu.memory_space<vmem>>, vector<8x176xf32>
    %c208 = arith.constant 208 : index
    %c0_180 = arith.constant 0 : index
    %207 = vector.load %arg13[%c208, %c0_180] : memref<280x176xf32, #tpu.memory_space<vmem>>, vector<8x176xf32>
    %208 = arith.addf %206, %207 : vector<8x176xf32>
    %c160 = arith.constant 160 : index
    %c0_181 = arith.constant 0 : index
    %209 = vector.load %arg13[%c160, %c0_181] : memref<280x176xf32, #tpu.memory_space<vmem>>, vector<8x176xf32>
    %210 = arith.addf %208, %209 : vector<8x176xf32>
    %211 = vector.broadcast %115 : vector<1x176xf32> to vector<8x176xf32>
    %212 = arith.addf %210, %211 : vector<8x176xf32>
    %cst_182 = arith.constant 0.000000e+00 : f32
    %213 = vector.broadcast %cst_182 : f32 to vector<8x176xf32>
    %214 = arith.maximumf %212, %213 : vector<8x176xf32>
    %c64_183 = arith.constant 64 : index
    %c0_184 = arith.constant 0 : index
    %215 = vector.load %arg14[%c64_183, %c0_184] : memref<88x176xf32, #tpu.memory_space<vmem>>, vector<8x176xf32>
    tpu.vector_store %arg14[%c64_183, %c0_184], %214 {strides = array<i32>} : memref<88x176xf32, #tpu.memory_space<vmem>>, vector<8x176xf32>,
    %c264 = arith.constant 264 : index
    %c0_185 = arith.constant 0 : index
    %216 = vector.load %arg13[%c264, %c0_185] : memref<280x176xf32, #tpu.memory_space<vmem>>, vector<8x176xf32>
    %c216 = arith.constant 216 : index
    %c0_186 = arith.constant 0 : index
    %217 = vector.load %arg13[%c216, %c0_186] : memref<280x176xf32, #tpu.memory_space<vmem>>, vector<8x176xf32>
    %218 = arith.addf %216, %217 : vector<8x176xf32>
    %219 = vector.broadcast %115 : vector<1x176xf32> to vector<8x176xf32>
    %220 = arith.addf %218, %219 : vector<8x176xf32>
    %cst_187 = arith.constant 0.000000e+00 : f32
    %221 = vector.broadcast %cst_187 : f32 to vector<8x176xf32>
    %222 = arith.maximumf %220, %221 : vector<8x176xf32>
    %c72_188 = arith.constant 72 : index
    %c0_189 = arith.constant 0 : index
    %223 = vector.load %arg14[%c72_188, %c0_189] : memref<88x176xf32, #tpu.memory_space<vmem>>, vector<8x176xf32>
    tpu.vector_store %arg14[%c72_188, %c0_189], %222 {strides = array<i32>} : memref<88x176xf32, #tpu.memory_space<vmem>>, vector<8x176xf32>,
    %c272 = arith.constant 272 : index
    %c0_190 = arith.constant 0 : index
    %224 = vector.load %arg13[%c272, %c0_190] : memref<280x176xf32, #tpu.memory_space<vmem>>, vector<8x176xf32>
    %225 = vector.broadcast %115 : vector<1x176xf32> to vector<8x176xf32>
    %226 = arith.addf %224, %225 : vector<8x176xf32>
    %cst_191 = arith.constant 0.000000e+00 : f32
    %227 = vector.broadcast %cst_191 : f32 to vector<8x176xf32>
    %228 = arith.maximumf %226, %227 : vector<8x176xf32>
    %c80_192 = arith.constant 80 : index
    %c0_193 = arith.constant 0 : index
    %229 = vector.load %arg14[%c80_192, %c0_193] : memref<88x176xf32, #tpu.memory_space<vmem>>, vector<8x176xf32>
    tpu.vector_store %arg14[%c80_192, %c0_193], %228 {strides = array<i32>} : memref<88x176xf32, #tpu.memory_space<vmem>>, vector<8x176xf32>,
    %c0_194 = arith.constant 0 : index
    %c0_195 = arith.constant 0 : index
    %230 = vector.load %arg14[%c0_194, %c0_195] : memref<88x176xf32, #tpu.memory_space<vmem>>, vector<88x176xf32>
    %c0_196 = arith.constant 0 : index
    %c0_197 = arith.constant 0 : index
    %231 = vector.load %arg7[%c0_196, %c0_197] : memref<1408x28xf32, #tpu.memory_space<vmem>>, vector<176x28xf32>
    %cst_198 = arith.constant dense<0.000000e+00> : vector<88x28xf32>
    %232 = tpu.matmul %230, %231, %cst_198 {dimension_numbers = #tpu.dot_dimension_numbers<[1], [0], [0], [1], [0, 0, 1, 1], [], []>} : vector<88x176xf32>, vector<176x28xf32>, vector<88x28xf32> -> vector<88x28xf32>
    %c0_199 = arith.constant 0 : index
    %c0_200 = arith.constant 0 : index
    %233 = vector.load %arg15[%c0_199, %c0_200] : memref<704x28xf32, #tpu.memory_space<vmem>>, vector<88x28xf32>
    tpu.vector_store %arg15[%c0_199, %c0_200], %232 {strides = array<i32>} : memref<704x28xf32, #tpu.memory_space<vmem>>, vector<88x28xf32>,
    %c176_201 = arith.constant 176 : index
    %c0_202 = arith.constant 0 : index
    %234 = vector.load %arg7[%c176_201, %c0_202] : memref<1408x28xf32, #tpu.memory_space<vmem>>, vector<176x28xf32>
    %cst_203 = arith.constant dense<0.000000e+00> : vector<88x28xf32>
    %235 = tpu.matmul %230, %234, %cst_203 {dimension_numbers = #tpu.dot_dimension_numbers<[1], [0], [0], [1], [0, 0, 1, 1], [], []>} : vector<88x176xf32>, vector<176x28xf32>, vector<88x28xf32> -> vector<88x28xf32>
    %c88_204 = arith.constant 88 : index
    %c0_205 = arith.constant 0 : index
    %236 = vector.load %arg15[%c88_204, %c0_205] : memref<704x28xf32, #tpu.memory_space<vmem>>, vector<88x28xf32>
    tpu.vector_store %arg15[%c88_204, %c0_205], %235 {strides = array<i32>} : memref<704x28xf32, #tpu.memory_space<vmem>>, vector<88x28xf32>,
    %c352 = arith.constant 352 : index
    %c0_206 = arith.constant 0 : index
    %237 = vector.load %arg7[%c352, %c0_206] : memref<1408x28xf32, #tpu.memory_space<vmem>>, vector<176x28xf32>
    %cst_207 = arith.constant dense<0.000000e+00> : vector<88x28xf32>
    %238 = tpu.matmul %230, %237, %cst_207 {dimension_numbers = #tpu.dot_dimension_numbers<[1], [0], [0], [1], [0, 0, 1, 1], [], []>} : vector<88x176xf32>, vector<176x28xf32>, vector<88x28xf32> -> vector<88x28xf32>
    %c176_208 = arith.constant 176 : index
    %c0_209 = arith.constant 0 : index
    %239 = vector.load %arg15[%c176_208, %c0_209] : memref<704x28xf32, #tpu.memory_space<vmem>>, vector<88x28xf32>
    tpu.vector_store %arg15[%c176_208, %c0_209], %238 {strides = array<i32>} : memref<704x28xf32, #tpu.memory_space<vmem>>, vector<88x28xf32>,
    %c528 = arith.constant 528 : index
    %c0_210 = arith.constant 0 : index
    %240 = vector.load %arg7[%c528, %c0_210] : memref<1408x28xf32, #tpu.memory_space<vmem>>, vector<176x28xf32>
    %cst_211 = arith.constant dense<0.000000e+00> : vector<88x28xf32>
    %241 = tpu.matmul %230, %240, %cst_211 {dimension_numbers = #tpu.dot_dimension_numbers<[1], [0], [0], [1], [0, 0, 1, 1], [], []>} : vector<88x176xf32>, vector<176x28xf32>, vector<88x28xf32> -> vector<88x28xf32>
    %c264_212 = arith.constant 264 : index
    %c0_213 = arith.constant 0 : index
    %242 = vector.load %arg15[%c264_212, %c0_213] : memref<704x28xf32, #tpu.memory_space<vmem>>, vector<88x28xf32>
    tpu.vector_store %arg15[%c264_212, %c0_213], %241 {strides = array<i32>} : memref<704x28xf32, #tpu.memory_space<vmem>>, vector<88x28xf32>,
    %c704 = arith.constant 704 : index
    %c0_214 = arith.constant 0 : index
    %243 = vector.load %arg7[%c704, %c0_214] : memref<1408x28xf32, #tpu.memory_space<vmem>>, vector<176x28xf32>
    %cst_215 = arith.constant dense<0.000000e+00> : vector<88x28xf32>
    %244 = tpu.matmul %230, %243, %cst_215 {dimension_numbers = #tpu.dot_dimension_numbers<[1], [0], [0], [1], [0, 0, 1, 1], [], []>} : vector<88x176xf32>, vector<176x28xf32>, vector<88x28xf32> -> vector<88x28xf32>
    %c352_216 = arith.constant 352 : index
    %c0_217 = arith.constant 0 : index
    %245 = vector.load %arg15[%c352_216, %c0_217] : memref<704x28xf32, #tpu.memory_space<vmem>>, vector<88x28xf32>
    tpu.vector_store %arg15[%c352_216, %c0_217], %244 {strides = array<i32>} : memref<704x28xf32, #tpu.memory_space<vmem>>, vector<88x28xf32>,
    %c880 = arith.constant 880 : index
    %c0_218 = arith.constant 0 : index
    %246 = vector.load %arg7[%c880, %c0_218] : memref<1408x28xf32, #tpu.memory_space<vmem>>, vector<176x28xf32>
    %cst_219 = arith.constant dense<0.000000e+00> : vector<88x28xf32>
    %247 = tpu.matmul %230, %246, %cst_219 {dimension_numbers = #tpu.dot_dimension_numbers<[1], [0], [0], [1], [0, 0, 1, 1], [], []>} : vector<88x176xf32>, vector<176x28xf32>, vector<88x28xf32> -> vector<88x28xf32>
    %c440 = arith.constant 440 : index
    %c0_220 = arith.constant 0 : index
    %248 = vector.load %arg15[%c440, %c0_220] : memref<704x28xf32, #tpu.memory_space<vmem>>, vector<88x28xf32>
    tpu.vector_store %arg15[%c440, %c0_220], %247 {strides = array<i32>} : memref<704x28xf32, #tpu.memory_space<vmem>>, vector<88x28xf32>,
    %c1056 = arith.constant 1056 : index
    %c0_221 = arith.constant 0 : index
    %249 = vector.load %arg7[%c1056, %c0_221] : memref<1408x28xf32, #tpu.memory_space<vmem>>, vector<176x28xf32>
    %cst_222 = arith.constant dense<0.000000e+00> : vector<88x28xf32>
    %250 = tpu.matmul %230, %249, %cst_222 {dimension_numbers = #tpu.dot_dimension_numbers<[1], [0], [0], [1], [0, 0, 1, 1], [], []>} : vector<88x176xf32>, vector<176x28xf32>, vector<88x28xf32> -> vector<88x28xf32>
    %c528_223 = arith.constant 528 : index
    %c0_224 = arith.constant 0 : index
    %251 = vector.load %arg15[%c528_223, %c0_224] : memref<704x28xf32, #tpu.memory_space<vmem>>, vector<88x28xf32>
    tpu.vector_store %arg15[%c528_223, %c0_224], %250 {strides = array<i32>} : memref<704x28xf32, #tpu.memory_space<vmem>>, vector<88x28xf32>,
    %c1232 = arith.constant 1232 : index
    %c0_225 = arith.constant 0 : index
    %252 = vector.load %arg7[%c1232, %c0_225] : memref<1408x28xf32, #tpu.memory_space<vmem>>, vector<176x28xf32>
    %cst_226 = arith.constant dense<0.000000e+00> : vector<88x28xf32>
    %253 = tpu.matmul %230, %252, %cst_226 {dimension_numbers = #tpu.dot_dimension_numbers<[1], [0], [0], [1], [0, 0, 1, 1], [], []>} : vector<88x176xf32>, vector<176x28xf32>, vector<88x28xf32> -> vector<88x28xf32>
    %c616 = arith.constant 616 : index
    %c0_227 = arith.constant 0 : index
    %254 = vector.load %arg15[%c616, %c0_227] : memref<704x28xf32, #tpu.memory_space<vmem>>, vector<88x28xf32>
    tpu.vector_store %arg15[%c616, %c0_227], %253 {strides = array<i32>} : memref<704x28xf32, #tpu.memory_space<vmem>>, vector<88x28xf32>,
    %c0_228 = arith.constant 0 : index
    %c0_229 = arith.constant 0 : index
    %255 = vector.load %arg8[%c0_228, %c0_229] : memref<1x28xf32, #tpu.memory_space<vmem>>, vector<1x28xf32>
    %c0_230 = arith.constant 0 : index
    %c0_231 = arith.constant 0 : index
    %256 = vector.load %arg15[%c0_230, %c0_231] : memref<704x28xf32, #tpu.memory_space<vmem>>, vector<8x28xf32>
    %257 = vector.broadcast %255 : vector<1x28xf32> to vector<8x28xf32>
    %258 = arith.addf %256, %257 : vector<8x28xf32>
    %cst_232 = arith.constant 0.000000e+00 : f32
    %259 = vector.broadcast %cst_232 : f32 to vector<8x28xf32>
    %260 = arith.subf %259, %258 : vector<8x28xf32>
    %261 = math.exp %260 : vector<8x28xf32>
    %cst_233 = arith.constant 1.000000e+00 : f32
    %262 = vector.broadcast %cst_233 : f32 to vector<8x28xf32>
    %263 = arith.addf %262, %261 : vector<8x28xf32>
    %cst_234 = arith.constant 1.000000e+00 : f32
    %264 = vector.broadcast %cst_234 : f32 to vector<8x28xf32>
    %265 = arith.divf %264, %263 : vector<8x28xf32>
    %c0_235 = arith.constant 0 : index
    %c0_236 = arith.constant 0 : index
    %266 = vector.load %arg9[%c0_235, %c0_236] : memref<224x28xf32, #tpu.memory_space<vmem>>, vector<8x28xf32>
    tpu.vector_store %arg9[%c0_235, %c0_236], %265 {strides = array<i32>} : memref<224x28xf32, #tpu.memory_space<vmem>>, vector<8x28xf32>,
    %c88_237 = arith.constant 88 : index
    %c0_238 = arith.constant 0 : index
    %267 = vector.load %arg15[%c88_237, %c0_238] : memref<704x28xf32, #tpu.memory_space<vmem>>, vector<8x28xf32>
    %268 = vector.broadcast %255 : vector<1x28xf32> to vector<8x28xf32>
    %269 = arith.addf %267, %268 : vector<8x28xf32>
    %cst_239 = arith.constant 0.000000e+00 : f32
    %270 = vector.broadcast %cst_239 : f32 to vector<8x28xf32>
    %271 = arith.subf %270, %269 : vector<8x28xf32>
    %272 = math.exp %271 : vector<8x28xf32>
    %cst_240 = arith.constant 1.000000e+00 : f32
    %273 = vector.broadcast %cst_240 : f32 to vector<8x28xf32>
    %274 = arith.addf %273, %272 : vector<8x28xf32>
    %cst_241 = arith.constant 1.000000e+00 : f32
    %275 = vector.broadcast %cst_241 : f32 to vector<8x28xf32>
    %276 = arith.divf %275, %274 : vector<8x28xf32>
    %c8_242 = arith.constant 8 : index
    %c0_243 = arith.constant 0 : index
    %277 = vector.load %arg9[%c8_242, %c0_243] : memref<224x28xf32, #tpu.memory_space<vmem>>, vector<8x28xf32>
    tpu.vector_store %arg9[%c8_242, %c0_243], %276 {strides = array<i32>} : memref<224x28xf32, #tpu.memory_space<vmem>>, vector<8x28xf32>,
    %c176_244 = arith.constant 176 : index
    %c0_245 = arith.constant 0 : index
    %278 = vector.load %arg15[%c176_244, %c0_245] : memref<704x28xf32, #tpu.memory_space<vmem>>, vector<8x28xf32>
    %c8_246 = arith.constant 8 : index
    %c0_247 = arith.constant 0 : index
    %279 = vector.load %arg15[%c8_246, %c0_247] : memref<704x28xf32, #tpu.memory_space<vmem>>, vector<8x28xf32>
    %280 = arith.addf %278, %279 : vector<8x28xf32>
    %281 = vector.broadcast %255 : vector<1x28xf32> to vector<8x28xf32>
    %282 = arith.addf %280, %281 : vector<8x28xf32>
    %cst_248 = arith.constant 0.000000e+00 : f32
    %283 = vector.broadcast %cst_248 : f32 to vector<8x28xf32>
    %284 = arith.subf %283, %282 : vector<8x28xf32>
    %285 = math.exp %284 : vector<8x28xf32>
    %cst_249 = arith.constant 1.000000e+00 : f32
    %286 = vector.broadcast %cst_249 : f32 to vector<8x28xf32>
    %287 = arith.addf %286, %285 : vector<8x28xf32>
    %cst_250 = arith.constant 1.000000e+00 : f32
    %288 = vector.broadcast %cst_250 : f32 to vector<8x28xf32>
    %289 = arith.divf %288, %287 : vector<8x28xf32>
    %c16_251 = arith.constant 16 : index
    %c0_252 = arith.constant 0 : index
    %290 = vector.load %arg9[%c16_251, %c0_252] : memref<224x28xf32, #tpu.memory_space<vmem>>, vector<8x28xf32>
    tpu.vector_store %arg9[%c16_251, %c0_252], %289 {strides = array<i32>} : memref<224x28xf32, #tpu.memory_space<vmem>>, vector<8x28xf32>,
    %c264_253 = arith.constant 264 : index
    %c0_254 = arith.constant 0 : index
    %291 = vector.load %arg15[%c264_253, %c0_254] : memref<704x28xf32, #tpu.memory_space<vmem>>, vector<8x28xf32>
    %c96_255 = arith.constant 96 : index
    %c0_256 = arith.constant 0 : index
    %292 = vector.load %arg15[%c96_255, %c0_256] : memref<704x28xf32, #tpu.memory_space<vmem>>, vector<8x28xf32>
    %293 = arith.addf %291, %292 : vector<8x28xf32>
    %294 = vector.broadcast %255 : vector<1x28xf32> to vector<8x28xf32>
    %295 = arith.addf %293, %294 : vector<8x28xf32>
    %cst_257 = arith.constant 0.000000e+00 : f32
    %296 = vector.broadcast %cst_257 : f32 to vector<8x28xf32>
    %297 = arith.subf %296, %295 : vector<8x28xf32>
    %298 = math.exp %297 : vector<8x28xf32>
    %cst_258 = arith.constant 1.000000e+00 : f32
    %299 = vector.broadcast %cst_258 : f32 to vector<8x28xf32>
    %300 = arith.addf %299, %298 : vector<8x28xf32>
    %cst_259 = arith.constant 1.000000e+00 : f32
    %301 = vector.broadcast %cst_259 : f32 to vector<8x28xf32>
    %302 = arith.divf %301, %300 : vector<8x28xf32>
    %c24_260 = arith.constant 24 : index
    %c0_261 = arith.constant 0 : index
    %303 = vector.load %arg9[%c24_260, %c0_261] : memref<224x28xf32, #tpu.memory_space<vmem>>, vector<8x28xf32>
    tpu.vector_store %arg9[%c24_260, %c0_261], %302 {strides = array<i32>} : memref<224x28xf32, #tpu.memory_space<vmem>>, vector<8x28xf32>,
    %c352_262 = arith.constant 352 : index
    %c0_263 = arith.constant 0 : index
    %304 = vector.load %arg15[%c352_262, %c0_263] : memref<704x28xf32, #tpu.memory_space<vmem>>, vector<8x28xf32>
    %c184_264 = arith.constant 184 : index
    %c0_265 = arith.constant 0 : index
    %305 = vector.load %arg15[%c184_264, %c0_265] : memref<704x28xf32, #tpu.memory_space<vmem>>, vector<8x28xf32>
    %306 = arith.addf %304, %305 : vector<8x28xf32>
    %c16_266 = arith.constant 16 : index
    %c0_267 = arith.constant 0 : index
    %307 = vector.load %arg15[%c16_266, %c0_267] : memref<704x28xf32, #tpu.memory_space<vmem>>, vector<8x28xf32>
    %308 = arith.addf %306, %307 : vector<8x28xf32>
    %309 = vector.broadcast %255 : vector<1x28xf32> to vector<8x28xf32>
    %310 = arith.addf %308, %309 : vector<8x28xf32>
    %cst_268 = arith.constant 0.000000e+00 : f32
    %311 = vector.broadcast %cst_268 : f32 to vector<8x28xf32>
    %312 = arith.subf %311, %310 : vector<8x28xf32>
    %313 = math.exp %312 : vector<8x28xf32>
    %cst_269 = arith.constant 1.000000e+00 : f32
    %314 = vector.broadcast %cst_269 : f32 to vector<8x28xf32>
    %315 = arith.addf %314, %313 : vector<8x28xf32>
    %cst_270 = arith.constant 1.000000e+00 : f32
    %316 = vector.broadcast %cst_270 : f32 to vector<8x28xf32>
    %317 = arith.divf %316, %315 : vector<8x28xf32>
    %c32_271 = arith.constant 32 : index
    %c0_272 = arith.constant 0 : index
    %318 = vector.load %arg9[%c32_271, %c0_272] : memref<224x28xf32, #tpu.memory_space<vmem>>, vector<8x28xf32>
    tpu.vector_store %arg9[%c32_271, %c0_272], %317 {strides = array<i32>} : memref<224x28xf32, #tpu.memory_space<vmem>>, vector<8x28xf32>,
    %c440_273 = arith.constant 440 : index
    %c0_274 = arith.constant 0 : index
    %319 = vector.load %arg15[%c440_273, %c0_274] : memref<704x28xf32, #tpu.memory_space<vmem>>, vector<8x28xf32>
    %c272_275 = arith.constant 272 : index
    %c0_276 = arith.constant 0 : index
    %320 = vector.load %arg15[%c272_275, %c0_276] : memref<704x28xf32, #tpu.memory_space<vmem>>, vector<8x28xf32>
    %321 = arith.addf %319, %320 : vector<8x28xf32>
    %c104_277 = arith.constant 104 : index
    %c0_278 = arith.constant 0 : index
    %322 = vector.load %arg15[%c104_277, %c0_278] : memref<704x28xf32, #tpu.memory_space<vmem>>, vector<8x28xf32>
    %323 = arith.addf %321, %322 : vector<8x28xf32>
    %324 = vector.broadcast %255 : vector<1x28xf32> to vector<8x28xf32>
    %325 = arith.addf %323, %324 : vector<8x28xf32>
    %cst_279 = arith.constant 0.000000e+00 : f32
    %326 = vector.broadcast %cst_279 : f32 to vector<8x28xf32>
    %327 = arith.subf %326, %325 : vector<8x28xf32>
    %328 = math.exp %327 : vector<8x28xf32>
    %cst_280 = arith.constant 1.000000e+00 : f32
    %329 = vector.broadcast %cst_280 : f32 to vector<8x28xf32>
    %330 = arith.addf %329, %328 : vector<8x28xf32>
    %cst_281 = arith.constant 1.000000e+00 : f32
    %331 = vector.broadcast %cst_281 : f32 to vector<8x28xf32>
    %332 = arith.divf %331, %330 : vector<8x28xf32>
    %c40_282 = arith.constant 40 : index
    %c0_283 = arith.constant 0 : index
    %333 = vector.load %arg9[%c40_282, %c0_283] : memref<224x28xf32, #tpu.memory_space<vmem>>, vector<8x28xf32>
    tpu.vector_store %arg9[%c40_282, %c0_283], %332 {strides = array<i32>} : memref<224x28xf32, #tpu.memory_space<vmem>>, vector<8x28xf32>,
    %c528_284 = arith.constant 528 : index
    %c0_285 = arith.constant 0 : index
    %334 = vector.load %arg15[%c528_284, %c0_285] : memref<704x28xf32, #tpu.memory_space<vmem>>, vector<8x28xf32>
    %c360 = arith.constant 360 : index
    %c0_286 = arith.constant 0 : index
    %335 = vector.load %arg15[%c360, %c0_286] : memref<704x28xf32, #tpu.memory_space<vmem>>, vector<8x28xf32>
    %336 = arith.addf %334, %335 : vector<8x28xf32>
    %c192_287 = arith.constant 192 : index
    %c0_288 = arith.constant 0 : index
    %337 = vector.load %arg15[%c192_287, %c0_288] : memref<704x28xf32, #tpu.memory_space<vmem>>, vector<8x28xf32>
    %338 = arith.addf %336, %337 : vector<8x28xf32>
    %c24_289 = arith.constant 24 : index
    %c0_290 = arith.constant 0 : index
    %339 = vector.load %arg15[%c24_289, %c0_290] : memref<704x28xf32, #tpu.memory_space<vmem>>, vector<8x28xf32>
    %340 = arith.addf %338, %339 : vector<8x28xf32>
    %341 = vector.broadcast %255 : vector<1x28xf32> to vector<8x28xf32>
    %342 = arith.addf %340, %341 : vector<8x28xf32>
    %cst_291 = arith.constant 0.000000e+00 : f32
    %343 = vector.broadcast %cst_291 : f32 to vector<8x28xf32>
    %344 = arith.subf %343, %342 : vector<8x28xf32>
    %345 = math.exp %344 : vector<8x28xf32>
    %cst_292 = arith.constant 1.000000e+00 : f32
    %346 = vector.broadcast %cst_292 : f32 to vector<8x28xf32>
    %347 = arith.addf %346, %345 : vector<8x28xf32>
    %cst_293 = arith.constant 1.000000e+00 : f32
    %348 = vector.broadcast %cst_293 : f32 to vector<8x28xf32>
    %349 = arith.divf %348, %347 : vector<8x28xf32>
    %c48_294 = arith.constant 48 : index
    %c0_295 = arith.constant 0 : index
    %350 = vector.load %arg9[%c48_294, %c0_295] : memref<224x28xf32, #tpu.memory_space<vmem>>, vector<8x28xf32>
    tpu.vector_store %arg9[%c48_294, %c0_295], %349 {strides = array<i32>} : memref<224x28xf32, #tpu.memory_space<vmem>>, vector<8x28xf32>,
    %c616_296 = arith.constant 616 : index
    %c0_297 = arith.constant 0 : index
    %351 = vector.load %arg15[%c616_296, %c0_297] : memref<704x28xf32, #tpu.memory_space<vmem>>, vector<8x28xf32>
    %c448_298 = arith.constant 448 : index
    %c0_299 = arith.constant 0 : index
    %352 = vector.load %arg15[%c448_298, %c0_299] : memref<704x28xf32, #tpu.memory_space<vmem>>, vector<8x28xf32>
    %353 = arith.addf %351, %352 : vector<8x28xf32>
    %c280 = arith.constant 280 : index
    %c0_300 = arith.constant 0 : index
    %354 = vector.load %arg15[%c280, %c0_300] : memref<704x28xf32, #tpu.memory_space<vmem>>, vector<8x28xf32>
    %355 = arith.addf %353, %354 : vector<8x28xf32>
    %c112_301 = arith.constant 112 : index
    %c0_302 = arith.constant 0 : index
    %356 = vector.load %arg15[%c112_301, %c0_302] : memref<704x28xf32, #tpu.memory_space<vmem>>, vector<8x28xf32>
    %357 = arith.addf %355, %356 : vector<8x28xf32>
    %358 = vector.broadcast %255 : vector<1x28xf32> to vector<8x28xf32>
    %359 = arith.addf %357, %358 : vector<8x28xf32>
    %cst_303 = arith.constant 0.000000e+00 : f32
    %360 = vector.broadcast %cst_303 : f32 to vector<8x28xf32>
    %361 = arith.subf %360, %359 : vector<8x28xf32>
    %362 = math.exp %361 : vector<8x28xf32>
    %cst_304 = arith.constant 1.000000e+00 : f32
    %363 = vector.broadcast %cst_304 : f32 to vector<8x28xf32>
    %364 = arith.addf %363, %362 : vector<8x28xf32>
    %cst_305 = arith.constant 1.000000e+00 : f32
    %365 = vector.broadcast %cst_305 : f32 to vector<8x28xf32>
    %366 = arith.divf %365, %364 : vector<8x28xf32>
    %c56_306 = arith.constant 56 : index
    %c0_307 = arith.constant 0 : index
    %367 = vector.load %arg9[%c56_306, %c0_307] : memref<224x28xf32, #tpu.memory_space<vmem>>, vector<8x28xf32>
    tpu.vector_store %arg9[%c56_306, %c0_307], %366 {strides = array<i32>} : memref<224x28xf32, #tpu.memory_space<vmem>>, vector<8x28xf32>,
    %c536 = arith.constant 536 : index
    %c0_308 = arith.constant 0 : index
    %368 = vector.load %arg15[%c536, %c0_308] : memref<704x28xf32, #tpu.memory_space<vmem>>, vector<8x28xf32>
    %c368 = arith.constant 368 : index
    %c0_309 = arith.constant 0 : index
    %369 = vector.load %arg15[%c368, %c0_309] : memref<704x28xf32, #tpu.memory_space<vmem>>, vector<8x28xf32>
    %370 = arith.addf %368, %369 : vector<8x28xf32>
    %c200_310 = arith.constant 200 : index
    %c0_311 = arith.constant 0 : index
    %371 = vector.load %arg15[%c200_310, %c0_311] : memref<704x28xf32, #tpu.memory_space<vmem>>, vector<8x28xf32>
    %372 = arith.addf %370, %371 : vector<8x28xf32>
    %c32_312 = arith.constant 32 : index
    %c0_313 = arith.constant 0 : index
    %373 = vector.load %arg15[%c32_312, %c0_313] : memref<704x28xf32, #tpu.memory_space<vmem>>, vector<8x28xf32>
    %374 = arith.addf %372, %373 : vector<8x28xf32>
    %375 = vector.broadcast %255 : vector<1x28xf32> to vector<8x28xf32>
    %376 = arith.addf %374, %375 : vector<8x28xf32>
    %cst_314 = arith.constant 0.000000e+00 : f32
    %377 = vector.broadcast %cst_314 : f32 to vector<8x28xf32>
    %378 = arith.subf %377, %376 : vector<8x28xf32>
    %379 = math.exp %378 : vector<8x28xf32>
    %cst_315 = arith.constant 1.000000e+00 : f32
    %380 = vector.broadcast %cst_315 : f32 to vector<8x28xf32>
    %381 = arith.addf %380, %379 : vector<8x28xf32>
    %cst_316 = arith.constant 1.000000e+00 : f32
    %382 = vector.broadcast %cst_316 : f32 to vector<8x28xf32>
    %383 = arith.divf %382, %381 : vector<8x28xf32>
    %c64_317 = arith.constant 64 : index
    %c0_318 = arith.constant 0 : index
    %384 = vector.load %arg9[%c64_317, %c0_318] : memref<224x28xf32, #tpu.memory_space<vmem>>, vector<8x28xf32>
    tpu.vector_store %arg9[%c64_317, %c0_318], %383 {strides = array<i32>} : memref<224x28xf32, #tpu.memory_space<vmem>>, vector<8x28xf32>,
    %c624 = arith.constant 624 : index
    %c0_319 = arith.constant 0 : index
    %385 = vector.load %arg15[%c624, %c0_319] : memref<704x28xf32, #tpu.memory_space<vmem>>, vector<8x28xf32>
    %c456 = arith.constant 456 : index
    %c0_320 = arith.constant 0 : index
    %386 = vector.load %arg15[%c456, %c0_320] : memref<704x28xf32, #tpu.memory_space<vmem>>, vector<8x28xf32>
    %387 = arith.addf %385, %386 : vector<8x28xf32>
    %c288 = arith.constant 288 : index
    %c0_321 = arith.constant 0 : index
    %388 = vector.load %arg15[%c288, %c0_321] : memref<704x28xf32, #tpu.memory_space<vmem>>, vector<8x28xf32>
    %389 = arith.addf %387, %388 : vector<8x28xf32>
    %c120_322 = arith.constant 120 : index
    %c0_323 = arith.constant 0 : index
    %390 = vector.load %arg15[%c120_322, %c0_323] : memref<704x28xf32, #tpu.memory_space<vmem>>, vector<8x28xf32>
    %391 = arith.addf %389, %390 : vector<8x28xf32>
    %392 = vector.broadcast %255 : vector<1x28xf32> to vector<8x28xf32>
    %393 = arith.addf %391, %392 : vector<8x28xf32>
    %cst_324 = arith.constant 0.000000e+00 : f32
    %394 = vector.broadcast %cst_324 : f32 to vector<8x28xf32>
    %395 = arith.subf %394, %393 : vector<8x28xf32>
    %396 = math.exp %395 : vector<8x28xf32>
    %cst_325 = arith.constant 1.000000e+00 : f32
    %397 = vector.broadcast %cst_325 : f32 to vector<8x28xf32>
    %398 = arith.addf %397, %396 : vector<8x28xf32>
    %cst_326 = arith.constant 1.000000e+00 : f32
    %399 = vector.broadcast %cst_326 : f32 to vector<8x28xf32>
    %400 = arith.divf %399, %398 : vector<8x28xf32>
    %c72_327 = arith.constant 72 : index
    %c0_328 = arith.constant 0 : index
    %401 = vector.load %arg9[%c72_327, %c0_328] : memref<224x28xf32, #tpu.memory_space<vmem>>, vector<8x28xf32>
    tpu.vector_store %arg9[%c72_327, %c0_328], %400 {strides = array<i32>} : memref<224x28xf32, #tpu.memory_space<vmem>>, vector<8x28xf32>,
    %c544 = arith.constant 544 : index
    %c0_329 = arith.constant 0 : index
    %402 = vector.load %arg15[%c544, %c0_329] : memref<704x28xf32, #tpu.memory_space<vmem>>, vector<8x28xf32>
    %c376 = arith.constant 376 : index
    %c0_330 = arith.constant 0 : index
    %403 = vector.load %arg15[%c376, %c0_330] : memref<704x28xf32, #tpu.memory_space<vmem>>, vector<8x28xf32>
    %404 = arith.addf %402, %403 : vector<8x28xf32>
    %c208_331 = arith.constant 208 : index
    %c0_332 = arith.constant 0 : index
    %405 = vector.load %arg15[%c208_331, %c0_332] : memref<704x28xf32, #tpu.memory_space<vmem>>, vector<8x28xf32>
    %406 = arith.addf %404, %405 : vector<8x28xf32>
    %c40_333 = arith.constant 40 : index
    %c0_334 = arith.constant 0 : index
    %407 = vector.load %arg15[%c40_333, %c0_334] : memref<704x28xf32, #tpu.memory_space<vmem>>, vector<8x28xf32>
    %408 = arith.addf %406, %407 : vector<8x28xf32>
    %409 = vector.broadcast %255 : vector<1x28xf32> to vector<8x28xf32>
    %410 = arith.addf %408, %409 : vector<8x28xf32>
    %cst_335 = arith.constant 0.000000e+00 : f32
    %411 = vector.broadcast %cst_335 : f32 to vector<8x28xf32>
    %412 = arith.subf %411, %410 : vector<8x28xf32>
    %413 = math.exp %412 : vector<8x28xf32>
    %cst_336 = arith.constant 1.000000e+00 : f32
    %414 = vector.broadcast %cst_336 : f32 to vector<8x28xf32>
    %415 = arith.addf %414, %413 : vector<8x28xf32>
    %cst_337 = arith.constant 1.000000e+00 : f32
    %416 = vector.broadcast %cst_337 : f32 to vector<8x28xf32>
    %417 = arith.divf %416, %415 : vector<8x28xf32>
    %c80_338 = arith.constant 80 : index
    %c0_339 = arith.constant 0 : index
    %418 = vector.load %arg9[%c80_338, %c0_339] : memref<224x28xf32, #tpu.memory_space<vmem>>, vector<8x28xf32>
    tpu.vector_store %arg9[%c80_338, %c0_339], %417 {strides = array<i32>} : memref<224x28xf32, #tpu.memory_space<vmem>>, vector<8x28xf32>,
    %c632 = arith.constant 632 : index
    %c0_340 = arith.constant 0 : index
    %419 = vector.load %arg15[%c632, %c0_340] : memref<704x28xf32, #tpu.memory_space<vmem>>, vector<8x28xf32>
    %c464 = arith.constant 464 : index
    %c0_341 = arith.constant 0 : index
    %420 = vector.load %arg15[%c464, %c0_341] : memref<704x28xf32, #tpu.memory_space<vmem>>, vector<8x28xf32>
    %421 = arith.addf %419, %420 : vector<8x28xf32>
    %c296 = arith.constant 296 : index
    %c0_342 = arith.constant 0 : index
    %422 = vector.load %arg15[%c296, %c0_342] : memref<704x28xf32, #tpu.memory_space<vmem>>, vector<8x28xf32>
    %423 = arith.addf %421, %422 : vector<8x28xf32>
    %c128_343 = arith.constant 128 : index
    %c0_344 = arith.constant 0 : index
    %424 = vector.load %arg15[%c128_343, %c0_344] : memref<704x28xf32, #tpu.memory_space<vmem>>, vector<8x28xf32>
    %425 = arith.addf %423, %424 : vector<8x28xf32>
    %426 = vector.broadcast %255 : vector<1x28xf32> to vector<8x28xf32>
    %427 = arith.addf %425, %426 : vector<8x28xf32>
    %cst_345 = arith.constant 0.000000e+00 : f32
    %428 = vector.broadcast %cst_345 : f32 to vector<8x28xf32>
    %429 = arith.subf %428, %427 : vector<8x28xf32>
    %430 = math.exp %429 : vector<8x28xf32>
    %cst_346 = arith.constant 1.000000e+00 : f32
    %431 = vector.broadcast %cst_346 : f32 to vector<8x28xf32>
    %432 = arith.addf %431, %430 : vector<8x28xf32>
    %cst_347 = arith.constant 1.000000e+00 : f32
    %433 = vector.broadcast %cst_347 : f32 to vector<8x28xf32>
    %434 = arith.divf %433, %432 : vector<8x28xf32>
    %c88_348 = arith.constant 88 : index
    %c0_349 = arith.constant 0 : index
    %435 = vector.load %arg9[%c88_348, %c0_349] : memref<224x28xf32, #tpu.memory_space<vmem>>, vector<8x28xf32>
    tpu.vector_store %arg9[%c88_348, %c0_349], %434 {strides = array<i32>} : memref<224x28xf32, #tpu.memory_space<vmem>>, vector<8x28xf32>,
    %c552 = arith.constant 552 : index
    %c0_350 = arith.constant 0 : index
    %436 = vector.load %arg15[%c552, %c0_350] : memref<704x28xf32, #tpu.memory_space<vmem>>, vector<8x28xf32>
    %c384 = arith.constant 384 : index
    %c0_351 = arith.constant 0 : index
    %437 = vector.load %arg15[%c384, %c0_351] : memref<704x28xf32, #tpu.memory_space<vmem>>, vector<8x28xf32>
    %438 = arith.addf %436, %437 : vector<8x28xf32>
    %c216_352 = arith.constant 216 : index
    %c0_353 = arith.constant 0 : index
    %439 = vector.load %arg15[%c216_352, %c0_353] : memref<704x28xf32, #tpu.memory_space<vmem>>, vector<8x28xf32>
    %440 = arith.addf %438, %439 : vector<8x28xf32>
    %c48_354 = arith.constant 48 : index
    %c0_355 = arith.constant 0 : index
    %441 = vector.load %arg15[%c48_354, %c0_355] : memref<704x28xf32, #tpu.memory_space<vmem>>, vector<8x28xf32>
    %442 = arith.addf %440, %441 : vector<8x28xf32>
    %443 = vector.broadcast %255 : vector<1x28xf32> to vector<8x28xf32>
    %444 = arith.addf %442, %443 : vector<8x28xf32>
    %cst_356 = arith.constant 0.000000e+00 : f32
    %445 = vector.broadcast %cst_356 : f32 to vector<8x28xf32>
    %446 = arith.subf %445, %444 : vector<8x28xf32>
    %447 = math.exp %446 : vector<8x28xf32>
    %cst_357 = arith.constant 1.000000e+00 : f32
    %448 = vector.broadcast %cst_357 : f32 to vector<8x28xf32>
    %449 = arith.addf %448, %447 : vector<8x28xf32>
    %cst_358 = arith.constant 1.000000e+00 : f32
    %450 = vector.broadcast %cst_358 : f32 to vector<8x28xf32>
    %451 = arith.divf %450, %449 : vector<8x28xf32>
    %c96_359 = arith.constant 96 : index
    %c0_360 = arith.constant 0 : index
    %452 = vector.load %arg9[%c96_359, %c0_360] : memref<224x28xf32, #tpu.memory_space<vmem>>, vector<8x28xf32>
    tpu.vector_store %arg9[%c96_359, %c0_360], %451 {strides = array<i32>} : memref<224x28xf32, #tpu.memory_space<vmem>>, vector<8x28xf32>,
    %c640 = arith.constant 640 : index
    %c0_361 = arith.constant 0 : index
    %453 = vector.load %arg15[%c640, %c0_361] : memref<704x28xf32, #tpu.memory_space<vmem>>, vector<8x28xf32>
    %c472 = arith.constant 472 : index
    %c0_362 = arith.constant 0 : index
    %454 = vector.load %arg15[%c472, %c0_362] : memref<704x28xf32, #tpu.memory_space<vmem>>, vector<8x28xf32>
    %455 = arith.addf %453, %454 : vector<8x28xf32>
    %c304 = arith.constant 304 : index
    %c0_363 = arith.constant 0 : index
    %456 = vector.load %arg15[%c304, %c0_363] : memref<704x28xf32, #tpu.memory_space<vmem>>, vector<8x28xf32>
    %457 = arith.addf %455, %456 : vector<8x28xf32>
    %c136_364 = arith.constant 136 : index
    %c0_365 = arith.constant 0 : index
    %458 = vector.load %arg15[%c136_364, %c0_365] : memref<704x28xf32, #tpu.memory_space<vmem>>, vector<8x28xf32>
    %459 = arith.addf %457, %458 : vector<8x28xf32>
    %460 = vector.broadcast %255 : vector<1x28xf32> to vector<8x28xf32>
    %461 = arith.addf %459, %460 : vector<8x28xf32>
    %cst_366 = arith.constant 0.000000e+00 : f32
    %462 = vector.broadcast %cst_366 : f32 to vector<8x28xf32>
    %463 = arith.subf %462, %461 : vector<8x28xf32>
    %464 = math.exp %463 : vector<8x28xf32>
    %cst_367 = arith.constant 1.000000e+00 : f32
    %465 = vector.broadcast %cst_367 : f32 to vector<8x28xf32>
    %466 = arith.addf %465, %464 : vector<8x28xf32>
    %cst_368 = arith.constant 1.000000e+00 : f32
    %467 = vector.broadcast %cst_368 : f32 to vector<8x28xf32>
    %468 = arith.divf %467, %466 : vector<8x28xf32>
    %c104_369 = arith.constant 104 : index
    %c0_370 = arith.constant 0 : index
    %469 = vector.load %arg9[%c104_369, %c0_370] : memref<224x28xf32, #tpu.memory_space<vmem>>, vector<8x28xf32>
    tpu.vector_store %arg9[%c104_369, %c0_370], %468 {strides = array<i32>} : memref<224x28xf32, #tpu.memory_space<vmem>>, vector<8x28xf32>,
    %c560 = arith.constant 560 : index
    %c0_371 = arith.constant 0 : index
    %470 = vector.load %arg15[%c560, %c0_371] : memref<704x28xf32, #tpu.memory_space<vmem>>, vector<8x28xf32>
    %c392 = arith.constant 392 : index
    %c0_372 = arith.constant 0 : index
    %471 = vector.load %arg15[%c392, %c0_372] : memref<704x28xf32, #tpu.memory_space<vmem>>, vector<8x28xf32>
    %472 = arith.addf %470, %471 : vector<8x28xf32>
    %c224_373 = arith.constant 224 : index
    %c0_374 = arith.constant 0 : index
    %473 = vector.load %arg15[%c224_373, %c0_374] : memref<704x28xf32, #tpu.memory_space<vmem>>, vector<8x28xf32>
    %474 = arith.addf %472, %473 : vector<8x28xf32>
    %c56_375 = arith.constant 56 : index
    %c0_376 = arith.constant 0 : index
    %475 = vector.load %arg15[%c56_375, %c0_376] : memref<704x28xf32, #tpu.memory_space<vmem>>, vector<8x28xf32>
    %476 = arith.addf %474, %475 : vector<8x28xf32>
    %477 = vector.broadcast %255 : vector<1x28xf32> to vector<8x28xf32>
    %478 = arith.addf %476, %477 : vector<8x28xf32>
    %cst_377 = arith.constant 0.000000e+00 : f32
    %479 = vector.broadcast %cst_377 : f32 to vector<8x28xf32>
    %480 = arith.subf %479, %478 : vector<8x28xf32>
    %481 = math.exp %480 : vector<8x28xf32>
    %cst_378 = arith.constant 1.000000e+00 : f32
    %482 = vector.broadcast %cst_378 : f32 to vector<8x28xf32>
    %483 = arith.addf %482, %481 : vector<8x28xf32>
    %cst_379 = arith.constant 1.000000e+00 : f32
    %484 = vector.broadcast %cst_379 : f32 to vector<8x28xf32>
    %485 = arith.divf %484, %483 : vector<8x28xf32>
    %c112_380 = arith.constant 112 : index
    %c0_381 = arith.constant 0 : index
    %486 = vector.load %arg9[%c112_380, %c0_381] : memref<224x28xf32, #tpu.memory_space<vmem>>, vector<8x28xf32>
    tpu.vector_store %arg9[%c112_380, %c0_381], %485 {strides = array<i32>} : memref<224x28xf32, #tpu.memory_space<vmem>>, vector<8x28xf32>,
    %c648 = arith.constant 648 : index
    %c0_382 = arith.constant 0 : index
    %487 = vector.load %arg15[%c648, %c0_382] : memref<704x28xf32, #tpu.memory_space<vmem>>, vector<8x28xf32>
    %c480 = arith.constant 480 : index
    %c0_383 = arith.constant 0 : index
    %488 = vector.load %arg15[%c480, %c0_383] : memref<704x28xf32, #tpu.memory_space<vmem>>, vector<8x28xf32>
    %489 = arith.addf %487, %488 : vector<8x28xf32>
    %c312 = arith.constant 312 : index
    %c0_384 = arith.constant 0 : index
    %490 = vector.load %arg15[%c312, %c0_384] : memref<704x28xf32, #tpu.memory_space<vmem>>, vector<8x28xf32>
    %491 = arith.addf %489, %490 : vector<8x28xf32>
    %c144_385 = arith.constant 144 : index
    %c0_386 = arith.constant 0 : index
    %492 = vector.load %arg15[%c144_385, %c0_386] : memref<704x28xf32, #tpu.memory_space<vmem>>, vector<8x28xf32>
    %493 = arith.addf %491, %492 : vector<8x28xf32>
    %494 = vector.broadcast %255 : vector<1x28xf32> to vector<8x28xf32>
    %495 = arith.addf %493, %494 : vector<8x28xf32>
    %cst_387 = arith.constant 0.000000e+00 : f32
    %496 = vector.broadcast %cst_387 : f32 to vector<8x28xf32>
    %497 = arith.subf %496, %495 : vector<8x28xf32>
    %498 = math.exp %497 : vector<8x28xf32>
    %cst_388 = arith.constant 1.000000e+00 : f32
    %499 = vector.broadcast %cst_388 : f32 to vector<8x28xf32>
    %500 = arith.addf %499, %498 : vector<8x28xf32>
    %cst_389 = arith.constant 1.000000e+00 : f32
    %501 = vector.broadcast %cst_389 : f32 to vector<8x28xf32>
    %502 = arith.divf %501, %500 : vector<8x28xf32>
    %c120_390 = arith.constant 120 : index
    %c0_391 = arith.constant 0 : index
    %503 = vector.load %arg9[%c120_390, %c0_391] : memref<224x28xf32, #tpu.memory_space<vmem>>, vector<8x28xf32>
    tpu.vector_store %arg9[%c120_390, %c0_391], %502 {strides = array<i32>} : memref<224x28xf32, #tpu.memory_space<vmem>>, vector<8x28xf32>,
    %c568 = arith.constant 568 : index
    %c0_392 = arith.constant 0 : index
    %504 = vector.load %arg15[%c568, %c0_392] : memref<704x28xf32, #tpu.memory_space<vmem>>, vector<8x28xf32>
    %c400 = arith.constant 400 : index
    %c0_393 = arith.constant 0 : index
    %505 = vector.load %arg15[%c400, %c0_393] : memref<704x28xf32, #tpu.memory_space<vmem>>, vector<8x28xf32>
    %506 = arith.addf %504, %505 : vector<8x28xf32>
    %c232_394 = arith.constant 232 : index
    %c0_395 = arith.constant 0 : index
    %507 = vector.load %arg15[%c232_394, %c0_395] : memref<704x28xf32, #tpu.memory_space<vmem>>, vector<8x28xf32>
    %508 = arith.addf %506, %507 : vector<8x28xf32>
    %c64_396 = arith.constant 64 : index
    %c0_397 = arith.constant 0 : index
    %509 = vector.load %arg15[%c64_396, %c0_397] : memref<704x28xf32, #tpu.memory_space<vmem>>, vector<8x28xf32>
    %510 = arith.addf %508, %509 : vector<8x28xf32>
    %511 = vector.broadcast %255 : vector<1x28xf32> to vector<8x28xf32>
    %512 = arith.addf %510, %511 : vector<8x28xf32>
    %cst_398 = arith.constant 0.000000e+00 : f32
    %513 = vector.broadcast %cst_398 : f32 to vector<8x28xf32>
    %514 = arith.subf %513, %512 : vector<8x28xf32>
    %515 = math.exp %514 : vector<8x28xf32>
    %cst_399 = arith.constant 1.000000e+00 : f32
    %516 = vector.broadcast %cst_399 : f32 to vector<8x28xf32>
    %517 = arith.addf %516, %515 : vector<8x28xf32>
    %cst_400 = arith.constant 1.000000e+00 : f32
    %518 = vector.broadcast %cst_400 : f32 to vector<8x28xf32>
    %519 = arith.divf %518, %517 : vector<8x28xf32>
    %c128_401 = arith.constant 128 : index
    %c0_402 = arith.constant 0 : index
    %520 = vector.load %arg9[%c128_401, %c0_402] : memref<224x28xf32, #tpu.memory_space<vmem>>, vector<8x28xf32>
    tpu.vector_store %arg9[%c128_401, %c0_402], %519 {strides = array<i32>} : memref<224x28xf32, #tpu.memory_space<vmem>>, vector<8x28xf32>,
    %c656 = arith.constant 656 : index
    %c0_403 = arith.constant 0 : index
    %521 = vector.load %arg15[%c656, %c0_403] : memref<704x28xf32, #tpu.memory_space<vmem>>, vector<8x28xf32>
    %c488 = arith.constant 488 : index
    %c0_404 = arith.constant 0 : index
    %522 = vector.load %arg15[%c488, %c0_404] : memref<704x28xf32, #tpu.memory_space<vmem>>, vector<8x28xf32>
    %523 = arith.addf %521, %522 : vector<8x28xf32>
    %c320 = arith.constant 320 : index
    %c0_405 = arith.constant 0 : index
    %524 = vector.load %arg15[%c320, %c0_405] : memref<704x28xf32, #tpu.memory_space<vmem>>, vector<8x28xf32>
    %525 = arith.addf %523, %524 : vector<8x28xf32>
    %c152_406 = arith.constant 152 : index
    %c0_407 = arith.constant 0 : index
    %526 = vector.load %arg15[%c152_406, %c0_407] : memref<704x28xf32, #tpu.memory_space<vmem>>, vector<8x28xf32>
    %527 = arith.addf %525, %526 : vector<8x28xf32>
    %528 = vector.broadcast %255 : vector<1x28xf32> to vector<8x28xf32>
    %529 = arith.addf %527, %528 : vector<8x28xf32>
    %cst_408 = arith.constant 0.000000e+00 : f32
    %530 = vector.broadcast %cst_408 : f32 to vector<8x28xf32>
    %531 = arith.subf %530, %529 : vector<8x28xf32>
    %532 = math.exp %531 : vector<8x28xf32>
    %cst_409 = arith.constant 1.000000e+00 : f32
    %533 = vector.broadcast %cst_409 : f32 to vector<8x28xf32>
    %534 = arith.addf %533, %532 : vector<8x28xf32>
    %cst_410 = arith.constant 1.000000e+00 : f32
    %535 = vector.broadcast %cst_410 : f32 to vector<8x28xf32>
    %536 = arith.divf %535, %534 : vector<8x28xf32>
    %c136_411 = arith.constant 136 : index
    %c0_412 = arith.constant 0 : index
    %537 = vector.load %arg9[%c136_411, %c0_412] : memref<224x28xf32, #tpu.memory_space<vmem>>, vector<8x28xf32>
    tpu.vector_store %arg9[%c136_411, %c0_412], %536 {strides = array<i32>} : memref<224x28xf32, #tpu.memory_space<vmem>>, vector<8x28xf32>,
    %c576 = arith.constant 576 : index
    %c0_413 = arith.constant 0 : index
    %538 = vector.load %arg15[%c576, %c0_413] : memref<704x28xf32, #tpu.memory_space<vmem>>, vector<8x28xf32>
    %c408 = arith.constant 408 : index
    %c0_414 = arith.constant 0 : index
    %539 = vector.load %arg15[%c408, %c0_414] : memref<704x28xf32, #tpu.memory_space<vmem>>, vector<8x28xf32>
    %540 = arith.addf %538, %539 : vector<8x28xf32>
    %c240_415 = arith.constant 240 : index
    %c0_416 = arith.constant 0 : index
    %541 = vector.load %arg15[%c240_415, %c0_416] : memref<704x28xf32, #tpu.memory_space<vmem>>, vector<8x28xf32>
    %542 = arith.addf %540, %541 : vector<8x28xf32>
    %c72_417 = arith.constant 72 : index
    %c0_418 = arith.constant 0 : index
    %543 = vector.load %arg15[%c72_417, %c0_418] : memref<704x28xf32, #tpu.memory_space<vmem>>, vector<8x28xf32>
    %544 = arith.addf %542, %543 : vector<8x28xf32>
    %545 = vector.broadcast %255 : vector<1x28xf32> to vector<8x28xf32>
    %546 = arith.addf %544, %545 : vector<8x28xf32>
    %cst_419 = arith.constant 0.000000e+00 : f32
    %547 = vector.broadcast %cst_419 : f32 to vector<8x28xf32>
    %548 = arith.subf %547, %546 : vector<8x28xf32>
    %549 = math.exp %548 : vector<8x28xf32>
    %cst_420 = arith.constant 1.000000e+00 : f32
    %550 = vector.broadcast %cst_420 : f32 to vector<8x28xf32>
    %551 = arith.addf %550, %549 : vector<8x28xf32>
    %cst_421 = arith.constant 1.000000e+00 : f32
    %552 = vector.broadcast %cst_421 : f32 to vector<8x28xf32>
    %553 = arith.divf %552, %551 : vector<8x28xf32>
    %c144_422 = arith.constant 144 : index
    %c0_423 = arith.constant 0 : index
    %554 = vector.load %arg9[%c144_422, %c0_423] : memref<224x28xf32, #tpu.memory_space<vmem>>, vector<8x28xf32>
    tpu.vector_store %arg9[%c144_422, %c0_423], %553 {strides = array<i32>} : memref<224x28xf32, #tpu.memory_space<vmem>>, vector<8x28xf32>,
    %c664 = arith.constant 664 : index
    %c0_424 = arith.constant 0 : index
    %555 = vector.load %arg15[%c664, %c0_424] : memref<704x28xf32, #tpu.memory_space<vmem>>, vector<8x28xf32>
    %c496 = arith.constant 496 : index
    %c0_425 = arith.constant 0 : index
    %556 = vector.load %arg15[%c496, %c0_425] : memref<704x28xf32, #tpu.memory_space<vmem>>, vector<8x28xf32>
    %557 = arith.addf %555, %556 : vector<8x28xf32>
    %c328 = arith.constant 328 : index
    %c0_426 = arith.constant 0 : index
    %558 = vector.load %arg15[%c328, %c0_426] : memref<704x28xf32, #tpu.memory_space<vmem>>, vector<8x28xf32>
    %559 = arith.addf %557, %558 : vector<8x28xf32>
    %c160_427 = arith.constant 160 : index
    %c0_428 = arith.constant 0 : index
    %560 = vector.load %arg15[%c160_427, %c0_428] : memref<704x28xf32, #tpu.memory_space<vmem>>, vector<8x28xf32>
    %561 = arith.addf %559, %560 : vector<8x28xf32>
    %562 = vector.broadcast %255 : vector<1x28xf32> to vector<8x28xf32>
    %563 = arith.addf %561, %562 : vector<8x28xf32>
    %cst_429 = arith.constant 0.000000e+00 : f32
    %564 = vector.broadcast %cst_429 : f32 to vector<8x28xf32>
    %565 = arith.subf %564, %563 : vector<8x28xf32>
    %566 = math.exp %565 : vector<8x28xf32>
    %cst_430 = arith.constant 1.000000e+00 : f32
    %567 = vector.broadcast %cst_430 : f32 to vector<8x28xf32>
    %568 = arith.addf %567, %566 : vector<8x28xf32>
    %cst_431 = arith.constant 1.000000e+00 : f32
    %569 = vector.broadcast %cst_431 : f32 to vector<8x28xf32>
    %570 = arith.divf %569, %568 : vector<8x28xf32>
    %c152_432 = arith.constant 152 : index
    %c0_433 = arith.constant 0 : index
    %571 = vector.load %arg9[%c152_432, %c0_433] : memref<224x28xf32, #tpu.memory_space<vmem>>, vector<8x28xf32>
    tpu.vector_store %arg9[%c152_432, %c0_433], %570 {strides = array<i32>} : memref<224x28xf32, #tpu.memory_space<vmem>>, vector<8x28xf32>,
    %c584 = arith.constant 584 : index
    %c0_434 = arith.constant 0 : index
    %572 = vector.load %arg15[%c584, %c0_434] : memref<704x28xf32, #tpu.memory_space<vmem>>, vector<8x28xf32>
    %c416 = arith.constant 416 : index
    %c0_435 = arith.constant 0 : index
    %573 = vector.load %arg15[%c416, %c0_435] : memref<704x28xf32, #tpu.memory_space<vmem>>, vector<8x28xf32>
    %574 = arith.addf %572, %573 : vector<8x28xf32>
    %c248_436 = arith.constant 248 : index
    %c0_437 = arith.constant 0 : index
    %575 = vector.load %arg15[%c248_436, %c0_437] : memref<704x28xf32, #tpu.memory_space<vmem>>, vector<8x28xf32>
    %576 = arith.addf %574, %575 : vector<8x28xf32>
    %c80_438 = arith.constant 80 : index
    %c0_439 = arith.constant 0 : index
    %577 = vector.load %arg15[%c80_438, %c0_439] : memref<704x28xf32, #tpu.memory_space<vmem>>, vector<8x28xf32>
    %578 = arith.addf %576, %577 : vector<8x28xf32>
    %579 = vector.broadcast %255 : vector<1x28xf32> to vector<8x28xf32>
    %580 = arith.addf %578, %579 : vector<8x28xf32>
    %cst_440 = arith.constant 0.000000e+00 : f32
    %581 = vector.broadcast %cst_440 : f32 to vector<8x28xf32>
    %582 = arith.subf %581, %580 : vector<8x28xf32>
    %583 = math.exp %582 : vector<8x28xf32>
    %cst_441 = arith.constant 1.000000e+00 : f32
    %584 = vector.broadcast %cst_441 : f32 to vector<8x28xf32>
    %585 = arith.addf %584, %583 : vector<8x28xf32>
    %cst_442 = arith.constant 1.000000e+00 : f32
    %586 = vector.broadcast %cst_442 : f32 to vector<8x28xf32>
    %587 = arith.divf %586, %585 : vector<8x28xf32>
    %c160_443 = arith.constant 160 : index
    %c0_444 = arith.constant 0 : index
    %588 = vector.load %arg9[%c160_443, %c0_444] : memref<224x28xf32, #tpu.memory_space<vmem>>, vector<8x28xf32>
    tpu.vector_store %arg9[%c160_443, %c0_444], %587 {strides = array<i32>} : memref<224x28xf32, #tpu.memory_space<vmem>>, vector<8x28xf32>,
    %c672_445 = arith.constant 672 : index
    %c0_446 = arith.constant 0 : index
    %589 = vector.load %arg15[%c672_445, %c0_446] : memref<704x28xf32, #tpu.memory_space<vmem>>, vector<8x28xf32>
    %c504 = arith.constant 504 : index
    %c0_447 = arith.constant 0 : index
    %590 = vector.load %arg15[%c504, %c0_447] : memref<704x28xf32, #tpu.memory_space<vmem>>, vector<8x28xf32>
    %591 = arith.addf %589, %590 : vector<8x28xf32>
    %c336 = arith.constant 336 : index
    %c0_448 = arith.constant 0 : index
    %592 = vector.load %arg15[%c336, %c0_448] : memref<704x28xf32, #tpu.memory_space<vmem>>, vector<8x28xf32>
    %593 = arith.addf %591, %592 : vector<8x28xf32>
    %c168_449 = arith.constant 168 : index
    %c0_450 = arith.constant 0 : index
    %594 = vector.load %arg15[%c168_449, %c0_450] : memref<704x28xf32, #tpu.memory_space<vmem>>, vector<8x28xf32>
    %595 = arith.addf %593, %594 : vector<8x28xf32>
    %596 = vector.broadcast %255 : vector<1x28xf32> to vector<8x28xf32>
    %597 = arith.addf %595, %596 : vector<8x28xf32>
    %cst_451 = arith.constant 0.000000e+00 : f32
    %598 = vector.broadcast %cst_451 : f32 to vector<8x28xf32>
    %599 = arith.subf %598, %597 : vector<8x28xf32>
    %600 = math.exp %599 : vector<8x28xf32>
    %cst_452 = arith.constant 1.000000e+00 : f32
    %601 = vector.broadcast %cst_452 : f32 to vector<8x28xf32>
    %602 = arith.addf %601, %600 : vector<8x28xf32>
    %cst_453 = arith.constant 1.000000e+00 : f32
    %603 = vector.broadcast %cst_453 : f32 to vector<8x28xf32>
    %604 = arith.divf %603, %602 : vector<8x28xf32>
    %c168_454 = arith.constant 168 : index
    %c0_455 = arith.constant 0 : index
    %605 = vector.load %arg9[%c168_454, %c0_455] : memref<224x28xf32, #tpu.memory_space<vmem>>, vector<8x28xf32>
    tpu.vector_store %arg9[%c168_454, %c0_455], %604 {strides = array<i32>} : memref<224x28xf32, #tpu.memory_space<vmem>>, vector<8x28xf32>,
    %c592 = arith.constant 592 : index
    %c0_456 = arith.constant 0 : index
    %606 = vector.load %arg15[%c592, %c0_456] : memref<704x28xf32, #tpu.memory_space<vmem>>, vector<8x28xf32>
    %c424 = arith.constant 424 : index
    %c0_457 = arith.constant 0 : index
    %607 = vector.load %arg15[%c424, %c0_457] : memref<704x28xf32, #tpu.memory_space<vmem>>, vector<8x28xf32>
    %608 = arith.addf %606, %607 : vector<8x28xf32>
    %c256_458 = arith.constant 256 : index
    %c0_459 = arith.constant 0 : index
    %609 = vector.load %arg15[%c256_458, %c0_459] : memref<704x28xf32, #tpu.memory_space<vmem>>, vector<8x28xf32>
    %610 = arith.addf %608, %609 : vector<8x28xf32>
    %611 = vector.broadcast %255 : vector<1x28xf32> to vector<8x28xf32>
    %612 = arith.addf %610, %611 : vector<8x28xf32>
    %cst_460 = arith.constant 0.000000e+00 : f32
    %613 = vector.broadcast %cst_460 : f32 to vector<8x28xf32>
    %614 = arith.subf %613, %612 : vector<8x28xf32>
    %615 = math.exp %614 : vector<8x28xf32>
    %cst_461 = arith.constant 1.000000e+00 : f32
    %616 = vector.broadcast %cst_461 : f32 to vector<8x28xf32>
    %617 = arith.addf %616, %615 : vector<8x28xf32>
    %cst_462 = arith.constant 1.000000e+00 : f32
    %618 = vector.broadcast %cst_462 : f32 to vector<8x28xf32>
    %619 = arith.divf %618, %617 : vector<8x28xf32>
    %c176_463 = arith.constant 176 : index
    %c0_464 = arith.constant 0 : index
    %620 = vector.load %arg9[%c176_463, %c0_464] : memref<224x28xf32, #tpu.memory_space<vmem>>, vector<8x28xf32>
    tpu.vector_store %arg9[%c176_463, %c0_464], %619 {strides = array<i32>} : memref<224x28xf32, #tpu.memory_space<vmem>>, vector<8x28xf32>,
    %c680 = arith.constant 680 : index
    %c0_465 = arith.constant 0 : index
    %621 = vector.load %arg15[%c680, %c0_465] : memref<704x28xf32, #tpu.memory_space<vmem>>, vector<8x28xf32>
    %c512_466 = arith.constant 512 : index
    %c0_467 = arith.constant 0 : index
    %622 = vector.load %arg15[%c512_466, %c0_467] : memref<704x28xf32, #tpu.memory_space<vmem>>, vector<8x28xf32>
    %623 = arith.addf %621, %622 : vector<8x28xf32>
    %c344 = arith.constant 344 : index
    %c0_468 = arith.constant 0 : index
    %624 = vector.load %arg15[%c344, %c0_468] : memref<704x28xf32, #tpu.memory_space<vmem>>, vector<8x28xf32>
    %625 = arith.addf %623, %624 : vector<8x28xf32>
    %626 = vector.broadcast %255 : vector<1x28xf32> to vector<8x28xf32>
    %627 = arith.addf %625, %626 : vector<8x28xf32>
    %cst_469 = arith.constant 0.000000e+00 : f32
    %628 = vector.broadcast %cst_469 : f32 to vector<8x28xf32>
    %629 = arith.subf %628, %627 : vector<8x28xf32>
    %630 = math.exp %629 : vector<8x28xf32>
    %cst_470 = arith.constant 1.000000e+00 : f32
    %631 = vector.broadcast %cst_470 : f32 to vector<8x28xf32>
    %632 = arith.addf %631, %630 : vector<8x28xf32>
    %cst_471 = arith.constant 1.000000e+00 : f32
    %633 = vector.broadcast %cst_471 : f32 to vector<8x28xf32>
    %634 = arith.divf %633, %632 : vector<8x28xf32>
    %c184_472 = arith.constant 184 : index
    %c0_473 = arith.constant 0 : index
    %635 = vector.load %arg9[%c184_472, %c0_473] : memref<224x28xf32, #tpu.memory_space<vmem>>, vector<8x28xf32>
    tpu.vector_store %arg9[%c184_472, %c0_473], %634 {strides = array<i32>} : memref<224x28xf32, #tpu.memory_space<vmem>>, vector<8x28xf32>,
    %c600 = arith.constant 600 : index
    %c0_474 = arith.constant 0 : index
    %636 = vector.load %arg15[%c600, %c0_474] : memref<704x28xf32, #tpu.memory_space<vmem>>, vector<8x28xf32>
    %c432 = arith.constant 432 : index
    %c0_475 = arith.constant 0 : index
    %637 = vector.load %arg15[%c432, %c0_475] : memref<704x28xf32, #tpu.memory_space<vmem>>, vector<8x28xf32>
    %638 = arith.addf %636, %637 : vector<8x28xf32>
    %639 = vector.broadcast %255 : vector<1x28xf32> to vector<8x28xf32>
    %640 = arith.addf %638, %639 : vector<8x28xf32>
    %cst_476 = arith.constant 0.000000e+00 : f32
    %641 = vector.broadcast %cst_476 : f32 to vector<8x28xf32>
    %642 = arith.subf %641, %640 : vector<8x28xf32>
    %643 = math.exp %642 : vector<8x28xf32>
    %cst_477 = arith.constant 1.000000e+00 : f32
    %644 = vector.broadcast %cst_477 : f32 to vector<8x28xf32>
    %645 = arith.addf %644, %643 : vector<8x28xf32>
    %cst_478 = arith.constant 1.000000e+00 : f32
    %646 = vector.broadcast %cst_478 : f32 to vector<8x28xf32>
    %647 = arith.divf %646, %645 : vector<8x28xf32>
    %c192_479 = arith.constant 192 : index
    %c0_480 = arith.constant 0 : index
    %648 = vector.load %arg9[%c192_479, %c0_480] : memref<224x28xf32, #tpu.memory_space<vmem>>, vector<8x28xf32>
    tpu.vector_store %arg9[%c192_479, %c0_480], %647 {strides = array<i32>} : memref<224x28xf32, #tpu.memory_space<vmem>>, vector<8x28xf32>,
    %c688 = arith.constant 688 : index
    %c0_481 = arith.constant 0 : index
    %649 = vector.load %arg15[%c688, %c0_481] : memref<704x28xf32, #tpu.memory_space<vmem>>, vector<8x28xf32>
    %c520 = arith.constant 520 : index
    %c0_482 = arith.constant 0 : index
    %650 = vector.load %arg15[%c520, %c0_482] : memref<704x28xf32, #tpu.memory_space<vmem>>, vector<8x28xf32>
    %651 = arith.addf %649, %650 : vector<8x28xf32>
    %652 = vector.broadcast %255 : vector<1x28xf32> to vector<8x28xf32>
    %653 = arith.addf %651, %652 : vector<8x28xf32>
    %cst_483 = arith.constant 0.000000e+00 : f32
    %654 = vector.broadcast %cst_483 : f32 to vector<8x28xf32>
    %655 = arith.subf %654, %653 : vector<8x28xf32>
    %656 = math.exp %655 : vector<8x28xf32>
    %cst_484 = arith.constant 1.000000e+00 : f32
    %657 = vector.broadcast %cst_484 : f32 to vector<8x28xf32>
    %658 = arith.addf %657, %656 : vector<8x28xf32>
    %cst_485 = arith.constant 1.000000e+00 : f32
    %659 = vector.broadcast %cst_485 : f32 to vector<8x28xf32>
    %660 = arith.divf %659, %658 : vector<8x28xf32>
    %c200_486 = arith.constant 200 : index
    %c0_487 = arith.constant 0 : index
    %661 = vector.load %arg9[%c200_486, %c0_487] : memref<224x28xf32, #tpu.memory_space<vmem>>, vector<8x28xf32>
    tpu.vector_store %arg9[%c200_486, %c0_487], %660 {strides = array<i32>} : memref<224x28xf32, #tpu.memory_space<vmem>>, vector<8x28xf32>,
    %c608 = arith.constant 608 : index
    %c0_488 = arith.constant 0 : index
    %662 = vector.load %arg15[%c608, %c0_488] : memref<704x28xf32, #tpu.memory_space<vmem>>, vector<8x28xf32>
    %663 = vector.broadcast %255 : vector<1x28xf32> to vector<8x28xf32>
    %664 = arith.addf %662, %663 : vector<8x28xf32>
    %cst_489 = arith.constant 0.000000e+00 : f32
    %665 = vector.broadcast %cst_489 : f32 to vector<8x28xf32>
    %666 = arith.subf %665, %664 : vector<8x28xf32>
    %667 = math.exp %666 : vector<8x28xf32>
    %cst_490 = arith.constant 1.000000e+00 : f32
    %668 = vector.broadcast %cst_490 : f32 to vector<8x28xf32>
    %669 = arith.addf %668, %667 : vector<8x28xf32>
    %cst_491 = arith.constant 1.000000e+00 : f32
    %670 = vector.broadcast %cst_491 : f32 to vector<8x28xf32>
    %671 = arith.divf %670, %669 : vector<8x28xf32>
    %c208_492 = arith.constant 208 : index
    %c0_493 = arith.constant 0 : index
    %672 = vector.load %arg9[%c208_492, %c0_493] : memref<224x28xf32, #tpu.memory_space<vmem>>, vector<8x28xf32>
    tpu.vector_store %arg9[%c208_492, %c0_493], %671 {strides = array<i32>} : memref<224x28xf32, #tpu.memory_space<vmem>>, vector<8x28xf32>,
    %c696 = arith.constant 696 : index
    %c0_494 = arith.constant 0 : index
    %673 = vector.load %arg15[%c696, %c0_494] : memref<704x28xf32, #tpu.memory_space<vmem>>, vector<8x28xf32>
    %674 = vector.broadcast %255 : vector<1x28xf32> to vector<8x28xf32>
    %675 = arith.addf %673, %674 : vector<8x28xf32>
    %cst_495 = arith.constant 0.000000e+00 : f32
    %676 = vector.broadcast %cst_495 : f32 to vector<8x28xf32>
    %677 = arith.subf %676, %675 : vector<8x28xf32>
    %678 = math.exp %677 : vector<8x28xf32>
    %cst_496 = arith.constant 1.000000e+00 : f32
    %679 = vector.broadcast %cst_496 : f32 to vector<8x28xf32>
    %680 = arith.addf %679, %678 : vector<8x28xf32>
    %cst_497 = arith.constant 1.000000e+00 : f32
    %681 = vector.broadcast %cst_497 : f32 to vector<8x28xf32>
    %682 = arith.divf %681, %680 : vector<8x28xf32>
    %c216_498 = arith.constant 216 : index
    %c0_499 = arith.constant 0 : index
    %683 = vector.load %arg9[%c216_498, %c0_499] : memref<224x28xf32, #tpu.memory_space<vmem>>, vector<8x28xf32>
    tpu.vector_store %arg9[%c216_498, %c0_499], %682 {strides = array<i32>} : memref<224x28xf32, #tpu.memory_space<vmem>>, vector<8x28xf32>,
    return
  }
}

</mosaic_0001>

<bundles_post_ra>
// kernel: g_fmnist_forward.1
= control target key start
LH: loop header
LB: loop body
LE: loop exit
PB: predicated region body
PF: predicated region fallthrough
CT: control target
= control target key end

     0   :  { %v5357_v3 = vmov 0.0   ;;  %vm139_vm0 = vcmask 523264   ;;  %vm605_vm1 = vcmask 785408   ;;  %vm1572_vm2 = vcmask 392192   ;;  %s9067_s1 = inlined_call_operand.vmem [shape: f32[64,1024], index: 1, kind: input, shape index: {}]   ;;  %s9068_s0 = inlined_call_operand.vmem [shape: f32[8,64], index: 0, kind: input, shape index: {}]   ;;  %s9069_s3 = inlined_call_operand.vmem [shape: f32[1280,224], index: 3, kind: input, shape index: {}]   ;;  %s9070_s2 = inlined_call_operand.vmem [shape: f32[1,1024], index: 2, kind: input, shape index: {}]   ;;  %s9071_s5 = inlined_call_operand.vmem [shape: f32[1120,176], index: 5, kind: input, shape index: {}]   ;;  %s9072_s4 = inlined_call_operand.vmem [shape: f32[1,224], index: 4, kind: input, shape index: {}]   ;;  %s9073_s7 = inlined_call_operand.vmem [shape: f32[1408,28], index: 7, kind: input, shape index: {}]   ;;  %s9074_s6 = inlined_call_operand.vmem [shape: f32[1,176], index: 6, kind: input, shape index: {}]   ;;  %s9075_s8 = inlined_call_operand.vmem [shape: f32[1,28], index: 8, kind: input, shape index: {}]   ;;  %s9076_s9 = inlined_call_operand.vmem [shape: f32[224,28], index: 9, kind: output, shape index: {}]  }
   0x1   :  { %v34_v0 = vld [vmem:[%s9067_s1 + $0x8] sm:$0xff]  ;;  %v33_v2 = vld [vmem:[%s9067_s1] sm:$0xff]  ;;  %207 = vmatprep.mubr.f32.mxu0 %v5357_v3  ;;  %278 = vmatprep.mubr.f32.mxu1 %v5357_v3  ;;  %v36_v10 = vld [vmem:[%s9067_s1 + $0x18] sm:$0xff]  ;;  %vm2687_vm3 = vcmask 228352  }
   0x2   :  { %v42_v1 = vld [vmem:[%s9067_s1 + $0x48] sm:$0xff]  ;;  %v41_v5 = vld [vmem:[%s9067_s1 + $0x40] sm:$0xff]  ;;  %v44_v11 = vld [vmem:[%s9067_s1 + $0x58] sm:$0xff] }
   0x3   :  { %v4281_v4 = vpack.c.bf16 %v42_v1, %v34_v0  ;;  %v50_v6 = vld [vmem:[%s9067_s1 + $0x88] sm:$0xff]  ;;  %v4283_v8 = vpack.c.bf16 %v41_v5, %v33_v2  ;;  %v49_v12 = vld [vmem:[%s9067_s1 + $0x80] sm:$0xff]  ;;  %v4297_v13 = vpack.c.bf16 %v44_v11, %v36_v10  ;;  %v35_v15 = vld [vmem:[%s9067_s1 + $0x10] sm:$0xff] }
   0x4   :  { %v58_v7 = vld [vmem:[%s9067_s1 + $0xc8] sm:$0xff]  ;;  %v57_v14 = vld [vmem:[%s9067_s1 + $0xc0] sm:$0xff]  ;;  %v43_v16 = vld [vmem:[%s9067_s1 + $0x50] sm:$0xff] }
   0x5   :  { %v4285_v9 = vpack.c.bf16 %v58_v7, %v50_v6  ;;  %4282 = vmatprep.subr.bf16.mxu0 %v4281_v4  ;;  %v4287_v17 = vpack.c.bf16 %v57_v14, %v49_v12  ;;  %v4299_v18 = vpack.c.bf16 %v43_v16, %v35_v15  ;;  %v66_v19 = vld [vmem:[%s9067_s1 + $0x108] sm:$0xff]  ;;  %v52_v21 = vld [vmem:[%s9067_s1 + $0x98] sm:$0xff]  ;;  %4298 = vmatprep.subr.bf16.mxu1 %v4297_v13  ;;  %v65_v24 = vld [vmem:[%s9067_s1 + $0x100] sm:$0xff] }
   0x6   :  { %4284 = vmatpush1.bf16.msra.mxu0 %v4283_v8  ;;  %v74_v20 = vld [vmem:[%s9067_s1 + $0x148] sm:$0xff]  ;;  %v60_v23 = vld [vmem:[%s9067_s1 + $0xd8] sm:$0xff]  ;;  %v73_v25 = vld [vmem:[%s9067_s1 + $0x140] sm:$0xff] }
   0x7   :  { %4286 = vmatprep.subr.bf16.mxu0 %v4285_v9  ;;  %v4289_v22 = vpack.c.bf16 %v74_v20, %v66_v19  ;;  %4300 = vmatpush1.bf16.msra.mxu1 %v4299_v18  ;;  %v4301_v26 = vpack.c.bf16 %v60_v23, %v52_v21  ;;  %v51_v27 = vld [vmem:[%s9067_s1 + $0x90] sm:$0xff]  ;;  %v82_v29 = vld [vmem:[%s9067_s1 + $0x188] sm:$0xff]  ;;  %v68_v32 = vld [vmem:[%s9067_s1 + $0x118] sm:$0xff]  ;;  %v4291_v34 = vpack.c.bf16 %v73_v25, %v65_v24 }
   0x8   :  { %v59_v28 = vld [vmem:[%s9067_s1 + $0xd0] sm:$0xff]  ;;  %v90_v31 = vld [vmem:[%s9067_s1 + $0x1c8] sm:$0xff]  ;;  %v76_v33 = vld [vmem:[%s9067_s1 + $0x158] sm:$0xff] }
   0x9   :  { %v4303_v30 = vpack.c.bf16 %v59_v28, %v51_v27  ;;  %4302 = vmatprep.subr.bf16.mxu1 %v4301_v26  ;;  %v4305_v35 = vpack.c.bf16 %v76_v33, %v68_v32  ;;  %v81_v36 = vld [vmem:[%s9067_s1 + $0x180] sm:$0xff]  ;;  %v67_v37 = vld [vmem:[%s9067_s1 + $0x110] sm:$0xff]  ;;  %v4293_v38 = vpack.c.bf16 %v90_v31, %v82_v29  ;;  %v84_v41 = vld [vmem:[%s9067_s1 + $0x198] sm:$0xff] }
   0xa   :  { %4288 = vmatpush1.bf16.msra.mxu0 %v4287_v17  ;;  %v89_v39 = vld [vmem:[%s9067_s1 + $0x1c0] sm:$0xff]  ;;  %v75_v40 = vld [vmem:[%s9067_s1 + $0x150] sm:$0xff]  ;;  %v92_v43 = vld [vmem:[%s9067_s1 + $0x1d8] sm:$0xff] }
   0xb   :  { %4290 = vmatprep.subr.bf16.mxu0 %v4289_v22  ;;  %4304 = vmatpush1.bf16.msra.mxu1 %v4303_v30  ;;  %v4307_v42 = vpack.c.bf16 %v75_v40, %v67_v37  ;;  %v38_v44 = vld [vmem:[%s9067_s1 + $0x28] sm:$0xff]  ;;  %v4309_v46 = vpack.c.bf16 %v92_v43, %v84_v41  ;;  %v83_v47 = vld [vmem:[%s9067_s1 + $0x190] sm:$0xff]  ;;  %v4295_v49 = vpack.c.bf16 %v89_v39, %v81_v36  ;;  %v37_v50 = vld [vmem:[%s9067_s1 + $0x20] sm:$0xff] }
   0xc   :  { %v46_v45 = vld [vmem:[%s9067_s1 + $0x68] sm:$0xff]  ;;  %4306 = vmatprep.subr.bf16.mxu1 %v4305_v35  ;;  %v91_v48 = vld [vmem:[%s9067_s1 + $0x1d0] sm:$0xff]  ;;  %v45_v52 = vld [vmem:[%s9067_s1 + $0x60] sm:$0xff] }
   0xd   :  { %v4313_v51 = vpack.c.bf16 %v46_v45, %v38_v44  ;;  %v40_v53 = vld [vmem:[%s9067_s1 + $0x38] sm:$0xff]  ;;  %v4311_v55 = vpack.c.bf16 %v91_v48, %v83_v47  ;;  %v54_v56 = vld [vmem:[%s9067_s1 + $0xa8] sm:$0xff]  ;;  %v39_v59 = vld [vmem:[%s9067_s1 + $0x30] sm:$0xff]  ;;  %v4315_v62 = vpack.c.bf16 %v45_v52, %v37_v50 }
   0xe   :  { %4292 = vmatpush1.bf16.msra.mxu0 %v4291_v34  ;;  %v48_v54 = vld [vmem:[%s9067_s1 + $0x78] sm:$0xff]  ;;  %v62_v57 = vld [vmem:[%s9067_s1 + $0xe8] sm:$0xff]  ;;  %v47_v60 = vld [vmem:[%s9067_s1 + $0x70] sm:$0xff] }
   0xf   :  { %4294 = vmatprep.subr.bf16.mxu0 %v4293_v38  ;;  %4308 = vmatpush1.bf16.msra.mxu1 %v4307_v42  ;;  %v4329_v58 = vpack.c.bf16 %v48_v54, %v40_v53  ;;  %v5540_v61 = vld [vmem:[%s9068_s0] sm:$0xff]  ;;  %v56_v63 = vld [vmem:[%s9067_s1 + $0xb8] sm:$0xff]  ;;  %v4317_v1 = vpack.c.bf16 %v62_v57, %v54_v56  ;;  %v4331_v5 = vpack.c.bf16 %v47_v60, %v39_v59  ;;  %v70_v6 = vld [vmem:[%s9067_s1 + $0x128] sm:$0xff] }
  0x10   :  { %4310 = vmatprep.subr.bf16.mxu1 %v4309_v46  ;;  %v64_v0 = vld [vmem:[%s9067_s1 + $0xf8] sm:$0xff]  ;;  %v53_v2 = vld [vmem:[%s9067_s1 + $0xa0] sm:$0xff]  ;;  %v78_v7 = vld [vmem:[%s9067_s1 + $0x168] sm:$0xff] }
  0x11   :  { %v61_v4 = vld [vmem:[%s9067_s1 + $0xe0] sm:$0xff]  ;;  %v4333_v8 = vpack.c.bf16 %v64_v0, %v56_v63  ;;  %v55_v9 = vld [vmem:[%s9067_s1 + $0xb0] sm:$0xff]  ;;  %v72_v12 = vld [vmem:[%s9067_s1 + $0x138] sm:$0xff]  ;;  %v4321_v14 = vpack.c.bf16 %v78_v7, %v70_v6 }
  0x12   :  { %4296 = vmatpush1.bf16.msra.mxu0 %v4295_v49  ;;  %v63_v10 = vld [vmem:[%s9067_s1 + $0xf0] sm:$0xff]  ;;  %v4319_v11 = vpack.c.bf16 %v61_v4, %v53_v2  ;;  %v80_v13 = vld [vmem:[%s9067_s1 + $0x178] sm:$0xff]  ;;  %v69_v15 = vld [vmem:[%s9067_s1 + $0x120] sm:$0xff] }
  0x13   :  { %4314 = vmatprep.subr.bf16.mxu0 %v4313_v51  ;;  %4312 = vmatpush1.bf16.msra.mxu1 %v4311_v55  ;;  %v77_v16 = vld [vmem:[%s9067_s1 + $0x160] sm:$0xff]  ;;  %v4335_v17 = vpack.c.bf16 %v63_v10, %v55_v9  ;;  %v86_v18 = vld [vmem:[%s9067_s1 + $0x1a8] sm:$0xff]  ;;  %v4337_v20 = vpack.c.bf16 %v80_v13, %v72_v12  ;;  %v71_v21 = vld [vmem:[%s9067_s1 + $0x130] sm:$0xff] }
  0x14   :  { %4330 = vmatprep.subr.bf16.mxu1 %v4329_v58  ;;  %v94_v19 = vld [vmem:[%s9067_s1 + $0x1e8] sm:$0xff]  ;;  %v79_v22 = vld [vmem:[%s9067_s1 + $0x170] sm:$0xff]  ;;  %v4323_v23 = vpack.c.bf16 %v77_v16, %v69_v15  ;;  %v88_v24 = vld [vmem:[%s9067_s1 + $0x1b8] sm:$0xff] }
  0x15   :  { %4153 = vmatmul.mubr.msk.f32.vlgmr.msra.gmra.mrb[0].mxu0 %vm139_vm0, %v5540_v61  ;;  %v4325_v25 = vpack.c.bf16 %v94_v19, %v86_v18  ;;  %v85_v26 = vld [vmem:[%s9067_s1 + $0x1a0] sm:$0xff]  ;;  %v4339_v28 = vpack.c.bf16 %v79_v22, %v71_v21  ;;  %v452_v29 = vld [vmem:[%s9069_s3 + $0x8] sm:$0xff]  ;;  %v454_v30 = vld [vmem:[%s9069_s3 + $0x18] sm:$0xff] }
  0x16   :  { %4316 = vmatpush1.bf16.msra.mxu0 %v4315_v62  ;;  %349 = vmatprep.mubr.f32.mxu0 %v5357_v3  ;;  %v93_v27 = vld [vmem:[%s9067_s1 + $0x1e0] sm:$0xff]  ;;  %v87_v32 = vld [vmem:[%s9067_s1 + $0x1b0] sm:$0xff]  ;;  %v614_v35 = vld [vmem:[%s9069_s3 + $0x208] sm:$0xff]  ;;  %v4345_v37 = vpack.c.bf16 %v454_v30, %v452_v29 }
  0x17   :  { %4154 = vmatmul.mubr.msk.f32.vlgmr.msra.gmra.mrb[0].mxu1 %vm139_vm0, %v5540_v61  ;;  %4318 = vmatprep.subr.bf16.mxu0 %v4317_v1  ;;  %v95_v33 = vld [vmem:[%s9067_s1 + $0x1f0] sm:$0xff]  ;;  %v4327_v34 = vpack.c.bf16 %v93_v27, %v85_v26  ;;  %v616_v36 = vld [vmem:[%s9069_s3 + $0x218] sm:$0xff]  ;;  %v451_v38 = vld [vmem:[%s9069_s3] sm:$0xff] }
  0x18   :  { %4332 = vmatpush1.bf16.msra.mxu1 %v4331_v5  ;;  %420 = vmatprep.mubr.f32.mxu1 %v5357_v3  ;;  %v96_v3 = vld [vmem:[%s9067_s1 + $0x1f8] sm:$0xff]  ;;  %v453_v39 = vld [vmem:[%s9069_s3 + $0x10] sm:$0xff]  ;;  %v4343_v40 = vpack.c.bf16 %v95_v33, %v87_v32  ;;  %v456_v41 = vld [vmem:[%s9069_s3 + $0x28] sm:$0xff]  ;;  %v4409_v43 = vpack.c.bf16 %v616_v36, %v614_v35 }
  0x19   :  { %4334 = vmatprep.subr.bf16.mxu1 %v4333_v8  ;;  %v4341_v31 = vpack.c.bf16 %v96_v3, %v88_v24  ;;  %v458_v42 = vld [vmem:[%s9069_s3 + $0x38] sm:$0xff]  ;;  %v613_v44 = vld [vmem:[%s9069_s3 + $0x200] sm:$0xff]  ;;  %v615_v45 = vld [vmem:[%s9069_s3 + $0x210] sm:$0xff]  ;;  %v4347_v46 = vpack.c.bf16 %v453_v39, %v451_v38 }
  0x1a   :  { %4320 = vmatpush1.bf16.msra.mxu0 %v4319_v11  ;;  %v618_v47 = vld [vmem:[%s9069_s3 + $0x228] sm:$0xff]  ;;  %v620_v48 = vld [vmem:[%s9069_s3 + $0x238] sm:$0xff]  ;;  %v4349_v49 = vpack.c.bf16 %v458_v42, %v456_v41  ;;  %v455_v50 = vld [vmem:[%s9069_s3 + $0x20] sm:$0xff]  ;;  %v4411_v52 = vpack.c.bf16 %v615_v45, %v613_v44 }
  0x1b   :  { %4322 = vmatprep.subr.bf16.mxu0 %v4321_v14  ;;  %v457_v51 = vld [vmem:[%s9069_s3 + $0x30] sm:$0xff]  ;;  %v460_v53 = vld [vmem:[%s9069_s3 + $0x48] sm:$0xff]  ;;  %v462_v54 = vld [vmem:[%s9069_s3 + $0x58] sm:$0xff]  ;;  %v4413_v55 = vpack.c.bf16 %v620_v48, %v618_v47 }
  0x1c   :  { %4336 = vmatpush1.bf16.msra.mxu1 %v4335_v17  ;;  %v617_v56 = vld [vmem:[%s9069_s3 + $0x220] sm:$0xff]  ;;  %v619_v57 = vld [vmem:[%s9069_s3 + $0x230] sm:$0xff]  ;;  %v4351_v58 = vpack.c.bf16 %v457_v51, %v455_v50  ;;  %v622_v59 = vld [vmem:[%s9069_s3 + $0x248] sm:$0xff]  ;;  %v4353_v62 = vpack.c.bf16 %v462_v54, %v460_v53 }
  0x1d   :  { %4338 = vmatprep.subr.bf16.mxu1 %v4337_v20  ;;  %v624_v60 = vld [vmem:[%s9069_s3 + $0x258] sm:$0xff]  ;;  %v459_v63 = vld [vmem:[%s9069_s3 + $0x40] sm:$0xff]  ;;  %v461_v0 = vld [vmem:[%s9069_s3 + $0x50] sm:$0xff]  ;;  %v4415_v1 = vpack.c.bf16 %v619_v57, %v617_v56 }
  0x1e   :  { %4324 = vmatpush1.bf16.msra.mxu0 %v4323_v23  ;;  %v464_v2 = vld [vmem:[%s9069_s3 + $0x68] sm:$0xff]  ;;  %v4417_v4 = vpack.c.bf16 %v624_v60, %v622_v59  ;;  %v621_v5 = vld [vmem:[%s9069_s3 + $0x240] sm:$0xff]  ;;  %v623_v6 = vld [vmem:[%s9069_s3 + $0x250] sm:$0xff]  ;;  %v4355_v7 = vpack.c.bf16 %v461_v0, %v459_v63 }
  0x1f   :  { %4326 = vmatprep.subr.bf16.mxu0 %v4325_v25  ;;  %v626_v8 = vld [vmem:[%s9069_s3 + $0x268] sm:$0xff]  ;;  %v628_v9 = vld [vmem:[%s9069_s3 + $0x278] sm:$0xff]  ;;  %v463_v11 = vld [vmem:[%s9069_s3 + $0x60] sm:$0xff]  ;;  %v4419_v13 = vpack.c.bf16 %v623_v6, %v621_v5 }
  0x20   :  { %4340 = vmatpush1.bf16.msra.mxu1 %v4339_v28  ;;  %v465_v12 = vld [vmem:[%s9069_s3 + $0x70] sm:$0xff]  ;;  %v468_v14 = vld [vmem:[%s9069_s3 + $0x88] sm:$0xff]  ;;  %v470_v15 = vld [vmem:[%s9069_s3 + $0x98] sm:$0xff]  ;;  %v4421_v16 = vpack.c.bf16 %v628_v9, %v626_v8 }
  0x21   :  { %4342 = vmatprep.subr.bf16.mxu1 %v4341_v31  ;;  %v625_v17 = vld [vmem:[%s9069_s3 + $0x260] sm:$0xff]  ;;  %v627_v18 = vld [vmem:[%s9069_s3 + $0x270] sm:$0xff]  ;;  %v4359_v19 = vpack.c.bf16 %v465_v12, %v463_v11  ;;  %v630_v20 = vld [vmem:[%s9069_s3 + $0x288] sm:$0xff]  ;;  %v4361_v22 = vpack.c.bf16 %v470_v15, %v468_v14 }
  0x22   :  { %4328 = vmatpush1.bf16.msra.mxu0 %v4327_v34  ;;  %v632_v21 = vld [vmem:[%s9069_s3 + $0x298] sm:$0xff]  ;;  %v467_v23 = vld [vmem:[%s9069_s3 + $0x80] sm:$0xff]  ;;  %v469_v24 = vld [vmem:[%s9069_s3 + $0x90] sm:$0xff]  ;;  %v4423_v3 = vpack.c.bf16 %v627_v18, %v625_v17 }
  0x23   :  { %4346 = vmatprep.subr.bf16.mxu0 %v4345_v37  ;;  %v472_v25 = vld [vmem:[%s9069_s3 + $0xa8] sm:$0xff]  ;;  %v474_v26 = vld [vmem:[%s9069_s3 + $0xb8] sm:$0xff]  ;;  %v4425_v27 = vpack.c.bf16 %v632_v21, %v630_v20  ;;  %v629_v28 = vld [vmem:[%s9069_s3 + $0x280] sm:$0xff]  ;;  %v4363_v30 = vpack.c.bf16 %v469_v24, %v467_v23 }
  0x24   :  { %4344 = vmatpush1.bf16.msra.mxu1 %v4343_v40  ;;  %v631_v29 = vld [vmem:[%s9069_s3 + $0x290] sm:$0xff]  ;;  %v634_v31 = vld [vmem:[%s9069_s3 + $0x2a8] sm:$0xff]  ;;  %v636_v32 = vld [vmem:[%s9069_s3 + $0x2b8] sm:$0xff]  ;;  %v4365_v33 = vpack.c.bf16 %v474_v26, %v472_v25 }
  0x25   :  { %4155 = vmatmul.mubr.msk.f32.vlgmr.msra.gmra.mrb[2].mxu0 %vm139_vm0, %v5540_v61  ;;  %4410 = vmatprep.subr.bf16.mxu1 %v4409_v43  ;;  %v471_v34 = vld [vmem:[%s9069_s3 + $0xa0] sm:$0xff]  ;;  %v473_v35 = vld [vmem:[%s9069_s3 + $0xb0] sm:$0xff]  ;;  %v4427_v36 = vpack.c.bf16 %v631_v29, %v629_v28  ;;  %v476_v37 = vld [vmem:[%s9069_s3 + $0xc8] sm:$0xff]  ;;  %v4429_v39 = vpack.c.bf16 %v636_v32, %v634_v31 }
  0x26   :  { %4348 = vmatpush1.bf16.msra.mxu0 %v4347_v46  ;;  %v478_v38 = vld [vmem:[%s9069_s3 + $0xd8] sm:$0xff]  ;;  %v633_v40 = vld [vmem:[%s9069_s3 + $0x2a0] sm:$0xff]  ;;  %v635_v41 = vld [vmem:[%s9069_s3 + $0x2b0] sm:$0xff]  ;;  %v4367_v42 = vpack.c.bf16 %v473_v35, %v471_v34 }
  0x27   :  { %4156 = vmatmul.mubr.msk.f32.vlgmr.msra.gmra.mrb[2].mxu1 %vm139_vm0, %v5540_v61  ;;  %4350 = vmatprep.subr.bf16.mxu0 %v4349_v49  ;;  %v466_v61 = vld [vmem:[%s9069_s3 + $0x78] sm:$0xff]  ;;  %v638_v43 = vld [vmem:[%s9069_s3 + $0x2c8] sm:$0xff]  ;;  %v4369_v45 = vpack.c.bf16 %v478_v38, %v476_v37  ;;  %v475_v46 = vld [vmem:[%s9069_s3 + $0xc0] sm:$0xff]  ;;  %v4431_v48 = vpack.c.bf16 %v635_v41, %v633_v40 }
  0x28   :  { %4412 = vmatpush1.bf16.msra.mxu1 %v4411_v52  ;;  %v4357_v10 = vpack.c.bf16 %v466_v61, %v464_v2  ;;  %v640_v44 = vld [vmem:[%s9069_s3 + $0x2d8] sm:$0xff]  ;;  %v477_v47 = vld [vmem:[%s9069_s3 + $0xd0] sm:$0xff]  ;;  %v480_v49 = vld [vmem:[%s9069_s3 + $0xe8] sm:$0xff] }
  0x29   :  { %4414 = vmatprep.subr.bf16.mxu1 %v4413_v55  ;;  %v482_v50 = vld [vmem:[%s9069_s3 + $0xf8] sm:$0xff]  ;;  %v4433_v51 = vpack.c.bf16 %v640_v44, %v638_v43  ;;  %v637_v52 = vld [vmem:[%s9069_s3 + $0x2c0] sm:$0xff]  ;;  %v639_v53 = vld [vmem:[%s9069_s3 + $0x2d0] sm:$0xff]  ;;  %v4371_v54 = vpack.c.bf16 %v477_v47, %v475_v46 }
  0x2a   :  { %4352 = vmatpush1.bf16.msra.mxu0 %v4351_v58  ;;  %v642_v55 = vld [vmem:[%s9069_s3 + $0x2e8] sm:$0xff]  ;;  %v644_v56 = vld [vmem:[%s9069_s3 + $0x2f8] sm:$0xff]  ;;  %v4373_v57 = vpack.c.bf16 %v482_v50, %v480_v49  ;;  %v479_v58 = vld [vmem:[%s9069_s3 + $0xe0] sm:$0xff]  ;;  %v4435_v60 = vpack.c.bf16 %v639_v53, %v637_v52 }
  0x2b   :  { %4354 = vmatprep.subr.bf16.mxu0 %v4353_v62  ;;  %v481_v59 = vld [vmem:[%s9069_s3 + $0xf0] sm:$0xff]  ;;  %v484_v62 = vld [vmem:[%s9069_s3 + $0x108] sm:$0xff]  ;;  %v486_v63 = vld [vmem:[%s9069_s3 + $0x118] sm:$0xff]  ;;  %v4437_v0 = vpack.c.bf16 %v644_v56, %v642_v55 }
  0x2c   :  { %4416 = vmatpush1.bf16.msra.mxu1 %v4415_v1  ;;  %v641_v1 = vld [vmem:[%s9069_s3 + $0x2e0] sm:$0xff]  ;;  %v643_v2 = vld [vmem:[%s9069_s3 + $0x2f0] sm:$0xff]  ;;  %v4375_v61 = vpack.c.bf16 %v481_v59, %v479_v58  ;;  %v648_v5 = vld [vmem:[%s9069_s3 + $0x318] sm:$0xff]  ;;  %v4377_v6 = vpack.c.bf16 %v486_v63, %v484_v62 }
  0x2d   :  { %4418 = vmatprep.subr.bf16.mxu1 %v4417_v4  ;;  %v646_v4 = vld [vmem:[%s9069_s3 + $0x308] sm:$0xff]  ;;  %v485_v8 = vld [vmem:[%s9069_s3 + $0x110] sm:$0xff]  ;;  %v4439_v9 = vpack.c.bf16 %v643_v2, %v641_v1  ;;  %v490_v11 = vld [vmem:[%s9069_s3 + $0x138] sm:$0xff] }
  0x2e   :  { %4356 = vmatpush1.bf16.msra.mxu0 %v4355_v7  ;;  %v483_v7 = vld [vmem:[%s9069_s3 + $0x100] sm:$0xff]  ;;  %v4441_v12 = vpack.c.bf16 %v648_v5, %v646_v4  ;;  %v647_v14 = vld [vmem:[%s9069_s3 + $0x310] sm:$0xff]  ;;  %v652_v17 = vld [vmem:[%s9069_s3 + $0x338] sm:$0xff] }
  0x2f   :  { %4358 = vmatprep.subr.bf16.mxu0 %v4357_v10  ;;  %v488_v10 = vld [vmem:[%s9069_s3 + $0x128] sm:$0xff]  ;;  %v4379_v15 = vpack.c.bf16 %v485_v8, %v483_v7  ;;  %v489_v20 = vld [vmem:[%s9069_s3 + $0x130] sm:$0xff]  ;;  %v494_v23 = vld [vmem:[%s9069_s3 + $0x158] sm:$0xff] }
  0x30   :  { %4420 = vmatpush1.bf16.msra.mxu1 %v4419_v13  ;;  %v645_v13 = vld [vmem:[%s9069_s3 + $0x300] sm:$0xff]  ;;  %v4381_v18 = vpack.c.bf16 %v490_v11, %v488_v10  ;;  %v651_v25 = vld [vmem:[%s9069_s3 + $0x330] sm:$0xff]  ;;  %v656_v28 = vld [vmem:[%s9069_s3 + $0x358] sm:$0xff] }
  0x31   :  { %4422 = vmatprep.subr.bf16.mxu1 %v4421_v16  ;;  %v650_v16 = vld [vmem:[%s9069_s3 + $0x328] sm:$0xff]  ;;  %v4443_v21 = vpack.c.bf16 %v647_v14, %v645_v13  ;;  %v493_v31 = vld [vmem:[%s9069_s3 + $0x150] sm:$0xff]  ;;  %v498_v34 = vld [vmem:[%s9069_s3 + $0x178] sm:$0xff] }
  0x32   :  { %4360 = vmatpush1.bf16.msra.mxu0 %v4359_v19  ;;  %v487_v19 = vld [vmem:[%s9069_s3 + $0x120] sm:$0xff]  ;;  %v4445_v24 = vpack.c.bf16 %v652_v17, %v650_v16  ;;  %v655_v37 = vld [vmem:[%s9069_s3 + $0x350] sm:$0xff]  ;;  %v660_v40 = vld [vmem:[%s9069_s3 + $0x378] sm:$0xff] }
  0x33   :  { %4362 = vmatprep.subr.bf16.mxu0 %v4361_v22  ;;  %v492_v22 = vld [vmem:[%s9069_s3 + $0x148] sm:$0xff]  ;;  %v4383_v26 = vpack.c.bf16 %v489_v20, %v487_v19  ;;  %v497_v43 = vld [vmem:[%s9069_s3 + $0x170] sm:$0xff]  ;;  %v502_v46 = vld [vmem:[%s9069_s3 + $0x198] sm:$0xff] }
  0x34   :  { %4424 = vmatpush1.bf16.msra.mxu1 %v4423_v3  ;;  %v649_v3 = vld [vmem:[%s9069_s3 + $0x320] sm:$0xff]  ;;  %v4385_v29 = vpack.c.bf16 %v494_v23, %v492_v22  ;;  %v659_v49 = vld [vmem:[%s9069_s3 + $0x370] sm:$0xff]  ;;  %v664_v52 = vld [vmem:[%s9069_s3 + $0x398] sm:$0xff] }
  0x35   :  { %4426 = vmatprep.subr.bf16.mxu1 %v4425_v27  ;;  %v654_v27 = vld [vmem:[%s9069_s3 + $0x348] sm:$0xff]  ;;  %v4447_v32 = vpack.c.bf16 %v651_v25, %v649_v3  ;;  %v501_v55 = vld [vmem:[%s9069_s3 + $0x190] sm:$0xff]  ;;  %v506_v58 = vld [vmem:[%s9069_s3 + $0x1b8] sm:$0xff] }
  0x36   :  { %4364 = vmatpush1.bf16.msra.mxu0 %v4363_v30  ;;  %v491_v30 = vld [vmem:[%s9069_s3 + $0x140] sm:$0xff]  ;;  %v4449_v35 = vpack.c.bf16 %v656_v28, %v654_v27  ;;  %v663_v62 = vld [vmem:[%s9069_s3 + $0x390] sm:$0xff]  ;;  %v668_v1 = vld [vmem:[%s9069_s3 + $0x3b8] sm:$0xff] }
  0x37   :  { %4366 = vmatprep.subr.bf16.mxu0 %v4365_v33  ;;  %v496_v33 = vld [vmem:[%s9069_s3 + $0x168] sm:$0xff]  ;;  %v4387_v38 = vpack.c.bf16 %v493_v31, %v491_v30  ;;  %v505_v4 = vld [vmem:[%s9069_s3 + $0x1b0] sm:$0xff]  ;;  %v510_v7 = vld [vmem:[%s9069_s3 + $0x1d8] sm:$0xff] }
  0x38   :  { %4428 = vmatpush1.bf16.msra.mxu1 %v4427_v36  ;;  %v653_v36 = vld [vmem:[%s9069_s3 + $0x340] sm:$0xff]  ;;  %v4389_v41 = vpack.c.bf16 %v498_v34, %v496_v33  ;;  %v667_v10 = vld [vmem:[%s9069_s3 + $0x3b0] sm:$0xff]  ;;  %v672_v13 = vld [vmem:[%s9069_s3 + $0x3d8] sm:$0xff] }
  0x39   :  { %4430 = vmatprep.subr.bf16.mxu1 %v4429_v39  ;;  %v658_v39 = vld [vmem:[%s9069_s3 + $0x368] sm:$0xff]  ;;  %v4451_v44 = vpack.c.bf16 %v655_v37, %v653_v36  ;;  %v509_v16 = vld [vmem:[%s9069_s3 + $0x1d0] sm:$0xff]  ;;  %v669_v19 = vld [vmem:[%s9069_s3 + $0x3c0] sm:$0xff] }
  0x3a   :  { %4368 = vmatpush1.bf16.msra.mxu0 %v4367_v42  ;;  %v495_v42 = vld [vmem:[%s9069_s3 + $0x160] sm:$0xff]  ;;  %v4453_v47 = vpack.c.bf16 %v660_v40, %v658_v39  ;;  %v671_v20 = vld [vmem:[%s9069_s3 + $0x3d0] sm:$0xff]  ;;  %v512_v23 = vld [vmem:[%s9069_s3 + $0x1e8] sm:$0xff]  ;;  %v99_v40 = vlaneseq }
  0x3b   :  { %4370 = vmatprep.subr.bf16.mxu0 %v4369_v45  ;;  %v500_v45 = vld [vmem:[%s9069_s3 + $0x188] sm:$0xff]  ;;  %v4391_v50 = vpack.c.bf16 %v497_v43, %v495_v42  ;;  %v4467_v22 = vpack.c.bf16 %v671_v20, %v669_v19  ;;  %v511_v27 = vld [vmem:[%s9069_s3 + $0x1e0] sm:$0xff]  ;;  %v513_v28 = vld [vmem:[%s9069_s3 + $0x1f0] sm:$0xff] }
  0x3c   :  { %4432 = vmatpush1.bf16.msra.mxu1 %v4431_v48  ;;  %v657_v48 = vld [vmem:[%s9069_s3 + $0x360] sm:$0xff]  ;;  %v4393_v53 = vpack.c.bf16 %v502_v46, %v500_v45  ;;  %v674_v3 = vld [vmem:[%s9069_s3 + $0x3e8] sm:$0xff]  ;;  %v4407_v30 = vpack.c.bf16 %v513_v28, %v511_v27  ;;  %v938_v37 = vld [vmem:[%s9069_s3 + $0x618] sm:$0xff] }
  0x3d   :  { %4434 = vmatprep.subr.bf16.mxu1 %v4433_v51  ;;  %v662_v51 = vld [vmem:[%s9069_s3 + $0x388] sm:$0xff]  ;;  %v4455_v56 = vpack.c.bf16 %v659_v49, %v657_v48  ;;  %v673_v31 = vld [vmem:[%s9069_s3 + $0x3e0] sm:$0xff] }
  0x3e   :  { %4372 = vmatpush1.bf16.msra.mxu0 %v4371_v54  ;;  %v499_v54 = vld [vmem:[%s9069_s3 + $0x180] sm:$0xff]  ;;  %v4457_v59 = vpack.c.bf16 %v664_v52, %v662_v51  ;;  %v775_v34 = vld [vmem:[%s9069_s3 + $0x408] sm:$0xff] }
  0x3f   :  { %4374 = vmatprep.subr.bf16.mxu0 %v4373_v57  ;;  %v504_v57 = vld [vmem:[%s9069_s3 + $0x1a8] sm:$0xff]  ;;  %v4395_v63 = vpack.c.bf16 %v501_v55, %v499_v54  ;;  %v6022_v43 = vld [vmem:[%s9070_s2] sm:$0xff]  ;;  %v776_v55 = vld [vmem:[%s9069_s3 + $0x410] sm:$0xff] }
  0x40   :  { %4436 = vmatpush1.bf16.msra.mxu1 %v4435_v60  ;;  %v661_v60 = vld [vmem:[%s9069_s3 + $0x380] sm:$0xff]  ;;  %v4397_v2 = vpack.c.bf16 %v506_v58, %v504_v57  ;;  %v936_v36 = vld [vmem:[%s9069_s3 + $0x608] sm:$0xff]  ;;  %v937_v57 = vld [vmem:[%s9069_s3 + $0x610] sm:$0xff] }
  0x41   :  { %4438 = vmatprep.subr.bf16.mxu1 %v4437_v0  ;;  %v666_v0 = vld [vmem:[%s9069_s3 + $0x3a8] sm:$0xff]  ;;  %v4459_v5 = vpack.c.bf16 %v663_v62, %v661_v60  ;;  %v4537_v39 = vpack.c.bf16 %v938_v37, %v936_v36  ;;  %v774_v52 = vld [vmem:[%s9069_s3 + $0x400] sm:$0xff]  ;;  %v781_v62 = vld [vmem:[%s9069_s3 + $0x438] sm:$0xff] }
  0x42   :  { %4376 = vmatpush1.bf16.msra.mxu0 %v4375_v61  ;;  %v503_v61 = vld [vmem:[%s9069_s3 + $0x1a0] sm:$0xff]  ;;  %v4461_v8 = vpack.c.bf16 %v668_v1, %v666_v0  ;;  %v779_v60 = vld [vmem:[%s9069_s3 + $0x428] sm:$0xff]  ;;  %v788_v37 = vld [vmem:[%s9069_s3 + $0x470] sm:$0xff] }
  0x43   :  { %4378 = vmatprep.subr.bf16.mxu0 %v4377_v6  ;;  %v508_v6 = vld [vmem:[%s9069_s3 + $0x1c8] sm:$0xff]  ;;  %v4399_v11 = vpack.c.bf16 %v505_v4, %v503_v61  ;;  %v786_v36 = vld [vmem:[%s9069_s3 + $0x460] sm:$0xff] }
  0x44   :  { %4440 = vmatpush1.bf16.msra.mxu1 %v4439_v9  ;;  %v665_v9 = vld [vmem:[%s9069_s3 + $0x3a0] sm:$0xff]  ;;  %v4401_v14 = vpack.c.bf16 %v510_v7, %v508_v6  ;;  %v940_v1 = vld [vmem:[%s9069_s3 + $0x628] sm:$0xff] }
  0x45   :  { %4442 = vmatprep.subr.bf16.mxu1 %v4441_v12  ;;  %v670_v12 = vld [vmem:[%s9069_s3 + $0x3c8] sm:$0xff]  ;;  %v4463_v17 = vpack.c.bf16 %v667_v10, %v665_v9  ;;  %v778_v7 = vld [vmem:[%s9069_s3 + $0x420] sm:$0xff]  ;;  %v4477_v10 = vpack.c.bf16 %v781_v62, %v779_v60 }
  0x46   :  { %4380 = vmatpush1.bf16.msra.mxu0 %v4379_v15  ;;  %v507_v15 = vld [vmem:[%s9069_s3 + $0x1c0] sm:$0xff]  ;;  %v787_v28 = vld [vmem:[%s9069_s3 + $0x468] sm:$0xff] }
  0x47   :  { %4382 = vmatprep.subr.bf16.mxu0 %v4381_v18  ;;  %v4465_v18 = vpack.c.bf16 %v672_v13, %v670_v12  ;;  %v941_v12 = vld [vmem:[%s9069_s3 + $0x630] sm:$0xff]  ;;  %v783_v13 = vld [vmem:[%s9069_s3 + $0x448] sm:$0xff] }
  0x48   :  { %4444 = vmatpush1.bf16.msra.mxu1 %v4443_v21  ;;  %v4403_v21 = vpack.c.bf16 %v509_v16, %v507_v15  ;;  %v785_v16 = vld [vmem:[%s9069_s3 + $0x458] sm:$0xff] }
  0x49   :  { %4446 = vmatprep.subr.bf16.mxu1 %v4445_v24  ;;  %v514_v24 = vld [vmem:[%s9069_s3 + $0x1f8] sm:$0xff] }
  0x4a   :  { %4384 = vmatpush1.bf16.msra.mxu0 %v4383_v26  ;;  %v4405_v25 = vpack.c.bf16 %v514_v24, %v512_v23  ;;  %v676_v26 = vld [vmem:[%s9069_s3 + $0x3f8] sm:$0xff]  ;;  %v784_v23 = vld [vmem:[%s9069_s3 + $0x450] sm:$0xff]  ;;  %v4481_v24 = vpack.c.bf16 %v785_v16, %v783_v13 }
  0x4b   :  { %4386 = vmatprep.subr.bf16.mxu0 %v4385_v29  ;;  %v4469_v29 = vpack.c.bf16 %v676_v26, %v674_v3  ;;  %v945_v26 = vld [vmem:[%s9069_s3 + $0x650] sm:$0xff] }
  0x4c   :  { %4448 = vmatpush1.bf16.msra.mxu1 %v4447_v32  ;;  %v675_v32 = vld [vmem:[%s9069_s3 + $0x3f0] sm:$0xff] }
  0x4d   :  { %4450 = vmatprep.subr.bf16.mxu1 %v4449_v35  ;;  %v4471_v33 = vpack.c.bf16 %v675_v32, %v673_v31  ;;  %v777_v35 = vld [vmem:[%s9069_s3 + $0x418] sm:$0xff]  ;;  %v948_v31 = vld [vmem:[%s9069_s3 + $0x668] sm:$0xff] }
  0x4e   :  { %4388 = vmatpush1.bf16.msra.mxu0 %v4387_v38  ;;  %v4473_v38 = vpack.c.bf16 %v777_v35, %v775_v34  ;;  %v950_v32 = vld [vmem:[%s9069_s3 + $0x678] sm:$0xff] }
  0x4f   :  { %4390 = vmatprep.subr.bf16.mxu0 %v4389_v41  ;;  %v6014_v41 = vshrl.u32 %v99_v40, 7 }
  0x50   :  { %4452 = vmatpush1.bf16.msra.mxu1 %v4451_v44 }
  0x51   :  { %4454 = vmatprep.subr.bf16.mxu1 %v4453_v47  ;;  %v6017_v42 = vsub.s32 0, %v6014_v41  ;;  %v6025_v44 = vsub.s32 1, %v6014_v41  ;;  %v109_v45 = vsub.s32 2, %v6014_v41  ;;  %v113_v46 = vsub.s32 3, %v6014_v41 }
  0x52   :  { %4392 = vmatpush1.bf16.msra.mxu0 %v4391_v50  ;;  %v117_v27 = vsub.s32 4, %v6014_v41 }
  0x53   :  { %4394 = vmatprep.subr.bf16.mxu0 %v4393_v53  ;;  %v102_v47 = vrot.slane %v6022_v43, %v6017_v42  ;;  %v106_v48 = vrot.slane %v6022_v43, %v6025_v44  ;;  %v110_v49 = vrot.slane %v6022_v43, %v109_v45  ;;  %v114_v51 = vrot.slane %v6022_v43, %v113_v46  ;;  %v947_v46 = vld [vmem:[%s9069_s3 + $0x660] sm:$0xff] }
  0x54   :  { %4456 = vmatpush1.bf16.msra.mxu1 %v4455_v56  ;;  %v935_v56 = vld [vmem:[%s9069_s3 + $0x600] sm:$0xff]  ;;  %v4549_v45 = vpack.c.bf16 %v950_v32, %v948_v31  ;;  %v800_v32 = vld [vmem:[%s9069_s3 + $0x4d0] sm:$0xff] }
  0x55   :  { %4458 = vmatprep.subr.bf16.mxu1 %v4457_v59  ;;  %v4539_v6 = vpack.c.bf16 %v937_v57, %v935_v56  ;;  %v790_v57 = vld [vmem:[%s9069_s3 + $0x480] sm:$0xff] }
  0x56   :  { %4396 = vmatpush1.bf16.msra.mxu0 %v4395_v63  ;;  %v798_v31 = vld [vmem:[%s9069_s3 + $0x4c0] sm:$0xff] }
  0x57   :  { %4398 = vmatprep.subr.bf16.mxu0 %v4397_v2  ;;  %v942_v2 = vld [vmem:[%s9069_s3 + $0x638] sm:$0xff] }
  0x58   :  { %4460 = vmatpush1.bf16.msra.mxu1 %v4459_v5  ;;  %v4475_v5 = vpack.c.bf16 %v776_v55, %v774_v52  ;;  %v4541_v15 = vpack.c.bf16 %v942_v2, %v940_v1 }
  0x59   :  { %4462 = vmatprep.subr.bf16.mxu1 %v4461_v8  ;;  %v780_v8 = vld [vmem:[%s9069_s3 + $0x430] sm:$0xff] }
  0x5a   :  { %4400 = vmatpush1.bf16.msra.mxu0 %v4399_v11  ;;  %v939_v11 = vld [vmem:[%s9069_s3 + $0x620] sm:$0xff]  ;;  %v4479_v20 = vpack.c.bf16 %v780_v8, %v778_v7  ;;  %v797_v8 = vld [vmem:[%s9069_s3 + $0x4b8] sm:$0xff] }
  0x5b   :  { %4402 = vmatprep.subr.bf16.mxu0 %v4401_v14 }
  0x5c   :  { %4464 = vmatpush1.bf16.msra.mxu1 %v4463_v17  ;;  %v944_v17 = vld [vmem:[%s9069_s3 + $0x648] sm:$0xff] }
  0x5d   :  { %4466 = vmatprep.subr.bf16.mxu1 %v4465_v18  ;;  %v946_v18 = vld [vmem:[%s9069_s3 + $0x658] sm:$0xff] }
  0x5e   :  { %4404 = vmatpush1.bf16.msra.mxu0 %v4403_v21  ;;  %v4543_v21 = vpack.c.bf16 %v941_v12, %v939_v11  ;;  %v4545_v3 = vpack.c.bf16 %v946_v18, %v944_v17  ;;  %v958_v11 = vld [vmem:[%s9069_s3 + $0x6b8] sm:$0xff]  ;;  %v794_v17 = vld [vmem:[%s9069_s3 + $0x4a0] sm:$0xff]  ;;  %v796_v18 = vld [vmem:[%s9069_s3 + $0x4b0] sm:$0xff] }
  0x5f   :  { %4406 = vmatprep.subr.bf16.mxu0 %v4405_v25  ;;  %v943_v25 = vld [vmem:[%s9069_s3 + $0x640] sm:$0xff] }
  0x60   :  { %4468 = vmatpush1.bf16.msra.mxu1 %v4467_v22  ;;  %v782_v22 = vld [vmem:[%s9069_s3 + $0x440] sm:$0xff]  ;;  %v4547_v35 = vpack.c.bf16 %v945_v26, %v943_v25  ;;  %v801_v26 = vld [vmem:[%s9069_s3 + $0x4d8] sm:$0xff] }
  0x61   :  { %4470 = vmatprep.subr.bf16.mxu1 %v4469_v29  ;;  %v121_v29 = vsub.s32 5, %v6014_v41  ;;  %v4483_v34 = vpack.c.bf16 %v784_v23, %v782_v22 }
  0x62   :  { %4408 = vmatpush1.bf16.msra.mxu0 %v4407_v30  ;;  %v789_v30 = vld [vmem:[%s9069_s3 + $0x478] sm:$0xff] }
  0x63   :  { %4474 = vmatprep.subr.bf16.mxu0 %v4473_v38  ;;  %v129_v38 = vsub.s32 7, %v6014_v41  ;;  %v4485_v40 = vpack.c.bf16 %v789_v30, %v787_v28  ;;  %v962_v28 = vld [vmem:[%s9069_s3 + $0x6d8] sm:$0xff] }
  0x64   :  { %4472 = vmatpush1.bf16.msra.mxu1 %v4471_v33  ;;  %v125_v33 = vsub.s32 6, %v6014_v41  ;;  %v122_v41 = vrot.slane %v6022_v43, %v121_v29  ;;  %v4495_v29 = vpack.c.bf16 %v796_v18, %v794_v17  ;;  %v815_v17 = vld [vmem:[%s9069_s3 + $0x548] sm:$0xff]  ;;  %v817_v18 = vld [vmem:[%s9069_s3 + $0x558] sm:$0xff] }
  0x65   :  { %4538 = vmatprep.subr.bf16.mxu1 %v4537_v39  ;;  %v118_v39 = vrot.slane %v6022_v43, %v117_v27  ;;  %v130_v56 = vrot.slane %v6022_v43, %v129_v38  ;;  %v960_v27 = vld [vmem:[%s9069_s3 + $0x6c8] sm:$0xff]  ;;  %v805_v38 = vld [vmem:[%s9069_s3 + $0x4f8] sm:$0xff] }
  0x66   :  { %v126_v52 = vrot.slane %v6022_v43, %v125_v33  ;;  %v953_v43 = vld [vmem:[%s9069_s3 + $0x690] sm:$0xff]  ;;  %v959_v33 = vld [vmem:[%s9069_s3 + $0x6c0] sm:$0xff] }
  0xe8   :  { %v209_v50 = vpop.f32.mrb[0].mxu0 }
  0xe9   :  { %v210_v53 = vadd.f32 %v209_v50, %v102_v47  ;;  %v211_v54 = vpop.f32.mrb[1].mxu0  ;;  %v949_v47 = vld [vmem:[%s9069_s3 + $0x670] sm:$0xff]  ;;  %v952_v50 = vld [vmem:[%s9069_s3 + $0x688] sm:$0xff] }
  0xea   :  { %v212_v58 = vadd.f32 %v211_v54, %v106_v48  ;;  %v280_v59 = vpop.f32.mrb[0].mxu1  ;;  %v791_v48 = vld [vmem:[%s9069_s3 + $0x488] sm:$0xff]  ;;  %v4487_v54 = vpack.c.bf16 %v788_v37, %v786_v36  ;;  %v4551_v55 = vpack.c.bf16 %v949_v47, %v947_v46  ;;  %v4561_v37 = vpack.c.bf16 %v962_v28, %v960_v27  ;;  %v802_v47 = vld [vmem:[%s9069_s3 + $0x4e0] sm:$0xff] }
  0xeb   :  { %v281_v63 = vadd.f32 %v280_v59, %v110_v49  ;;  %v282_v0 = vpop.f32.mrb[1].mxu1  ;;  %v6067_v9 = vmax.f32 %v210_v53, 0.0  ;;  %v793_v49 = vld [vmem:[%s9069_s3 + $0x498] sm:$0xff]  ;;  %v4513_v27 = vpack.c.bf16 %v817_v18, %v815_v17  ;;  %v830_v17 = vld [vmem:[%s9069_s3 + $0x5c0] sm:$0xff]  ;;  %v832_v18 = vld [vmem:[%s9069_s3 + $0x5d0] sm:$0xff] }
  0xec   :  { %v6059_v61 = vmax.f32 %v212_v58, 0.0  ;;  %v283_v4 = vadd.f32 %v282_v0, %v114_v51  ;;  %v954_v51 = vld [vmem:[%s9069_s3 + $0x698] sm:$0xff]  ;;  %v4489_v60 = vpack.c.bf16 %v793_v49, %v791_v48  ;;  %v951_v0 = vld [vmem:[%s9069_s3 + $0x680] sm:$0xff]  ;;  %v804_v48 = vld [vmem:[%s9069_s3 + $0x4f0] sm:$0xff] }
  0xed   :  { %v6091_v19 = vmax.f32 %v281_v63, 0.0  ;;  %v4553_v62 = vpack.c.bf16 %v954_v51, %v952_v50  ;;  %v792_v63 = vld [vmem:[%s9069_s3 + $0x490] sm:$0xff]  ;;  %v4555_v16 = vpack.c.bf16 %v953_v43, %v951_v0  ;;  %v963_v50 = vld [vmem:[%s9069_s3 + $0x6e0] sm:$0xff]  ;;  %v811_v43 = vld [vmem:[%s9069_s3 + $0x528] sm:$0xff] }
  0xee   :  { %v6078_v14 = vmax.f32 %v283_v4, 0.0  ;;  %579 = vmatprep.mubr.f32.mxu0 %v6059_v61  ;;  %741 = vmatprep.mubr.f32.mxu1 %v6059_v61  ;;  %v795_v4 = vld [vmem:[%s9069_s3 + $0x4a8] sm:$0xff]  ;;  %v965_v51 = vld [vmem:[%s9069_s3 + $0x6f0] sm:$0xff] }
  0xef   :  { %580 = vmatmul.mubr.f32.vlgmr.msra.gmra.mrb[4].mxu0 %v6067_v9  ;;  %742 = vmatmul.mubr.f32.vlgmr.msra.gmra.mrb[4].mxu1 %v6067_v9  ;;  %v4493_v23 = vpack.c.bf16 %v797_v8, %v795_v4  ;;  %v969_v0 = vld [vmem:[%s9069_s3 + $0x710] sm:$0xff]  ;;  %v974_v4 = vld [vmem:[%s9069_s3 + $0x738] sm:$0xff]  ;;  %v810_v8 = vld [vmem:[%s9069_s3 + $0x520] sm:$0xff] }
  0xf0   :  { %4476 = vmatpush1.bf16.msra.mxu0 %v4475_v5  ;;  %4540 = vmatpush1.bf16.msra.mxu1 %v4539_v6 }
  0xf1   :  { %585 = vmatprep.mubr.f32.mxu0 %v6078_v14  ;;  %4478 = vmatprep.subr.bf16.mxu0 %v4477_v10  ;;  %v956_v10 = vld [vmem:[%s9069_s3 + $0x6a8] sm:$0xff] }
  0xf2   :  { %4542 = vmatprep.subr.bf16.mxu1 %v4541_v15  ;;  %747 = vmatprep.mubr.f32.mxu1 %v6078_v14  ;;  %v4491_v15 = vpack.c.bf16 %v792_v63, %v790_v57  ;;  %v4567_v57 = vpack.c.bf16 %v965_v51, %v963_v50  ;;  %v967_v63 = vld [vmem:[%s9069_s3 + $0x700] sm:$0xff] }
  0xf3   :  { %586 = vmatmul.mubr.f32.gmra.mrb[6].mxu0 %v6091_v19  ;;  %748 = vmatmul.mubr.f32.gmra.mrb[6].mxu1 %v6091_v19 }
  0xf4   :  { %4480 = vmatpush1.bf16.msra.mxu0 %v4479_v20  ;;  %4544 = vmatpush1.bf16.msra.mxu1 %v4543_v21  ;;  %v955_v20 = vld [vmem:[%s9069_s3 + $0x6a0] sm:$0xff]  ;;  %v957_v21 = vld [vmem:[%s9069_s3 + $0x6b0] sm:$0xff] }
  0xf5   :  { %4482 = vmatprep.subr.bf16.mxu0 %v4481_v24  ;;  %4546 = vmatprep.subr.bf16.mxu1 %v4545_v3  ;;  %v4557_v24 = vpack.c.bf16 %v958_v11, %v956_v10  ;;  %v799_v3 = vld [vmem:[%s9069_s3 + $0x4c8] sm:$0xff]  ;;  %v4559_v30 = vpack.c.bf16 %v957_v21, %v955_v20  ;;  %v812_v10 = vld [vmem:[%s9069_s3 + $0x530] sm:$0xff]  ;;  %v978_v21 = vld [vmem:[%s9069_s3 + $0x758] sm:$0xff] }
  0xf6   :  { %v4497_v36 = vpack.c.bf16 %v801_v26, %v799_v3  ;;  %v976_v20 = vld [vmem:[%s9069_s3 + $0x748] sm:$0xff]  ;;  %v814_v3 = vld [vmem:[%s9069_s3 + $0x540] sm:$0xff]  ;;  %v816_v26 = vld [vmem:[%s9069_s3 + $0x550] sm:$0xff] }
  0xf7   :  { %v4577_v28 = vpack.c.bf16 %v978_v21, %v976_v20 }
  0xf8   :  { %4484 = vmatpush1.bf16.msra.mxu0 %v4483_v34  ;;  %4548 = vmatpush1.bf16.msra.mxu1 %v4547_v35  ;;  %v351_v53 = vpop.f32.mrb[2].mxu0  ;;  %v961_v34 = vld [vmem:[%s9069_s3 + $0x6d0] sm:$0xff]  ;;  %v803_v35 = vld [vmem:[%s9069_s3 + $0x4e8] sm:$0xff] }
  0xf9   :  { %v352_v58 = vadd.f32 %v351_v53, %v118_v39  ;;  %v353_v59 = vpop.f32.mrb[3].mxu0  ;;  %4486 = vmatprep.subr.bf16.mxu0 %v4485_v40  ;;  %4550 = vmatprep.subr.bf16.mxu1 %v4549_v45  ;;  %v964_v39 = vld [vmem:[%s9069_s3 + $0x6e8] sm:$0xff]  ;;  %v966_v40 = vld [vmem:[%s9069_s3 + $0x6f8] sm:$0xff]  ;;  %v4499_v45 = vpack.c.bf16 %v800_v32, %v798_v31  ;;  %v4563_v46 = vpack.c.bf16 %v961_v34, %v959_v33 }
  0xfa   :  { %v354_v1 = vadd.f32 %v353_v59, %v122_v41  ;;  %v422_v2 = vpop.f32.mrb[2].mxu1  ;;  %v4501_v41 = vpack.c.bf16 %v805_v38, %v803_v35  ;;  %v4565_v49 = vpack.c.bf16 %v966_v40, %v964_v39  ;;  %v809_v53 = vld [vmem:[%s9069_s3 + $0x518] sm:$0xff]  ;;  %v808_v59 = vld [vmem:[%s9069_s3 + $0x510] sm:$0xff]  ;;  %v819_v31 = vld [vmem:[%s9069_s3 + $0x568] sm:$0xff]  ;;  %v4515_v35 = vpack.c.bf16 %v816_v26, %v814_v3 }
  0xfb   :  { %v6170_v5 = vmax.f32 %v352_v58, 0.0  ;;  %v423_v6 = vadd.f32 %v422_v2, %v126_v52  ;;  %v424_v7 = vpop.f32.mrb[3].mxu1  ;;  %v807_v52 = vld [vmem:[%s9069_s3 + $0x508] sm:$0xff]  ;;  %v806_v58 = vld [vmem:[%s9069_s3 + $0x500] sm:$0xff]  ;;  %v821_v32 = vld [vmem:[%s9069_s3 + $0x578] sm:$0xff] }
  0xfc   :  { %v6181_v12 = vmax.f32 %v354_v1, 0.0  ;;  %4488 = vmatpush1.bf16.msra.mxu0 %v4487_v54  ;;  %4552 = vmatpush1.bf16.msra.mxu1 %v4551_v55  ;;  %v425_v13 = vadd.f32 %v424_v7, %v130_v56  ;;  %v968_v54 = vld [vmem:[%s9069_s3 + $0x708] sm:$0xff]  ;;  %v970_v55 = vld [vmem:[%s9069_s3 + $0x718] sm:$0xff]  ;;  %v4503_v56 = vpack.c.bf16 %v804_v48, %v802_v47  ;;  %v4571_v7 = vpack.c.bf16 %v969_v0, %v967_v63  ;;  %v820_v38 = vld [vmem:[%s9069_s3 + $0x570] sm:$0xff] }
  0xfd   :  { %4490 = vmatprep.subr.bf16.mxu0 %v4489_v60  ;;  %4554 = vmatprep.subr.bf16.mxu1 %v4553_v62  ;;  %v6202_v25 = vmax.f32 %v423_v6, 0.0  ;;  %v4505_v60 = vpack.c.bf16 %v809_v53, %v807_v52  ;;  %v4569_v62 = vpack.c.bf16 %v970_v55, %v968_v54  ;;  %v813_v1 = vld [vmem:[%s9069_s3 + $0x538] sm:$0xff]  ;;  %v972_v2 = vld [vmem:[%s9069_s3 + $0x728] sm:$0xff]  ;;  %v4507_v6 = vpack.c.bf16 %v808_v59, %v806_v58  ;;  %v822_v52 = vld [vmem:[%s9069_s3 + $0x580] sm:$0xff] }
  0xfe   :  { %v6195_v22 = vmax.f32 %v425_v13, 0.0  ;;  %591 = vmatprep.mubr.f32.mxu0 %v6181_v12  ;;  %753 = vmatprep.mubr.f32.mxu1 %v6181_v12  ;;  %v4509_v11 = vpack.c.bf16 %v813_v1, %v811_v43  ;;  %v4573_v13 = vpack.c.bf16 %v974_v4, %v972_v2  ;;  %v980_v33 = vld [vmem:[%s9069_s3 + $0x768] sm:$0xff]  ;;  %v982_v34 = vld [vmem:[%s9069_s3 + $0x778] sm:$0xff]  ;;  %v4517_v39 = vpack.c.bf16 %v821_v32, %v819_v31  ;;  %v824_v53 = vld [vmem:[%s9069_s3 + $0x590] sm:$0xff] }
  0xff   :  { %592 = vmatmul.mubr.f32.gmra.mrb[8].mxu0 %v6170_v5  ;;  %754 = vmatmul.mubr.f32.gmra.mrb[8].mxu1 %v6170_v5  ;;  %v4581_v40 = vpack.c.bf16 %v982_v34, %v980_v33  ;;  %v823_v47 = vld [vmem:[%s9069_s3 + $0x588] sm:$0xff]  ;;  %v825_v48 = vld [vmem:[%s9069_s3 + $0x598] sm:$0xff]  ;;  %v4523_v63 = vpack.c.bf16 %v824_v53, %v822_v52  ;;  %v826_v43 = vld [vmem:[%s9069_s3 + $0x5a0] sm:$0xff] }
 0x100   :  { %4492 = vmatpush1.bf16.msra.mxu0 %v4491_v15  ;;  %4556 = vmatpush1.bf16.msra.mxu1 %v4555_v16  ;;  %v971_v15 = vld [vmem:[%s9069_s3 + $0x720] sm:$0xff]  ;;  %v973_v16 = vld [vmem:[%s9069_s3 + $0x730] sm:$0xff]  ;;  %v4521_v54 = vpack.c.bf16 %v825_v48, %v823_v47  ;;  %v827_v58 = vld [vmem:[%s9069_s3 + $0x5a8] sm:$0xff] }
 0x101   :  { %597 = vmatprep.mubr.f32.mxu0 %v6195_v22  ;;  %759 = vmatprep.mubr.f32.mxu1 %v6195_v22  ;;  %v829_v59 = vld [vmem:[%s9069_s3 + $0x5b8] sm:$0xff]  ;;  %v828_v1 = vld [vmem:[%s9069_s3 + $0x5b0] sm:$0xff]  ;;  %v835_v3 = vld [vmem:[%s9069_s3 + $0x5e8] sm:$0xff] }
 0x102   :  { %4494 = vmatprep.subr.bf16.mxu0 %v4493_v23  ;;  %4558 = vmatprep.subr.bf16.mxu1 %v4557_v24  ;;  %v4511_v23 = vpack.c.bf16 %v812_v10, %v810_v8  ;;  %v4575_v24 = vpack.c.bf16 %v973_v16, %v971_v15  ;;  %v4525_v2 = vpack.c.bf16 %v829_v59, %v827_v58  ;;  %v831_v8 = vld [vmem:[%s9069_s3 + $0x5c8] sm:$0xff]  ;;  %v833_v10 = vld [vmem:[%s9069_s3 + $0x5d8] sm:$0xff]  ;;  %v834_v31 = vld [vmem:[%s9069_s3 + $0x5e0] sm:$0xff] }
 0x103   :  { %598 = vmatmul.mubr.f32.gmra.mrb[10].mxu0 %v6202_v25  ;;  %760 = vmatmul.mubr.f32.gmra.mrb[10].mxu1 %v6202_v25  ;;  %v4527_v15 = vpack.c.bf16 %v828_v1, %v826_v43  ;;  %v4529_v20 = vpack.c.bf16 %v833_v10, %v831_v8  ;;  %v837_v26 = vld [vmem:[%s9069_s3 + $0x5f8] sm:$0xff]  ;;  %v836_v32 = vld [vmem:[%s9069_s3 + $0x5f0] sm:$0xff]  ;;  %v1096_v48 = vld [vmem:[%s9069_s3 + $0x800] sm:$0xff] }
 0x104   :  { %4496 = vmatpush1.bf16.msra.mxu0 %v4495_v29  ;;  %4560 = vmatpush1.bf16.msra.mxu1 %v4559_v30  ;;  %v975_v29 = vld [vmem:[%s9069_s3 + $0x740] sm:$0xff]  ;;  %v977_v30 = vld [vmem:[%s9069_s3 + $0x750] sm:$0xff]  ;;  %v4533_v33 = vpack.c.bf16 %v837_v26, %v835_v3  ;;  %v1103_v53 = vld [vmem:[%s9069_s3 + $0x838] sm:$0xff] }
 0x105   :  { %902 = vmatprep.mubr.f32.mxu0 %v6059_v61  ;;  %1063 = vmatprep.mubr.f32.mxu1 %v6059_v61  ;;  %v1389_v52 = vld [vmem:[%s9071_s5 + $0x10] sm:$0xff]  ;;  %v1107_v1 = vld [vmem:[%s9069_s3 + $0x858] sm:$0xff] }
 0x106   :  { %4498 = vmatprep.subr.bf16.mxu0 %v4497_v36  ;;  %4562 = vmatprep.subr.bf16.mxu1 %v4561_v37  ;;  %v4579_v36 = vpack.c.bf16 %v977_v30, %v975_v29  ;;  %v818_v37 = vld [vmem:[%s9069_s3 + $0x560] sm:$0xff]  ;;  %v4531_v29 = vpack.c.bf16 %v832_v18, %v830_v17  ;;  %v1102_v58 = vld [vmem:[%s9069_s3 + $0x830] sm:$0xff]  ;;  %v1111_v18 = vld [vmem:[%s9069_s3 + $0x878] sm:$0xff] }
 0x107   :  { %v4519_v50 = vpack.c.bf16 %v820_v38, %v818_v37  ;;  %v1097_v37 = vld [vmem:[%s9069_s3 + $0x808] sm:$0xff]  ;;  %v1099_v38 = vld [vmem:[%s9069_s3 + $0x818] sm:$0xff]  ;;  %v1393_v43 = vld [vmem:[%s9071_s5 + $0x30] sm:$0xff] }
 0x108   :  { %4500 = vmatpush1.bf16.msra.mxu0 %v4499_v45  ;;  %4564 = vmatpush1.bf16.msra.mxu1 %v4563_v46  ;;  %v979_v45 = vld [vmem:[%s9069_s3 + $0x760] sm:$0xff]  ;;  %v981_v46 = vld [vmem:[%s9069_s3 + $0x770] sm:$0xff]  ;;  %v4601_v47 = vpack.c.bf16 %v1099_v38, %v1097_v37 }
 0x109   :  { %4502 = vmatprep.subr.bf16.mxu0 %v4501_v41  ;;  %4566 = vmatprep.subr.bf16.mxu1 %v4565_v49  ;;  %v984_v41 = vld [vmem:[%s9069_s3 + $0x788] sm:$0xff]  ;;  %v986_v49 = vld [vmem:[%s9069_s3 + $0x798] sm:$0xff]  ;;  %v4583_v51 = vpack.c.bf16 %v981_v46, %v979_v45  ;;  %v4535_v45 = vpack.c.bf16 %v836_v32, %v834_v31  ;;  %v1106_v8 = vld [vmem:[%s9069_s3 + $0x850] sm:$0xff] }
 0x10a   :  { %v4585_v55 = vpack.c.bf16 %v986_v49, %v984_v41  ;;  %v1098_v41 = vld [vmem:[%s9069_s3 + $0x810] sm:$0xff]  ;;  %v1115_v32 = vld [vmem:[%s9069_s3 + $0x898] sm:$0xff] }
 0x10b   :  { %v1397_v17 = vld [vmem:[%s9071_s5 + $0x50] sm:$0xff] }
 0x10c   :  { %4504 = vmatpush1.bf16.msra.mxu0 %v4503_v56  ;;  %4568 = vmatpush1.bf16.msra.mxu1 %v4567_v57  ;;  %v983_v56 = vld [vmem:[%s9069_s3 + $0x780] sm:$0xff]  ;;  %v985_v57 = vld [vmem:[%s9069_s3 + $0x790] sm:$0xff] }
 0x10d   :  { %4506 = vmatprep.subr.bf16.mxu0 %v4505_v60  ;;  %4570 = vmatprep.subr.bf16.mxu1 %v4569_v62  ;;  %v988_v60 = vld [vmem:[%s9069_s3 + $0x7a8] sm:$0xff]  ;;  %v990_v62 = vld [vmem:[%s9069_s3 + $0x7b8] sm:$0xff]  ;;  %v4587_v0 = vpack.c.bf16 %v985_v57, %v983_v56  ;;  %v4603_v56 = vpack.c.bf16 %v1098_v41, %v1096_v48  ;;  %v1100_v57 = vld [vmem:[%s9069_s3 + $0x820] sm:$0xff] }
 0x10e   :  { %v4589_v4 = vpack.c.bf16 %v990_v62, %v988_v60  ;;  %v1105_v62 = vld [vmem:[%s9069_s3 + $0x848] sm:$0xff]  ;;  %v1110_v3 = vld [vmem:[%s9069_s3 + $0x870] sm:$0xff]  ;;  %v1119_v48 = vld [vmem:[%s9069_s3 + $0x8b8] sm:$0xff] }
 0x10f   :  { %v1401_v31 = vld [vmem:[%s9071_s5 + $0x70] sm:$0xff]  ;;  %v1408_v41 = vld [vmem:[%s9071_s5 + $0xa8] sm:$0xff] }
 0x110   :  { %4508 = vmatpush1.bf16.msra.mxu0 %v4507_v6  ;;  %4572 = vmatpush1.bf16.msra.mxu1 %v4571_v7  ;;  %v987_v6 = vld [vmem:[%s9069_s3 + $0x7a0] sm:$0xff]  ;;  %v989_v7 = vld [vmem:[%s9069_s3 + $0x7b0] sm:$0xff] }
 0x111   :  { %4510 = vmatprep.subr.bf16.mxu0 %v4509_v11  ;;  %4574 = vmatprep.subr.bf16.mxu1 %v4573_v13  ;;  %v992_v11 = vld [vmem:[%s9069_s3 + $0x7c8] sm:$0xff]  ;;  %v994_v13 = vld [vmem:[%s9069_s3 + $0x7d8] sm:$0xff]  ;;  %v4591_v16 = vpack.c.bf16 %v989_v7, %v987_v6  ;;  %v4607_v6 = vpack.c.bf16 %v1102_v58, %v1100_v57  ;;  %v1104_v7 = vld [vmem:[%s9069_s3 + $0x840] sm:$0xff] }
 0x112   :  { %v4593_v21 = vpack.c.bf16 %v994_v13, %v992_v11  ;;  %v4609_v11 = vpack.c.bf16 %v1107_v1, %v1105_v62  ;;  %v1109_v13 = vld [vmem:[%s9069_s3 + $0x868] sm:$0xff]  ;;  %v1114_v37 = vld [vmem:[%s9069_s3 + $0x890] sm:$0xff]  ;;  %v1123_v58 = vld [vmem:[%s9069_s3 + $0x8d8] sm:$0xff] }
 0x113   :  { %v1409_v57 = vld [vmem:[%s9071_s5 + $0xb0] sm:$0xff] }
 0x114   :  { %4512 = vmatpush1.bf16.msra.mxu0 %v4511_v23  ;;  %4576 = vmatpush1.bf16.msra.mxu1 %v4575_v24  ;;  %v991_v23 = vld [vmem:[%s9069_s3 + $0x7c0] sm:$0xff]  ;;  %v993_v24 = vld [vmem:[%s9069_s3 + $0x7d0] sm:$0xff] }
 0x115   :  { %4514 = vmatprep.subr.bf16.mxu0 %v4513_v27  ;;  %4578 = vmatprep.subr.bf16.mxu1 %v4577_v28  ;;  %v996_v27 = vld [vmem:[%s9069_s3 + $0x7e8] sm:$0xff]  ;;  %v998_v28 = vld [vmem:[%s9069_s3 + $0x7f8] sm:$0xff]  ;;  %v4595_v30 = vpack.c.bf16 %v993_v24, %v991_v23  ;;  %v4611_v23 = vpack.c.bf16 %v1106_v8, %v1104_v7  ;;  %v1108_v24 = vld [vmem:[%s9069_s3 + $0x860] sm:$0xff] }
 0x116   :  { %v4597_v34 = vpack.c.bf16 %v998_v28, %v996_v27  ;;  %v4613_v27 = vpack.c.bf16 %v1111_v18, %v1109_v13  ;;  %v1113_v28 = vld [vmem:[%s9069_s3 + $0x888] sm:$0xff]  ;;  %v1413_v7 = vld [vmem:[%s9071_s5 + $0xd0] sm:$0xff]  ;;  %v1127_v8 = vld [vmem:[%s9069_s3 + $0x8f8] sm:$0xff] }
 0x118   :  { %4516 = vmatpush1.bf16.msra.mxu0 %v4515_v35  ;;  %4580 = vmatpush1.bf16.msra.mxu1 %v4579_v36  ;;  %v995_v35 = vld [vmem:[%s9069_s3 + $0x7e0] sm:$0xff]  ;;  %v997_v36 = vld [vmem:[%s9069_s3 + $0x7f0] sm:$0xff] }
 0x119   :  { %4518 = vmatprep.subr.bf16.mxu0 %v4517_v39  ;;  %4582 = vmatprep.subr.bf16.mxu1 %v4581_v40  ;;  %v1388_v39 = vld [vmem:[%s9071_s5 + $0x8] sm:$0xff]  ;;  %v1390_v40 = vld [vmem:[%s9071_s5 + $0x18] sm:$0xff]  ;;  %v4599_v46 = vpack.c.bf16 %v997_v36, %v995_v35  ;;  %v4615_v35 = vpack.c.bf16 %v1110_v3, %v1108_v24  ;;  %v1112_v36 = vld [vmem:[%s9069_s3 + $0x880] sm:$0xff] }
 0x11a   :  { %v4665_v49 = vpack.c.bf16 %v1390_v40, %v1388_v39  ;;  %v4617_v39 = vpack.c.bf16 %v1115_v32, %v1113_v28  ;;  %v1117_v40 = vld [vmem:[%s9069_s3 + $0x8a8] sm:$0xff]  ;;  %v1417_v24 = vld [vmem:[%s9071_s5 + $0xf0] sm:$0xff]  ;;  %v1131_v3 = vld [vmem:[%s9069_s3 + $0x918] sm:$0xff] }
 0x11c   :  { %4520 = vmatpush1.bf16.msra.mxu0 %v4519_v50  ;;  %4584 = vmatpush1.bf16.msra.mxu1 %v4583_v51  ;;  %v1101_v50 = vld [vmem:[%s9069_s3 + $0x828] sm:$0xff]  ;;  %v1387_v51 = vld [vmem:[%s9071_s5] sm:$0xff] }
 0x11d   :  { %4522 = vmatprep.subr.bf16.mxu0 %v4521_v54  ;;  %4586 = vmatprep.subr.bf16.mxu1 %v4585_v55  ;;  %v1392_v54 = vld [vmem:[%s9071_s5 + $0x28] sm:$0xff]  ;;  %v1394_v55 = vld [vmem:[%s9071_s5 + $0x38] sm:$0xff]  ;;  %v4667_v59 = vpack.c.bf16 %v1389_v52, %v1387_v51  ;;  %v4605_v60 = vpack.c.bf16 %v1103_v53, %v1101_v50  ;;  %v4619_v50 = vpack.c.bf16 %v1114_v37, %v1112_v36  ;;  %v1116_v51 = vld [vmem:[%s9069_s3 + $0x8a0] sm:$0xff] }
 0x11e   :  { %v1118_v52 = vld [vmem:[%s9069_s3 + $0x8b0] sm:$0xff]  ;;  %v1135_v37 = vld [vmem:[%s9069_s3 + $0x938] sm:$0xff] }
 0x11f   :  { %v4623_v62 = vpack.c.bf16 %v1118_v52, %v1116_v51  ;;  %v1421_v36 = vld [vmem:[%s9071_s5 + $0x110] sm:$0xff]  ;;  %v1139_v52 = vld [vmem:[%s9069_s3 + $0x958] sm:$0xff] }
 0x120   :  { %4524 = vmatpush1.bf16.msra.mxu0 %v4523_v63  ;;  %4588 = vmatpush1.bf16.msra.mxu1 %v4587_v0  ;;  %v4669_v63 = vpack.c.bf16 %v1394_v55, %v1392_v54  ;;  %v1391_v0 = vld [vmem:[%s9071_s5 + $0x20] sm:$0xff]  ;;  %v4621_v54 = vpack.c.bf16 %v1119_v48, %v1117_v40  ;;  %v1121_v55 = vld [vmem:[%s9069_s3 + $0x8c8] sm:$0xff]  ;;  %v1425_v51 = vld [vmem:[%s9071_s5 + $0x130] sm:$0xff] }
 0x121   :  { %4526 = vmatprep.subr.bf16.mxu0 %v4525_v2  ;;  %4590 = vmatprep.subr.bf16.mxu1 %v4589_v4  ;;  %v1396_v2 = vld [vmem:[%s9071_s5 + $0x48] sm:$0xff]  ;;  %v1398_v4 = vld [vmem:[%s9071_s5 + $0x58] sm:$0xff]  ;;  %v4671_v10 = vpack.c.bf16 %v1393_v43, %v1391_v0  ;;  %v1122_v0 = vld [vmem:[%s9069_s3 + $0x8d0] sm:$0xff]  ;;  %v4625_v1 = vpack.c.bf16 %v1123_v58, %v1121_v55 }
 0x124   :  { %4528 = vmatpush1.bf16.msra.mxu0 %v4527_v15  ;;  %4592 = vmatpush1.bf16.msra.mxu1 %v4591_v16  ;;  %v4673_v15 = vpack.c.bf16 %v1398_v4, %v1396_v2  ;;  %v1395_v16 = vld [vmem:[%s9071_s5 + $0x40] sm:$0xff]  ;;  %v1125_v2 = vld [vmem:[%s9069_s3 + $0x8e8] sm:$0xff] }
 0x125   :  { %4530 = vmatprep.subr.bf16.mxu0 %v4529_v20  ;;  %4594 = vmatprep.subr.bf16.mxu1 %v4593_v21  ;;  %v1400_v20 = vld [vmem:[%s9071_s5 + $0x68] sm:$0xff]  ;;  %v1402_v21 = vld [vmem:[%s9071_s5 + $0x78] sm:$0xff]  ;;  %v4675_v26 = vpack.c.bf16 %v1397_v17, %v1395_v16  ;;  %v1126_v16 = vld [vmem:[%s9069_s3 + $0x8f0] sm:$0xff]  ;;  %v4629_v18 = vpack.c.bf16 %v1127_v8, %v1125_v2 }
 0x128   :  { %4532 = vmatpush1.bf16.msra.mxu0 %v4531_v29  ;;  %4596 = vmatpush1.bf16.msra.mxu1 %v4595_v30  ;;  %v4677_v29 = vpack.c.bf16 %v1402_v21, %v1400_v20  ;;  %v1399_v30 = vld [vmem:[%s9071_s5 + $0x60] sm:$0xff]  ;;  %v1129_v20 = vld [vmem:[%s9069_s3 + $0x908] sm:$0xff] }
 0x129   :  { %4534 = vmatprep.subr.bf16.mxu0 %v4533_v33  ;;  %4598 = vmatprep.subr.bf16.mxu1 %v4597_v34  ;;  %v1404_v33 = vld [vmem:[%s9071_s5 + $0x88] sm:$0xff]  ;;  %v1406_v34 = vld [vmem:[%s9071_s5 + $0x98] sm:$0xff]  ;;  %v4679_v38 = vpack.c.bf16 %v1401_v31, %v1399_v30  ;;  %v1130_v30 = vld [vmem:[%s9069_s3 + $0x910] sm:$0xff]  ;;  %v4633_v32 = vpack.c.bf16 %v1131_v3, %v1129_v20 }
 0x12c   :  { %4536 = vmatpush1.bf16.msra.mxu0 %v4535_v45  ;;  %4600 = vmatpush1.bf16.msra.mxu1 %v4599_v46  ;;  %v4681_v45 = vpack.c.bf16 %v1406_v34, %v1404_v33  ;;  %v1403_v46 = vld [vmem:[%s9071_s5 + $0x80] sm:$0xff]  ;;  %v1133_v33 = vld [vmem:[%s9069_s3 + $0x928] sm:$0xff] }
 0x12d   :  { %4602 = vmatprep.subr.bf16.mxu0 %v4601_v47  ;;  %4666 = vmatprep.subr.bf16.mxu1 %v4665_v49  ;;  %v1405_v47 = vld [vmem:[%s9071_s5 + $0x90] sm:$0xff]  ;;  %v1410_v49 = vld [vmem:[%s9071_s5 + $0xb8] sm:$0xff]  ;;  %v4637_v48 = vpack.c.bf16 %v1135_v37, %v1133_v33 }
 0x12e   :  { %v4683_v53 = vpack.c.bf16 %v1405_v47, %v1403_v46  ;;  %v1134_v46 = vld [vmem:[%s9069_s3 + $0x930] sm:$0xff] }
 0x12f   :  { %903 = vmatmul.mubr.f32.vlgmr.msra.gmra.mrb[12].mxu0 %v6067_v9  ;;  %1064 = vmatmul.mubr.f32.vlgmr.msra.gmra.mrb[12].mxu1 %v6067_v9  ;;  %v1150_v37 = vld [vmem:[%s9069_s3 + $0x9b0] sm:$0xff] }
 0x130   :  { %908 = vmatprep.mubr.f32.mxu0 %v6078_v14  ;;  %1069 = vmatprep.mubr.f32.mxu1 %v6078_v14 }
 0x131   :  { %4604 = vmatpush1.bf16.msra.mxu0 %v4603_v56  ;;  %4668 = vmatpush1.bf16.msra.mxu1 %v4667_v59  ;;  %v1407_v56 = vld [vmem:[%s9071_s5 + $0xa0] sm:$0xff]  ;;  %v1412_v59 = vld [vmem:[%s9071_s5 + $0xc8] sm:$0xff] }
 0x132   :  { %4606 = vmatprep.subr.bf16.mxu0 %v4605_v60  ;;  %4670 = vmatprep.subr.bf16.mxu1 %v4669_v63  ;;  %v1414_v60 = vld [vmem:[%s9071_s5 + $0xd8] sm:$0xff]  ;;  %v1120_v63 = vld [vmem:[%s9069_s3 + $0x8c0] sm:$0xff]  ;;  %v4687_v43 = vpack.c.bf16 %v1409_v57, %v1407_v56  ;;  %v1138_v56 = vld [vmem:[%s9069_s3 + $0x950] sm:$0xff] }
 0x133   :  { %909 = vmatmul.mubr.f32.gmra.mrb[14].mxu0 %v6091_v19  ;;  %1070 = vmatmul.mubr.f32.gmra.mrb[14].mxu1 %v6091_v19  ;;  %v4689_v4 = vpack.c.bf16 %v1414_v60, %v1412_v59  ;;  %v4627_v13 = vpack.c.bf16 %v1122_v0, %v1120_v63  ;;  %v1141_v59 = vld [vmem:[%s9069_s3 + $0x968] sm:$0xff]  ;;  %v1429_v63 = vld [vmem:[%s9071_s5 + $0x150] sm:$0xff]  ;;  %v1143_v0 = vld [vmem:[%s9069_s3 + $0x978] sm:$0xff] }
 0x134   :  { %914 = vmatprep.mubr.f32.mxu0 %v6181_v12  ;;  %1075 = vmatprep.mubr.f32.mxu1 %v6181_v12  ;;  %v4645_v8 = vpack.c.bf16 %v1143_v0, %v1141_v59  ;;  %v1770_v0 = vld [vmem:[%s9071_s5 + $0x3b8] sm:$0xff] }
 0x135   :  { %4608 = vmatpush1.bf16.msra.mxu0 %v4607_v6  ;;  %4672 = vmatpush1.bf16.msra.mxu1 %v4671_v10  ;;  %v1411_v6 = vld [vmem:[%s9071_s5 + $0xc0] sm:$0xff]  ;;  %v1416_v10 = vld [vmem:[%s9071_s5 + $0xe8] sm:$0xff] }
 0x136   :  { %4610 = vmatprep.subr.bf16.mxu0 %v4609_v11  ;;  %4674 = vmatprep.subr.bf16.mxu1 %v4673_v15  ;;  %v1418_v11 = vld [vmem:[%s9071_s5 + $0xf8] sm:$0xff]  ;;  %v1124_v15 = vld [vmem:[%s9069_s3 + $0x8e0] sm:$0xff]  ;;  %v4691_v17 = vpack.c.bf16 %v1413_v7, %v1411_v6  ;;  %v1142_v6 = vld [vmem:[%s9069_s3 + $0x970] sm:$0xff] }
 0x137   :  { %915 = vmatmul.mubr.f32.gmra.mrb[16].mxu0 %v6170_v5  ;;  %1076 = vmatmul.mubr.f32.gmra.mrb[16].mxu1 %v6170_v5  ;;  %v4693_v21 = vpack.c.bf16 %v1418_v11, %v1416_v10  ;;  %v4631_v28 = vpack.c.bf16 %v1126_v16, %v1124_v15  ;;  %v1145_v10 = vld [vmem:[%s9069_s3 + $0x988] sm:$0xff]  ;;  %v1433_v15 = vld [vmem:[%s9071_s5 + $0x170] sm:$0xff]  ;;  %v1147_v16 = vld [vmem:[%s9069_s3 + $0x998] sm:$0xff] }
 0x138   :  { %920 = vmatprep.mubr.f32.mxu0 %v6195_v22  ;;  %1081 = vmatprep.mubr.f32.mxu1 %v6195_v22  ;;  %v4649_v3 = vpack.c.bf16 %v1147_v16, %v1145_v10 }
 0x139   :  { %4612 = vmatpush1.bf16.msra.mxu0 %v4611_v23  ;;  %4676 = vmatpush1.bf16.msra.mxu1 %v4675_v26  ;;  %v1415_v23 = vld [vmem:[%s9071_s5 + $0xe0] sm:$0xff]  ;;  %v1420_v26 = vld [vmem:[%s9071_s5 + $0x108] sm:$0xff] }
 0x13a   :  { %4614 = vmatprep.subr.bf16.mxu0 %v4613_v27  ;;  %4678 = vmatprep.subr.bf16.mxu1 %v4677_v29  ;;  %v1422_v27 = vld [vmem:[%s9071_s5 + $0x118] sm:$0xff]  ;;  %v1128_v29 = vld [vmem:[%s9069_s3 + $0x900] sm:$0xff]  ;;  %v4695_v31 = vpack.c.bf16 %v1417_v24, %v1415_v23  ;;  %v1146_v23 = vld [vmem:[%s9069_s3 + $0x990] sm:$0xff] }
 0x13b   :  { %921 = vmatmul.mubr.f32.gmra.mrb[18].mxu0 %v6202_v25  ;;  %1082 = vmatmul.mubr.f32.gmra.mrb[18].mxu1 %v6202_v25  ;;  %v4697_v34 = vpack.c.bf16 %v1422_v27, %v1420_v26  ;;  %v4635_v40 = vpack.c.bf16 %v1130_v30, %v1128_v29  ;;  %v1149_v26 = vld [vmem:[%s9069_s3 + $0x9a8] sm:$0xff]  ;;  %v1437_v29 = vld [vmem:[%s9071_s5 + $0x190] sm:$0xff]  ;;  %v1151_v30 = vld [vmem:[%s9069_s3 + $0x9b8] sm:$0xff] }
 0x13c   :  { %1224 = vmatprep.mubr.f32.mxu0 %v6059_v61  ;;  %v4685_v61 = vpack.c.bf16 %v1410_v49, %v1408_v41  ;;  %v1137_v41 = vld [vmem:[%s9069_s3 + $0x948] sm:$0xff] }
 0x13d   :  { %4616 = vmatpush1.bf16.msra.mxu0 %v4615_v35  ;;  %4680 = vmatpush1.bf16.msra.mxu1 %v4679_v38  ;;  %v1419_v35 = vld [vmem:[%s9071_s5 + $0x100] sm:$0xff]  ;;  %v1424_v38 = vld [vmem:[%s9071_s5 + $0x128] sm:$0xff]  ;;  %v4641_v58 = vpack.c.bf16 %v1139_v52, %v1137_v41  ;;  %v1159_v52 = vld [vmem:[%s9069_s3 + $0x9f8] sm:$0xff] }
 0x13e   :  { %4618 = vmatprep.subr.bf16.mxu0 %v4617_v39  ;;  %4682 = vmatprep.subr.bf16.mxu1 %v4681_v45  ;;  %v1426_v39 = vld [vmem:[%s9071_s5 + $0x138] sm:$0xff]  ;;  %v1132_v45 = vld [vmem:[%s9069_s3 + $0x920] sm:$0xff]  ;;  %v4699_v47 = vpack.c.bf16 %v1421_v36, %v1419_v35  ;;  %v4653_v36 = vpack.c.bf16 %v1151_v30, %v1149_v26 }
 0x13f   :  { %v4701_v49 = vpack.c.bf16 %v1426_v39, %v1424_v38  ;;  %v4639_v55 = vpack.c.bf16 %v1134_v46, %v1132_v45  ;;  %v1439_v39 = vld [vmem:[%s9071_s5 + $0x1a0] sm:$0xff]  ;;  %v1153_v45 = vld [vmem:[%s9069_s3 + $0x9c8] sm:$0xff]  ;;  %v1155_v46 = vld [vmem:[%s9069_s3 + $0x9d8] sm:$0xff] }
 0x140   :  { %v4657_v41 = vpack.c.bf16 %v1155_v46, %v1153_v45  ;;  %v1798_v45 = vld [vmem:[%s9071_s5 + $0x498] sm:$0xff] }
 0x141   :  { %4620 = vmatpush1.bf16.msra.mxu0 %v4619_v50  ;;  %4684 = vmatpush1.bf16.msra.mxu1 %v4683_v53  ;;  %v1423_v50 = vld [vmem:[%s9071_s5 + $0x120] sm:$0xff]  ;;  %v1428_v53 = vld [vmem:[%s9071_s5 + $0x148] sm:$0xff] }
 0x142   :  { %4622 = vmatprep.subr.bf16.mxu0 %v4621_v54  ;;  %4686 = vmatprep.subr.bf16.mxu1 %v4685_v61  ;;  %v1430_v54 = vld [vmem:[%s9071_s5 + $0x158] sm:$0xff]  ;;  %v1136_v61 = vld [vmem:[%s9069_s3 + $0x940] sm:$0xff]  ;;  %v4703_v57 = vpack.c.bf16 %v1425_v51, %v1423_v50  ;;  %v1154_v50 = vld [vmem:[%s9069_s3 + $0x9d0] sm:$0xff] }
 0x143   :  { %v4705_v60 = vpack.c.bf16 %v1430_v54, %v1428_v53  ;;  %v4643_v2 = vpack.c.bf16 %v1138_v56, %v1136_v61  ;;  %v1157_v51 = vld [vmem:[%s9069_s3 + $0x9e8] sm:$0xff]  ;;  %v1158_v61 = vld [vmem:[%s9069_s3 + $0x9f0] sm:$0xff] }
 0x144   :  { %v4661_v54 = vpack.c.bf16 %v1159_v52, %v1157_v51  ;;  %v1764_v56 = vld [vmem:[%s9071_s5 + $0x388] sm:$0xff] }
 0x145   :  { %4624 = vmatpush1.bf16.msra.mxu0 %v4623_v62  ;;  %4688 = vmatpush1.bf16.msra.mxu1 %v4687_v43  ;;  %v1427_v62 = vld [vmem:[%s9071_s5 + $0x140] sm:$0xff]  ;;  %v1432_v43 = vld [vmem:[%s9071_s5 + $0x168] sm:$0xff] }
 0x146   :  { %4626 = vmatprep.subr.bf16.mxu0 %v4625_v1  ;;  %4690 = vmatprep.subr.bf16.mxu1 %v4689_v4  ;;  %v1434_v1 = vld [vmem:[%s9071_s5 + $0x178] sm:$0xff]  ;;  %v1140_v4 = vld [vmem:[%s9069_s3 + $0x960] sm:$0xff]  ;;  %v4707_v7 = vpack.c.bf16 %v1429_v63, %v1427_v62  ;;  %v1765_v62 = vld [vmem:[%s9071_s5 + $0x390] sm:$0xff] }
 0x147   :  { %v4709_v11 = vpack.c.bf16 %v1434_v1, %v1432_v43  ;;  %v4647_v20 = vpack.c.bf16 %v1142_v6, %v1140_v4  ;;  %v1768_v63 = vld [vmem:[%s9071_s5 + $0x3a8] sm:$0xff]  ;;  %v1769_v4 = vld [vmem:[%s9071_s5 + $0x3b0] sm:$0xff] }
 0x148   :  { %v4781_v1 = vpack.c.bf16 %v1770_v0, %v1768_v63  ;;  %v1772_v6 = vld [vmem:[%s9071_s5 + $0x3c8] sm:$0xff] }
 0x149   :  { %4628 = vmatpush1.bf16.msra.mxu0 %v4627_v13  ;;  %4692 = vmatpush1.bf16.msra.mxu1 %v4691_v17  ;;  %v1431_v13 = vld [vmem:[%s9071_s5 + $0x160] sm:$0xff]  ;;  %v1436_v17 = vld [vmem:[%s9071_s5 + $0x188] sm:$0xff] }
 0x14a   :  { %4630 = vmatprep.subr.bf16.mxu0 %v4629_v18  ;;  %4694 = vmatprep.subr.bf16.mxu1 %v4693_v21  ;;  %v1438_v18 = vld [vmem:[%s9071_s5 + $0x198] sm:$0xff]  ;;  %v1144_v21 = vld [vmem:[%s9069_s3 + $0x980] sm:$0xff]  ;;  %v4711_v24 = vpack.c.bf16 %v1433_v15, %v1431_v13  ;;  %v1773_v13 = vld [vmem:[%s9071_s5 + $0x3d0] sm:$0xff] }
 0x14b   :  { %v4713_v27 = vpack.c.bf16 %v1438_v18, %v1436_v17  ;;  %v4651_v33 = vpack.c.bf16 %v1146_v23, %v1144_v21  ;;  %v1776_v15 = vld [vmem:[%s9071_s5 + $0x3e8] sm:$0xff]  ;;  %v1775_v17 = vld [vmem:[%s9071_s5 + $0x3e0] sm:$0xff]  ;;  %v1777_v18 = vld [vmem:[%s9071_s5 + $0x3f0] sm:$0xff] }
 0x14c   :  { %v1779_v23 = vld [vmem:[%s9071_s5 + $0x400] sm:$0xff] }
 0x14d   :  { %4632 = vmatpush1.bf16.msra.mxu0 %v4631_v28  ;;  %4696 = vmatpush1.bf16.msra.mxu1 %v4695_v31  ;;  %v1435_v28 = vld [vmem:[%s9071_s5 + $0x180] sm:$0xff]  ;;  %v1440_v31 = vld [vmem:[%s9071_s5 + $0x1a8] sm:$0xff] }
 0x14e   :  { %4634 = vmatprep.subr.bf16.mxu0 %v4633_v32  ;;  %4698 = vmatprep.subr.bf16.mxu1 %v4697_v34  ;;  %v1442_v32 = vld [vmem:[%s9071_s5 + $0x1b8] sm:$0xff]  ;;  %v1148_v34 = vld [vmem:[%s9069_s3 + $0x9a0] sm:$0xff]  ;;  %v4715_v35 = vpack.c.bf16 %v1437_v29, %v1435_v28  ;;  %v1785_v28 = vld [vmem:[%s9071_s5 + $0x430] sm:$0xff] }
 0x14f   :  { %v4717_v38 = vpack.c.bf16 %v1442_v32, %v1440_v31  ;;  %v1788_v29 = vld [vmem:[%s9071_s5 + $0x448] sm:$0xff]  ;;  %v1787_v32 = vld [vmem:[%s9071_s5 + $0x440] sm:$0xff] }
 0x151   :  { %4636 = vmatpush1.bf16.msra.mxu0 %v4635_v40  ;;  %4700 = vmatpush1.bf16.msra.mxu1 %v4699_v47  ;;  %v1441_v40 = vld [vmem:[%s9071_s5 + $0x1b0] sm:$0xff]  ;;  %v4655_v47 = vpack.c.bf16 %v1150_v37, %v1148_v34  ;;  %v1792_v34 = vld [vmem:[%s9071_s5 + $0x468] sm:$0xff] }
 0x152   :  { %4638 = vmatprep.subr.bf16.mxu0 %v4637_v48  ;;  %4702 = vmatprep.subr.bf16.mxu1 %v4701_v49  ;;  %v4719_v48 = vpack.c.bf16 %v1441_v40, %v1439_v39  ;;  %v1152_v49 = vld [vmem:[%s9069_s3 + $0x9c0] sm:$0xff]  ;;  %v1793_v39 = vld [vmem:[%s9071_s5 + $0x470] sm:$0xff]  ;;  %v1796_v40 = vld [vmem:[%s9071_s5 + $0x488] sm:$0xff] }
 0x153   :  { %v4659_v53 = vpack.c.bf16 %v1154_v50, %v1152_v49  ;;  %v1800_v49 = vld [vmem:[%s9071_s5 + $0x4a8] sm:$0xff]  ;;  %v1802_v50 = vld [vmem:[%s9071_s5 + $0x4b8] sm:$0xff] }
 0x154   :  { %v4813_v52 = vpack.c.bf16 %v1802_v50, %v1800_v49  ;;  %v1586_v49 = vld [vmem:[%s9071_s5 + $0x1c0] sm:$0xff]  ;;  %v1588_v50 = vld [vmem:[%s9071_s5 + $0x1d0] sm:$0xff] }
 0x155   :  { %4640 = vmatpush1.bf16.msra.mxu0 %v4639_v55  ;;  %4704 = vmatpush1.bf16.msra.mxu1 %v4703_v57  ;;  %v1156_v55 = vld [vmem:[%s9069_s3 + $0x9e0] sm:$0xff]  ;;  %v1766_v57 = vld [vmem:[%s9071_s5 + $0x398] sm:$0xff] }
 0x156   :  { %4642 = vmatprep.subr.bf16.mxu0 %v4641_v58  ;;  %4706 = vmatprep.subr.bf16.mxu1 %v4705_v60  ;;  %v4663_v58 = vpack.c.bf16 %v1158_v61, %v1156_v55  ;;  %v4777_v59 = vpack.c.bf16 %v1766_v57, %v1764_v56  ;;  %v1763_v60 = vld [vmem:[%s9071_s5 + $0x380] sm:$0xff]  ;;  %v1804_v55 = vld [vmem:[%s9071_s5 + $0x4c8] sm:$0xff]  ;;  %v1806_v61 = vld [vmem:[%s9071_s5 + $0x4d8] sm:$0xff] }
 0x157   :  { %v4779_v43 = vpack.c.bf16 %v1765_v62, %v1763_v60  ;;  %v4817_v57 = vpack.c.bf16 %v1806_v61, %v1804_v55  ;;  %v1808_v60 = vld [vmem:[%s9071_s5 + $0x4e8] sm:$0xff]  ;;  %v1810_v62 = vld [vmem:[%s9071_s5 + $0x4f8] sm:$0xff] }
 0x158   :  { %v4821_v0 = vpack.c.bf16 %v1810_v62, %v1808_v60  ;;  %v1591_v55 = vld [vmem:[%s9071_s5 + $0x1e8] sm:$0xff]  ;;  %v4723_v62 = vpack.c.bf16 %v1588_v50, %v1586_v49  ;;  %v1602_v49 = vld [vmem:[%s9071_s5 + $0x240] sm:$0xff]  ;;  %v1604_v50 = vld [vmem:[%s9071_s5 + $0x250] sm:$0xff] }
 0x159   :  { %4644 = vmatpush1.bf16.msra.mxu0 %v4643_v2  ;;  %4708 = vmatpush1.bf16.msra.mxu1 %v4707_v7  ;;  %v1767_v2 = vld [vmem:[%s9071_s5 + $0x3a0] sm:$0xff]  ;;  %v1774_v7 = vld [vmem:[%s9071_s5 + $0x3d8] sm:$0xff] }
 0x15a   :  { %4646 = vmatprep.subr.bf16.mxu0 %v4645_v8  ;;  %4710 = vmatprep.subr.bf16.mxu1 %v4709_v11  ;;  %v4783_v8 = vpack.c.bf16 %v1769_v4, %v1767_v2  ;;  %v4785_v10 = vpack.c.bf16 %v1774_v7, %v1772_v6  ;;  %v1771_v11 = vld [vmem:[%s9071_s5 + $0x3c0] sm:$0xff]  ;;  %v1812_v2 = vld [vmem:[%s9071_s5 + $0x508] sm:$0xff]  ;;  %v1814_v4 = vld [vmem:[%s9071_s5 + $0x518] sm:$0xff] }
 0x15b   :  { %v4825_v7 = vpack.c.bf16 %v1814_v4, %v1812_v2 }
 0x15d   :  { %4648 = vmatpush1.bf16.msra.mxu0 %v4647_v20  ;;  %4712 = vmatpush1.bf16.msra.mxu1 %v4711_v24  ;;  %v1780_v20 = vld [vmem:[%s9071_s5 + $0x408] sm:$0xff]  ;;  %v1781_v24 = vld [vmem:[%s9071_s5 + $0x410] sm:$0xff] }
 0x15e   :  { %4650 = vmatprep.subr.bf16.mxu0 %v4649_v3  ;;  %4714 = vmatprep.subr.bf16.mxu1 %v4713_v27  ;;  %v1784_v3 = vld [vmem:[%s9071_s5 + $0x428] sm:$0xff]  ;;  %v1783_v27 = vld [vmem:[%s9071_s5 + $0x420] sm:$0xff] }
 0x15f   :  { %v4799_v30 = vpack.c.bf16 %v1785_v28, %v1783_v27 }
 0x161   :  { %4652 = vmatpush1.bf16.msra.mxu0 %v4651_v33  ;;  %4716 = vmatpush1.bf16.msra.mxu1 %v4715_v35  ;;  %v1789_v33 = vld [vmem:[%s9071_s5 + $0x450] sm:$0xff]  ;;  %v1794_v35 = vld [vmem:[%s9071_s5 + $0x478] sm:$0xff] }
 0x162   :  { %4654 = vmatprep.subr.bf16.mxu0 %v4653_v36  ;;  %4718 = vmatprep.subr.bf16.mxu1 %v4717_v38  ;;  %v4803_v36 = vpack.c.bf16 %v1789_v33, %v1787_v32  ;;  %v4805_v37 = vpack.c.bf16 %v1794_v35, %v1792_v34  ;;  %v1791_v38 = vld [vmem:[%s9071_s5 + $0x460] sm:$0xff] }
 0x163   :  { %v4807_v46 = vpack.c.bf16 %v1793_v39, %v1791_v38 }
 0x165   :  { %4656 = vmatpush1.bf16.msra.mxu0 %v4655_v47  ;;  %4720 = vmatpush1.bf16.msra.mxu1 %v4719_v48  ;;  %v4809_v47 = vpack.c.bf16 %v1798_v45, %v1796_v40  ;;  %v1795_v48 = vld [vmem:[%s9071_s5 + $0x480] sm:$0xff] }
 0x166   :  { %4658 = vmatprep.subr.bf16.mxu0 %v4657_v41  ;;  %v1797_v41 = vld [vmem:[%s9071_s5 + $0x490] sm:$0xff] }
 0x167   :  { %v4811_v51 = vpack.c.bf16 %v1797_v41, %v1795_v48 }
 0x169   :  { %4660 = vmatpush1.bf16.msra.mxu0 %v4659_v53  ;;  %v1799_v53 = vld [vmem:[%s9071_s5 + $0x4a0] sm:$0xff] }
 0x16a   :  { %4662 = vmatprep.subr.bf16.mxu0 %v4661_v54  ;;  %v1801_v54 = vld [vmem:[%s9071_s5 + $0x4b0] sm:$0xff] }
 0x16b   :  { %v4815_v56 = vpack.c.bf16 %v1801_v54, %v1799_v53  ;;  %v2117_v53 = vld [vmem:[%s9071_s5 + $0x700] sm:$0xff]  ;;  %v2119_v54 = vld [vmem:[%s9071_s5 + $0x710] sm:$0xff] }
 0x16d   :  { %4664 = vmatpush1.bf16.msra.mxu0 %v4663_v58  ;;  %v1803_v58 = vld [vmem:[%s9071_s5 + $0x4c0] sm:$0xff] }
 0x16e   :  { %4778 = vmatprep.subr.bf16.mxu0 %v4777_v59  ;;  %v1805_v59 = vld [vmem:[%s9071_s5 + $0x4d0] sm:$0xff] }
 0x16f   :  { %v4819_v63 = vpack.c.bf16 %v1805_v59, %v1803_v58  ;;  %v2124_v58 = vld [vmem:[%s9071_s5 + $0x738] sm:$0xff] }
 0x170   :  { %1225 = vmatmul.mubr.f32.vlgmr.msra.gmra.mrb[20].mxu0 %v6067_v9  ;;  %v1778_v9 = vld [vmem:[%s9071_s5 + $0x3f8] sm:$0xff] }
 0x171   :  { %1230 = vmatprep.mubr.f32.mxu0 %v6078_v14  ;;  %4780 = vmatpush1.bf16.msra.mxu0 %v4779_v43  ;;  %v4787_v14 = vpack.c.bf16 %v1773_v13, %v1771_v11  ;;  %v4789_v16 = vpack.c.bf16 %v1778_v9, %v1776_v15  ;;  %v1807_v43 = vld [vmem:[%s9071_s5 + $0x4e0] sm:$0xff]  ;;  %v1816_v11 = vld [vmem:[%s9071_s5 + $0x528] sm:$0xff]  ;;  %v1818_v13 = vld [vmem:[%s9071_s5 + $0x538] sm:$0xff] }
 0x172   :  { %4782 = vmatprep.subr.bf16.mxu0 %v4781_v1  ;;  %v1809_v1 = vld [vmem:[%s9071_s5 + $0x4f0] sm:$0xff]  ;;  %v4829_v9 = vpack.c.bf16 %v1818_v13, %v1816_v11  ;;  %v1595_v11 = vld [vmem:[%s9071_s5 + $0x208] sm:$0xff]  ;;  %v1597_v13 = vld [vmem:[%s9071_s5 + $0x218] sm:$0xff] }
 0x173   :  { %v4823_v6 = vpack.c.bf16 %v1809_v1, %v1807_v43 }
 0x174   :  { %1231 = vmatmul.mubr.f32.gmra.mrb[22].mxu0 %v6091_v19  ;;  %v1782_v19 = vld [vmem:[%s9071_s5 + $0x418] sm:$0xff] }
 0x175   :  { %1236 = vmatprep.mubr.f32.mxu0 %v6181_v12  ;;  %4784 = vmatpush1.bf16.msra.mxu0 %v4783_v8  ;;  %v4791_v12 = vpack.c.bf16 %v1777_v18, %v1775_v17  ;;  %v4793_v21 = vpack.c.bf16 %v1782_v19, %v1780_v20  ;;  %v1811_v8 = vld [vmem:[%s9071_s5 + $0x500] sm:$0xff]  ;;  %v1587_v18 = vld [vmem:[%s9071_s5 + $0x1c8] sm:$0xff]  ;;  %v1589_v20 = vld [vmem:[%s9071_s5 + $0x1d8] sm:$0xff] }
 0x176   :  { %4786 = vmatprep.subr.bf16.mxu0 %v4785_v10  ;;  %v1813_v10 = vld [vmem:[%s9071_s5 + $0x510] sm:$0xff]  ;;  %v4721_v19 = vpack.c.bf16 %v1589_v20, %v1587_v18  ;;  %v2125_v20 = vld [vmem:[%s9071_s5 + $0x740] sm:$0xff] }
 0x177   :  { %v4827_v15 = vpack.c.bf16 %v1813_v10, %v1811_v8  ;;  %v2121_v8 = vld [vmem:[%s9071_s5 + $0x720] sm:$0xff]  ;;  %v2123_v10 = vld [vmem:[%s9071_s5 + $0x730] sm:$0xff] }
 0x178   :  { %1237 = vmatmul.mubr.f32.gmra.mrb[24].mxu0 %v6170_v5  ;;  %v1786_v5 = vld [vmem:[%s9071_s5 + $0x438] sm:$0xff]  ;;  %4722 = vmatprep.subr.bf16.mxu1 %v4721_v19  ;;  %v1596_v18 = vld [vmem:[%s9071_s5 + $0x210] sm:$0xff] }
 0x179   :  { %1242 = vmatprep.mubr.f32.mxu0 %v6195_v22  ;;  %4788 = vmatpush1.bf16.msra.mxu0 %v4787_v14  ;;  %v4795_v22 = vpack.c.bf16 %v1781_v24, %v1779_v23  ;;  %v4797_v26 = vpack.c.bf16 %v1786_v5, %v1784_v3  ;;  %v1815_v14 = vld [vmem:[%s9071_s5 + $0x520] sm:$0xff] }
 0x17a   :  { %4790 = vmatprep.subr.bf16.mxu0 %v4789_v16  ;;  %v1817_v16 = vld [vmem:[%s9071_s5 + $0x530] sm:$0xff]  ;;  %v1257_v24 = vld [vmem:[%s9072_s4] sm:$0x3] }
 0x17b   :  { %v4831_v17 = vpack.c.bf16 %v1817_v16, %v1815_v14  ;;  %v7015_v3 = vrot.slane %v1257_v24, %v6017_v42  ;;  %v7026_v34 = vrot.slane %v1257_v24, %v6025_v44  ;;  %v4895_v16 = vpack.c.bf16 %v2123_v10, %v2121_v8  ;;  %v1599_v24 = vld [vmem:[%s9071_s5 + $0x228] sm:$0xff]  ;;  %v1613_v8 = vld [vmem:[%s9071_s5 + $0x298] sm:$0xff] }
 0x17c   :  { %1243 = vmatmul.mubr.f32.gmra.mrb[26].mxu0 %v6202_v25  ;;  %v1790_v25 = vld [vmem:[%s9071_s5 + $0x458] sm:$0xff]  ;;  %v2142_v10 = vld [vmem:[%s9071_s5 + $0x7c8] sm:$0xff] }
 0x17d   :  { %4792 = vmatpush1.bf16.msra.mxu0 %v4791_v12  ;;  %v4801_v31 = vpack.c.bf16 %v1790_v25, %v1788_v29  ;;  %v2118_v12 = vld [vmem:[%s9071_s5 + $0x708] sm:$0xff] }
 0x17e   :  { %4794 = vmatprep.subr.bf16.mxu0 %v4793_v21  ;;  %v2120_v21 = vld [vmem:[%s9071_s5 + $0x718] sm:$0xff] }
 0x17f   :  { %v4889_v23 = vpack.c.bf16 %v2120_v21, %v2118_v12  ;;  %v4729_v12 = vpack.c.bf16 %v1597_v13, %v1595_v11  ;;  %v2144_v11 = vld [vmem:[%s9071_s5 + $0x7d8] sm:$0xff] }
 0x181   :  { %4796 = vmatpush1.bf16.msra.mxu0 %v4795_v22 }
 0x182   :  { %4798 = vmatprep.subr.bf16.mxu0 %v4797_v26 }
 0x185   :  { %4800 = vmatpush1.bf16.msra.mxu0 %v4799_v30 }
 0x186   :  { %4802 = vmatprep.subr.bf16.mxu0 %v4801_v31 }
 0x189   :  { %4804 = vmatpush1.bf16.msra.mxu0 %v4803_v36 }
 0x18a   :  { %4806 = vmatprep.subr.bf16.mxu0 %v4805_v37 }
 0x18d   :  { %4808 = vmatpush1.bf16.msra.mxu0 %v4807_v46 }
 0x18e   :  { %4810 = vmatprep.subr.bf16.mxu0 %v4809_v47 }
 0x191   :  { %4812 = vmatpush1.bf16.msra.mxu0 %v4811_v51 }
 0x192   :  { %4814 = vmatprep.subr.bf16.mxu0 %v4813_v52 }
 0x195   :  { %4816 = vmatpush1.bf16.msra.mxu0 %v4815_v56  ;;  %v1593_v56 = vld [vmem:[%s9071_s5 + $0x1f8] sm:$0xff] }
 0x196   :  { %4818 = vmatprep.subr.bf16.mxu0 %v4817_v57  ;;  %v2122_v57 = vld [vmem:[%s9071_s5 + $0x728] sm:$0xff]  ;;  %v4725_v2 = vpack.c.bf16 %v1593_v56, %v1591_v55 }
 0x197   :  { %v4893_v4 = vpack.c.bf16 %v2124_v58, %v2122_v57  ;;  %v1607_v55 = vld [vmem:[%s9071_s5 + $0x268] sm:$0xff]  ;;  %v2140_v57 = vld [vmem:[%s9071_s5 + $0x7b8] sm:$0xff]  ;;  %v4739_v58 = vpack.c.bf16 %v1604_v50, %v1602_v49  ;;  %v2149_v50 = vld [vmem:[%s9071_s5 + $0x800] sm:$0xff] }
 0x198   :  { %v2138_v56 = vld [vmem:[%s9071_s5 + $0x7a8] sm:$0xff] }
 0x199   :  { %4820 = vmatpush1.bf16.msra.mxu0 %v4819_v63  ;;  %v4891_v63 = vpack.c.bf16 %v2119_v54, %v2117_v53  ;;  %v2133_v53 = vld [vmem:[%s9071_s5 + $0x780] sm:$0xff]  ;;  %v2135_v54 = vld [vmem:[%s9071_s5 + $0x790] sm:$0xff] }
 0x19a   :  { %4822 = vmatprep.subr.bf16.mxu0 %v4821_v0 }
 0x19d   :  { %4824 = vmatpush1.bf16.msra.mxu0 %v4823_v6  ;;  %v1590_v6 = vld [vmem:[%s9071_s5 + $0x1e0] sm:$0xff] }
 0x19e   :  { %4826 = vmatprep.subr.bf16.mxu0 %v4825_v7  ;;  %v1592_v7 = vld [vmem:[%s9071_s5 + $0x1f0] sm:$0xff] }
 0x19f   :  { %v4727_v14 = vpack.c.bf16 %v1592_v7, %v1590_v6  ;;  %v2139_v6 = vld [vmem:[%s9071_s5 + $0x7b0] sm:$0xff]  ;;  %v1611_v7 = vld [vmem:[%s9071_s5 + $0x288] sm:$0xff] }
 0x1a1   :  { %4828 = vmatpush1.bf16.msra.mxu0 %v4827_v15  ;;  %v2126_v15 = vld [vmem:[%s9071_s5 + $0x748] sm:$0xff] }
 0x1a2   :  { %4830 = vmatprep.subr.bf16.mxu0 %v4829_v9  ;;  %v2128_v9 = vld [vmem:[%s9071_s5 + $0x758] sm:$0xff] }
 0x1a3   :  { %v4897_v21 = vpack.c.bf16 %v2128_v9, %v2126_v15  ;;  %v1610_v9 = vld [vmem:[%s9071_s5 + $0x280] sm:$0xff] }
 0x1a5   :  { %4832 = vmatpush1.bf16.msra.mxu0 %v4831_v17  ;;  %v1594_v17 = vld [vmem:[%s9071_s5 + $0x200] sm:$0xff] }
 0x1a6   :  { %4890 = vmatprep.subr.bf16.mxu0 %v4889_v23  ;;  %v2127_v23 = vld [vmem:[%s9071_s5 + $0x750] sm:$0xff] }
 0x1c2   :  { %v581_v5 = vpop.f32.mrb[4].mxu0  ;;  %v743_v22 = vpop.f32.mrb[4].mxu1 }
 0x1c3   :  { %v1271_v26 = vadd.f32 %v7015_v3, %v581_v5  ;;  %v583_v27 = vpop.f32.mrb[5].mxu0  ;;  %v745_v28 = vpop.f32.mrb[5].mxu1  ;;  %v1601_v5 = vld [vmem:[%s9071_s5 + $0x238] sm:$0xff] }
 0x1c4   :  { %606 = vst.msk [vmem:[#allocation3 + $0x8] sm:$0xff] %vm605_vm1, %v583_v27  ;;  %767 = vst.msk [vmem:[#allocation3 + $0x48] sm:$0xff] %vm605_vm1, %v745_v28  ;;  %v4731_v27 = vpack.c.bf16 %v1596_v18, %v1594_v17  ;;  %v4899_v28 = vpack.c.bf16 %v2127_v23, %v2125_v20  ;;  %v4913_v17 = vpack.c.bf16 %v2144_v11, %v2142_v10  ;;  %v2141_v18 = vld [vmem:[%s9071_s5 + $0x7c0] sm:$0xff]  ;;  %v2143_v20 = vld [vmem:[%s9071_s5 + $0x7d0] sm:$0xff] }
 0x1c5   :  { %v7020_v29 = vmax.f32 %v1271_v26, 0.0  ;;  %v2132_v26 = vld [vmem:[%s9071_s5 + $0x778] sm:$0xff]  ;;  %v2146_v23 = vld [vmem:[%s9071_s5 + $0x7e8] sm:$0xff]  ;;  %v1626_v11 = vld [vmem:[%s9071_s5 + $0x300] sm:$0xff] }
 0x1c6   :  { %v587_v25 = vpop.f32.mrb[6].mxu0  ;;  %v7022_v30 = vpop.f32.mrb[6].mxu1 }
 0x1c7   :  { %1275 = vst [vmem:[#allocation4] sm:$0xff] %v7020_v29  ;;  %v1281_v31 = vadd.f32 %v743_v22, %v587_v25  ;;  %v589_v32 = vpop.f32.mrb[7].mxu0  ;;  %v751_v33 = vpop.f32.mrb[7].mxu1  ;;  %v2130_v22 = vld [vmem:[%s9071_s5 + $0x768] sm:$0xff]  ;;  %v1598_v25 = vld [vmem:[%s9071_s5 + $0x220] sm:$0xff] }
 0x1c8   :  { %608 = vst.msk [vmem:[#allocation3 + $0x18] sm:$0xff] %vm605_vm1, %v589_v32  ;;  %769 = vst.msk [vmem:[#allocation3 + $0x58] sm:$0xff] %vm605_vm1, %v751_v33  ;;  %v4733_v32 = vpack.c.bf16 %v1601_v5, %v1599_v24  ;;  %v4901_v33 = vpack.c.bf16 %v2132_v26, %v2130_v22  ;;  %v2148_v24 = vld [vmem:[%s9071_s5 + $0x7f8] sm:$0xff]  ;;  %v4915_v22 = vpack.c.bf16 %v2143_v20, %v2141_v18  ;;  %v1614_v26 = vld [vmem:[%s9071_s5 + $0x2a0] sm:$0xff] }
 0x1c9   :  { %v1283_v35 = vadd.f32 %v1281_v31, %v7015_v3  ;;  %v1600_v31 = vld [vmem:[%s9071_s5 + $0x230] sm:$0xff]  ;;  %v1633_v18 = vld [vmem:[%s9071_s5 + $0x338] sm:$0xff]  ;;  %v2162_v20 = vld [vmem:[%s9071_s5 + $0x868] sm:$0xff] }
 0x1cb   :  { %v1259_v36 = vld [vmem:[#allocation3 + $0x8] sm:$0xff]  ;;  %v7031_v37 = vmax.f32 %v1283_v35, 0.0  ;;  %v2129_v35 = vld [vmem:[%s9071_s5 + $0x760] sm:$0xff] }
 0x1cc   :  { %v1272_v38 = vadd.f32 %v7026_v34, %v1259_v36  ;;  %v1278_v40 = vld [vmem:[#allocation3 + $0x48] sm:$0xff]  ;;  %v2131_v36 = vld [vmem:[%s9071_s5 + $0x770] sm:$0xff] }
 0x1cd   :  { %1287 = vst [vmem:[#allocation4 + $0x10] sm:$0xff] %v7031_v37 }
 0x1ce   :  { %v1274_v39 = vmax.f32 %v1272_v38, 0.0  ;;  %v1603_v38 = vld [vmem:[%s9071_s5 + $0x248] sm:$0xff] }
 0x1cf   :  { %v1280_v45 = vld [vmem:[#allocation3 + $0x18] sm:$0xff] }
 0x1d0   :  { %1276 = vst.msk [vmem:[#allocation4 + $0x8] sm:$0xff] %vm605_vm1, %v1274_v39  ;;  %v1282_v46 = vadd.f32 %v1280_v45, %v1278_v40  ;;  %v1605_v39 = vld [vmem:[%s9071_s5 + $0x258] sm:$0xff]  ;;  %v2134_v40 = vld [vmem:[%s9071_s5 + $0x788] sm:$0xff] }
 0x1d1   :  { %v2136_v45 = vld [vmem:[%s9071_s5 + $0x798] sm:$0xff] }
 0x1d2   :  { %v1284_v47 = vadd.f32 %v1282_v46, %v7026_v34  ;;  %v7037_v48 = vpop.f32.mrb[8].mxu0  ;;  %v7039_v41 = vpop.f32.mrb[8].mxu1  ;;  %v4735_v46 = vpack.c.bf16 %v1600_v31, %v1598_v25  ;;  %v4917_v25 = vpack.c.bf16 %v2148_v24, %v2146_v23  ;;  %v2145_v31 = vld [vmem:[%s9071_s5 + $0x7e0] sm:$0xff] }
 0x1d3   :  { %v595_v51 = vpop.f32.mrb[9].mxu0  ;;  %v757_v52 = vpop.f32.mrb[9].mxu1  ;;  %v1630_v24 = vld [vmem:[%s9071_s5 + $0x320] sm:$0xff] }
 0x1d4   :  { %v1286_v61 = vmax.f32 %v1284_v47, 0.0  ;;  %610 = vst.msk [vmem:[#allocation3 + $0x28] sm:$0xff] %vm605_vm1, %v595_v51  ;;  %771 = vst.msk [vmem:[#allocation3 + $0x68] sm:$0xff] %vm605_vm1, %v757_v52  ;;  %v4903_v47 = vpack.c.bf16 %v2131_v36, %v2129_v35  ;;  %v4737_v51 = vpack.c.bf16 %v1605_v39, %v1603_v38  ;;  %v4905_v52 = vpack.c.bf16 %v2136_v45, %v2134_v40  ;;  %v1621_v35 = vld [vmem:[%s9071_s5 + $0x2d8] sm:$0xff]  ;;  %v2150_v36 = vld [vmem:[%s9071_s5 + $0x808] sm:$0xff] }
 0x1d5   :  { %v2152_v38 = vld [vmem:[%s9071_s5 + $0x818] sm:$0xff]  ;;  %v1618_v45 = vld [vmem:[%s9071_s5 + $0x2c0] sm:$0xff] }
 0x1d6   :  { %1288 = vst.msk [vmem:[#allocation4 + $0x18] sm:$0xff] %vm605_vm1, %v1286_v61  ;;  %v7068_v59 = vpop.f32.mrb[10].mxu0  ;;  %v7070_v60 = vpop.f32.mrb[10].mxu1  ;;  %v1609_v61 = vld [vmem:[%s9071_s5 + $0x278] sm:$0xff]  ;;  %v4921_v49 = vpack.c.bf16 %v2152_v38, %v2150_v36 }
 0x1d7   :  { %v7072_v0 = vld [vmem:[#allocation4 + $0x8] sm:$0xff]  ;;  %v601_v43 = vpop.f32.mrb[11].mxu0  ;;  %v763_v1 = vpop.f32.mrb[11].mxu1  ;;  %v2168_v36 = vld [vmem:[%s9071_s5 + $0x898] sm:$0xff] }
 0x1d8   :  { %4157 = vmatprep.mubr.msk.f32.mxu1 %vm605_vm1, %v7072_v0  ;;  %4171 = vmatprep.mubr.msk.f32.mxu0 %vm605_vm1, %v7072_v0  ;;  %612 = vst.msk [vmem:[#allocation3 + $0x38] sm:$0xff] %vm605_vm1, %v601_v43  ;;  %773 = vst.msk [vmem:[#allocation3 + $0x78] sm:$0xff] %vm605_vm1, %v763_v1  ;;  %v1608_v43 = vld [vmem:[%s9071_s5 + $0x270] sm:$0xff]  ;;  %v4741_v1 = vpack.c.bf16 %v1609_v61, %v1607_v55  ;;  %v2156_v55 = vld [vmem:[%s9071_s5 + $0x838] sm:$0xff] }
 0x1d9   :  { %1529 = vmatmul.mubr.f32.vlgmr.msra.gmra.mrb[20].mxu1 %v7020_v29  ;;  %1884 = vmatmul.mubr.f32.vlgmr.msra.gmra.mrb[28].mxu0 %v7020_v29 }
 0x1da   :  { %4724 = vmatpush1.bf16.msra.mxu1 %v4723_v62  ;;  %4892 = vmatpush1.bf16.msra.mxu0 %v4891_v63  ;;  %v4907_v62 = vpack.c.bf16 %v2135_v54, %v2133_v53  ;;  %v1606_v63 = vld [vmem:[%s9071_s5 + $0x260] sm:$0xff]  ;;  %v1625_v53 = vld [vmem:[%s9071_s5 + $0x2f8] sm:$0xff]  ;;  %v2154_v54 = vld [vmem:[%s9071_s5 + $0x828] sm:$0xff] }
 0x1db   :  { %4726 = vmatprep.subr.bf16.mxu1 %v4725_v2  ;;  %4894 = vmatprep.subr.bf16.mxu0 %v4893_v4  ;;  %v4909_v2 = vpack.c.bf16 %v2140_v57, %v2138_v56  ;;  %v2137_v4 = vld [vmem:[%s9071_s5 + $0x7a0] sm:$0xff]  ;;  %v4743_v13 = vpack.c.bf16 %v1608_v43, %v1606_v63  ;;  %v4925_v63 = vpack.c.bf16 %v2156_v55, %v2154_v54  ;;  %v1639_v54 = vld [vmem:[%s9071_s5 + $0x368] sm:$0xff] }
 0x1dc   :  { %v4911_v15 = vpack.c.bf16 %v2139_v6, %v2137_v4  ;;  %v1622_v57 = vld [vmem:[%s9071_s5 + $0x2e0] sm:$0xff]  ;;  %v1629_v4 = vld [vmem:[%s9071_s5 + $0x318] sm:$0xff]  ;;  %v2158_v6 = vld [vmem:[%s9071_s5 + $0x848] sm:$0xff] }
 0x1dd   :  { %v7115_v19 = vld [vmem:[#allocation4 + $0x18] sm:$0xff]  ;;  %v2153_v43 = vld [vmem:[%s9071_s5 + $0x820] sm:$0xff] }
 0x1de   :  { %4158 = vmatprep.mubr.msk.f32.mxu1 %vm605_vm1, %v7115_v19  ;;  %4172 = vmatprep.mubr.msk.f32.mxu0 %vm605_vm1, %v7115_v19 }
 0x1df   :  { %1535 = vmatmul.mubr.f32.gmra.mrb[22].mxu1 %v7031_v37  ;;  %1890 = vmatmul.mubr.f32.gmra.mrb[30].mxu0 %v7031_v37 }
 0x1e0   :  { %4728 = vmatpush1.bf16.msra.mxu1 %v4727_v14  ;;  %4896 = vmatpush1.bf16.msra.mxu0 %v4895_v16  ;;  %v1612_v14 = vld [vmem:[%s9071_s5 + $0x290] sm:$0xff]  ;;  %v4745_v16 = vpack.c.bf16 %v1613_v8, %v1611_v7  ;;  %v2160_v7 = vld [vmem:[%s9071_s5 + $0x858] sm:$0xff] }
 0x1e1   :  { %4730 = vmatprep.subr.bf16.mxu1 %v4729_v12  ;;  %4898 = vmatprep.subr.bf16.mxu0 %v4897_v21  ;;  %v1615_v12 = vld [vmem:[%s9071_s5 + $0x2a8] sm:$0xff]  ;;  %v1617_v21 = vld [vmem:[%s9071_s5 + $0x2b8] sm:$0xff]  ;;  %v4747_v5 = vpack.c.bf16 %v1612_v14, %v1610_v9  ;;  %v4929_v9 = vpack.c.bf16 %v2160_v7, %v2158_v6  ;;  %v2157_v14 = vld [vmem:[%s9071_s5 + $0x840] sm:$0xff] }
 0x1e4   :  { %4732 = vmatpush1.bf16.msra.mxu1 %v4731_v27  ;;  %4900 = vmatpush1.bf16.msra.mxu0 %v4899_v28  ;;  %v1616_v27 = vld [vmem:[%s9071_s5 + $0x2b0] sm:$0xff]  ;;  %v4749_v28 = vpack.c.bf16 %v1617_v21, %v1615_v12  ;;  %v2164_v12 = vld [vmem:[%s9071_s5 + $0x878] sm:$0xff] }
 0x1e5   :  { %4734 = vmatprep.subr.bf16.mxu1 %v4733_v32  ;;  %4902 = vmatprep.subr.bf16.mxu0 %v4901_v33  ;;  %v2147_v32 = vld [vmem:[%s9071_s5 + $0x7f0] sm:$0xff]  ;;  %v1619_v33 = vld [vmem:[%s9071_s5 + $0x2c8] sm:$0xff]  ;;  %v4751_v39 = vpack.c.bf16 %v1616_v27, %v1614_v26  ;;  %v4933_v26 = vpack.c.bf16 %v2164_v12, %v2162_v20  ;;  %v2161_v27 = vld [vmem:[%s9071_s5 + $0x860] sm:$0xff] }
 0x1e6   :  { %v4919_v40 = vpack.c.bf16 %v2147_v32, %v2145_v31 }
 0x1e8   :  { %4736 = vmatpush1.bf16.msra.mxu1 %v4735_v46  ;;  %4904 = vmatpush1.bf16.msra.mxu0 %v4903_v47  ;;  %v1620_v46 = vld [vmem:[%s9071_s5 + $0x2d0] sm:$0xff]  ;;  %v4753_v47 = vpack.c.bf16 %v1621_v35, %v1619_v33  ;;  %v1637_v33 = vld [vmem:[%s9071_s5 + $0x358] sm:$0xff]  ;;  %v2166_v35 = vld [vmem:[%s9071_s5 + $0x888] sm:$0xff] }
 0x1e9   :  { %4738 = vmatprep.subr.bf16.mxu1 %v4737_v51  ;;  %4906 = vmatprep.subr.bf16.mxu0 %v4905_v52  ;;  %v2151_v51 = vld [vmem:[%s9071_s5 + $0x810] sm:$0xff]  ;;  %v1623_v52 = vld [vmem:[%s9071_s5 + $0x2e8] sm:$0xff]  ;;  %v4755_v61 = vpack.c.bf16 %v1620_v46, %v1618_v45 }
 0x1ea   :  { %v4923_v56 = vpack.c.bf16 %v2151_v51, %v2149_v50  ;;  %v4937_v51 = vpack.c.bf16 %v2168_v36, %v2166_v35 }
 0x1ec   :  { %4740 = vmatpush1.bf16.msra.mxu1 %v4739_v58  ;;  %4908 = vmatpush1.bf16.msra.mxu0 %v4907_v62  ;;  %v1624_v58 = vld [vmem:[%s9071_s5 + $0x2f0] sm:$0xff]  ;;  %v4757_v62 = vpack.c.bf16 %v1625_v53, %v1623_v52  ;;  %v2165_v52 = vld [vmem:[%s9071_s5 + $0x880] sm:$0xff] }
 0x1ed   :  { %4742 = vmatprep.subr.bf16.mxu1 %v4741_v1  ;;  %4910 = vmatprep.subr.bf16.mxu0 %v4909_v2  ;;  %v2155_v1 = vld [vmem:[%s9071_s5 + $0x830] sm:$0xff]  ;;  %v1627_v2 = vld [vmem:[%s9071_s5 + $0x308] sm:$0xff]  ;;  %v4759_v8 = vpack.c.bf16 %v1624_v58, %v1622_v57  ;;  %v2172_v57 = vld [vmem:[%s9071_s5 + $0x8b8] sm:$0xff] }
 0x1ee   :  { %v4927_v10 = vpack.c.bf16 %v2155_v1, %v2153_v43  ;;  %v2167_v53 = vld [vmem:[%s9071_s5 + $0x890] sm:$0xff] }
 0x1f0   :  { %4744 = vmatpush1.bf16.msra.mxu1 %v4743_v13  ;;  %4912 = vmatpush1.bf16.msra.mxu0 %v4911_v15  ;;  %v1628_v13 = vld [vmem:[%s9071_s5 + $0x310] sm:$0xff]  ;;  %v4761_v15 = vpack.c.bf16 %v1629_v4, %v1627_v2  ;;  %v4939_v2 = vpack.c.bf16 %v2167_v53, %v2165_v52  ;;  %v1638_v4 = vld [vmem:[%s9071_s5 + $0x360] sm:$0xff] }
 0x1f1   :  { %4746 = vmatprep.subr.bf16.mxu1 %v4745_v16  ;;  %4914 = vmatprep.subr.bf16.mxu0 %v4913_v17  ;;  %v2159_v16 = vld [vmem:[%s9071_s5 + $0x850] sm:$0xff]  ;;  %v1631_v17 = vld [vmem:[%s9071_s5 + $0x328] sm:$0xff]  ;;  %v4763_v21 = vpack.c.bf16 %v1628_v13, %v1626_v11  ;;  %v2169_v13 = vld [vmem:[%s9071_s5 + $0x8a0] sm:$0xff] }
 0x1f2   :  { %v4931_v23 = vpack.c.bf16 %v2159_v16, %v2157_v14  ;;  %v1943_v16 = vld [vmem:[%s9071_s5 + $0x558] sm:$0xff] }
 0x1f4   :  { %4748 = vmatpush1.bf16.msra.mxu1 %v4747_v5  ;;  %4916 = vmatpush1.bf16.msra.mxu0 %v4915_v22  ;;  %v1632_v5 = vld [vmem:[%s9071_s5 + $0x330] sm:$0xff]  ;;  %v4765_v22 = vpack.c.bf16 %v1633_v18, %v1631_v17  ;;  %v1292_v17 = vld [vmem:[#allocation3 + $0x58] sm:$0xff] }
 0x1f5   :  { %4750 = vmatprep.subr.bf16.mxu1 %v4749_v28  ;;  %4918 = vmatprep.subr.bf16.mxu0 %v4917_v25  ;;  %v2163_v28 = vld [vmem:[%s9071_s5 + $0x870] sm:$0xff]  ;;  %v1635_v25 = vld [vmem:[%s9071_s5 + $0x348] sm:$0xff]  ;;  %v4767_v45 = vpack.c.bf16 %v1632_v5, %v1630_v24 }
 0x1f6   :  { %v4935_v46 = vpack.c.bf16 %v2163_v28, %v2161_v27  ;;  %v4769_v50 = vpack.c.bf16 %v1637_v33, %v1635_v25 }
 0x1f8   :  { %4752 = vmatpush1.bf16.msra.mxu1 %v4751_v39  ;;  %4920 = vmatpush1.bf16.msra.mxu0 %v4919_v40 }
 0x1f9   :  { %4754 = vmatprep.subr.bf16.mxu1 %v4753_v47  ;;  %4922 = vmatprep.subr.bf16.mxu0 %v4921_v49  ;;  %v1634_v47 = vld [vmem:[%s9071_s5 + $0x340] sm:$0xff]  ;;  %v1636_v49 = vld [vmem:[%s9071_s5 + $0x350] sm:$0xff] }
 0x1fa   :  { %v4771_v1 = vpack.c.bf16 %v1636_v49, %v1634_v47  ;;  %v1316_v47 = vld [vmem:[#allocation3 + $0x38] sm:$0xff] }
 0x1fc   :  { %4756 = vmatpush1.bf16.msra.mxu1 %v4755_v61  ;;  %4924 = vmatpush1.bf16.msra.mxu0 %v4923_v56  ;;  %v2170_v56 = vld [vmem:[%s9071_s5 + $0x8a8] sm:$0xff] }
 0x1fd   :  { %4758 = vmatprep.subr.bf16.mxu1 %v4757_v62  ;;  %4926 = vmatprep.subr.bf16.mxu0 %v4925_v63  ;;  %v4941_v11 = vpack.c.bf16 %v2172_v57, %v2170_v56 }
 0x200   :  { %4760 = vmatpush1.bf16.msra.mxu1 %v4759_v8  ;;  %4928 = vmatpush1.bf16.msra.mxu0 %v4927_v10  ;;  %v1640_v10 = vld [vmem:[%s9071_s5 + $0x370] sm:$0xff] }
 0x201   :  { %4762 = vmatprep.subr.bf16.mxu1 %v4761_v15  ;;  %4930 = vmatprep.subr.bf16.mxu0 %v4929_v9  ;;  %v2171_v15 = vld [vmem:[%s9071_s5 + $0x8b0] sm:$0xff]  ;;  %v4775_v24 = vpack.c.bf16 %v1640_v10, %v1638_v4 }
 0x202   :  { %v904_v31 = vpop.f32.mrb[12].mxu0  ;;  %v1065_v32 = vpop.f32.mrb[12].mxu1  ;;  %v4943_v5 = vpack.c.bf16 %v2171_v15, %v2169_v13 }
 0x203   :  { %v1293_v38 = vadd.f32 %v904_v31, %v7022_v30  ;;  %v906_v39 = vpop.f32.mrb[13].mxu0  ;;  %v1067_v40 = vpop.f32.mrb[13].mxu1 }
 0x204   :  { %928 = vst.msk [vmem:[#allocation3 + $0x88] sm:$0xff] %vm605_vm1, %v906_v39  ;;  %1089 = vst.msk [vmem:[#allocation3 + $0xc8] sm:$0xff] %vm605_vm1, %v1067_v40  ;;  %4764 = vmatpush1.bf16.msra.mxu1 %v4763_v21  ;;  %4932 = vmatpush1.bf16.msra.mxu0 %v4931_v23  ;;  %v1312_v40 = vld [vmem:[#allocation3 + $0x68] sm:$0xff] }
 0x205   :  { %v1297_v30 = vadd.f32 %v1293_v38, %v7037_v48  ;;  %4766 = vmatprep.subr.bf16.mxu1 %v4765_v22  ;;  %4934 = vmatprep.subr.bf16.mxu0 %v4933_v26  ;;  %v1641_v48 = vld [vmem:[%s9071_s5 + $0x378] sm:$0xff]  ;;  %v1296_v22 = vld [vmem:[#allocation3 + $0x28] sm:$0xff] }
 0x206   :  { %v910_v55 = vpop.f32.mrb[14].mxu0  ;;  %v7373_v61 = vpop.f32.mrb[14].mxu1  ;;  %v4773_v8 = vpack.c.bf16 %v1641_v48, %v1639_v54 }
 0x207   :  { %v1299_v58 = vadd.f32 %v1297_v30, %v7015_v3  ;;  %v1309_v62 = vadd.f32 %v1065_v32, %v910_v55  ;;  %v912_v63 = vpop.f32.mrb[15].mxu0  ;;  %v1073_v43 = vpop.f32.mrb[15].mxu1 }
 0x208   :  { %930 = vst.msk [vmem:[#allocation3 + $0x98] sm:$0xff] %vm605_vm1, %v912_v63  ;;  %1091 = vst.msk [vmem:[#allocation3 + $0xd8] sm:$0xff] %vm605_vm1, %v1073_v43  ;;  %4768 = vmatpush1.bf16.msra.mxu1 %v4767_v45  ;;  %4936 = vmatpush1.bf16.msra.mxu0 %v4935_v46 }
 0x209   :  { %v7390_v6 = vmax.f32 %v1299_v58, 0.0  ;;  %v1313_v7 = vadd.f32 %v1309_v62, %v7039_v41  ;;  %4770 = vmatprep.subr.bf16.mxu1 %v4769_v50  ;;  %4938 = vmatprep.subr.bf16.mxu0 %v4937_v51  ;;  %v1941_v41 = vld [vmem:[%s9071_s5 + $0x548] sm:$0xff]  ;;  %v5358_v51 = vmov 0.0|0.0  }
 0x20a   :  { %v916_v9 = vpop.f32.mrb[16].mxu0  ;;  %v7402_v14 = vpop.f32.mrb[16].mxu1  ;;  %v4833_v27 = vpack.c.bf16 %v1943_v16, %v1941_v41  ;;  %v1336_v16 = vld [vmem:[#allocation3 + $0x78] sm:$0xff] }
 0x20b   :  { %v1290_v18 = vld [vmem:[#allocation3 + $0x88] sm:$0xff]  ;;  %v1317_v20 = vadd.f32 %v1313_v7, %v7068_v59  ;;  %v918_v12 = vpop.f32.mrb[17].mxu0  ;;  %v1079_v21 = vpop.f32.mrb[17].mxu1 }
 0x20c   :  { %v1294_v23 = vadd.f32 %v1292_v17, %v1290_v18  ;;  %932 = vst.msk [vmem:[#allocation3 + $0xa8] sm:$0xff] %vm605_vm1, %v918_v12  ;;  %1093 = vst.msk [vmem:[#allocation3 + $0xe8] sm:$0xff] %vm605_vm1, %v1079_v21  ;;  %4772 = vmatpush1.bf16.msra.mxu1 %v4771_v1  ;;  %4940 = vmatpush1.bf16.msra.mxu0 %v4939_v2  ;;  %v1306_v31 = vld [vmem:[#allocation3 + $0xc8] sm:$0xff] }
 0x20d   :  { %v1319_v26 = vadd.f32 %v1317_v20, %v7015_v3  ;;  %4774 = vmatprep.subr.bf16.mxu1 %v4773_v8  ;;  %4942 = vmatprep.subr.bf16.mxu0 %v4941_v11 }
 0x20e   :  { %v1298_v28 = vadd.f32 %v1296_v22, %v1294_v23  ;;  %v922_v25 = vpop.f32.mrb[18].mxu0  ;;  %v1083_v59 = vpop.f32.mrb[18].mxu1 }
 0x20f   :  { %v1308_v32 = vld [vmem:[#allocation3 + $0x98] sm:$0xff]  ;;  %v924_v33 = vpop.f32.mrb[19].mxu0  ;;  %v1085_v35 = vpop.f32.mrb[19].mxu1  ;;  %v7414_v36 = vmax.f32 %v1319_v26, 0.0 }
 0x210   :  { %v1300_v38 = vadd.f32 %v1298_v28, %v7026_v34  ;;  %v1310_v39 = vadd.f32 %v1308_v32, %v1306_v31  ;;  %934 = vst.msk [vmem:[#allocation3 + $0xb8] sm:$0xff] %vm605_vm1, %v924_v33  ;;  %1095 = vst.msk [vmem:[#allocation3 + $0xf8] sm:$0xff] %vm605_vm1, %v1085_v35  ;;  %4776 = vmatpush1.bf16.msra.mxu1 %v4775_v24  ;;  %4944 = vmatpush1.bf16.msra.mxu0 %v4943_v5  ;;  %v1328_v4 = vld [vmem:[#allocation3 + $0xd8] sm:$0xff] }
 0x211   :  { %4834 = vmatprep.subr.bf16.mxu1 %v4833_v27  ;;  %4978 = vmatprep.subr.bf16.mxu0 %v5358_v51 }
 0x212   :  { %v1302_v45 = vmax.f32 %v1300_v38, 0.0  ;;  %v1314_v46 = vadd.f32 %v1312_v40, %v1310_v39  ;;  %v1940_v38 = vld [vmem:[%s9071_s5 + $0x540] sm:$0xff]  ;;  %v1942_v39 = vld [vmem:[%s9071_s5 + $0x550] sm:$0xff]  ;;  %v1945_v40 = vld [vmem:[%s9071_s5 + $0x568] sm:$0xff] }
 0x213   :  { %v1348_v17 = vld [vmem:[#allocation3 + $0xe8] sm:$0xff] }
 0x214   :  { %1304 = vst.msk [vmem:[#allocation4 + $0x28] sm:$0xff] %vm605_vm1, %v1302_v45  ;;  %v1318_v49 = vadd.f32 %v1316_v47, %v1314_v46  ;;  %v1947_v45 = vld [vmem:[%s9071_s5 + $0x578] sm:$0xff]  ;;  %v2699_v46 = vld [vmem:[%s9073_s7 + $0xb0] sm:$0xff] }
 0x215   :  { %v2700_v47 = vld [vmem:[%s9073_s7 + $0xb8] sm:$0xff] }
 0x216   :  { %v1320_v30 = vadd.f32 %v1318_v49, %v7026_v34  ;;  %v4835_v49 = vpack.c.bf16 %v1942_v39, %v1940_v38  ;;  %v2706_v38 = vld [vmem:[%s9073_s7 + $0xe8] sm:$0xff] }
 0x217   :  { %v1352_v24 = vld [vmem:[#allocation3 + $0xb8] sm:$0xff] }
 0x218   :  { %v1322_v50 = vmax.f32 %v1320_v30, 0.0  ;;  %v1364_v26 = vld [vmem:[#allocation3 + $0xf8] sm:$0xff]  ;;  %v4837_v30 = vpack.c.bf16 %v1947_v45, %v1945_v40  ;;  %v1968_v45 = vld [vmem:[%s9071_s5 + $0x620] sm:$0xff] }
 0x21a   :  { %1324 = vst.msk [vmem:[#allocation4 + $0x38] sm:$0xff] %vm605_vm1, %v1322_v50  ;;  %v1944_v50 = vld [vmem:[%s9071_s5 + $0x560] sm:$0xff] }
 0x21b   :  { %v7423_v52 = vld [vmem:[#allocation4 + $0x28] sm:$0xff] }
 0x21c   :  { %4159 = vmatprep.mubr.msk.f32.mxu1 %vm605_vm1, %v7423_v52  ;;  %4173 = vmatprep.mubr.msk.f32.mxu0 %vm605_vm1, %v7423_v52 }
 0x21d   :  { %1541 = vmatmul.mubr.f32.gmra.mrb[24].mxu1 %v7390_v6  ;;  %1896 = vmatmul.mubr.f32.gmra.mrb[32].mxu0 %v7390_v6 }
 0x221   :  { %v7431_v53 = vld [vmem:[#allocation4 + $0x38] sm:$0xff] }
 0x222   :  { %4160 = vmatprep.mubr.msk.f32.mxu1 %vm605_vm1, %v7431_v53  ;;  %4174 = vmatprep.mubr.msk.f32.mxu0 %vm605_vm1, %v7431_v53 }
 0x223   :  { %1547 = vmatmul.mubr.f32.gmra.mrb[26].mxu1 %v7414_v36  ;;  %1902 = vmatmul.mubr.f32.gmra.mrb[34].mxu0 %v7414_v36 }
 0x243   :  { %v1226_v54 = vpop.f32.mrb[20].mxu0 }
 0x244   :  { %v1329_v55 = vadd.f32 %v1226_v54, %v7373_v61  ;;  %v1228_v48 = vpop.f32.mrb[21].mxu0  ;;  %v1946_v54 = vld [vmem:[%s9071_s5 + $0x570] sm:$0xff] }
 0x245   :  { %1250 = vst.msk [vmem:[#allocation3 + $0x108] sm:$0xff] %vm605_vm1, %v1228_v48  ;;  %v1951_v48 = vld [vmem:[%s9071_s5 + $0x598] sm:$0xff] }
 0x246   :  { %v1333_v56 = vadd.f32 %v1329_v55, %v916_v9  ;;  %v1949_v55 = vld [vmem:[%s9071_s5 + $0x588] sm:$0xff] }
 0x247   :  { %v1232_v57 = vpop.f32.mrb[22].mxu0 }
 0x248   :  { %v1337_v58 = vadd.f32 %v1333_v56, %v7070_v60  ;;  %v1349_v62 = vadd.f32 %v1232_v57, %v7402_v14  ;;  %v1234_v63 = vpop.f32.mrb[23].mxu0  ;;  %v1332_v60 = vld [vmem:[#allocation3 + $0xa8] sm:$0xff]  ;;  %v4979_v56 = vpack.c.bf16 %v2700_v47, %v2699_v46  ;;  %v4839_v57 = vpack.c.bf16 %v1946_v54, %v1944_v50  ;;  %v1970_v46 = vld [vmem:[%s9071_s5 + $0x630] sm:$0xff]  ;;  %v2708_v54 = vld [vmem:[%s9073_s7 + $0xf8] sm:$0xff] }
 0x249   :  { %1252 = vst.msk [vmem:[#allocation3 + $0x118] sm:$0xff] %vm605_vm1, %v1234_v63  ;;  %v1950_v63 = vld [vmem:[%s9071_s5 + $0x590] sm:$0xff]  ;;  %v1973_v47 = vld [vmem:[%s9071_s5 + $0x648] sm:$0xff] }
 0x24a   :  { %v1353_v43 = vadd.f32 %v1349_v62, %v922_v25  ;;  %v1339_v1 = vadd.f32 %v1337_v58, %v7015_v3  ;;  %v4841_v58 = vpack.c.bf16 %v1951_v48, %v1949_v55  ;;  %v1948_v62 = vld [vmem:[%s9071_s5 + $0x580] sm:$0xff]  ;;  %v2707_v50 = vld [vmem:[%s9073_s7 + $0xf0] sm:$0xff]  ;;  %v4863_v55 = vpack.c.bf16 %v1970_v46, %v1968_v45  ;;  %v2718_v45 = vld [vmem:[%s9073_s7 + $0x148] sm:$0xff] }
 0x24b   :  { %v1238_v2 = vpop.f32.mrb[24].mxu0 }
 0x24c   :  { %v1326_v7 = vld [vmem:[#allocation3 + $0x108] sm:$0xff]  ;;  %v1355_v61 = vadd.f32 %v1353_v43, %v7015_v3  ;;  %v1365_v8 = vadd.f32 %v1238_v2, %v1083_v59  ;;  %v1240_v10 = vpop.f32.mrb[25].mxu0  ;;  %v7446_v11 = vmax.f32 %v1339_v1, 0.0  ;;  %v1955_v43 = vld [vmem:[%s9071_s5 + $0x5b8] sm:$0xff]  ;;  %v4843_v2 = vpack.c.bf16 %v1950_v63, %v1948_v62  ;;  %v2709_v63 = vld [vmem:[%s9073_s7 + $0x100] sm:$0xff] }
 0x24d   :  { %v1330_v13 = vadd.f32 %v1328_v4, %v1326_v7  ;;  %1254 = vst.msk [vmem:[#allocation3 + $0x128] sm:$0xff] %vm605_vm1, %v1240_v10  ;;  %v2702_v1 = vld [vmem:[%s9073_s7 + $0xc8] sm:$0xff]  ;;  %v1954_v7 = vld [vmem:[%s9071_s5 + $0x5b0] sm:$0xff]  ;;  %v4991_v62 = vpack.c.bf16 %v2708_v54, %v2707_v50 }
 0x24e   :  { %v7449_v15 = vmax.f32 %v1355_v61, 0.0  ;;  %v1367_v9 = vadd.f32 %v1365_v8, %v7015_v3  ;;  %v1957_v61 = vld [vmem:[%s9071_s5 + $0x5c8] sm:$0xff]  ;;  %v1959_v8 = vld [vmem:[%s9071_s5 + $0x5d8] sm:$0xff]  ;;  %v2719_v54 = vld [vmem:[%s9073_s7 + $0x150] sm:$0xff] }
 0x24f   :  { %v1334_v14 = vadd.f32 %v1332_v60, %v1330_v13  ;;  %v1244_v41 = vpop.f32.mrb[26].mxu0  ;;  %v4849_v60 = vpack.c.bf16 %v1959_v8, %v1957_v61  ;;  %v2711_v61 = vld [vmem:[%s9073_s7 + $0x110] sm:$0xff]  ;;  %v2712_v8 = vld [vmem:[%s9073_s7 + $0x118] sm:$0xff] }
 0x250   :  { %v1346_v18 = vld [vmem:[#allocation3 + $0x118] sm:$0xff]  ;;  %v7452_v20 = vmax.f32 %v1367_v9, 0.0  ;;  %v1246_v12 = vpop.f32.mrb[27].mxu0  ;;  %v1956_v9 = vld [vmem:[%s9071_s5 + $0x5c0] sm:$0xff]  ;;  %v1961_v41 = vld [vmem:[%s9071_s5 + $0x5e8] sm:$0xff] }
 0x251   :  { %v1338_v21 = vadd.f32 %v1336_v16, %v1334_v14  ;;  %v1350_v23 = vadd.f32 %v1348_v17, %v1346_v18  ;;  %v1958_v14 = vld [vmem:[%s9071_s5 + $0x5d0] sm:$0xff]  ;;  %v1963_v16 = vld [vmem:[%s9071_s5 + $0x5f8] sm:$0xff] }
 0x252   :  { %v2703_v17 = vld [vmem:[%s9073_s7 + $0xd0] sm:$0xff]  ;;  %v2704_v18 = vld [vmem:[%s9073_s7 + $0xd8] sm:$0xff]  ;;  %v4851_v12 = vpack.c.bf16 %v1958_v14, %v1956_v9  ;;  %v1985_v14 = vld [vmem:[%s9071_s5 + $0x6a8] sm:$0xff] }
 0x253   :  { %v1340_v5 = vadd.f32 %v1338_v21, %v7026_v34  ;;  %v1354_v22 = vadd.f32 %v1352_v24, %v1350_v23  ;;  %v4853_v21 = vpack.c.bf16 %v1963_v16, %v1961_v41  ;;  %v1960_v23 = vld [vmem:[%s9071_s5 + $0x5e0] sm:$0xff]  ;;  %v1962_v24 = vld [vmem:[%s9071_s5 + $0x5f0] sm:$0xff]  ;;  %v4997_v41 = vpack.c.bf16 %v2712_v8, %v2711_v61  ;;  %v1987_v16 = vld [vmem:[%s9071_s5 + $0x6b8] sm:$0xff] }
 0x254   :  { %v1362_v27 = vld [vmem:[#allocation3 + $0x128] sm:$0xff]  ;;  %v1982_v9 = vld [vmem:[%s9071_s5 + $0x690] sm:$0xff] }
 0x255   :  { %v1356_v28 = vadd.f32 %v1354_v22, %v7026_v34  ;;  %v1366_v25 = vadd.f32 %v1364_v26, %v1362_v27  ;;  %v1342_v3 = vmax.f32 %v1340_v5, 0.0  ;;  %v1965_v5 = vld [vmem:[%s9071_s5 + $0x608] sm:$0xff]  ;;  %v1967_v22 = vld [vmem:[%s9071_s5 + $0x618] sm:$0xff]  ;;  %v4985_v26 = vpack.c.bf16 %v2704_v18, %v2703_v17  ;;  %v2713_v17 = vld [vmem:[%s9073_s7 + $0x120] sm:$0xff] }
 0x256   :  { %v4855_v27 = vpack.c.bf16 %v1962_v24, %v1960_v23  ;;  %v2714_v18 = vld [vmem:[%s9073_s7 + $0x128] sm:$0xff]  ;;  %v1984_v23 = vld [vmem:[%s9071_s5 + $0x6a0] sm:$0xff]  ;;  %v1986_v24 = vld [vmem:[%s9071_s5 + $0x6b0] sm:$0xff] }
 0x257   :  { %v1358_v59 = vmax.f32 %v1356_v28, 0.0  ;;  %v1368_v31 = vadd.f32 %v1366_v25, %v7026_v34  ;;  %1344 = vst.msk [vmem:[#allocation4 + $0x48] sm:$0xff] %vm605_vm1, %v1342_v3  ;;  %v4857_v28 = vpack.c.bf16 %v1967_v22, %v1965_v5  ;;  %v1964_v25 = vld [vmem:[%s9071_s5 + $0x600] sm:$0xff]  ;;  %v1966_v3 = vld [vmem:[%s9071_s5 + $0x610] sm:$0xff]  ;;  %v1989_v5 = vld [vmem:[%s9071_s5 + $0x6c8] sm:$0xff]  ;;  %v5000_v22 = vpack.c.bf16 %v2714_v18, %v2713_v17 }
 0x258   :  { %v4859_v39 = vpack.c.bf16 %v1966_v3, %v1964_v25  ;;  %v4879_v25 = vpack.c.bf16 %v1986_v24, %v1984_v23  ;;  %v2518_v8 = vld [vmem:[%s9073_s7 + $0x30] sm:$0xff] }
 0x259   :  { %1360 = vst.msk [vmem:[#allocation4 + $0x58] sm:$0xff] %vm605_vm1, %v1358_v59  ;;  %v1370_v32 = vmax.f32 %v1368_v31, 0.0  ;;  %v1969_v59 = vld [vmem:[%s9071_s5 + $0x628] sm:$0xff]  ;;  %v1971_v31 = vld [vmem:[%s9071_s5 + $0x638] sm:$0xff] }
 0x25a   :  { %v4861_v40 = vpack.c.bf16 %v1971_v31, %v1969_v59  ;;  %v1988_v59 = vld [vmem:[%s9071_s5 + $0x6c0] sm:$0xff]  ;;  %v1990_v31 = vld [vmem:[%s9071_s5 + $0x6d0] sm:$0xff] }
 0x25b   :  { %1372 = vst.msk [vmem:[#allocation4 + $0x68] sm:$0xff] %vm605_vm1, %v1370_v32  ;;  %v2705_v32 = vld [vmem:[%s9073_s7 + $0xe0] sm:$0xff]  ;;  %v4883_v46 = vpack.c.bf16 %v1990_v31, %v1988_v59  ;;  %v2531_v31 = vld [vmem:[%s9073_s7 + $0x98] sm:$0xff] }
 0x25e   :  { %v7460_v33 = vld [vmem:[#allocation4 + $0x48] sm:$0xff] }
 0x25f   :  { %4161 = vmatprep.mubr.msk.f32.mxu1 %vm605_vm1, %v7460_v33  ;;  %4175 = vmatprep.mubr.msk.f32.mxu0 %vm605_vm1, %v7460_v33 }
 0x260   :  { %1553 = vmatmul.mubr.f32.gmra.mrb[28].mxu1 %v7446_v11  ;;  %1908 = vmatmul.mubr.f32.gmra.mrb[36].mxu0 %v7446_v11  ;;  %v7468_v34 = vld [vmem:[#allocation4 + $0x58] sm:$0xff] }
 0x261   :  { %4162 = vmatprep.mubr.msk.f32.mxu1 %vm605_vm1, %v7468_v34  ;;  %4176 = vmatprep.mubr.msk.f32.mxu0 %vm605_vm1, %v7468_v34 }
 0x262   :  { %v7476_v35 = vld [vmem:[#allocation4 + $0x68] sm:$0xff] }
 0x264   :  { %1559 = vmatmul.mubr.f32.gmra.mrb[30].mxu1 %v7449_v15  ;;  %1914 = vmatmul.mubr.f32.gmra.mrb[38].mxu0 %v7449_v15 }
 0x265   :  { %4163 = vmatprep.mubr.msk.f32.mxu1 %vm605_vm1, %v7476_v35  ;;  %4177 = vmatprep.mubr.msk.f32.mxu0 %vm605_vm1, %v7476_v35 }
 0x268   :  { %1565 = vmatmul.mubr.f32.gmra.mrb[32].mxu1 %v7452_v20  ;;  %1920 = vmatmul.mubr.f32.gmra.mrb[40].mxu0 %v7452_v20 }
 0x269   :  { %4164 = vmatprep.mubr.msk.f32.mxu1 %vm605_vm1, %v7072_v0  ;;  %4185 = vmatprep.mubr.msk.f32.mxu0 %vm605_vm1, %v7072_v0 }
 0x26c   :  { %1707 = vmatmul.mubr.f32.vlgmr.msra.gmra.mrb[34].mxu1 %v7020_v29  ;;  %2238 = vmatmul.mubr.f32.vlgmr.msra.gmra.mrb[42].mxu0 %v7020_v29  ;;  %v1953_v29 = vld [vmem:[%s9071_s5 + $0x5a8] sm:$0xff] }
 0x26d   :  { %4836 = vmatpush1.bf16.msra.mxu1 %v4835_v49  ;;  %4165 = vmatprep.mubr.msk.f32.mxu1 %vm605_vm1, %v7115_v19  ;;  %v4845_v4 = vpack.c.bf16 %v1955_v43, %v1953_v29  ;;  %v4988_v49 = vpack.c.bf16 %v2706_v38, %v2705_v32  ;;  %v2710_v29 = vld [vmem:[%s9073_s7 + $0x108] sm:$0xff] }
 0x26e   :  { %4186 = vmatprep.mubr.msk.f32.mxu0 %vm605_vm1, %v7115_v19  ;;  %4838 = vmatprep.subr.bf16.mxu1 %v4837_v30  ;;  %v2701_v19 = vld [vmem:[%s9073_s7 + $0xc0] sm:$0xff]  ;;  %v1975_v30 = vld [vmem:[%s9071_s5 + $0x658] sm:$0xff]  ;;  %v1993_v32 = vld [vmem:[%s9071_s5 + $0x6e8] sm:$0xff] }
 0x26f   :  { %4980 = vmatpush1.bf16.msra.mxu0 %v4979_v56  ;;  %v4982_v10 = vpack.c.bf16 %v2702_v1, %v2701_v19  ;;  %v4865_v48 = vpack.c.bf16 %v1975_v30, %v1973_v47  ;;  %v1972_v56 = vld [vmem:[%s9071_s5 + $0x640] sm:$0xff]  ;;  %v1994_v30 = vld [vmem:[%s9071_s5 + $0x6f0] sm:$0xff] }
 0x270   :  { %1713 = vmatmul.mubr.f32.gmra.mrb[36].mxu1 %v7031_v37  ;;  %2244 = vmatmul.mubr.f32.gmra.mrb[44].mxu0 %v7031_v37  ;;  %v1952_v37 = vld [vmem:[%s9071_s5 + $0x5a0] sm:$0xff] }
 0x271   :  { %4840 = vmatpush1.bf16.msra.mxu1 %v4839_v57  ;;  %4166 = vmatprep.mubr.msk.f32.mxu1 %vm605_vm1, %v7423_v52  ;;  %v4847_v13 = vpack.c.bf16 %v1954_v7, %v1952_v37  ;;  %v1974_v57 = vld [vmem:[%s9071_s5 + $0x650] sm:$0xff]  ;;  %v1976_v1 = vld [vmem:[%s9071_s5 + $0x660] sm:$0xff]  ;;  %v4994_v37 = vpack.c.bf16 %v2710_v29, %v2709_v63  ;;  %v1983_v7 = vld [vmem:[%s9071_s5 + $0x698] sm:$0xff] }
 0x272   :  { %4187 = vmatprep.mubr.msk.f32.mxu0 %vm605_vm1, %v7423_v52  ;;  %4842 = vmatprep.subr.bf16.mxu1 %v4841_v58  ;;  %v1977_v58 = vld [vmem:[%s9071_s5 + $0x668] sm:$0xff]  ;;  %v4867_v43 = vpack.c.bf16 %v1974_v57, %v1972_v56  ;;  %v2512_v56 = vld [vmem:[%s9073_s7] sm:$0xff]  ;;  %v2515_v63 = vld [vmem:[%s9073_s7 + $0x18] sm:$0xff] }
 0x273   :  { %4981 = vmatprep.subr.bf16.mxu0 %v5358_v51  ;;  %v2513_v57 = vld [vmem:[%s9073_s7 + $0x8] sm:$0xff]  ;;  %v5345_v29 = vld [vmem:[#allocation4] sm:$0xff] }
 0x274   :  { %1719 = vmatmul.mubr.f32.gmra.mrb[38].mxu1 %v7390_v6  ;;  %2250 = vmatmul.mubr.f32.gmra.mrb[46].mxu0 %v7390_v6 }
 0x275   :  { %4844 = vmatpush1.bf16.msra.mxu1 %v4843_v2  ;;  %4167 = vmatprep.mubr.msk.f32.mxu1 %vm605_vm1, %v7431_v53  ;;  %v1978_v2 = vld [vmem:[%s9071_s5 + $0x670] sm:$0xff] }
 0x276   :  { %4188 = vmatprep.mubr.msk.f32.mxu0 %vm605_vm1, %v7431_v53  ;;  %4846 = vmatprep.subr.bf16.mxu1 %v4845_v4  ;;  %v1981_v4 = vld [vmem:[%s9071_s5 + $0x688] sm:$0xff] }
 0x277   :  { %4983 = vmatpush1.bf16.msra.mxu0 %v4982_v10  ;;  %v4871_v10 = vpack.c.bf16 %v1978_v2, %v1976_v1  ;;  %v2294_v1 = vld [vmem:[%s9074_s6] sm:$0x3] }
 0x278   :  { %1725 = vmatmul.mubr.f32.gmra.mrb[40].mxu1 %v7414_v36  ;;  %2256 = vmatmul.mubr.f32.gmra.mrb[48].mxu0 %v7414_v36  ;;  %v2516_v2 = vld [vmem:[%s9073_s7 + $0x20] sm:$0xff]  ;;  %v7822_v17 = vrot.slane %v2294_v1, %v6025_v44 }
 0x279   :  { %4848 = vmatpush1.bf16.msra.mxu1 %v4847_v13  ;;  %4168 = vmatprep.mubr.msk.f32.mxu1 %vm605_vm1, %v7460_v33  ;;  %v4873_v13 = vpack.c.bf16 %v1983_v7, %v1981_v4  ;;  %v2517_v4 = vld [vmem:[%s9073_s7 + $0x28] sm:$0xff]  ;;  %v7792_v7 = vrot.slane %v2294_v1, %v6017_v42 }
 0x27a   :  { %4189 = vmatprep.mubr.msk.f32.mxu0 %vm605_vm1, %v7460_v33  ;;  %4850 = vmatprep.subr.bf16.mxu1 %v4849_v60  ;;  %v1980_v60 = vld [vmem:[%s9071_s5 + $0x680] sm:$0xff]  ;;  %v4952_v61 = vpack.c.bf16 %v2517_v4, %v2516_v2  ;;  %v3008_v1 = vld [vmem:[%s9073_s7 + $0x228] sm:$0xff] }
 0x27b   :  { %4984 = vmatprep.subr.bf16.mxu0 %v5358_v51  ;;  %v2856_v4 = vld [vmem:[%s9073_s7 + $0x180] sm:$0xff] }
 0x27c   :  { %1731 = vmatmul.mubr.f32.gmra.mrb[42].mxu1 %v7446_v11  ;;  %2262 = vmatmul.mubr.f32.gmra.mrb[50].mxu0 %v7446_v11 }
 0x27d   :  { %4852 = vmatpush1.bf16.msra.mxu1 %v4851_v12  ;;  %4169 = vmatprep.mubr.msk.f32.mxu1 %vm605_vm1, %v7468_v34  ;;  %v4875_v12 = vpack.c.bf16 %v1982_v9, %v1980_v60 }
 0x27e   :  { %4190 = vmatprep.mubr.msk.f32.mxu0 %vm605_vm1, %v7468_v34  ;;  %4854 = vmatprep.subr.bf16.mxu1 %v4853_v21  ;;  %v4877_v21 = vpack.c.bf16 %v1987_v16, %v1985_v14 }
 0x27f   :  { %4986 = vmatpush1.bf16.msra.mxu0 %v4985_v26  ;;  %v1991_v26 = vld [vmem:[%s9071_s5 + $0x6d8] sm:$0xff] }
 0x280   :  { %1737 = vmatmul.mubr.f32.gmra.mrb[44].mxu1 %v7449_v15  ;;  %2268 = vmatmul.mubr.f32.gmra.mrb[52].mxu0 %v7449_v15  ;;  %v4881_v3 = vpack.c.bf16 %v1991_v26, %v1989_v5 }
 0x281   :  { %4856 = vmatpush1.bf16.msra.mxu1 %v4855_v27  ;;  %4170 = vmatprep.mubr.msk.f32.mxu1 %vm605_vm1, %v7476_v35  ;;  %v2715_v27 = vld [vmem:[%s9073_s7 + $0x130] sm:$0xff] }
 0x282   :  { %4191 = vmatprep.mubr.msk.f32.mxu0 %vm605_vm1, %v7476_v35  ;;  %4858 = vmatprep.subr.bf16.mxu1 %v4857_v28  ;;  %v2716_v28 = vld [vmem:[%s9073_s7 + $0x138] sm:$0xff] }
 0x283   :  { %4987 = vmatprep.subr.bf16.mxu0 %v5358_v51  ;;  %v5003_v38 = vpack.c.bf16 %v2716_v28, %v2715_v27  ;;  %v2526_v27 = vld [vmem:[%s9073_s7 + $0x70] sm:$0xff]  ;;  %v2527_v28 = vld [vmem:[%s9073_s7 + $0x78] sm:$0xff] }
 0x284   :  { %1743 = vmatmul.mubr.f32.gmra.mrb[46].mxu1 %v7452_v20  ;;  %2274 = vmatmul.mubr.f32.gmra.mrb[54].mxu0 %v7452_v20 }
 0x285   :  { %4860 = vmatpush1.bf16.msra.mxu1 %v4859_v39  ;;  %4178 = vmatprep.mubr.msk.f32.mxu1 %vm605_vm1, %v7072_v0  ;;  %v1979_v0 = vld [vmem:[%s9071_s5 + $0x678] sm:$0xff] }
 0x286   :  { %4862 = vmatprep.subr.bf16.mxu1 %v4861_v40  ;;  %4989 = vmatpush1.bf16.msra.mxu0 %v4988_v49  ;;  %v4869_v19 = vpack.c.bf16 %v1979_v0, %v1977_v58  ;;  %v1995_v39 = vld [vmem:[%s9071_s5 + $0x6f8] sm:$0xff]  ;;  %v2717_v40 = vld [vmem:[%s9073_s7 + $0x140] sm:$0xff]  ;;  %v2514_v0 = vld [vmem:[%s9073_s7 + $0x10] sm:$0xff] }
 0x287   :  { %4990 = vmatprep.subr.bf16.mxu0 %v5358_v51  ;;  %v4885_v47 = vpack.c.bf16 %v1995_v39, %v1993_v32  ;;  %v1992_v49 = vld [vmem:[%s9071_s5 + $0x6e0] sm:$0xff]  ;;  %v5006_v50 = vpack.c.bf16 %v2718_v45, %v2717_v40  ;;  %v2533_v39 = vld [vmem:[%s9073_s7 + $0xa8] sm:$0xff] }
 0x289   :  { %4864 = vmatpush1.bf16.msra.mxu1 %v4863_v55  ;;  %v2720_v55 = vld [vmem:[%s9073_s7 + $0x158] sm:$0xff] }
 0x28a   :  { %4866 = vmatprep.subr.bf16.mxu1 %v4865_v48  ;;  %4992 = vmatpush1.bf16.msra.mxu0 %v4991_v62  ;;  %v4887_v48 = vpack.c.bf16 %v1994_v30, %v1992_v49  ;;  %v5009_v58 = vpack.c.bf16 %v2720_v55, %v2719_v54  ;;  %v4946_v62 = vpack.c.bf16 %v2513_v57, %v2512_v56  ;;  %v2853_v56 = vld [vmem:[%s9073_s7 + $0x168] sm:$0xff]  ;;  %v3005_v57 = vld [vmem:[%s9073_s7 + $0x210] sm:$0xff] }
 0x28b   :  { %4993 = vmatprep.subr.bf16.mxu0 %v5358_v51 }
 0x28d   :  { %4868 = vmatpush1.bf16.msra.mxu1 %v4867_v43  ;;  %v5346_v43 = vld [vmem:[#allocation4 + $0x18] sm:$0xff] }
 0x28e   :  { %4870 = vmatprep.subr.bf16.mxu1 %v4869_v19  ;;  %4995 = vmatpush1.bf16.msra.mxu0 %v4994_v37  ;;  %v4949_v19 = vpack.c.bf16 %v2515_v63, %v2514_v0  ;;  %v5347_v37 = vld [vmem:[#allocation4 + $0x10] sm:$0xff] }
 0x28f   :  { %4996 = vmatprep.subr.bf16.mxu0 %v5358_v51  ;;  %v2854_v63 = vld [vmem:[%s9073_s7 + $0x170] sm:$0xff] }
 0x291   :  { %4872 = vmatpush1.bf16.msra.mxu1 %v4871_v10  ;;  %v2519_v10 = vld [vmem:[%s9073_s7 + $0x38] sm:$0xff] }
 0x292   :  { %4874 = vmatprep.subr.bf16.mxu1 %v4873_v13  ;;  %4998 = vmatpush1.bf16.msra.mxu0 %v4997_v41  ;;  %v4955_v14 = vpack.c.bf16 %v2519_v10, %v2518_v8  ;;  %v3010_v10 = vld [vmem:[%s9073_s7 + $0x238] sm:$0xff] }
 0x293   :  { %4999 = vmatprep.subr.bf16.mxu0 %v5358_v51 }
 0x295   :  { %4876 = vmatpush1.bf16.msra.mxu1 %v4875_v12 }
 0x296   :  { %4878 = vmatprep.subr.bf16.mxu1 %v4877_v21  ;;  %5001 = vmatpush1.bf16.msra.mxu0 %v5000_v22  ;;  %v2522_v21 = vld [vmem:[%s9073_s7 + $0x50] sm:$0xff]  ;;  %v2524_v22 = vld [vmem:[%s9073_s7 + $0x60] sm:$0xff] }
 0x297   :  { %5002 = vmatprep.subr.bf16.mxu0 %v5358_v51 }
 0x299   :  { %4880 = vmatpush1.bf16.msra.mxu1 %v4879_v25  ;;  %v2529_v25 = vld [vmem:[%s9073_s7 + $0x88] sm:$0xff] }
 0x29a   :  { %4882 = vmatprep.subr.bf16.mxu1 %v4881_v3  ;;  %5004 = vmatpush1.bf16.msra.mxu0 %v5003_v38  ;;  %v2532_v38 = vld [vmem:[%s9073_s7 + $0xa0] sm:$0xff] }
 0x29b   :  { %5005 = vmatprep.subr.bf16.mxu0 %v5358_v51  ;;  %v4976_v40 = vpack.c.bf16 %v2533_v39, %v2532_v38  ;;  %v3020_v38 = vld [vmem:[%s9073_s7 + $0x288] sm:$0xff] }
 0x29d   :  { %4884 = vmatpush1.bf16.msra.mxu1 %v4883_v46 }
 0x29e   :  { %4886 = vmatprep.subr.bf16.mxu1 %v4885_v47  ;;  %5007 = vmatpush1.bf16.msra.mxu0 %v5006_v50 }
 0x29f   :  { %5008 = vmatprep.subr.bf16.mxu0 %v5358_v51 }
 0x2a1   :  { %4888 = vmatpush1.bf16.msra.mxu1 %v4887_v48  ;;  %v2852_v48 = vld [vmem:[%s9073_s7 + $0x160] sm:$0xff] }
 0x2a2   :  { %4945 = vmatprep.subr.bf16.mxu1 %v5358_v51  ;;  %5010 = vmatpush1.bf16.msra.mxu0 %v5009_v58  ;;  %v5012_v58 = vpack.c.bf16 %v2853_v56, %v2852_v48  ;;  %v2870_v56 = vld [vmem:[%s9073_s7 + $0x1f0] sm:$0xff] }
 0x2a3   :  { %5044 = vmatprep.subr.bf16.mxu0 %v5358_v51 }
 0x2a4   :  { %2061 = vmatmul.mubr.f32.vlgmr.msra.gmra.mrb[48].mxu1 %v5345_v29  ;;  %v2855_v29 = vld [vmem:[%s9073_s7 + $0x178] sm:$0xff] }
 0x2a5   :  { %4179 = vmatprep.mubr.msk.f32.mxu1 %vm605_vm1, %v5346_v43  ;;  %4947 = vmatpush1.bf16.msra.mxu1 %v4946_v62  ;;  %v3006_v62 = vld [vmem:[%s9073_s7 + $0x218] sm:$0xff]  ;;  %v3007_v43 = vld [vmem:[%s9073_s7 + $0x220] sm:$0xff] }
 0x2a6   :  { %4948 = vmatprep.subr.bf16.mxu1 %v5358_v51  ;;  %v5045_v0 = vpack.c.bf16 %v3006_v62, %v3005_v57  ;;  %v5048_v2 = vpack.c.bf16 %v3008_v1, %v3007_v43  ;;  %v2871_v57 = vld [vmem:[%s9073_s7 + $0x1f8] sm:$0xff]  ;;  %v2873_v43 = vld [vmem:[%s9073_s7 + $0x208] sm:$0xff] }
 0x2a7   :  { %v5039_v62 = vpack.c.bf16 %v2871_v57, %v2870_v56 }
 0x2a8   :  { %2067 = vmatmul.mubr.f32.gmra.mrb[50].mxu1 %v5347_v37  ;;  %v2857_v37 = vld [vmem:[%s9073_s7 + $0x188] sm:$0xff] }
 0x2a9   :  { %4180 = vmatprep.mubr.msk.f32.mxu1 %vm605_vm1, %v7423_v52  ;;  %4950 = vmatpush1.bf16.msra.mxu1 %v4949_v19  ;;  %v5015_v19 = vpack.c.bf16 %v2855_v29, %v2854_v63  ;;  %v5018_v8 = vpack.c.bf16 %v2857_v37, %v2856_v4  ;;  %v2872_v29 = vld [vmem:[%s9073_s7 + $0x200] sm:$0xff] }
 0x2aa   :  { %4951 = vmatprep.subr.bf16.mxu1 %v5358_v51  ;;  %v5042_v1 = vpack.c.bf16 %v2873_v43, %v2872_v29 }
 0x2ac   :  { %2073 = vmatmul.mubr.f32.gmra.mrb[52].mxu1 %v7390_v6  ;;  %v1530_v42 = vpop.f32.mrb[20].mxu1  ;;  %v7804_v13 = vpop.f32.mrb[28].mxu0  ;;  %v2520_v6 = vld [vmem:[%s9073_s7 + $0x40] sm:$0xff] }
 0x2ad   :  { %4181 = vmatprep.mubr.msk.f32.mxu1 %vm605_vm1, %v7431_v53  ;;  %4953 = vmatpush1.bf16.msra.mxu1 %v4952_v61  ;;  %v2308_v52 = vadd.f32 %v7792_v7, %v1530_v42  ;;  %v1532_v60 = vpop.f32.mrb[21].mxu1  ;;  %v1887_v9 = vpop.f32.mrb[29].mxu0  ;;  %v2521_v53 = vld [vmem:[%s9073_s7 + $0x48] sm:$0xff]  ;;  %v3009_v61 = vld [vmem:[%s9073_s7 + $0x230] sm:$0xff] }
 0x2ae   :  { %1573 = vst.msk [vmem:[#allocation5 + $0x8] sm:$0xff] %vm1572_vm2, %v1532_v60  ;;  %1927 = vst.msk [vmem:[#allocation5 + $0xe8] sm:$0xff] %vm1572_vm2, %v1887_v9  ;;  %4954 = vmatprep.subr.bf16.mxu1 %v5358_v51  ;;  %v4958_v16 = vpack.c.bf16 %v2521_v53, %v2520_v6  ;;  %v5051_v42 = vpack.c.bf16 %v3010_v10, %v3009_v61  ;;  %v2859_v60 = vld [vmem:[%s9073_s7 + $0x198] sm:$0xff]  ;;  %v3011_v9 = vld [vmem:[%s9073_s7 + $0x240] sm:$0xff] }
 0x2af   :  { %v2310_v41 = vmax.f32 %v2308_v52, 0.0  ;;  %v2858_v52 = vld [vmem:[%s9073_s7 + $0x190] sm:$0xff]  ;;  %v3012_v6 = vld [vmem:[%s9073_s7 + $0x248] sm:$0xff] }
 0x2b0   :  { %2079 = vmatmul.mubr.f32.gmra.mrb[54].mxu1 %v7414_v36  ;;  %v2523_v36 = vld [vmem:[%s9073_s7 + $0x58] sm:$0xff]  ;;  %v5054_v53 = vpack.c.bf16 %v3012_v6, %v3011_v9 }
 0x2b1   :  { %2312 = vst [vmem:[#allocation6] sm:$0xff] %v2310_v41  ;;  %4182 = vmatprep.mubr.msk.f32.mxu1 %vm605_vm1, %v7460_v33  ;;  %4956 = vmatpush1.bf16.msra.mxu1 %v4955_v14  ;;  %v4961_v24 = vpack.c.bf16 %v2523_v36, %v2522_v21  ;;  %v5021_v14 = vpack.c.bf16 %v2859_v60, %v2858_v52  ;;  %v3013_v21 = vld [vmem:[%s9073_s7 + $0x250] sm:$0xff] }
 0x2b2   :  { %4957 = vmatprep.subr.bf16.mxu1 %v5358_v51  ;;  %v7825_v18 = vpop.f32.mrb[22].mxu1  ;;  %v7827_v12 = vpop.f32.mrb[30].mxu0 }
 0x2b3   :  { %v1538_v33 = vpop.f32.mrb[23].mxu1  ;;  %v1893_v23 = vpop.f32.mrb[31].mxu0 }
 0x2b4   :  { %2085 = vmatmul.mubr.f32.gmra.mrb[56].mxu1 %v7446_v11  ;;  %1575 = vst.msk [vmem:[#allocation5 + $0x18] sm:$0xff] %vm1572_vm2, %v1538_v33  ;;  %1929 = vst.msk [vmem:[#allocation5 + $0xf8] sm:$0xff] %vm1572_vm2, %v1893_v23  ;;  %v2525_v11 = vld [vmem:[%s9073_s7 + $0x68] sm:$0xff]  ;;  %v3014_v33 = vld [vmem:[%s9073_s7 + $0x258] sm:$0xff] }
 0x2b5   :  { %v2296_v44 = vld [vmem:[#allocation5 + $0x8] sm:$0xff]  ;;  %4183 = vmatprep.mubr.msk.f32.mxu1 %vm605_vm1, %v7468_v34  ;;  %4959 = vmatpush1.bf16.msra.mxu1 %v4958_v16  ;;  %v4964_v34 = vpack.c.bf16 %v2525_v11, %v2524_v22  ;;  %v2861_v16 = vld [vmem:[%s9073_s7 + $0x1a8] sm:$0xff]  ;;  %v5057_v23 = vpack.c.bf16 %v3014_v33, %v3013_v21 }
 0x2b6   :  { %v2309_v5 = vadd.f32 %v7822_v17, %v2296_v44  ;;  %4960 = vmatprep.subr.bf16.mxu1 %v5358_v51  ;;  %v2862_v44 = vld [vmem:[%s9073_s7 + $0x1b0] sm:$0xff]  ;;  %v3016_v11 = vld [vmem:[%s9073_s7 + $0x268] sm:$0xff] }
 0x2b8   :  { %v2311_v26 = vmax.f32 %v2309_v5, 0.0  ;;  %2091 = vmatmul.mubr.f32.gmra.mrb[58].mxu1 %v7449_v15  ;;  %v4967_v15 = vpack.c.bf16 %v2527_v28, %v2526_v27  ;;  %v3015_v5 = vld [vmem:[%s9073_s7 + $0x260] sm:$0xff]  ;;  %v2865_v27 = vld [vmem:[%s9073_s7 + $0x1c8] sm:$0xff] }
 0x2b9   :  { %4184 = vmatprep.mubr.msk.f32.mxu1 %vm605_vm1, %v7476_v35  ;;  %4962 = vmatpush1.bf16.msra.mxu1 %v4961_v24  ;;  %v2528_v35 = vld [vmem:[%s9073_s7 + $0x80] sm:$0xff]  ;;  %v2863_v24 = vld [vmem:[%s9073_s7 + $0x1b8] sm:$0xff] }
 0x2ba   :  { %2313 = vst.msk [vmem:[#allocation6 + $0x8] sm:$0xff] %vm1572_vm2, %v2311_v26  ;;  %4963 = vmatprep.subr.bf16.mxu1 %v5358_v51  ;;  %v4970_v3 = vpack.c.bf16 %v2529_v25, %v2528_v35  ;;  %v5027_v22 = vpack.c.bf16 %v2863_v24, %v2862_v44  ;;  %v5060_v26 = vpack.c.bf16 %v3016_v11, %v3015_v5  ;;  %v3018_v35 = vld [vmem:[%s9073_s7 + $0x278] sm:$0xff] }
 0x2bc   :  { %2097 = vmatmul.mubr.f32.gmra.mrb[60].mxu1 %v7452_v20  ;;  %v2530_v20 = vld [vmem:[%s9073_s7 + $0x90] sm:$0xff] }
 0x2bd   :  { %4965 = vmatpush1.bf16.msra.mxu1 %v4964_v34  ;;  %v4973_v32 = vpack.c.bf16 %v2531_v31, %v2530_v20  ;;  %v2864_v34 = vld [vmem:[%s9073_s7 + $0x1c0] sm:$0xff]  ;;  %v2867_v20 = vld [vmem:[%s9073_s7 + $0x1d8] sm:$0xff] }
 0x2be   :  { %4966 = vmatprep.subr.bf16.mxu1 %v5358_v51  ;;  %v5030_v28 = vpack.c.bf16 %v2865_v27, %v2864_v34  ;;  %v3019_v31 = vld [vmem:[%s9073_s7 + $0x280] sm:$0xff] }
 0x2bf   :  { %v5066_v39 = vpack.c.bf16 %v3020_v38, %v3019_v31 }
 0x2c1   :  { %4968 = vmatpush1.bf16.msra.mxu1 %v4967_v15  ;;  %v7867_v59 = vld [vmem:[#allocation6 + $0x8] sm:$0xff]  ;;  %v3017_v15 = vld [vmem:[%s9073_s7 + $0x270] sm:$0xff] }
 0x2c2   :  { %4969 = vmatprep.subr.bf16.mxu1 %v5358_v51  ;;  %4192 = vmatprep.mubr.msk.f32.mxu1 %vm1572_vm2, %v7867_v59  ;;  %v5063_v25 = vpack.c.bf16 %v3018_v35, %v3017_v15  ;;  %v2317_v15 = vld [vmem:[#allocation5 + $0x18] sm:$0xff] }
 0x2c3   :  { %4203 = vmatprep.mubr.msk.f32.mxu0 %vm1572_vm2, %v7867_v59 }
 0x2c4   :  { %2786 = vmatmul.mubr.f32.vlgmr.msra.gmra.mrb[56].mxu0 %v2310_v41 }
 0x2c5   :  { %4971 = vmatpush1.bf16.msra.mxu1 %v4970_v3  ;;  %5046 = vmatpush1.bf16.msra.mxu0 %v5045_v0  ;;  %v2866_v3 = vld [vmem:[%s9073_s7 + $0x1d0] sm:$0xff]  ;;  %v3024_v0 = vld [vmem:[%s9073_s7 + $0x2a8] sm:$0xff] }
 0x2c6   :  { %4972 = vmatprep.subr.bf16.mxu1 %v5358_v51  ;;  %5047 = vmatprep.subr.bf16.mxu0 %v5358_v51 }
 0x2c9   :  { %4974 = vmatpush1.bf16.msra.mxu1 %v4973_v32  ;;  %5049 = vmatpush1.bf16.msra.mxu0 %v5048_v2  ;;  %v5033_v32 = vpack.c.bf16 %v2867_v20, %v2866_v3  ;;  %v3026_v2 = vld [vmem:[%s9073_s7 + $0x2b8] sm:$0xff] }
 0x2ca   :  { %4975 = vmatprep.subr.bf16.mxu1 %v5358_v51  ;;  %5050 = vmatprep.subr.bf16.mxu0 %v5358_v51 }
 0x2cd   :  { %4977 = vmatpush1.bf16.msra.mxu1 %v4976_v40  ;;  %5052 = vmatpush1.bf16.msra.mxu0 %v5051_v42  ;;  %v2868_v40 = vld [vmem:[%s9073_s7 + $0x1e0] sm:$0xff] }
 0x2ce   :  { %5011 = vmatprep.subr.bf16.mxu1 %v5358_v51  ;;  %5053 = vmatprep.subr.bf16.mxu0 %v5358_v51 }
 0x2d0   :  { %2632 = vmatmul.mubr.f32.vlgmr.msra.gmra.mrb[62].mxu1 %v2310_v41  ;;  %v2860_v41 = vld [vmem:[%s9073_s7 + $0x1a0] sm:$0xff] }
 0x2d1   :  { %5013 = vmatpush1.bf16.msra.mxu1 %v5012_v58  ;;  %5055 = vmatpush1.bf16.msra.mxu0 %v5054_v53  ;;  %v5024_v36 = vpack.c.bf16 %v2861_v16, %v2860_v41  ;;  %v3023_v58 = vld [vmem:[%s9073_s7 + $0x2a0] sm:$0xff] }
 0x2d2   :  { %5014 = vmatprep.subr.bf16.mxu1 %v5358_v51  ;;  %5056 = vmatprep.subr.bf16.mxu0 %v5358_v51  ;;  %v5072_v63 = vpack.c.bf16 %v3024_v0, %v3023_v58 }
 0x2d5   :  { %5016 = vmatpush1.bf16.msra.mxu1 %v5015_v19  ;;  %5058 = vmatpush1.bf16.msra.mxu0 %v5057_v23  ;;  %v3025_v19 = vld [vmem:[%s9073_s7 + $0x2b0] sm:$0xff] }
 0x2d6   :  { %5017 = vmatprep.subr.bf16.mxu1 %v5358_v51  ;;  %5059 = vmatprep.subr.bf16.mxu0 %v5358_v51  ;;  %v5075_v4 = vpack.c.bf16 %v3026_v2, %v3025_v19 }
 0x2d9   :  { %5019 = vmatpush1.bf16.msra.mxu1 %v5018_v8  ;;  %5061 = vmatpush1.bf16.msra.mxu0 %v5060_v26 }
 0x2da   :  { %5020 = vmatprep.subr.bf16.mxu1 %v5358_v51  ;;  %5062 = vmatprep.subr.bf16.mxu0 %v5358_v51 }
 0x2dd   :  { %5022 = vmatpush1.bf16.msra.mxu1 %v5021_v14  ;;  %5064 = vmatpush1.bf16.msra.mxu0 %v5063_v25 }
 0x2de   :  { %5023 = vmatprep.subr.bf16.mxu1 %v5358_v51  ;;  %5065 = vmatprep.subr.bf16.mxu0 %v5358_v51 }
 0x2e1   :  { %5025 = vmatpush1.bf16.msra.mxu1 %v5024_v36  ;;  %5067 = vmatpush1.bf16.msra.mxu0 %v5066_v39  ;;  %v2327_v39 = vld [vmem:[#allocation5 + $0xe8] sm:$0xff] }
 0x2e2   :  { %5026 = vmatprep.subr.bf16.mxu1 %v5358_v51  ;;  %5068 = vmatprep.subr.bf16.mxu0 %v5358_v51 }
 0x2e5   :  { %5028 = vmatpush1.bf16.msra.mxu1 %v5027_v22 }
 0x2e6   :  { %5029 = vmatprep.subr.bf16.mxu1 %v5358_v51 }
 0x2e9   :  { %5031 = vmatpush1.bf16.msra.mxu1 %v5030_v28 }
 0x2ea   :  { %5032 = vmatprep.subr.bf16.mxu1 %v5358_v51 }
 0x2ed   :  { %5034 = vmatpush1.bf16.msra.mxu1 %v5033_v32 }
 0x2ee   :  { %5035 = vmatprep.subr.bf16.mxu1 %v5358_v51 }
 0x2f0   :  { %v7889_v45 = vpop.f32.mrb[24].mxu1  ;;  %v7891_v46 = vpop.f32.mrb[32].mxu0 }
 0x2f1   :  { %v1544_v47 = vpop.f32.mrb[25].mxu1  ;;  %v1899_v49 = vpop.f32.mrb[33].mxu0 }
 0x2f2   :  { %1577 = vst.msk [vmem:[#allocation5 + $0x28] sm:$0xff] %vm1572_vm2, %v1544_v47  ;;  %1931 = vst.msk [vmem:[#allocation5 + $0x108] sm:$0xff] %vm1572_vm2, %v1899_v49  ;;  %v2869_v47 = vld [vmem:[%s9073_s7 + $0x1e8] sm:$0xff]  ;;  %v3021_v49 = vld [vmem:[%s9073_s7 + $0x290] sm:$0xff] }
 0x2f6   :  { %v7895_v30 = vpop.f32.mrb[26].mxu1  ;;  %v7897_v50 = vpop.f32.mrb[34].mxu0 }
 0x2f7   :  { %v1550_v54 = vpop.f32.mrb[27].mxu1  ;;  %v1905_v55 = vpop.f32.mrb[35].mxu0 }
 0x2f8   :  { %1579 = vst.msk [vmem:[#allocation5 + $0x38] sm:$0xff] %vm1572_vm2, %v1550_v54  ;;  %1933 = vst.msk [vmem:[#allocation5 + $0x118] sm:$0xff] %vm1572_vm2, %v1905_v55  ;;  %v5036_v54 = vpack.c.bf16 %v2869_v47, %v2868_v40  ;;  %v3022_v55 = vld [vmem:[%s9073_s7 + $0x298] sm:$0xff] }
 0x2f9   :  { %v5069_v48 = vpack.c.bf16 %v3022_v55, %v3021_v49 }
 0x2fa   :  { %5037 = vmatpush1.bf16.msra.mxu1 %v5036_v54 }
 0x2fb   :  { %5070 = vmatpush1.bf16.msra.mxu0 %v5069_v48  ;;  %5038 = vmatprep.subr.bf16.mxu1 %v5358_v51  ;;  %v2333_v48 = vld [vmem:[#allocation5 + $0x28] sm:$0xff] }
 0x2fc   :  { %5071 = vmatprep.subr.bf16.mxu0 %v5358_v51 }
 0x2fe   :  { %5040 = vmatpush1.bf16.msra.mxu1 %v5039_v62 }
 0x2ff   :  { %5073 = vmatpush1.bf16.msra.mxu0 %v5072_v63  ;;  %5041 = vmatprep.subr.bf16.mxu1 %v5358_v51 }
 0x300   :  { %5074 = vmatprep.subr.bf16.mxu0 %v5358_v51 }
 0x302   :  { %5043 = vmatpush1.bf16.msra.mxu1 %v5042_v1 }
 0x303   :  { %5076 = vmatpush1.bf16.msra.mxu0 %v5075_v4  ;;  %5077 = vmatprep.subr.bf16.mxu1 %v5358_v51 }
 0x304   :  { %5110 = vmatprep.subr.bf16.mxu0 %v5358_v51 }
 0x333   :  { %v8053_v37 = vpop.f32.mrb[28].mxu1  ;;  %v8055_v61 = vpop.f32.mrb[36].mxu0 }
 0x334   :  { %v1556_v8 = vpop.f32.mrb[29].mxu1  ;;  %v1911_v10 = vpop.f32.mrb[37].mxu0 }
 0x335   :  { %1581 = vst.msk [vmem:[#allocation5 + $0x48] sm:$0xff] %vm1572_vm2, %v1556_v8  ;;  %1935 = vst.msk [vmem:[#allocation5 + $0x128] sm:$0xff] %vm1572_vm2, %v1911_v10 }
 0x337   :  { %v8061_v42 = vpop.f32.mrb[30].mxu1  ;;  %v8063_v52 = vpop.f32.mrb[38].mxu0 }
 0x338   :  { %v1562_v60 = vpop.f32.mrb[31].mxu1  ;;  %v1917_v9 = vpop.f32.mrb[39].mxu0 }
 0x339   :  { %1583 = vst.msk [vmem:[#allocation5 + $0x58] sm:$0xff] %vm1572_vm2, %v1562_v60  ;;  %1937 = vst.msk [vmem:[#allocation5 + $0x138] sm:$0xff] %vm1572_vm2, %v1917_v9 }
 0x33b   :  { %v8067_v14 = vpop.f32.mrb[32].mxu1  ;;  %v8069_v6 = vpop.f32.mrb[40].mxu0 }
 0x33c   :  { %v1568_v53 = vpop.f32.mrb[33].mxu1  ;;  %v1923_v41 = vpop.f32.mrb[41].mxu0 }
 0x33d   :  { %1585 = vst.msk [vmem:[#allocation5 + $0x68] sm:$0xff] %vm1572_vm2, %v1568_v53  ;;  %1939 = vst.msk [vmem:[#allocation5 + $0x148] sm:$0xff] %vm1572_vm2, %v1923_v41 }
 0x33f   :  { %v1708_v16 = vpop.f32.mrb[34].mxu1  ;;  %v8073_v21 = vpop.f32.mrb[42].mxu0 }
 0x340   :  { %v2318_v36 = vadd.f32 %v1708_v16, %v7825_v18  ;;  %v1710_v33 = vpop.f32.mrb[35].mxu1  ;;  %v2241_v23 = vpop.f32.mrb[43].mxu0 }
 0x341   :  { %1750 = vst.msk [vmem:[#allocation5 + $0x78] sm:$0xff] %vm1572_vm2, %v1710_v33  ;;  %2281 = vst.msk [vmem:[#allocation5 + $0x1c8] sm:$0xff] %vm1572_vm2, %v2241_v23 }
 0x342   :  { %v2320_v44 = vadd.f32 %v2318_v36, %v7792_v7 }
 0x343   :  { %v1714_v24 = vpop.f32.mrb[36].mxu1  ;;  %v8079_v5 = vpop.f32.mrb[44].mxu0 }
 0x344   :  { %v8081_v22 = vmax.f32 %v2320_v44, 0.0  ;;  %v2330_v11 = vadd.f32 %v7804_v13, %v1714_v24  ;;  %v1716_v26 = vpop.f32.mrb[37].mxu1  ;;  %v2247_v34 = vpop.f32.mrb[45].mxu0 }
 0x345   :  { %1752 = vst.msk [vmem:[#allocation5 + $0x88] sm:$0xff] %vm1572_vm2, %v1716_v26  ;;  %2283 = vst.msk [vmem:[#allocation5 + $0x1d8] sm:$0xff] %vm1572_vm2, %v2247_v34 }
 0x346   :  { %2324 = vst [vmem:[#allocation6 + $0x10] sm:$0xff] %v8081_v22  ;;  %v2334_v18 = vadd.f32 %v2330_v11, %v7889_v45 }
 0x347   :  { %v8088_v27 = vpop.f32.mrb[38].mxu1  ;;  %v8090_v28 = vpop.f32.mrb[46].mxu0 }
 0x348   :  { %v2315_v35 = vld [vmem:[#allocation5 + $0x78] sm:$0xff]  ;;  %v2336_v25 = vadd.f32 %v2334_v18, %v7792_v7  ;;  %v1722_v3 = vpop.f32.mrb[39].mxu1  ;;  %v2253_v13 = vpop.f32.mrb[47].mxu0 }
 0x349   :  { %v2319_v20 = vadd.f32 %v2317_v15, %v2315_v35  ;;  %1754 = vst.msk [vmem:[#allocation5 + $0x98] sm:$0xff] %vm1572_vm2, %v1722_v3  ;;  %2285 = vst.msk [vmem:[#allocation5 + $0x1e8] sm:$0xff] %vm1572_vm2, %v2253_v13 }
 0x34a   :  { %v8095_v31 = vmax.f32 %v2336_v25, 0.0 }
 0x34b   :  { %v2321_v32 = vadd.f32 %v2319_v20, %v7822_v17  ;;  %v8098_v45 = vpop.f32.mrb[40].mxu1  ;;  %v8100_v38 = vpop.f32.mrb[48].mxu0  ;;  %v2345_v20 = vld [vmem:[#allocation5 + $0xf8] sm:$0xff] }
 0x34c   :  { %2340 = vst [vmem:[#allocation6 + $0x20] sm:$0xff] %v8095_v31  ;;  %v2329_v40 = vld [vmem:[#allocation5 + $0x88] sm:$0xff]  ;;  %v1728_v47 = vpop.f32.mrb[41].mxu1  ;;  %v2259_v49 = vpop.f32.mrb[49].mxu0 }
 0x34d   :  { %v2323_v54 = vmax.f32 %v2321_v32, 0.0  ;;  %v2331_v55 = vadd.f32 %v2329_v40, %v2327_v39  ;;  %1756 = vst.msk [vmem:[#allocation5 + $0xa8] sm:$0xff] %vm1572_vm2, %v1728_v47  ;;  %2287 = vst.msk [vmem:[#allocation5 + $0x1f8] sm:$0xff] %vm1572_vm2, %v2259_v49 }
 0x34f   :  { %2325 = vst.msk [vmem:[#allocation6 + $0x18] sm:$0xff] %vm1572_vm2, %v2323_v54  ;;  %v2335_v56 = vadd.f32 %v2333_v48, %v2331_v55  ;;  %v8106_v57 = vpop.f32.mrb[42].mxu1  ;;  %v8108_v58 = vpop.f32.mrb[50].mxu0  ;;  %v2353_v55 = vld [vmem:[#allocation5 + $0x38] sm:$0xff]  ;;  %v2363_v48 = vld [vmem:[#allocation5 + $0x1c8] sm:$0xff] }
 0x350   :  { %v1734_v62 = vpop.f32.mrb[43].mxu1  ;;  %v2265_v0 = vpop.f32.mrb[51].mxu0 }
 0x351   :  { %v2337_v63 = vadd.f32 %v2335_v56, %v7822_v17  ;;  %1758 = vst.msk [vmem:[#allocation5 + $0xb8] sm:$0xff] %vm1572_vm2, %v1734_v62  ;;  %2289 = vst.msk [vmem:[#allocation5 + $0x208] sm:$0xff] %vm1572_vm2, %v2265_v0 }
 0x353   :  { %v2339_v29 = vmax.f32 %v2337_v63, 0.0  ;;  %v8113_v43 = vpop.f32.mrb[44].mxu1  ;;  %v8115_v19 = vpop.f32.mrb[52].mxu0 }
 0x354   :  { %v1740_v1 = vpop.f32.mrb[45].mxu1  ;;  %v2271_v2 = vpop.f32.mrb[53].mxu0 }
 0x355   :  { %2341 = vst.msk [vmem:[#allocation6 + $0x28] sm:$0xff] %vm1572_vm2, %v2339_v29  ;;  %1760 = vst.msk [vmem:[#allocation5 + $0xc8] sm:$0xff] %vm1572_vm2, %v1740_v1  ;;  %v2369_v1 = vld [vmem:[#allocation5 + $0x108] sm:$0xff] }
 0x356   :  { %2291 = vst.msk [vmem:[#allocation5 + $0x218] sm:$0xff] %vm1572_vm2, %v2271_v2  ;;  %v8120_v4 = vld [vmem:[#allocation6 + $0x18] sm:$0xff] }
 0x357   :  { %v8122_v8 = vpop.f32.mrb[46].mxu1  ;;  %v2275_v10 = vpop.f32.mrb[54].mxu0  ;;  %4193 = vmatprep.mubr.msk.f32.mxu1 %vm1572_vm2, %v8120_v4  ;;  %4204 = vmatprep.mubr.msk.f32.mxu0 %vm1572_vm2, %v8120_v4 }
 0x358   :  { %v2484_v60 = vadd.f32 %v7792_v7, %v2275_v10  ;;  %v1746_v9 = vpop.f32.mrb[47].mxu1  ;;  %v2277_v53 = vpop.f32.mrb[55].mxu0  ;;  %2637 = vmatmul.mubr.f32.gmra.mrb[64].mxu1 %v8081_v22  ;;  %2791 = vmatmul.mubr.f32.gmra.mrb[58].mxu0 %v8081_v22 }
 0x359   :  { %1762 = vst.msk [vmem:[#allocation5 + $0xd8] sm:$0xff] %vm1572_vm2, %v1746_v9  ;;  %2293 = vst.msk [vmem:[#allocation5 + $0x228] sm:$0xff] %vm1572_vm2, %v2277_v53  ;;  %v2387_v53 = vld [vmem:[#allocation5 + $0x1d8] sm:$0xff] }
 0x35a   :  { %v8133_v41 = vmax.f32 %v2484_v60, 0.0 }
 0x35c   :  { %2488 = vst [vmem:[#allocation6 + $0xa0] sm:$0xff] %v8133_v41  ;;  %v8136_v16 = vld [vmem:[#allocation6 + $0x28] sm:$0xff] }
 0x35d   :  { %4194 = vmatprep.mubr.msk.f32.mxu1 %vm1572_vm2, %v8136_v16  ;;  %4205 = vmatprep.mubr.msk.f32.mxu0 %vm1572_vm2, %v8136_v16 }
 0x35e   :  { %2642 = vmatmul.mubr.f32.gmra.mrb[66].mxu1 %v8095_v31  ;;  %2796 = vmatmul.mubr.f32.gmra.mrb[60].mxu0 %v8095_v31 }
 0x360   :  { %v2483_v36 = vld [vmem:[#allocation5 + $0x228] sm:$0xff] }
 0x361   :  { %v2485_v33 = vadd.f32 %v2483_v36, %v7822_v17 }
 0x363   :  { %v2487_v23 = vmax.f32 %v2485_v33, 0.0 }
 0x365   :  { %2489 = vst.msk [vmem:[#allocation6 + $0xa8] sm:$0xff] %vm1572_vm2, %v2487_v23 }
 0x377   :  { %v2062_v44 = vpop.f32.mrb[48].mxu1 }
 0x378   :  { %v2346_v24 = vadd.f32 %v2062_v44, %v7827_v12  ;;  %v2064_v11 = vpop.f32.mrb[49].mxu1 }
 0x379   :  { %2104 = vst.msk [vmem:[#allocation5 + $0x158] sm:$0xff] %vm1572_vm2, %v2064_v11 }
 0x37a   :  { %v2350_v26 = vadd.f32 %v2346_v24, %v8088_v27 }
 0x37b   :  { %v2068_v34 = vpop.f32.mrb[50].mxu1 }
 0x37c   :  { %v2354_v18 = vadd.f32 %v2350_v26, %v7895_v30  ;;  %v2366_v15 = vadd.f32 %v8073_v21, %v2068_v34  ;;  %v2070_v35 = vpop.f32.mrb[51].mxu1  ;;  %v2349_v21 = vld [vmem:[#allocation5 + $0x98] sm:$0xff] }
 0x37d   :  { %2106 = vst.msk [vmem:[#allocation5 + $0x168] sm:$0xff] %vm1572_vm2, %v2070_v35 }
 0x37e   :  { %v2356_v25 = vadd.f32 %v2354_v18, %v7792_v7  ;;  %v2370_v3 = vadd.f32 %v2366_v15, %v7891_v46 }
 0x37f   :  { %v2074_v13 = vpop.f32.mrb[52].mxu1 }
 0x380   :  { %v8154_v12 = vmax.f32 %v2356_v25, 0.0  ;;  %v2343_v32 = vld [vmem:[#allocation5 + $0x158] sm:$0xff]  ;;  %v2374_v39 = vadd.f32 %v2370_v3, %v8098_v45  ;;  %v2390_v27 = vadd.f32 %v8079_v5, %v2074_v13  ;;  %v2076_v40 = vpop.f32.mrb[53].mxu1 }
 0x381   :  { %v2347_v30 = vadd.f32 %v2345_v20, %v2343_v32  ;;  %2108 = vst.msk [vmem:[#allocation5 + $0x178] sm:$0xff] %vm1572_vm2, %v2076_v40  ;;  %v2397_v3 = vld [vmem:[#allocation5 + $0xb8] sm:$0xff] }
 0x382   :  { %2360 = vst [vmem:[#allocation6 + $0x30] sm:$0xff] %v8154_v12  ;;  %v2378_v47 = vadd.f32 %v2374_v39, %v8053_v37  ;;  %v2394_v46 = vadd.f32 %v2390_v27, %v7897_v50 }
 0x383   :  { %v2351_v49 = vadd.f32 %v2349_v21, %v2347_v30  ;;  %v2080_v54 = vpop.f32.mrb[54].mxu1  ;;  %v2401_v21 = vld [vmem:[#allocation5 + $0x58] sm:$0xff] }
 0x384   :  { %v2380_v56 = vadd.f32 %v2378_v47, %v7792_v7  ;;  %v2365_v45 = vld [vmem:[#allocation5 + $0x168] sm:$0xff]  ;;  %v2398_v5 = vadd.f32 %v2394_v46, %v8106_v57  ;;  %v2414_v62 = vadd.f32 %v8090_v28, %v2080_v54  ;;  %v2082_v0 = vpop.f32.mrb[55].mxu1 }
 0x385   :  { %v2355_v63 = vadd.f32 %v2353_v55, %v2351_v49  ;;  %v2367_v29 = vadd.f32 %v2365_v45, %v2363_v48  ;;  %2110 = vst.msk [vmem:[#allocation5 + $0x188] sm:$0xff] %vm1572_vm2, %v2082_v0  ;;  %v2373_v57 = vld [vmem:[#allocation5 + $0xa8] sm:$0xff] }
 0x386   :  { %v8166_v37 = vmax.f32 %v2380_v56, 0.0  ;;  %v2402_v50 = vadd.f32 %v2398_v5, %v8061_v42  ;;  %v2418_v2 = vadd.f32 %v2414_v62, %v8055_v61  ;;  %v2393_v61 = vld [vmem:[#allocation5 + $0x118] sm:$0xff]  ;;  %v2377_v42 = vld [vmem:[#allocation5 + $0x48] sm:$0xff] }
 0x387   :  { %v2357_v10 = vadd.f32 %v2355_v63, %v7822_v17  ;;  %v2371_v60 = vadd.f32 %v2369_v1, %v2367_v29  ;;  %v2086_v9 = vpop.f32.mrb[56].mxu1  ;;  %v2421_v56 = vld [vmem:[#allocation5 + $0xc8] sm:$0xff] }
 0x388   :  { %v2404_v28 = vadd.f32 %v2402_v50, %v7792_v7  ;;  %v2389_v36 = vld [vmem:[#allocation5 + $0x178] sm:$0xff]  ;;  %v2422_v33 = vadd.f32 %v2418_v2, %v8113_v43  ;;  %v2438_v23 = vadd.f32 %v8100_v38, %v2086_v9  ;;  %v2088_v44 = vpop.f32.mrb[57].mxu1  ;;  %v2411_v38 = vld [vmem:[#allocation5 + $0x1e8] sm:$0xff] }
 0x389   :  { %v2359_v24 = vmax.f32 %v2357_v10, 0.0  ;;  %v2375_v11 = vadd.f32 %v2373_v57, %v2371_v60  ;;  %v2391_v26 = vadd.f32 %v2389_v36, %v2387_v53  ;;  %2112 = vst.msk [vmem:[#allocation5 + $0x198] sm:$0xff] %vm1572_vm2, %v2088_v44  ;;  %v2441_v50 = vld [vmem:[#allocation5 + $0x138] sm:$0xff]  ;;  %v2425_v2 = vld [vmem:[#allocation5 + $0x68] sm:$0xff] }
 0x38a   :  { %v8175_v34 = vmax.f32 %v2404_v28, 0.0  ;;  %v2426_v18 = vadd.f32 %v2422_v33, %v8067_v14  ;;  %v2442_v15 = vadd.f32 %v2438_v23, %v8063_v52  ;;  %v2417_v52 = vld [vmem:[#allocation5 + $0x128] sm:$0xff]  ;;  %v2445_v36 = vld [vmem:[#allocation5 + $0xd8] sm:$0xff] }
 0x38b   :  { %2361 = vst.msk [vmem:[#allocation6 + $0x38] sm:$0xff] %vm1572_vm2, %v2359_v24  ;;  %v2379_v35 = vadd.f32 %v2377_v42, %v2375_v11  ;;  %v2395_v43 = vadd.f32 %v2393_v61, %v2391_v26  ;;  %v2092_v25 = vpop.f32.mrb[58].mxu1  ;;  %v2455_v28 = vld [vmem:[#allocation5 + $0x208] sm:$0xff] }
 0x38c   :  { %v2428_v13 = vadd.f32 %v2426_v18, %v7792_v7  ;;  %v2413_v20 = vld [vmem:[#allocation5 + $0x188] sm:$0xff]  ;;  %v2446_v32 = vadd.f32 %v2442_v15, %v8122_v8  ;;  %v2458_v39 = vadd.f32 %v8108_v58, %v2092_v25  ;;  %v2094_v27 = vpop.f32.mrb[59].mxu1  ;;  %v2435_v58 = vld [vmem:[#allocation5 + $0x1f8] sm:$0xff] }
 0x38d   :  { %v2381_v40 = vadd.f32 %v2379_v35, %v7822_v17  ;;  %v2399_v14 = vadd.f32 %v2397_v3, %v2395_v43  ;;  %v2415_v30 = vadd.f32 %v2413_v20, %v2411_v38  ;;  %2114 = vst.msk [vmem:[#allocation5 + $0x1a8] sm:$0xff] %vm1572_vm2, %v2094_v27  ;;  %v2461_v11 = vld [vmem:[#allocation5 + $0x148] sm:$0xff]  ;;  %v2471_v15 = vld [vmem:[#allocation5 + $0x218] sm:$0xff] }
 0x38e   :  { %v8185_v47 = vmax.f32 %v2428_v13, 0.0  ;;  %v2448_v46 = vadd.f32 %v2446_v32, %v7792_v7  ;;  %v2462_v49 = vadd.f32 %v2458_v39, %v8069_v6 }
 0x38f   :  { %v2383_v54 = vmax.f32 %v2381_v40, 0.0  ;;  %v2403_v55 = vadd.f32 %v2401_v21, %v2399_v14  ;;  %v2419_v8 = vadd.f32 %v2417_v52, %v2415_v30  ;;  %v2098_v48 = vpop.f32.mrb[60].mxu1  ;;  %v8231_v40 = vld [vmem:[%s9075_s8] ss:$0 sm:$0xff] }
 0x390   :  { %v8189_v45 = vmax.f32 %v2448_v46, 0.0  ;;  %v2437_v5 = vld [vmem:[#allocation5 + $0x198] sm:$0xff]  ;;  %v2464_v62 = vadd.f32 %v2462_v49, %v7792_v7  ;;  %v2474_v0 = vadd.f32 %v8115_v19, %v2098_v48  ;;  %v2100_v63 = vpop.f32.mrb[61].mxu1 }
 0x391   :  { %2385 = vst.msk [vmem:[#allocation6 + $0x48] sm:$0xff] %vm1572_vm2, %v2383_v54  ;;  %v2405_v29 = vadd.f32 %v2403_v55, %v7822_v17  ;;  %v2423_v1 = vadd.f32 %v2421_v56, %v2419_v8  ;;  %v2439_v6 = vadd.f32 %v2437_v5, %v2435_v58  ;;  %2116 = vst.msk [vmem:[#allocation5 + $0x1b8] sm:$0xff] %vm1572_vm2, %v2100_v63  ;;  %v8275_v5 = vld [vmem:[#allocation6 + $0xa8] sm:$0xff]  ;;  %v3158_v63 = vld [vmem:[%s9073_s7 + $0x2c0] sm:$0xff] }
 0x392   :  { %v8196_v10 = vmax.f32 %v2464_v62, 0.0  ;;  %v2476_v60 = vadd.f32 %v2474_v0, %v7792_v7  ;;  %v8199_v9 = vld [vmem:[#allocation6 + $0x38] sm:$0xff] }
 0x393   :  { %v2407_v53 = vmax.f32 %v2405_v29, 0.0  ;;  %v2427_v57 = vadd.f32 %v2425_v2, %v2423_v1  ;;  %v2443_v19 = vadd.f32 %v2441_v50, %v2439_v6  ;;  %4195 = vmatprep.mubr.msk.f32.mxu1 %vm1572_vm2, %v8199_v9  ;;  %4206 = vmatprep.mubr.msk.f32.mxu0 %vm1572_vm2, %v8199_v9  ;;  %v3159_v29 = vld [vmem:[%s9073_s7 + $0x2c8] sm:$0xff]  ;;  %v3311_v6 = vld [vmem:[%s9073_s7 + $0x370] sm:$0xff]  ;;  %v3312_v50 = vld [vmem:[%s9073_s7 + $0x378] sm:$0xff] }
 0x394   :  { %v2457_v33 = vld [vmem:[#allocation5 + $0x1a8] sm:$0xff]  ;;  %v8205_v23 = vmax.f32 %v2476_v60, 0.0  ;;  %2647 = vmatmul.mubr.f32.gmra.mrb[68].mxu1 %v8154_v12  ;;  %2801 = vmatmul.mubr.f32.gmra.mrb[62].mxu0 %v8154_v12  ;;  %v5078_v2 = vpack.c.bf16 %v3159_v29, %v3158_v63  ;;  %v5111_v60 = vpack.c.bf16 %v3312_v50, %v3311_v6  ;;  %v3171_v63 = vld [vmem:[%s9073_s7 + $0x328] sm:$0xff] }
 0x395   :  { %2409 = vst.msk [vmem:[#allocation6 + $0x58] sm:$0xff] %vm1572_vm2, %v2407_v53  ;;  %v2429_v7 = vadd.f32 %v2427_v57, %v7822_v17  ;;  %v2447_v44 = vadd.f32 %v2445_v36, %v2443_v19  ;;  %v2459_v24 = vadd.f32 %v2457_v33, %v2455_v28  ;;  %v3160_v53 = vld [vmem:[%s9073_s7 + $0x2d0] sm:$0xff]  ;;  %v3161_v57 = vld [vmem:[%s9073_s7 + $0x2d8] sm:$0xff]  ;;  %v3313_v19 = vld [vmem:[%s9073_s7 + $0x380] sm:$0xff] }
 0x396   :  { %v3314_v28 = vld [vmem:[%s9073_s7 + $0x388] sm:$0xff]  ;;  %v8311_v36 = vld [vmem:[#allocation6] sm:$0xff]  ;;  %v3324_v6 = vld [vmem:[%s9073_s7 + $0x3d8] sm:$0xff] }
 0x397   :  { %v2431_v26 = vmax.f32 %v2429_v7, 0.0  ;;  %v2449_v61 = vadd.f32 %v2447_v44, %v7822_v17  ;;  %v2463_v42 = vadd.f32 %v2461_v11, %v2459_v24  ;;  %v2787_v18 = vpop.f32.mrb[56].mxu0  ;;  %v5114_v33 = vpack.c.bf16 %v3314_v28, %v3313_v19  ;;  %v3162_v7 = vld [vmem:[%s9073_s7 + $0x2e0] sm:$0xff]  ;;  %v3163_v44 = vld [vmem:[%s9073_s7 + $0x2e8] sm:$0xff]  ;;  %v3315_v24 = vld [vmem:[%s9073_s7 + $0x390] sm:$0xff] }
 0x398   :  { %v2473_v35 = vld [vmem:[#allocation5 + $0x1b8] sm:$0xff]  ;;  %2841 = vst.msk [vmem:[#allocation7 + $0x58] sm:$0xff] %vm2687_vm3, %v2787_v18  ;;  %v2789_v25 = vpop.f32.mrb[57].mxu0  ;;  %v3316_v11 = vld [vmem:[%s9073_s7 + $0x398] sm:$0xff]  ;;  %v3164_v18 = vld [vmem:[%s9073_s7 + $0x2f0] sm:$0xff] }
 0x399   :  { %v8212_v43 = vld [vmem:[#allocation6 + $0x48] sm:$0xff]  ;;  %2433 = vst.msk [vmem:[#allocation6 + $0x68] sm:$0xff] %vm1572_vm2, %v2431_v26  ;;  %v2451_v38 = vmax.f32 %v2449_v61, 0.0  ;;  %v2465_v3 = vadd.f32 %v2463_v42, %v7822_v17  ;;  %v2475_v13 = vadd.f32 %v2473_v35, %v2471_v15  ;;  %v5084_v26 = vpack.c.bf16 %v3163_v44, %v3162_v7  ;;  %v3165_v15 = vld [vmem:[%s9073_s7 + $0x2f8] sm:$0xff]  ;;  %v3327_v44 = vld [vmem:[%s9073_s7 + $0x3f0] sm:$0xff] }
 0x39a   :  { %4196 = vmatprep.mubr.msk.f32.mxu1 %vm1572_vm2, %v8212_v43  ;;  %4207 = vmatprep.mubr.msk.f32.mxu0 %vm1572_vm2, %v8212_v43  ;;  %v5117_v42 = vpack.c.bf16 %v3316_v11, %v3315_v24  ;;  %v3326_v19 = vld [vmem:[%s9073_s7 + $0x3e8] sm:$0xff]  ;;  %v3328_v24 = vld [vmem:[%s9073_s7 + $0x3f8] sm:$0xff] }
 0x39b   :  { %2652 = vmatmul.mubr.f32.gmra.mrb[70].mxu1 %v8166_v37  ;;  %2806 = vmatmul.mubr.f32.gmra.mrb[64].mxu0 %v8166_v37  ;;  %2453 = vst.msk [vmem:[#allocation6 + $0x78] sm:$0xff] %vm1572_vm2, %v2451_v38  ;;  %v2467_v20 = vmax.f32 %v2465_v3, 0.0  ;;  %v2477_v32 = vadd.f32 %v2475_v13, %v7822_v17  ;;  %v3317_v38 = vld [vmem:[%s9073_s7 + $0x3a0] sm:$0xff]  ;;  %v3318_v3 = vld [vmem:[%s9073_s7 + $0x3a8] sm:$0xff]  ;;  %v5087_v13 = vpack.c.bf16 %v3165_v15, %v3164_v18 }
 0x39c   :  { %v8225_v39 = vld [vmem:[#allocation6 + $0x58] sm:$0xff]  ;;  %v3175_v7 = vld [vmem:[%s9073_s7 + $0x348] sm:$0xff]  ;;  %v3329_v18 = vld [vmem:[%s9073_s7 + $0x400] sm:$0xff] }
 0x39d   :  { %2469 = vst.msk [vmem:[#allocation6 + $0x88] sm:$0xff] %vm1572_vm2, %v2467_v20  ;;  %v2479_v27 = vmax.f32 %v2477_v32, 0.0  ;;  %4197 = vmatprep.mubr.msk.f32.mxu1 %vm1572_vm2, %v8225_v39  ;;  %4208 = vmatprep.mubr.msk.f32.mxu0 %vm1572_vm2, %v8225_v39  ;;  %v5120_v20 = vpack.c.bf16 %v3318_v3, %v3317_v38  ;;  %v3166_v32 = vld [vmem:[%s9073_s7 + $0x300] sm:$0xff]  ;;  %v3330_v15 = vld [vmem:[%s9073_s7 + $0x408] sm:$0xff] }
 0x39e   :  { %v3178_v38 = vld [vmem:[%s9073_s7 + $0x360] sm:$0xff]  ;;  %v3179_v3 = vld [vmem:[%s9073_s7 + $0x368] sm:$0xff] }
 0x39f   :  { %2657 = vmatmul.mubr.f32.gmra.mrb[72].mxu1 %v8175_v34  ;;  %2811 = vmatmul.mubr.f32.gmra.mrb[66].mxu0 %v8175_v34  ;;  %2481 = vst.msk [vmem:[#allocation6 + $0x98] sm:$0xff] %vm1572_vm2, %v2479_v27  ;;  %v3786_v17 = vld [vmem:[#allocation7 + $0x58] sm:$0xff] }
 0x3a0   :  { %v3787_v14 = vadd.f32 %v8231_v40, %v3786_v17  ;;  %v8241_v30 = vld [vmem:[#allocation6 + $0x68] sm:$0xff]  ;;  %v3319_v17 = vld [vmem:[%s9073_s7 + $0x3b0] sm:$0xff] }
 0x3a1   :  { %4198 = vmatprep.mubr.msk.f32.mxu1 %vm1572_vm2, %v8241_v30  ;;  %4209 = vmatprep.mubr.msk.f32.mxu0 %vm1572_vm2, %v8241_v30  ;;  %v3167_v27 = vld [vmem:[%s9073_s7 + $0x308] sm:$0xff] }
 0x3a2   :  { %v3788_v52 = vsub.f32 0.0, %v3787_v14  ;;  %v8249_v21 = vld [vmem:[#allocation6 + $0x78] sm:$0xff] }
 0x3a3   :  { %2662 = vmatmul.mubr.f32.gmra.mrb[74].mxu1 %v8185_v47  ;;  %2816 = vmatmul.mubr.f32.gmra.mrb[68].mxu0 %v8185_v47  ;;  %v2633_v46 = vpop.f32.mrb[62].mxu1  ;;  %v3320_v14 = vld [vmem:[%s9073_s7 + $0x3b8] sm:$0xff] }
 0x3a4   :  { %4199 = vmatprep.mubr.msk.f32.mxu1 %vm1572_vm2, %v8249_v21  ;;  %4210 = vmatprep.mubr.msk.f32.mxu0 %vm1572_vm2, %v8249_v21  ;;  %v3789_v49 = vmul.f32 1.442695, %v3788_v52  ;;  %2688 = vst.msk [vmem:[#allocation7] sm:$0xff] %vm2687_vm3, %v2633_v46  ;;  %v2635_v54 = vpop.f32.mrb[63].mxu1  ;;  %v8258_v55 = vld [vmem:[#allocation6 + $0x88] sm:$0xff]  ;;  %v5090_v52 = vpack.c.bf16 %v3167_v27, %v3166_v32  ;;  %v5123_v46 = vpack.c.bf16 %v3320_v14, %v3319_v17  ;;  %v3464_v17 = vld [vmem:[%s9073_s7 + $0x420] sm:$0xff] }
 0x3a5   :  { %v3169_v54 = vld [vmem:[%s9073_s7 + $0x318] sm:$0xff]  ;;  %v5108_v32 = vpack.c.bf16 %v3179_v3, %v3178_v38  ;;  %v3465_v14 = vld [vmem:[%s9073_s7 + $0x428] sm:$0xff]  ;;  %v3478_v3 = vld [vmem:[%s9073_s7 + $0x490] sm:$0xff] }
 0x3a6   :  { %5233 = vpow2.f32 %v3789_v49  ;;  %v8266_v8 = vld [vmem:[#allocation6 + $0x98] sm:$0xff]  ;;  %v3168_v49 = vld [vmem:[%s9073_s7 + $0x310] sm:$0xff] }
 0x3a7   :  { %2667 = vmatmul.mubr.f32.gmra.mrb[76].mxu1 %v8189_v45  ;;  %2821 = vmatmul.mubr.f32.gmra.mrb[70].mxu0 %v8189_v45 }
 0x3a8   :  { %4200 = vmatprep.mubr.msk.f32.mxu1 %vm1572_vm2, %v8258_v55  ;;  %4211 = vmatprep.mubr.msk.f32.mxu0 %vm1572_vm2, %v8258_v55 }
 0x3ab   :  { %2672 = vmatmul.mubr.f32.gmra.mrb[78].mxu1 %v8196_v10  ;;  %2826 = vmatmul.mubr.f32.gmra.mrb[72].mxu0 %v8196_v10  ;;  %v3771_v48 = vld [vmem:[#allocation7] sm:$0xff] }
 0x3ac   :  { %4201 = vmatprep.mubr.msk.f32.mxu1 %vm1572_vm2, %v8266_v8  ;;  %4212 = vmatprep.mubr.msk.f32.mxu0 %vm1572_vm2, %v8266_v8  ;;  %v3778_v58 = vadd.f32 %v8231_v40, %v3771_v48  ;;  %v3321_v48 = vld [vmem:[%s9073_s7 + $0x3c0] sm:$0xff] }
 0x3ae   :  { %v3779_v56 = vsub.f32 0.0, %v3778_v58  ;;  %v3322_v58 = vld [vmem:[%s9073_s7 + $0x3c8] sm:$0xff] }
 0x3af   :  { %2677 = vmatmul.mubr.f32.gmra.mrb[80].mxu1 %v8205_v23  ;;  %2831 = vmatmul.mubr.f32.gmra.mrb[74].mxu0 %v8205_v23 }
 0x3b0   :  { %4202 = vmatprep.mubr.msk.f32.mxu1 %vm1572_vm2, %v8275_v5  ;;  %4213 = vmatprep.mubr.msk.f32.mxu0 %vm1572_vm2, %v8275_v5  ;;  %v5234_v62 = vpop.eup %5233  ;;  %v3780_v0 = vmul.f32 1.442695, %v3779_v56  ;;  %v5093_v56 = vpack.c.bf16 %v3169_v54, %v3168_v49  ;;  %v8523_v49 = vld [vmem:[#allocation6 + $0x8] sm:$0xff]  ;;  %v5144_v54 = vpack.c.bf16 %v3465_v14, %v3464_v17  ;;  %v3480_v14 = vld [vmem:[%s9073_s7 + $0x4a0] sm:$0xff] }
 0x3b1   :  { %v3791_v1 = vadd.f32 1.0, %v5234_v62  ;;  %v5126_v62 = vpack.c.bf16 %v3322_v58, %v3321_v48  ;;  %v3467_v48 = vld [vmem:[%s9073_s7 + $0x438] sm:$0xff] }
 0x3b2   :  { %5235 = vpow2.f32 %v3780_v0  ;;  %v3170_v0 = vld [vmem:[%s9073_s7 + $0x320] sm:$0xff] }
 0x3b3   :  { %2682 = vmatmul.mubr.f32.gmra.mrb[82].mxu1 %v8133_v41  ;;  %2836 = vmatmul.mubr.f32.gmra.mrb[76].mxu0 %v8133_v41  ;;  %5237 = vrcp.f32 %v3791_v1  ;;  %v3323_v1 = vld [vmem:[%s9073_s7 + $0x3d0] sm:$0xff]  ;;  %v5096_v50 = vpack.c.bf16 %v3171_v63, %v3170_v0  ;;  %v3468_v63 = vld [vmem:[%s9073_s7 + $0x440] sm:$0xff] }
 0x3b4   :  { %4214 = vmatprep.mubr.msk.f32.mxu1 %vm1572_vm2, %v7867_v59  ;;  %4225 = vmatprep.mubr.msk.f32.mxu0 %vm1572_vm2, %v7867_v59  ;;  %v5081_v59 = vpack.c.bf16 %v3161_v57, %v3160_v53  ;;  %v3173_v53 = vld [vmem:[%s9073_s7 + $0x338] sm:$0xff]  ;;  %v3325_v57 = vld [vmem:[%s9073_s7 + $0x3e0] sm:$0xff] }
 0x3b7   :  { %2939 = vmatmul.mubr.f32.vlgmr.msra.gmra.mrb[84].mxu1 %v8311_v36  ;;  %3092 = vmatmul.mubr.f32.vlgmr.msra.gmra.mrb[78].mxu0 %v8311_v36 }
 0x3b8   :  { %5079 = vmatpush1.bf16.msra.mxu1 %v5078_v2  ;;  %4215 = vmatprep.mubr.msk.f32.mxu1 %vm1572_vm2, %v8120_v4  ;;  %v5129_v2 = vpack.c.bf16 %v3324_v6, %v3323_v1  ;;  %v3622_v6 = vld [vmem:[%s9073_s7 + $0x4f8] sm:$0xff] }
 0x3b9   :  { %4226 = vmatprep.mubr.msk.f32.mxu0 %vm1572_vm2, %v8120_v4  ;;  %5112 = vmatpush1.bf16.msra.mxu0 %v5111_v60  ;;  %v3172_v60 = vld [vmem:[%s9073_s7 + $0x330] sm:$0xff] }
 0x3ba   :  { %5080 = vmatprep.subr.bf16.mxu1 %v5358_v51  ;;  %5113 = vmatprep.subr.bf16.mxu0 %v5358_v51  ;;  %v5099_v28 = vpack.c.bf16 %v3173_v53, %v3172_v60  ;;  %v3471_v60 = vld [vmem:[%s9073_s7 + $0x458] sm:$0xff]  ;;  %v3624_v53 = vld [vmem:[%s9073_s7 + $0x508] sm:$0xff] }
 0x3bb   :  { %2944 = vmatmul.mubr.f32.gmra.mrb[86].mxu1 %v8081_v22  ;;  %3097 = vmatmul.mubr.f32.gmra.mrb[80].mxu0 %v8081_v22 }
 0x3bc   :  { %5082 = vmatpush1.bf16.msra.mxu1 %v5081_v59  ;;  %4216 = vmatprep.mubr.msk.f32.mxu1 %vm1572_vm2, %v8136_v16  ;;  %v5236_v61 = vpop.eup %5235  ;;  %v5132_v59 = vpack.c.bf16 %v3326_v19, %v3325_v57  ;;  %v3472_v19 = vld [vmem:[%s9073_s7 + $0x460] sm:$0xff] }
 0x3bd   :  { %4227 = vmatprep.mubr.msk.f32.mxu0 %vm1572_vm2, %v8136_v16  ;;  %5115 = vmatpush1.bf16.msra.mxu0 %v5114_v33  ;;  %v5238_v35 = vpop.eup %5237  ;;  %v3782_v25 = vadd.f32 1.0, %v5236_v61  ;;  %v3174_v33 = vld [vmem:[%s9073_s7 + $0x340] sm:$0xff]  ;;  %v3176_v61 = vld [vmem:[%s9073_s7 + $0x350] sm:$0xff] }
 0x3be   :  { %5083 = vmatprep.subr.bf16.mxu1 %v5358_v51  ;;  %5116 = vmatprep.subr.bf16.mxu0 %v5358_v51  ;;  %3794 = vst.msk [vmem:[%s9076_s9 + $0x8] sm:$0xff] %vm2687_vm3, %v5238_v35  ;;  %v5102_v11 = vpack.c.bf16 %v3175_v7, %v3174_v33  ;;  %v3626_v33 = vld [vmem:[%s9073_s7 + $0x518] sm:$0xff] }
 0x3bf   :  { %2949 = vmatmul.mubr.f32.gmra.mrb[88].mxu1 %v8095_v31  ;;  %3102 = vmatmul.mubr.f32.gmra.mrb[82].mxu0 %v8095_v31  ;;  %5239 = vrcp.f32 %v3782_v25  ;;  %v5138_v25 = vpack.c.bf16 %v3330_v15, %v3329_v18  ;;  %v3477_v18 = vld [vmem:[%s9073_s7 + $0x488] sm:$0xff] }
 0x3c0   :  { %5085 = vmatpush1.bf16.msra.mxu1 %v5084_v26  ;;  %4217 = vmatprep.mubr.msk.f32.mxu1 %vm1572_vm2, %v8199_v9  ;;  %v5135_v26 = vpack.c.bf16 %v3328_v24, %v3327_v44  ;;  %v3474_v44 = vld [vmem:[%s9073_s7 + $0x470] sm:$0xff]  ;;  %v3475_v24 = vld [vmem:[%s9073_s7 + $0x478] sm:$0xff] }
 0x3c1   :  { %4228 = vmatprep.mubr.msk.f32.mxu0 %vm1572_vm2, %v8199_v9  ;;  %5118 = vmatpush1.bf16.msra.mxu0 %v5117_v42  ;;  %v3177_v42 = vld [vmem:[%s9073_s7 + $0x358] sm:$0xff] }
 0x3c2   :  { %5086 = vmatprep.subr.bf16.mxu1 %v5358_v51  ;;  %5119 = vmatprep.subr.bf16.mxu0 %v5358_v51  ;;  %v5105_v35 = vpack.c.bf16 %v3177_v42, %v3176_v61  ;;  %v5159_v61 = vpack.c.bf16 %v3475_v24, %v3474_v44  ;;  %v3476_v42 = vld [vmem:[%s9073_s7 + $0x480] sm:$0xff] }
 0x3c3   :  { %2954 = vmatmul.mubr.f32.gmra.mrb[90].mxu1 %v8154_v12  ;;  %3107 = vmatmul.mubr.f32.gmra.mrb[84].mxu0 %v8154_v12  ;;  %v5162_v38 = vpack.c.bf16 %v3477_v18, %v3476_v42 }
 0x3c4   :  { %5088 = vmatpush1.bf16.msra.mxu1 %v5087_v13  ;;  %4218 = vmatprep.mubr.msk.f32.mxu1 %vm1572_vm2, %v8212_v43  ;;  %v3331_v13 = vld [vmem:[%s9073_s7 + $0x410] sm:$0xff] }
 0x3c5   :  { %4229 = vmatprep.mubr.msk.f32.mxu0 %vm1572_vm2, %v8212_v43  ;;  %5121 = vmatpush1.bf16.msra.mxu0 %v5120_v20  ;;  %v3332_v20 = vld [vmem:[%s9073_s7 + $0x418] sm:$0xff] }
 0x3c6   :  { %5089 = vmatprep.subr.bf16.mxu1 %v5358_v51  ;;  %5122 = vmatprep.subr.bf16.mxu0 %v5358_v51  ;;  %v5141_v27 = vpack.c.bf16 %v3332_v20, %v3331_v13  ;;  %v3479_v13 = vld [vmem:[%s9073_s7 + $0x498] sm:$0xff] }
 0x3c7   :  { %2959 = vmatmul.mubr.f32.gmra.mrb[92].mxu1 %v8166_v37  ;;  %3112 = vmatmul.mubr.f32.gmra.mrb[86].mxu0 %v8166_v37  ;;  %v5165_v17 = vpack.c.bf16 %v3479_v13, %v3478_v3 }
 0x3c8   :  { %5091 = vmatpush1.bf16.msra.mxu1 %v5090_v52  ;;  %4219 = vmatprep.mubr.msk.f32.mxu1 %vm1572_vm2, %v8225_v39  ;;  %v3617_v52 = vld [vmem:[%s9073_s7 + $0x4d0] sm:$0xff] }
 0x3c9   :  { %4230 = vmatprep.mubr.msk.f32.mxu0 %vm1572_vm2, %v8225_v39  ;;  %5124 = vmatpush1.bf16.msra.mxu0 %v5123_v46  ;;  %v5240_v29 = vpop.eup %5239  ;;  %v3618_v46 = vld [vmem:[%s9073_s7 + $0x4d8] sm:$0xff] }
 0x3ca   :  { %5092 = vmatprep.subr.bf16.mxu1 %v5358_v51  ;;  %5125 = vmatprep.subr.bf16.mxu0 %v5358_v51  ;;  %3785 = vst.msk [vmem:[%s9076_s9] sm:$0xff] %vm2687_vm3, %v5240_v29  ;;  %v8537_v58 = vpack.c.bf16 %v3618_v46, %v3617_v52  ;;  %v3469_v29 = vld [vmem:[%s9073_s7 + $0x448] sm:$0xff] }
 0x3cb   :  { %2964 = vmatmul.mubr.f32.gmra.mrb[94].mxu1 %v8175_v34  ;;  %3117 = vmatmul.mubr.f32.gmra.mrb[88].mxu0 %v8175_v34  ;;  %v3481_v52 = vld [vmem:[%s9073_s7 + $0x4a8] sm:$0xff] }
 0x3cc   :  { %5094 = vmatpush1.bf16.msra.mxu1 %v5093_v56  ;;  %4220 = vmatprep.mubr.msk.f32.mxu1 %vm1572_vm2, %v8241_v30  ;;  %v3619_v56 = vld [vmem:[%s9073_s7 + $0x4e0] sm:$0xff] }
 0x3cd   :  { %4231 = vmatprep.mubr.msk.f32.mxu0 %vm1572_vm2, %v8241_v30  ;;  %5127 = vmatpush1.bf16.msra.mxu0 %v5126_v62  ;;  %v3620_v62 = vld [vmem:[%s9073_s7 + $0x4e8] sm:$0xff] }
 0x3ce   :  { %5095 = vmatprep.subr.bf16.mxu1 %v5358_v51  ;;  %5128 = vmatprep.subr.bf16.mxu0 %v5358_v51  ;;  %v8559_v1 = vpack.c.bf16 %v3620_v62, %v3619_v56  ;;  %v3482_v56 = vld [vmem:[%s9073_s7 + $0x4b0] sm:$0xff]  ;;  %v3483_v62 = vld [vmem:[%s9073_s7 + $0x4b8] sm:$0xff] }
 0x3cf   :  { %2969 = vmatmul.mubr.f32.gmra.mrb[96].mxu1 %v8185_v47  ;;  %3122 = vmatmul.mubr.f32.gmra.mrb[90].mxu0 %v8185_v47 }
 0x3d0   :  { %5097 = vmatpush1.bf16.msra.mxu1 %v5096_v50  ;;  %4221 = vmatprep.mubr.msk.f32.mxu1 %vm1572_vm2, %v8249_v21  ;;  %v5150_v50 = vpack.c.bf16 %v3469_v29, %v3468_v63  ;;  %v3635_v63 = vld [vmem:[%s9073_s7 + $0x560] sm:$0xff]  ;;  %v3636_v29 = vld [vmem:[%s9073_s7 + $0x568] sm:$0xff] }
 0x3d1   :  { %4232 = vmatprep.mubr.msk.f32.mxu0 %vm1572_vm2, %v8249_v21  ;;  %5130 = vmatpush1.bf16.msra.mxu0 %v5129_v2  ;;  %v3470_v2 = vld [vmem:[%s9073_s7 + $0x450] sm:$0xff] }
 0x3d2   :  { %5098 = vmatprep.subr.bf16.mxu1 %v5358_v51  ;;  %5131 = vmatprep.subr.bf16.mxu0 %v5358_v51  ;;  %v5153_v57 = vpack.c.bf16 %v3471_v60, %v3470_v2  ;;  %v8743_v2 = vpack.c.bf16 %v3636_v29, %v3635_v63  ;;  %v3637_v60 = vld [vmem:[%s9073_s7 + $0x570] sm:$0xff] }
 0x3d3   :  { %2974 = vmatmul.mubr.f32.gmra.mrb[98].mxu1 %v8189_v45  ;;  %3127 = vmatmul.mubr.f32.gmra.mrb[92].mxu0 %v8189_v45 }
 0x3d4   :  { %5100 = vmatpush1.bf16.msra.mxu1 %v5099_v28  ;;  %4222 = vmatprep.mubr.msk.f32.mxu1 %vm1572_vm2, %v8258_v55  ;;  %v3473_v28 = vld [vmem:[%s9073_s7 + $0x468] sm:$0xff] }
 0x3d5   :  { %4233 = vmatprep.mubr.msk.f32.mxu0 %vm1572_vm2, %v8258_v55  ;;  %5133 = vmatpush1.bf16.msra.mxu0 %v5132_v59  ;;  %v3625_v59 = vld [vmem:[%s9073_s7 + $0x510] sm:$0xff]  ;;  %v5156_v7 = vpack.c.bf16 %v3473_v28, %v3472_v19  ;;  %v8762_v19 = vld [vmem:[#allocation6 + $0xa0] sm:$0xff]  ;;  %v5351_v28 = vld [vmem:[#allocation6 + $0x18] sm:$0xff] }
 0x3d6   :  { %5101 = vmatprep.subr.bf16.mxu1 %v5358_v51  ;;  %5134 = vmatprep.subr.bf16.mxu0 %v5358_v51 }
 0x3d7   :  { %2979 = vmatmul.mubr.f32.gmra.mrb[100].mxu1 %v8196_v10  ;;  %3132 = vmatmul.mubr.f32.gmra.mrb[94].mxu0 %v8196_v10 }
 0x3d8   :  { %5103 = vmatpush1.bf16.msra.mxu1 %v5102_v11  ;;  %4223 = vmatprep.mubr.msk.f32.mxu1 %vm1572_vm2, %v8266_v8  ;;  %v3627_v11 = vld [vmem:[%s9073_s7 + $0x520] sm:$0xff] }
 0x3d9   :  { %4234 = vmatprep.mubr.msk.f32.mxu0 %vm1572_vm2, %v8266_v8  ;;  %5136 = vmatpush1.bf16.msra.mxu0 %v5135_v26  ;;  %v3628_v26 = vld [vmem:[%s9073_s7 + $0x528] sm:$0xff] }
 0x3da   :  { %5104 = vmatprep.subr.bf16.mxu1 %v5358_v51  ;;  %5137 = vmatprep.subr.bf16.mxu0 %v5358_v51  ;;  %v8651_v15 = vpack.c.bf16 %v3628_v26, %v3627_v11 }
 0x3db   :  { %2984 = vmatmul.mubr.f32.gmra.mrb[102].mxu1 %v8205_v23  ;;  %3137 = vmatmul.mubr.f32.gmra.mrb[96].mxu0 %v8205_v23 }
 0x3dc   :  { %5106 = vmatpush1.bf16.msra.mxu1 %v5105_v35  ;;  %4224 = vmatprep.mubr.msk.f32.mxu1 %vm1572_vm2, %v8275_v5  ;;  %v3629_v35 = vld [vmem:[%s9073_s7 + $0x530] sm:$0xff] }
 0x3dd   :  { %4235 = vmatprep.mubr.msk.f32.mxu0 %vm1572_vm2, %v8275_v5  ;;  %5139 = vmatpush1.bf16.msra.mxu0 %v5138_v25  ;;  %v3630_v25 = vld [vmem:[%s9073_s7 + $0x538] sm:$0xff] }
 0x3de   :  { %5107 = vmatprep.subr.bf16.mxu1 %v5358_v51  ;;  %5140 = vmatprep.subr.bf16.mxu0 %v5358_v51  ;;  %v8674_v20 = vpack.c.bf16 %v3630_v25, %v3629_v35 }
 0x3df   :  { %2989 = vmatmul.mubr.f32.gmra.mrb[104].mxu1 %v8133_v41  ;;  %3142 = vmatmul.mubr.f32.gmra.mrb[98].mxu0 %v8133_v41  ;;  %v3466_v41 = vld [vmem:[%s9073_s7 + $0x430] sm:$0xff] }
 0x3e0   :  { %5109 = vmatpush1.bf16.msra.mxu1 %v5108_v32  ;;  %4236 = vmatprep.mubr.msk.f32.mxu1 %vm1572_vm2, %v8523_v49  ;;  %v5147_v0 = vpack.c.bf16 %v3467_v48, %v3466_v41  ;;  %v3631_v32 = vld [vmem:[%s9073_s7 + $0x540] sm:$0xff]  ;;  %v3634_v41 = vld [vmem:[%s9073_s7 + $0x558] sm:$0xff]  ;;  %v5168_v48 = vpack.c.bf16 %v3481_v52, %v3480_v14 }
 0x3e1   :  { %5142 = vmatpush1.bf16.msra.mxu0 %v5141_v27  ;;  %4247 = vmatprep.mubr.msk.f32.mxu0 %vm1572_vm2, %v8523_v49  ;;  %v3632_v27 = vld [vmem:[%s9073_s7 + $0x548] sm:$0xff] }
 0x3e2   :  { %5143 = vmatprep.subr.bf16.mxu1 %v5358_v51  ;;  %5176 = vmatprep.subr.bf16.mxu0 %v5358_v51  ;;  %v8697_v46 = vpack.c.bf16 %v3632_v27, %v3631_v32 }
 0x3e3   :  { %3245 = vmatmul.mubr.f32.vlgmr.msra.gmra.mrb[106].mxu1 %v8311_v36 }
 0x3e4   :  { %3398 = vmatmul.mubr.f32.vlgmr.msra.gmra.mrb[100].mxu0 %v8311_v36  ;;  %5145 = vmatpush1.bf16.msra.mxu1 %v5144_v54  ;;  %v3633_v54 = vld [vmem:[%s9073_s7 + $0x550] sm:$0xff] }
 0x3e5   :  { %4237 = vmatprep.mubr.msk.f32.mxu1 %vm1572_vm2, %v8120_v4  ;;  %4248 = vmatprep.mubr.msk.f32.mxu0 %vm1572_vm2, %v8120_v4  ;;  %v3621_v4 = vld [vmem:[%s9073_s7 + $0x4f0] sm:$0xff] }
 0x3e6   :  { %5178 = vmatpush1.bf16.msra.mxu0 %v8537_v58  ;;  %5146 = vmatprep.subr.bf16.mxu1 %v5358_v51 }
 0x3e7   :  { %3250 = vmatmul.mubr.f32.gmra.mrb[108].mxu1 %v8081_v22  ;;  %5179 = vmatprep.subr.bf16.mxu0 %v5358_v51 }
 0x3e8   :  { %3403 = vmatmul.mubr.f32.gmra.mrb[102].mxu0 %v8081_v22  ;;  %5148 = vmatpush1.bf16.msra.mxu1 %v5147_v0  ;;  %v8582_v22 = vpack.c.bf16 %v3622_v6, %v3621_v4  ;;  %v8720_v0 = vpack.c.bf16 %v3634_v41, %v3633_v54  ;;  %v5171_v4 = vpack.c.bf16 %v3483_v62, %v3482_v56  ;;  %v3484_v6 = vld [vmem:[%s9073_s7 + $0x4c0] sm:$0xff] }
 0x3e9   :  { %4238 = vmatprep.mubr.msk.f32.mxu1 %vm1572_vm2, %v8136_v16  ;;  %4249 = vmatprep.mubr.msk.f32.mxu0 %vm1572_vm2, %v8136_v16  ;;  %v3623_v16 = vld [vmem:[%s9073_s7 + $0x500] sm:$0xff] }
 0x3ea   :  { %5181 = vmatpush1.bf16.msra.mxu0 %v8559_v1  ;;  %5149 = vmatprep.subr.bf16.mxu1 %v5358_v51 }
 0x3eb   :  { %3255 = vmatmul.mubr.f32.gmra.mrb[110].mxu1 %v8095_v31  ;;  %5182 = vmatprep.subr.bf16.mxu0 %v5358_v51 }
 0x3ec   :  { %3408 = vmatmul.mubr.f32.gmra.mrb[104].mxu0 %v8095_v31  ;;  %5151 = vmatpush1.bf16.msra.mxu1 %v5150_v50  ;;  %v8605_v31 = vpack.c.bf16 %v3624_v53, %v3623_v16  ;;  %v3485_v50 = vld [vmem:[%s9073_s7 + $0x4c8] sm:$0xff]  ;;  %v3638_v16 = vld [vmem:[%s9073_s7 + $0x578] sm:$0xff] }
 0x3ed   :  { %4239 = vmatprep.mubr.msk.f32.mxu1 %vm1572_vm2, %v8199_v9  ;;  %4250 = vmatprep.mubr.msk.f32.mxu0 %vm1572_vm2, %v8199_v9  ;;  %v5174_v53 = vpack.c.bf16 %v3485_v50, %v3484_v6 }
 0x3ee   :  { %5184 = vmatpush1.bf16.msra.mxu0 %v8582_v22  ;;  %5152 = vmatprep.subr.bf16.mxu1 %v5358_v51 }
 0x3ef   :  { %3260 = vmatmul.mubr.f32.gmra.mrb[112].mxu1 %v8154_v12  ;;  %5185 = vmatprep.subr.bf16.mxu0 %v5358_v51 }
 0x3f0   :  { %3413 = vmatmul.mubr.f32.gmra.mrb[106].mxu0 %v8154_v12  ;;  %5154 = vmatpush1.bf16.msra.mxu1 %v5153_v57  ;;  %v8628_v12 = vpack.c.bf16 %v3626_v33, %v3625_v59  ;;  %v8760_v57 = vpack.c.bf16 %v3638_v16, %v3637_v60  ;;  %v5352_v59 = vld [vmem:[#allocation6 + $0x10] sm:$0xff] }
 0x3f1   :  { %4240 = vmatprep.mubr.msk.f32.mxu1 %vm1572_vm2, %v8212_v43  ;;  %4251 = vmatprep.mubr.msk.f32.mxu0 %vm1572_vm2, %v8212_v43 }
 0x3f2   :  { %5187 = vmatpush1.bf16.msra.mxu0 %v8605_v31  ;;  %5155 = vmatprep.subr.bf16.mxu1 %v5358_v51 }
 0x3f3   :  { %3265 = vmatmul.mubr.f32.gmra.mrb[114].mxu1 %v8166_v37  ;;  %5188 = vmatprep.subr.bf16.mxu0 %v5358_v51 }
 0x3f4   :  { %3418 = vmatmul.mubr.f32.gmra.mrb[108].mxu0 %v8166_v37  ;;  %5157 = vmatpush1.bf16.msra.mxu1 %v5156_v7 }
 0x3f5   :  { %4241 = vmatprep.mubr.msk.f32.mxu1 %vm1572_vm2, %v8225_v39  ;;  %4252 = vmatprep.mubr.msk.f32.mxu0 %vm1572_vm2, %v8225_v39 }
 0x3f6   :  { %5190 = vmatpush1.bf16.msra.mxu0 %v8628_v12  ;;  %5158 = vmatprep.subr.bf16.mxu1 %v5358_v51 }
 0x3f7   :  { %3270 = vmatmul.mubr.f32.gmra.mrb[116].mxu1 %v8175_v34  ;;  %5191 = vmatprep.subr.bf16.mxu0 %v5358_v51 }
 0x3f8   :  { %3423 = vmatmul.mubr.f32.gmra.mrb[110].mxu0 %v8175_v34  ;;  %5160 = vmatpush1.bf16.msra.mxu1 %v5159_v61 }
 0x3f9   :  { %4242 = vmatprep.mubr.msk.f32.mxu1 %vm1572_vm2, %v8241_v30  ;;  %4253 = vmatprep.mubr.msk.f32.mxu0 %vm1572_vm2, %v8241_v30 }
 0x3fa   :  { %5193 = vmatpush1.bf16.msra.mxu0 %v8651_v15  ;;  %5161 = vmatprep.subr.bf16.mxu1 %v5358_v51 }
 0x3fb   :  { %3275 = vmatmul.mubr.f32.gmra.mrb[118].mxu1 %v8185_v47  ;;  %5194 = vmatprep.subr.bf16.mxu0 %v5358_v51 }
 0x3fc   :  { %3428 = vmatmul.mubr.f32.gmra.mrb[112].mxu0 %v8185_v47  ;;  %5163 = vmatpush1.bf16.msra.mxu1 %v5162_v38 }
 0x3fd   :  { %4243 = vmatprep.mubr.msk.f32.mxu1 %vm1572_vm2, %v8249_v21  ;;  %4254 = vmatprep.mubr.msk.f32.mxu0 %vm1572_vm2, %v8249_v21 }
 0x3fe   :  { %5196 = vmatpush1.bf16.msra.mxu0 %v8674_v20  ;;  %5164 = vmatprep.subr.bf16.mxu1 %v5358_v51 }
 0x3ff   :  { %3280 = vmatmul.mubr.f32.gmra.mrb[120].mxu1 %v8189_v45  ;;  %5197 = vmatprep.subr.bf16.mxu0 %v5358_v51 }
 0x400   :  { %3433 = vmatmul.mubr.f32.gmra.mrb[114].mxu0 %v8189_v45  ;;  %5166 = vmatpush1.bf16.msra.mxu1 %v5165_v17 }
 0x401   :  { %4244 = vmatprep.mubr.msk.f32.mxu1 %vm1572_vm2, %v8258_v55  ;;  %4255 = vmatprep.mubr.msk.f32.mxu0 %vm1572_vm2, %v8258_v55 }
 0x402   :  { %5199 = vmatpush1.bf16.msra.mxu0 %v8697_v46  ;;  %5167 = vmatprep.subr.bf16.mxu1 %v5358_v51 }
 0x403   :  { %3285 = vmatmul.mubr.f32.gmra.mrb[122].mxu1 %v8196_v10  ;;  %5200 = vmatprep.subr.bf16.mxu0 %v5358_v51 }
 0x404   :  { %3438 = vmatmul.mubr.f32.gmra.mrb[116].mxu0 %v8196_v10  ;;  %5169 = vmatpush1.bf16.msra.mxu1 %v5168_v48 }
 0x405   :  { %4245 = vmatprep.mubr.msk.f32.mxu1 %vm1572_vm2, %v8266_v8  ;;  %4256 = vmatprep.mubr.msk.f32.mxu0 %vm1572_vm2, %v8266_v8 }
 0x406   :  { %5202 = vmatpush1.bf16.msra.mxu0 %v8720_v0  ;;  %5170 = vmatprep.subr.bf16.mxu1 %v5358_v51 }
 0x407   :  { %3290 = vmatmul.mubr.f32.gmra.mrb[124].mxu1 %v8205_v23  ;;  %5203 = vmatprep.subr.bf16.mxu0 %v5358_v51 }
 0x408   :  { %3443 = vmatmul.mubr.f32.gmra.mrb[118].mxu0 %v8205_v23  ;;  %5172 = vmatpush1.bf16.msra.mxu1 %v5171_v4 }
 0x409   :  { %4246 = vmatprep.mubr.msk.f32.mxu1 %vm1572_vm2, %v8275_v5  ;;  %4257 = vmatprep.mubr.msk.f32.mxu0 %vm1572_vm2, %v8275_v5 }
 0x40a   :  { %5205 = vmatpush1.bf16.msra.mxu0 %v8743_v2  ;;  %5173 = vmatprep.subr.bf16.mxu1 %v5358_v51 }
 0x40b   :  { %3295 = vmatmul.mubr.f32.gmra.mrb[126].mxu1 %v8762_v19  ;;  %5206 = vmatprep.subr.bf16.mxu0 %v5358_v51 }
 0x40c   :  { %3448 = vmatmul.mubr.f32.gmra.mrb[120].mxu0 %v8762_v19  ;;  %5175 = vmatpush1.bf16.msra.mxu1 %v5174_v53 }
 0x40d   :  { %4258 = vmatprep.mubr.msk.f32.mxu1 %vm1572_vm2, %v8523_v49  ;;  %4269 = vmatprep.mubr.msk.f32.mxu0 %vm1572_vm2, %v8523_v49  ;;  %v5353_v49 = vld [vmem:[#allocation6 + $0x28] sm:$0xff] }
 0x40e   :  { %5208 = vmatpush1.bf16.msra.mxu0 %v8760_v57  ;;  %5209 = vmatprep.subr.bf16.mxu1 %v5358_v51 }
 0x40f   :  { %3551 = vmatmul.mubr.f32.vlgmr.msra.gmra.mrb[128].mxu1 %v8311_v36 }
 0x410   :  { %5220 = vmatpush1.bf16.msra.mxu1 %v8537_v58  ;;  %4259 = vmatprep.mubr.msk.f32.mxu1 %vm1572_vm2, %v5351_v28  ;;  %v5354_v58 = vld [vmem:[#allocation6 + $0x20] sm:$0xff] }
 0x411   :  { %3704 = vmatmul.mubr.f32.vlgmr.msra.gmra.mrb[122].mxu0 %v8311_v36  ;;  %5210 = vmatprep.subr.bf16.mxu1 %v5358_v51  ;;  %v5355_v36 = vld [vmem:[#allocation6 + $0x30] sm:$0xff] }
 0x412   :  { %4270 = vmatprep.mubr.msk.f32.mxu0 %vm1572_vm2, %v5351_v28 }
 0x413   :  { %3556 = vmatmul.mubr.f32.gmra.mrb[130].mxu1 %v5352_v59 }
 0x414   :  { %5221 = vmatpush1.bf16.msra.mxu1 %v8559_v1  ;;  %4260 = vmatprep.mubr.msk.f32.mxu1 %vm1572_vm2, %v5353_v49 }
 0x415   :  { %3709 = vmatmul.mubr.f32.gmra.mrb[124].mxu0 %v5352_v59  ;;  %5211 = vmatprep.subr.bf16.mxu1 %v5358_v51  ;;  %v8876_v59 = vld [vmem:[%s9075_s8] ss:$0 sm:$0xff] }
 0x416   :  { %4271 = vmatprep.mubr.msk.f32.mxu0 %vm1572_vm2, %v5353_v49 }
 0x417   :  { %3561 = vmatmul.mubr.f32.gmra.mrb[132].mxu1 %v5354_v58 }
 0x418   :  { %5222 = vmatpush1.bf16.msra.mxu1 %v8582_v22  ;;  %4261 = vmatprep.mubr.msk.f32.mxu1 %vm1572_vm2, %v8199_v9 }
 0x419   :  { %3714 = vmatmul.mubr.f32.gmra.mrb[126].mxu0 %v5354_v58  ;;  %5212 = vmatprep.subr.bf16.mxu1 %v5358_v51 }
 0x41a   :  { %4272 = vmatprep.mubr.msk.f32.mxu0 %vm1572_vm2, %v8199_v9 }
 0x41b   :  { %3566 = vmatmul.mubr.f32.gmra.mrb[134].mxu1 %v5355_v36 }
 0x41c   :  { %5223 = vmatpush1.bf16.msra.mxu1 %v8605_v31  ;;  %4262 = vmatprep.mubr.msk.f32.mxu1 %vm1572_vm2, %v8212_v43 }
 0x41d   :  { %3719 = vmatmul.mubr.f32.gmra.mrb[128].mxu0 %v5355_v36  ;;  %5213 = vmatprep.subr.bf16.mxu1 %v5358_v51 }
 0x41e   :  { %4273 = vmatprep.mubr.msk.f32.mxu0 %vm1572_vm2, %v8212_v43 }
 0x41f   :  { %3571 = vmatmul.mubr.f32.gmra.mrb[136].mxu1 %v8166_v37 }
 0x420   :  { %5224 = vmatpush1.bf16.msra.mxu1 %v8628_v12  ;;  %4263 = vmatprep.mubr.msk.f32.mxu1 %vm1572_vm2, %v8225_v39 }
 0x421   :  { %3724 = vmatmul.mubr.f32.gmra.mrb[130].mxu0 %v8166_v37  ;;  %5214 = vmatprep.subr.bf16.mxu1 %v5358_v51 }
 0x422   :  { %4274 = vmatprep.mubr.msk.f32.mxu0 %vm1572_vm2, %v8225_v39 }
 0x423   :  { %3576 = vmatmul.mubr.f32.gmra.mrb[138].mxu1 %v8175_v34 }
 0x424   :  { %5225 = vmatpush1.bf16.msra.mxu1 %v8651_v15  ;;  %4264 = vmatprep.mubr.msk.f32.mxu1 %vm1572_vm2, %v8241_v30 }
 0x425   :  { %3729 = vmatmul.mubr.f32.gmra.mrb[132].mxu0 %v8175_v34  ;;  %5215 = vmatprep.subr.bf16.mxu1 %v5358_v51 }
 0x426   :  { %4275 = vmatprep.mubr.msk.f32.mxu0 %vm1572_vm2, %v8241_v30 }
 0x427   :  { %3581 = vmatmul.mubr.f32.gmra.mrb[140].mxu1 %v8185_v47 }
 0x428   :  { %5226 = vmatpush1.bf16.msra.mxu1 %v8674_v20  ;;  %4265 = vmatprep.mubr.msk.f32.mxu1 %vm1572_vm2, %v8249_v21 }
 0x429   :  { %3734 = vmatmul.mubr.f32.gmra.mrb[134].mxu0 %v8185_v47  ;;  %5216 = vmatprep.subr.bf16.mxu1 %v5358_v51 }
 0x42a   :  { %4276 = vmatprep.mubr.msk.f32.mxu0 %vm1572_vm2, %v8249_v21 }
 0x42b   :  { %3586 = vmatmul.mubr.f32.gmra.mrb[142].mxu1 %v8189_v45  ;;  %v2638_v37 = vpop.f32.mrb[64].mxu1  ;;  %v2792_v34 = vpop.f32.mrb[58].mxu0 }
 0x42c   :  { %5227 = vmatpush1.bf16.msra.mxu1 %v8697_v46  ;;  %4266 = vmatprep.mubr.msk.f32.mxu1 %vm1572_vm2, %v8258_v55  ;;  %2689 = vst.msk [vmem:[#allocation7 + $0x8] sm:$0xff] %vm2687_vm3, %v2638_v37  ;;  %2842 = vst.msk [vmem:[#allocation7 + $0x60] sm:$0xff] %vm2687_vm3, %v2792_v34  ;;  %v2640_v47 = vpop.f32.mrb[65].mxu1  ;;  %v2794_v9 = vpop.f32.mrb[59].mxu0 }
 0x42d   :  { %3739 = vmatmul.mubr.f32.gmra.mrb[136].mxu0 %v8189_v45  ;;  %5217 = vmatprep.subr.bf16.mxu1 %v5358_v51 }
 0x42e   :  { %4277 = vmatprep.mubr.msk.f32.mxu0 %vm1572_vm2, %v8258_v55 }
 0x42f   :  { %3591 = vmatmul.mubr.f32.gmra.mrb[144].mxu1 %v8196_v10 }
 0x430   :  { %5228 = vmatpush1.bf16.msra.mxu1 %v8720_v0  ;;  %4267 = vmatprep.mubr.msk.f32.mxu1 %vm1572_vm2, %v8266_v8 }
 0x431   :  { %3744 = vmatmul.mubr.f32.gmra.mrb[138].mxu0 %v8196_v10  ;;  %5218 = vmatprep.subr.bf16.mxu1 %v5358_v51  ;;  %v2643_v45 = vpop.f32.mrb[66].mxu1  ;;  %v2797_v43 = vpop.f32.mrb[60].mxu0 }
 0x432   :  { %4278 = vmatprep.mubr.msk.f32.mxu0 %vm1572_vm2, %v8266_v8  ;;  %2690 = vst.msk [vmem:[#allocation7 + $0x10] sm:$0xff] %vm2687_vm3, %v2643_v45  ;;  %2843 = vst.msk [vmem:[#allocation7 + $0x68] sm:$0xff] %vm2687_vm3, %v2797_v43  ;;  %v2645_v39 = vpop.f32.mrb[67].mxu1  ;;  %v2799_v30 = vpop.f32.mrb[61].mxu0 }
 0x433   :  { %3596 = vmatmul.mubr.f32.gmra.mrb[146].mxu1 %v8205_v23  ;;  %v3796_v29 = vld [vmem:[#allocation7 + $0x8] sm:$0xff]  ;;  %v3807_v4 = vld [vmem:[#allocation7 + $0x60] sm:$0xff] }
 0x434   :  { %5229 = vmatpush1.bf16.msra.mxu1 %v8743_v2  ;;  %4268 = vmatprep.mubr.msk.f32.mxu1 %vm1572_vm2, %v8275_v5 }
 0x435   :  { %3749 = vmatmul.mubr.f32.gmra.mrb[140].mxu0 %v8205_v23  ;;  %5219 = vmatprep.subr.bf16.mxu1 %v5358_v51 }
 0x437   :  { %3601 = vmatmul.mubr.f32.gmra.mrb[148].mxu1 %v8762_v19 }
 0x438   :  { %5230 = vmatpush1.bf16.msra.mxu1 %v8760_v57  ;;  %4279 = vmatprep.mubr.msk.f32.mxu1 %vm1572_vm2, %v8275_v5 }
 0x43b   :  { %3754 = vmatmul.mubr.f32.vlgmr.msra.gmra.mrb[150].mxu1 %v8762_v19 }
 0x467   :  { %v2648_v10 = vpop.f32.mrb[68].mxu1  ;;  %v2802_v21 = vpop.f32.mrb[62].mxu0 }
 0x468   :  { %2691 = vst.msk [vmem:[#allocation7 + $0x18] sm:$0xff] %vm2687_vm3, %v2648_v10  ;;  %2844 = vst.msk [vmem:[#allocation7 + $0x70] sm:$0xff] %vm2687_vm3, %v2802_v21  ;;  %v2650_v55 = vpop.f32.mrb[69].mxu1  ;;  %v2804_v8 = vpop.f32.mrb[63].mxu0 }
 0x46e   :  { %v2653_v23 = vpop.f32.mrb[70].mxu1  ;;  %v2807_v1 = vpop.f32.mrb[64].mxu0 }
 0x46f   :  { %2692 = vst.msk [vmem:[#allocation7 + $0x20] sm:$0xff] %vm2687_vm3, %v2653_v23  ;;  %2845 = vst.msk [vmem:[#allocation7 + $0x78] sm:$0xff] %vm2687_vm3, %v2807_v1  ;;  %v2655_v51 = vpop.f32.mrb[71].mxu1  ;;  %v2809_v22 = vpop.f32.mrb[65].mxu0 }
 0x472   :  { %v2658_v31 = vpop.f32.mrb[72].mxu1  ;;  %v2812_v5 = vpop.f32.mrb[66].mxu0 }
 0x473   :  { %2693 = vst.msk [vmem:[#allocation7 + $0x28] sm:$0xff] %vm2687_vm3, %v2658_v31  ;;  %2846 = vst.msk [vmem:[#allocation7 + $0x80] sm:$0xff] %vm2687_vm3, %v2812_v5  ;;  %v2660_v33 = vpop.f32.mrb[73].mxu1  ;;  %v2814_v7 = vpop.f32.mrb[67].mxu0 }
 0x476   :  { %v2663_v44 = vpop.f32.mrb[74].mxu1  ;;  %v2817_v24 = vpop.f32.mrb[68].mxu0 }
 0x477   :  { %2694 = vst.msk [vmem:[#allocation7 + $0x30] sm:$0xff] %vm2687_vm3, %v2663_v44  ;;  %2847 = vst.msk [vmem:[#allocation7 + $0x88] sm:$0xff] %vm2687_vm3, %v2817_v24  ;;  %v2665_v12 = vpop.f32.mrb[75].mxu1  ;;  %v2819_v11 = vpop.f32.mrb[69].mxu0 }
 0x47a   :  { %v2668_v26 = vpop.f32.mrb[76].mxu1  ;;  %v2822_v61 = vpop.f32.mrb[70].mxu0 }
 0x47b   :  { %2695 = vst.msk [vmem:[#allocation7 + $0x38] sm:$0xff] %vm2687_vm3, %v2668_v26  ;;  %2848 = vst.msk [vmem:[#allocation7 + $0x90] sm:$0xff] %vm2687_vm3, %v2822_v61  ;;  %v2670_v42 = vpop.f32.mrb[77].mxu1  ;;  %v2824_v18 = vpop.f32.mrb[71].mxu0 }
 0x47e   :  { %v2673_v15 = vpop.f32.mrb[78].mxu1  ;;  %v2827_v35 = vpop.f32.mrb[72].mxu0 }
 0x47f   :  { %2696 = vst.msk [vmem:[#allocation7 + $0x40] sm:$0xff] %vm2687_vm3, %v2673_v15  ;;  %2849 = vst.msk [vmem:[#allocation7 + $0x98] sm:$0xff] %vm2687_vm3, %v2827_v35  ;;  %v2675_v25 = vpop.f32.mrb[79].mxu1  ;;  %v2829_v38 = vpop.f32.mrb[73].mxu0 }
 0x482   :  { %v2678_v3 = vpop.f32.mrb[80].mxu1  ;;  %v2832_v13 = vpop.f32.mrb[74].mxu0 }
 0x483   :  { %2697 = vst.msk [vmem:[#allocation7 + $0x48] sm:$0xff] %vm2687_vm3, %v2678_v3  ;;  %2850 = vst.msk [vmem:[#allocation7 + $0xa0] sm:$0xff] %vm2687_vm3, %v2832_v13  ;;  %v2680_v20 = vpop.f32.mrb[81].mxu1  ;;  %v2834_v32 = vpop.f32.mrb[75].mxu0 }
 0x486   :  { %v2683_v27 = vpop.f32.mrb[82].mxu1  ;;  %v2837_v17 = vpop.f32.mrb[76].mxu0 }
 0x487   :  { %2698 = vst.msk [vmem:[#allocation7 + $0x50] sm:$0xff] %vm2687_vm3, %v2683_v27  ;;  %2851 = vst.msk [vmem:[#allocation7 + $0xa8] sm:$0xff] %vm2687_vm3, %v2837_v17  ;;  %v2685_v14 = vpop.f32.mrb[83].mxu1  ;;  %v2839_v52 = vpop.f32.mrb[77].mxu0 }
 0x48a   :  { %v2940_v46 = vpop.f32.mrb[84].mxu1  ;;  %v3093_v54 = vpop.f32.mrb[78].mxu0 }
 0x48b   :  { %2994 = vst.msk [vmem:[#allocation7 + $0xb0] sm:$0xff] %vm2687_vm3, %v2940_v46  ;;  %3147 = vst.msk [vmem:[#allocation7 + $0x108] sm:$0xff] %vm2687_vm3, %v3093_v54  ;;  %v2942_v41 = vpop.f32.mrb[85].mxu1  ;;  %v3095_v48 = vpop.f32.mrb[79].mxu0 }
 0x48e   :  { %v2945_v56 = vpop.f32.mrb[86].mxu1  ;;  %v3098_v62 = vpop.f32.mrb[80].mxu0 }
 0x48f   :  { %2995 = vst.msk [vmem:[#allocation7 + $0xb8] sm:$0xff] %vm2687_vm3, %v2945_v56  ;;  %3148 = vst.msk [vmem:[#allocation7 + $0x110] sm:$0xff] %vm2687_vm3, %v3098_v62  ;;  %v2947_v0 = vpop.f32.mrb[87].mxu1  ;;  %v3100_v63 = vpop.f32.mrb[81].mxu0 }
 0x492   :  { %v3795_v6 = vld [vmem:[#allocation7 + $0xb0] sm:$0xff]  ;;  %v3806_v50 = vld [vmem:[#allocation7 + $0x108] sm:$0xff]  ;;  %v2950_v2 = vpop.f32.mrb[88].mxu1  ;;  %v3103_v60 = vpop.f32.mrb[82].mxu0 }
 0x493   :  { %v3797_v16 = vadd.f32 %v3796_v29, %v3795_v6  ;;  %v3808_v53 = vadd.f32 %v3807_v4, %v3806_v50  ;;  %2996 = vst.msk [vmem:[#allocation7 + $0xc0] sm:$0xff] %vm2687_vm3, %v2950_v2  ;;  %3149 = vst.msk [vmem:[#allocation7 + $0x118] sm:$0xff] %vm2687_vm3, %v3103_v60  ;;  %v2952_v57 = vpop.f32.mrb[89].mxu1  ;;  %v3105_v19 = vpop.f32.mrb[83].mxu0 }
 0x495   :  { %v3798_v28 = vadd.f32 %v8231_v40, %v3797_v16  ;;  %v3809_v49 = vadd.f32 %v8876_v59, %v3808_v53  ;;  %v3820_v53 = vld [vmem:[#allocation7 + $0x10] sm:$0xff] }
 0x496   :  { %v2955_v58 = vpop.f32.mrb[90].mxu1  ;;  %v3108_v36 = vpop.f32.mrb[84].mxu0  ;;  %v3818_v63 = vld [vmem:[#allocation7 + $0xb8] sm:$0xff]  ;;  %v3831_v6 = vld [vmem:[#allocation7 + $0x110] sm:$0xff] }
 0x497   :  { %v3799_v37 = vsub.f32 0.0, %v3798_v28  ;;  %v3810_v34 = vsub.f32 0.0, %v3809_v49  ;;  %2997 = vst.msk [vmem:[#allocation7 + $0xc8] sm:$0xff] %vm2687_vm3, %v2955_v58  ;;  %3150 = vst.msk [vmem:[#allocation7 + $0x120] sm:$0xff] %vm2687_vm3, %v3108_v36  ;;  %v2957_v47 = vpop.f32.mrb[91].mxu1  ;;  %v3110_v9 = vpop.f32.mrb[85].mxu0 }
 0x498   :  { %v3833_v28 = vld [vmem:[#allocation7 + $0x68] sm:$0xff] }
 0x499   :  { %v3800_v45 = vmul.f32 1.442695, %v3799_v37  ;;  %v3811_v43 = vmul.f32 1.442695, %v3810_v34 }
 0x49a   :  { %v2960_v40 = vpop.f32.mrb[92].mxu1  ;;  %v3113_v39 = vpop.f32.mrb[86].mxu0 }
 0x49b   :  { %5241 = vpow2.f32 %v3800_v45  ;;  %2998 = vst.msk [vmem:[#allocation7 + $0xd0] sm:$0xff] %vm2687_vm3, %v2960_v40  ;;  %3151 = vst.msk [vmem:[#allocation7 + $0x128] sm:$0xff] %vm2687_vm3, %v3113_v39  ;;  %v2962_v30 = vpop.f32.mrb[93].mxu1  ;;  %v3115_v10 = vpop.f32.mrb[87].mxu0 }
 0x49c   :  { %5243 = vpow2.f32 %v3811_v43 }
 0x49e   :  { %v2965_v21 = vpop.f32.mrb[94].mxu1  ;;  %v3118_v55 = vpop.f32.mrb[88].mxu0 }
 0x49f   :  { %2999 = vst.msk [vmem:[#allocation7 + $0xd8] sm:$0xff] %vm2687_vm3, %v2965_v21  ;;  %3152 = vst.msk [vmem:[#allocation7 + $0x130] sm:$0xff] %vm2687_vm3, %v3118_v55  ;;  %v2967_v8 = vpop.f32.mrb[95].mxu1  ;;  %v3120_v23 = vpop.f32.mrb[89].mxu0 }
 0x4a2   :  { %v2970_v1 = vpop.f32.mrb[96].mxu1  ;;  %v3123_v51 = vpop.f32.mrb[90].mxu0 }
 0x4a3   :  { %3000 = vst.msk [vmem:[#allocation7 + $0xe0] sm:$0xff] %vm2687_vm3, %v2970_v1  ;;  %3153 = vst.msk [vmem:[#allocation7 + $0x138] sm:$0xff] %vm2687_vm3, %v3123_v51  ;;  %v2972_v22 = vpop.f32.mrb[97].mxu1  ;;  %v3125_v31 = vpop.f32.mrb[91].mxu0 }
 0x4a5   :  { %v5242_v5 = vpop.eup %5241 }
 0x4a6   :  { %v5244_v33 = vpop.eup %5243  ;;  %v3802_v7 = vadd.f32 1.0, %v5242_v5  ;;  %v2975_v44 = vpop.f32.mrb[98].mxu1 }
 0x4a7   :  { %v3128_v24 = vpop.f32.mrb[92].mxu0  ;;  %v3813_v12 = vadd.f32 1.0, %v5244_v33  ;;  %3001 = vst.msk [vmem:[#allocation7 + $0xe8] sm:$0xff] %vm2687_vm3, %v2975_v44  ;;  %v2977_v11 = vpop.f32.mrb[99].mxu1 }
 0x4a8   :  { %3154 = vst.msk [vmem:[#allocation7 + $0x140] sm:$0xff] %vm2687_vm3, %v3128_v24  ;;  %v3130_v26 = vpop.f32.mrb[93].mxu0  ;;  %5245 = vrcp.f32 %v3802_v7 }
 0x4a9   :  { %5247 = vrcp.f32 %v3813_v12 }
 0x4aa   :  { %v2980_v61 = vpop.f32.mrb[100].mxu1  ;;  %v3133_v42 = vpop.f32.mrb[94].mxu0 }
 0x4ab   :  { %3002 = vst.msk [vmem:[#allocation7 + $0xf0] sm:$0xff] %vm2687_vm3, %v2980_v61  ;;  %3155 = vst.msk [vmem:[#allocation7 + $0x148] sm:$0xff] %vm2687_vm3, %v3133_v42  ;;  %v2982_v18 = vpop.f32.mrb[101].mxu1  ;;  %v3135_v15 = vpop.f32.mrb[95].mxu0 }
 0x4ae   :  { %v2985_v35 = vpop.f32.mrb[102].mxu1  ;;  %v3138_v25 = vpop.f32.mrb[96].mxu0 }
 0x4af   :  { %3003 = vst.msk [vmem:[#allocation7 + $0xf8] sm:$0xff] %vm2687_vm3, %v2985_v35  ;;  %3156 = vst.msk [vmem:[#allocation7 + $0x150] sm:$0xff] %vm2687_vm3, %v3138_v25  ;;  %v2987_v38 = vpop.f32.mrb[103].mxu1  ;;  %v3140_v3 = vpop.f32.mrb[97].mxu0 }
 0x4b2   :  { %v5246_v13 = vpop.eup %5245  ;;  %v2990_v20 = vpop.f32.mrb[104].mxu1 }
 0x4b3   :  { %v3143_v32 = vpop.f32.mrb[98].mxu0  ;;  %v5248_v27 = vpop.eup %5247  ;;  %3805 = vst.msk [vmem:[%s9076_s9 + $0x10] sm:$0xff] %vm2687_vm3, %v5246_v13  ;;  %3004 = vst.msk [vmem:[#allocation7 + $0x100] sm:$0xff] %vm2687_vm3, %v2990_v20 }
 0x4b4   :  { %3157 = vst.msk [vmem:[#allocation7 + $0x158] sm:$0xff] %vm2687_vm3, %v3143_v32  ;;  %v2992_v17 = vpop.f32.mrb[105].mxu1  ;;  %v3145_v14 = vpop.f32.mrb[99].mxu0  ;;  %3816 = vst.msk [vmem:[%s9076_s9 + $0x18] sm:$0xff] %vm2687_vm3, %v5248_v27 }
 0x4b6   :  { %v3246_v52 = vpop.f32.mrb[106].mxu1 }
 0x4b7   :  { %3300 = vst.msk [vmem:[#allocation7 + $0x160] sm:$0xff] %vm2687_vm3, %v3246_v52  ;;  %v3399_v46 = vpop.f32.mrb[100].mxu0  ;;  %v3248_v54 = vpop.f32.mrb[107].mxu1 }
 0x4b8   :  { %3453 = vst.msk [vmem:[#allocation7 + $0x1b8] sm:$0xff] %vm2687_vm3, %v3399_v46  ;;  %v3401_v41 = vpop.f32.mrb[101].mxu0 }
 0x4ba   :  { %v3251_v48 = vpop.f32.mrb[108].mxu1 }
 0x4bb   :  { %3301 = vst.msk [vmem:[#allocation7 + $0x168] sm:$0xff] %vm2687_vm3, %v3251_v48  ;;  %v3404_v56 = vpop.f32.mrb[102].mxu0  ;;  %v3253_v62 = vpop.f32.mrb[109].mxu1 }
 0x4bc   :  { %3454 = vst.msk [vmem:[#allocation7 + $0x1c0] sm:$0xff] %vm2687_vm3, %v3404_v56  ;;  %v3406_v0 = vpop.f32.mrb[103].mxu0 }
 0x4be   :  { %v3817_v29 = vld [vmem:[#allocation7 + $0x160] sm:$0xff]  ;;  %v3256_v4 = vpop.f32.mrb[110].mxu1 }
 0x4bf   :  { %v3819_v50 = vadd.f32 %v3818_v63, %v3817_v29  ;;  %v3830_v2 = vld [vmem:[#allocation7 + $0x1b8] sm:$0xff]  ;;  %3302 = vst.msk [vmem:[#allocation7 + $0x170] sm:$0xff] %vm2687_vm3, %v3256_v4  ;;  %v3409_v60 = vpop.f32.mrb[104].mxu0  ;;  %v3258_v16 = vpop.f32.mrb[111].mxu1 }
 0x4c0   :  { %v3832_v57 = vadd.f32 %v3831_v6, %v3830_v2  ;;  %3455 = vst.msk [vmem:[#allocation7 + $0x1c8] sm:$0xff] %vm2687_vm3, %v3409_v60  ;;  %v3411_v19 = vpop.f32.mrb[105].mxu0 }
 0x4c1   :  { %v3821_v49 = vadd.f32 %v3820_v53, %v3819_v50  ;;  %v3846_v53 = vld [vmem:[#allocation7 + $0xc0] sm:$0xff] }
 0x4c2   :  { %v3834_v58 = vadd.f32 %v3833_v28, %v3832_v57  ;;  %v3261_v36 = vpop.f32.mrb[112].mxu1  ;;  %v3844_v6 = vld [vmem:[#allocation7 + $0x168] sm:$0xff] }
 0x4c3   :  { %v3822_v37 = vadd.f32 %v8876_v59, %v3821_v49  ;;  %3303 = vst.msk [vmem:[#allocation7 + $0x178] sm:$0xff] %vm2687_vm3, %v3261_v36  ;;  %v3414_v34 = vpop.f32.mrb[106].mxu0  ;;  %v3263_v47 = vpop.f32.mrb[113].mxu1  ;;  %v3859_v57 = vld [vmem:[#allocation7 + $0x1c0] sm:$0xff]  ;;  %v3848_v49 = vld [vmem:[#allocation7 + $0x18] sm:$0xff] }
 0x4c4   :  { %v3835_v9 = vadd.f32 %v8876_v59, %v3834_v58  ;;  %3456 = vst.msk [vmem:[#allocation7 + $0x1d0] sm:$0xff] %vm2687_vm3, %v3414_v34  ;;  %v3416_v45 = vpop.f32.mrb[107].mxu0  ;;  %v3861_v34 = vld [vmem:[#allocation7 + $0x118] sm:$0xff] }
 0x4c5   :  { %v3823_v43 = vsub.f32 0.0, %v3822_v37 }
 0x4c6   :  { %v3836_v40 = vsub.f32 0.0, %v3835_v9  ;;  %v3266_v39 = vpop.f32.mrb[114].mxu1  ;;  %v3874_v47 = vld [vmem:[#allocation7 + $0x170] sm:$0xff] }
 0x4c7   :  { %v3824_v30 = vmul.f32 1.442695, %v3823_v43  ;;  %3304 = vst.msk [vmem:[#allocation7 + $0x180] sm:$0xff] %vm2687_vm3, %v3266_v39  ;;  %v3419_v10 = vpop.f32.mrb[108].mxu0  ;;  %v3268_v21 = vpop.f32.mrb[115].mxu1  ;;  %v3863_v43 = vld [vmem:[#allocation7 + $0x70] sm:$0xff] }
 0x4c8   :  { %v3837_v55 = vmul.f32 1.442695, %v3836_v40  ;;  %3457 = vst.msk [vmem:[#allocation7 + $0x1d8] sm:$0xff] %vm2687_vm3, %v3419_v10  ;;  %v3421_v8 = vpop.f32.mrb[109].mxu0  ;;  %v3876_v21 = vld [vmem:[#allocation7 + $0xc8] sm:$0xff] }
 0x4c9   :  { %5249 = vpow2.f32 %v3824_v30 }
 0x4ca   :  { %5251 = vpow2.f32 %v3837_v55  ;;  %v3271_v23 = vpop.f32.mrb[116].mxu1  ;;  %v3889_v55 = vld [vmem:[#allocation7 + $0x1c8] sm:$0xff] }
 0x4cb   :  { %3305 = vst.msk [vmem:[#allocation7 + $0x188] sm:$0xff] %vm2687_vm3, %v3271_v23  ;;  %v3424_v1 = vpop.f32.mrb[110].mxu0  ;;  %v3273_v51 = vpop.f32.mrb[117].mxu1 }
 0x4cc   :  { %3458 = vst.msk [vmem:[#allocation7 + $0x1e0] sm:$0xff] %vm2687_vm3, %v3424_v1  ;;  %v3426_v22 = vpop.f32.mrb[111].mxu0 }
 0x4ce   :  { %v3276_v31 = vpop.f32.mrb[118].mxu1 }
 0x4cf   :  { %3306 = vst.msk [vmem:[#allocation7 + $0x190] sm:$0xff] %vm2687_vm3, %v3276_v31  ;;  %v3429_v5 = vpop.f32.mrb[112].mxu0  ;;  %v3278_v33 = vpop.f32.mrb[119].mxu1 }
 0x4d0   :  { %3459 = vst.msk [vmem:[#allocation7 + $0x1e8] sm:$0xff] %vm2687_vm3, %v3429_v5  ;;  %v3431_v7 = vpop.f32.mrb[113].mxu0  ;;  %v3878_v33 = vld [vmem:[#allocation7 + $0x20] sm:$0xff] }
 0x4d1   :  { %v3891_v7 = vld [vmem:[#allocation7 + $0x120] sm:$0xff] }
 0x4d2   :  { %v3281_v44 = vpop.f32.mrb[120].mxu1 }
 0x4d3   :  { %v5250_v24 = vpop.eup %5249  ;;  %3307 = vst.msk [vmem:[#allocation7 + $0x198] sm:$0xff] %vm2687_vm3, %v3281_v44  ;;  %v3434_v12 = vpop.f32.mrb[114].mxu0 }
 0x4d4   :  { %v3283_v11 = vpop.f32.mrb[121].mxu1  ;;  %v5252_v26 = vpop.eup %5251  ;;  %v3826_v61 = vadd.f32 1.0, %v5250_v24  ;;  %3460 = vst.msk [vmem:[#allocation7 + $0x1f0] sm:$0xff] %vm2687_vm3, %v3434_v12  ;;  %v3904_v12 = vld [vmem:[#allocation7 + $0x178] sm:$0xff] }
 0x4d5   :  { %v3436_v42 = vpop.f32.mrb[115].mxu0  ;;  %v3839_v18 = vadd.f32 1.0, %v5252_v26 }
 0x4d6   :  { %5253 = vrcp.f32 %v3826_v61  ;;  %v3286_v15 = vpop.f32.mrb[122].mxu1 }
 0x4d7   :  { %5255 = vrcp.f32 %v3839_v18  ;;  %3308 = vst.msk [vmem:[#allocation7 + $0x1a0] sm:$0xff] %vm2687_vm3, %v3286_v15  ;;  %v3439_v35 = vpop.f32.mrb[116].mxu0  ;;  %v3288_v25 = vpop.f32.mrb[123].mxu1  ;;  %v3893_v15 = vld [vmem:[#allocation7 + $0x78] sm:$0xff] }
 0x4d8   :  { %3461 = vst.msk [vmem:[#allocation7 + $0x1f8] sm:$0xff] %vm2687_vm3, %v3439_v35  ;;  %v3441_v38 = vpop.f32.mrb[117].mxu0 }
 0x4da   :  { %v3291_v3 = vpop.f32.mrb[124].mxu1 }
 0x4db   :  { %3309 = vst.msk [vmem:[#allocation7 + $0x1a8] sm:$0xff] %vm2687_vm3, %v3291_v3  ;;  %v3444_v13 = vpop.f32.mrb[118].mxu0  ;;  %v3293_v20 = vpop.f32.mrb[125].mxu1  ;;  %v3906_v3 = vld [vmem:[#allocation7 + $0xd0] sm:$0xff] }
 0x4dc   :  { %3462 = vst.msk [vmem:[#allocation7 + $0x200] sm:$0xff] %vm2687_vm3, %v3444_v13  ;;  %v3446_v32 = vpop.f32.mrb[119].mxu0  ;;  %v3919_v13 = vld [vmem:[#allocation7 + $0x1d0] sm:$0xff] }
 0x4de   :  { %v3296_v27 = vpop.f32.mrb[126].mxu1 }
 0x4df   :  { %3310 = vst.msk [vmem:[#allocation7 + $0x1b0] sm:$0xff] %vm2687_vm3, %v3296_v27  ;;  %v3449_v17 = vpop.f32.mrb[120].mxu0  ;;  %v3298_v14 = vpop.f32.mrb[127].mxu1 }
 0x4e0   :  { %v5254_v52 = vpop.eup %5253  ;;  %3463 = vst.msk [vmem:[#allocation7 + $0x208] sm:$0xff] %vm2687_vm3, %v3449_v17  ;;  %v3451_v46 = vpop.f32.mrb[121].mxu0 }
 0x4e1   :  { %v5256_v54 = vpop.eup %5255  ;;  %3829 = vst.msk [vmem:[%s9076_s9 + $0x20] sm:$0xff] %vm2687_vm3, %v5254_v52  ;;  %v3908_v52 = vld [vmem:[#allocation7 + $0x28] sm:$0xff] }
 0x4e2   :  { %3842 = vst.msk [vmem:[%s9076_s9 + $0x28] sm:$0xff] %vm2687_vm3, %v5256_v54  ;;  %v3552_v41 = vpop.f32.mrb[128].mxu1 }
 0x4e3   :  { %3606 = vst.msk [vmem:[#allocation7 + $0x210] sm:$0xff] %vm2687_vm3, %v3552_v41  ;;  %v3554_v48 = vpop.f32.mrb[129].mxu1 }
 0x4e4   :  { %v3705_v56 = vpop.f32.mrb[122].mxu0 }
 0x4e5   :  { %3759 = vst.msk [vmem:[#allocation7 + $0x268] sm:$0xff] %vm2687_vm3, %v3705_v56  ;;  %v3707_v62 = vpop.f32.mrb[123].mxu0  ;;  %v3921_v56 = vld [vmem:[#allocation7 + $0x128] sm:$0xff] }
 0x4e6   :  { %v3557_v0 = vpop.f32.mrb[130].mxu1  ;;  %v3934_v62 = vld [vmem:[#allocation7 + $0x180] sm:$0xff] }
 0x4e7   :  { %3607 = vst.msk [vmem:[#allocation7 + $0x218] sm:$0xff] %vm2687_vm3, %v3557_v0  ;;  %v3559_v63 = vpop.f32.mrb[131].mxu1 }
 0x4e8   :  { %v3710_v29 = vpop.f32.mrb[124].mxu0 }
 0x4e9   :  { %3760 = vst.msk [vmem:[#allocation7 + $0x270] sm:$0xff] %vm2687_vm3, %v3710_v29  ;;  %v3712_v4 = vpop.f32.mrb[125].mxu0 }
 0x4ea   :  { %v3843_v50 = vld [vmem:[#allocation7 + $0x210] sm:$0xff]  ;;  %v3562_v2 = vpop.f32.mrb[132].mxu1 }
 0x4eb   :  { %v3845_v60 = vadd.f32 %v3844_v6, %v3843_v50  ;;  %3608 = vst.msk [vmem:[#allocation7 + $0x220] sm:$0xff] %vm2687_vm3, %v3562_v2  ;;  %v3564_v16 = vpop.f32.mrb[133].mxu1  ;;  %v3949_v6 = vld [vmem:[#allocation7 + $0x1d8] sm:$0xff] }
 0x4ec   :  { %v3858_v19 = vld [vmem:[#allocation7 + $0x268] sm:$0xff]  ;;  %v3715_v28 = vpop.f32.mrb[126].mxu0 }
 0x4ed   :  { %v3847_v58 = vadd.f32 %v3846_v53, %v3845_v60  ;;  %v3860_v36 = vadd.f32 %v3859_v57, %v3858_v19  ;;  %3761 = vst.msk [vmem:[#allocation7 + $0x278] sm:$0xff] %vm2687_vm3, %v3715_v28  ;;  %v3717_v37 = vpop.f32.mrb[127].mxu0  ;;  %v3923_v57 = vld [vmem:[#allocation7 + $0x80] sm:$0xff]  ;;  %v3936_v19 = vld [vmem:[#allocation7 + $0xd8] sm:$0xff] }
 0x4ee   :  { %v3873_v9 = vld [vmem:[#allocation7 + $0x218] sm:$0xff]  ;;  %v3567_v45 = vpop.f32.mrb[134].mxu1  ;;  %v3951_v37 = vld [vmem:[#allocation7 + $0x130] sm:$0xff] }
 0x4ef   :  { %v3849_v40 = vadd.f32 %v3848_v49, %v3847_v58  ;;  %v3862_v39 = vadd.f32 %v3861_v34, %v3860_v36  ;;  %v3875_v30 = vadd.f32 %v3874_v47, %v3873_v9  ;;  %3609 = vst.msk [vmem:[#allocation7 + $0x228] sm:$0xff] %vm2687_vm3, %v3567_v45  ;;  %v3569_v10 = vpop.f32.mrb[135].mxu1  ;;  %v3964_v34 = vld [vmem:[#allocation7 + $0x188] sm:$0xff] }
 0x4f0   :  { %v3888_v8 = vld [vmem:[#allocation7 + $0x270] sm:$0xff]  ;;  %v3720_v23 = vpop.f32.mrb[128].mxu0 }
 0x4f1   :  { %v3850_v1 = vadd.f32 %v8876_v59, %v3849_v40  ;;  %v3864_v51 = vadd.f32 %v3863_v43, %v3862_v39  ;;  %v3877_v22 = vadd.f32 %v3876_v21, %v3875_v30  ;;  %v3890_v31 = vadd.f32 %v3889_v55, %v3888_v8  ;;  %3762 = vst.msk [vmem:[#allocation7 + $0x280] sm:$0xff] %vm2687_vm3, %v3720_v23  ;;  %v3722_v5 = vpop.f32.mrb[129].mxu0  ;;  %v3938_v39 = vld [vmem:[#allocation7 + $0x30] sm:$0xff]  ;;  %v3953_v30 = vld [vmem:[#allocation7 + $0x88] sm:$0xff]  ;;  %v3966_v23 = vld [vmem:[#allocation7 + $0xe0] sm:$0xff] }
 0x4f2   :  { %v3903_v44 = vld [vmem:[#allocation7 + $0x220] sm:$0xff]  ;;  %v3572_v24 = vpop.f32.mrb[136].mxu1 }
 0x4f3   :  { %v3851_v11 = vsub.f32 0.0, %v3850_v1  ;;  %v3865_v26 = vadd.f32 %v8876_v59, %v3864_v51  ;;  %v3879_v61 = vadd.f32 %v3878_v33, %v3877_v22  ;;  %v3892_v42 = vadd.f32 %v3891_v7, %v3890_v31  ;;  %3610 = vst.msk [vmem:[#allocation7 + $0x230] sm:$0xff] %vm2687_vm3, %v3572_v24  ;;  %v3574_v18 = vpop.f32.mrb[137].mxu1  ;;  %v3979_v1 = vld [vmem:[#allocation7 + $0x1e0] sm:$0xff]  ;;  %v3968_v7 = vld [vmem:[#allocation7 + $0x38] sm:$0xff] }
 0x4f4   :  { %v3905_v35 = vadd.f32 %v3904_v12, %v3903_v44  ;;  %v3918_v25 = vld [vmem:[#allocation7 + $0x278] sm:$0xff]  ;;  %v3725_v38 = vpop.f32.mrb[130].mxu0 }
 0x4f5   :  { %v3852_v20 = vmul.f32 1.442695, %v3851_v11  ;;  %v3866_v32 = vsub.f32 0.0, %v3865_v26  ;;  %v3880_v27 = vadd.f32 %v8876_v59, %v3879_v61  ;;  %v3894_v17 = vadd.f32 %v3893_v15, %v3892_v42  ;;  %3763 = vst.msk [vmem:[#allocation7 + $0x288] sm:$0xff] %vm2687_vm3, %v3725_v38  ;;  %v3727_v14 = vpop.f32.mrb[131].mxu0  ;;  %v3981_v44 = vld [vmem:[#allocation7 + $0x138] sm:$0xff] }
 0x4f6   :  { %v3907_v46 = vadd.f32 %v3906_v3, %v3905_v35  ;;  %v3920_v54 = vadd.f32 %v3919_v13, %v3918_v25  ;;  %v3933_v41 = vld [vmem:[#allocation7 + $0x228] sm:$0xff]  ;;  %v3577_v48 = vpop.f32.mrb[138].mxu1  ;;  %v3994_v61 = vld [vmem:[#allocation7 + $0x190] sm:$0xff] }
 0x4f7   :  { %5257 = vpow2.f32 %v3852_v20  ;;  %v3867_v0 = vmul.f32 1.442695, %v3866_v32  ;;  %v3881_v63 = vsub.f32 0.0, %v3880_v27  ;;  %v3895_v29 = vadd.f32 %v8876_v59, %v3894_v17  ;;  %3611 = vst.msk [vmem:[#allocation7 + $0x238] sm:$0xff] %vm2687_vm3, %v3577_v48  ;;  %v3579_v4 = vpop.f32.mrb[139].mxu1  ;;  %v3983_v38 = vld [vmem:[#allocation7 + $0x90] sm:$0xff] }
 0x4f8   :  { %v3909_v50 = vadd.f32 %v3908_v52, %v3907_v46  ;;  %v3922_v2 = vadd.f32 %v3921_v56, %v3920_v54  ;;  %v3935_v60 = vadd.f32 %v3934_v62, %v3933_v41  ;;  %v3948_v16 = vld [vmem:[#allocation7 + $0x280] sm:$0xff]  ;;  %v3730_v53 = vpop.f32.mrb[132].mxu0  ;;  %v3996_v17 = vld [vmem:[#allocation7 + $0xe8] sm:$0xff] }
 0x4f9   :  { %5259 = vpow2.f32 %v3867_v0  ;;  %v3882_v28 = vmul.f32 1.442695, %v3881_v63  ;;  %v3896_v49 = vsub.f32 0.0, %v3895_v29  ;;  %v3950_v58 = vadd.f32 %v3949_v6, %v3948_v16  ;;  %3764 = vst.msk [vmem:[#allocation7 + $0x290] sm:$0xff] %vm2687_vm3, %v3730_v53  ;;  %v3732_v36 = vpop.f32.mrb[133].mxu0  ;;  %v4009_v48 = vld [vmem:[#allocation7 + $0x1e8] sm:$0xff] }
 0x4fa   :  { %v3910_v47 = vadd.f32 %v8876_v59, %v3909_v50  ;;  %v3924_v9 = vadd.f32 %v3923_v57, %v3922_v2  ;;  %v3937_v45 = vadd.f32 %v3936_v19, %v3935_v60  ;;  %v3963_v43 = vld [vmem:[#allocation7 + $0x230] sm:$0xff]  ;;  %v3582_v40 = vpop.f32.mrb[140].mxu1  ;;  %v3998_v4 = vld [vmem:[#allocation7 + $0x40] sm:$0xff]  ;;  %v4024_v19 = vld [vmem:[#allocation7 + $0x198] sm:$0xff] }
 0x4fb   :  { %5261 = vpow2.f32 %v3882_v28  ;;  %v3897_v10 = vmul.f32 1.442695, %v3896_v49  ;;  %v3952_v21 = vadd.f32 %v3951_v37, %v3950_v58  ;;  %v3965_v55 = vadd.f32 %v3964_v34, %v3963_v43  ;;  %3612 = vst.msk [vmem:[#allocation7 + $0x240] sm:$0xff] %vm2687_vm3, %v3582_v40  ;;  %v3584_v8 = vpop.f32.mrb[141].mxu1  ;;  %v4011_v57 = vld [vmem:[#allocation7 + $0x140] sm:$0xff] }
 0x4fc   :  { %v3911_v51 = vsub.f32 0.0, %v3910_v47  ;;  %v3925_v22 = vadd.f32 %v8876_v59, %v3924_v9  ;;  %v3939_v31 = vadd.f32 %v3938_v39, %v3937_v45  ;;  %v3978_v5 = vld [vmem:[#allocation7 + $0x288] sm:$0xff]  ;;  %v3735_v33 = vpop.f32.mrb[134].mxu0  ;;  %v4013_v39 = vld [vmem:[#allocation7 + $0x98] sm:$0xff] }
 0x4fd   :  { %5263 = vpow2.f32 %v3897_v10  ;;  %v3954_v24 = vadd.f32 %v3953_v30, %v3952_v21  ;;  %v3967_v12 = vadd.f32 %v3966_v23, %v3965_v55  ;;  %v3980_v11 = vadd.f32 %v3979_v1, %v3978_v5  ;;  %3765 = vst.msk [vmem:[#allocation7 + $0x298] sm:$0xff] %vm2687_vm3, %v3735_v33  ;;  %v3737_v26 = vpop.f32.mrb[135].mxu0  ;;  %v4026_v30 = vld [vmem:[#allocation7 + $0xf0] sm:$0xff] }
 0x4fe   :  { %v3912_v42 = vmul.f32 1.442695, %v3911_v51  ;;  %v3926_v18 = vsub.f32 0.0, %v3925_v22  ;;  %v3940_v15 = vadd.f32 %v8876_v59, %v3939_v31  ;;  %v3993_v35 = vld [vmem:[#allocation7 + $0x238] sm:$0xff]  ;;  %v3587_v25 = vpop.f32.mrb[142].mxu1  ;;  %v4039_v23 = vld [vmem:[#allocation7 + $0x1f0] sm:$0xff] }
 0x4ff   :  { %v3955_v3 = vadd.f32 %v8876_v59, %v3954_v24  ;;  %v3969_v13 = vadd.f32 %v3968_v7, %v3967_v12  ;;  %v3982_v20 = vadd.f32 %v3981_v44, %v3980_v11  ;;  %v3995_v32 = vadd.f32 %v3994_v61, %v3993_v35  ;;  %3613 = vst.msk [vmem:[#allocation7 + $0x248] sm:$0xff] %vm2687_vm3, %v3587_v25  ;;  %v3589_v27 = vpop.f32.mrb[143].mxu1  ;;  %v4028_v7 = vld [vmem:[#allocation7 + $0x48] sm:$0xff]  ;;  %v4054_v61 = vld [vmem:[#allocation7 + $0x1a0] sm:$0xff] }
 0x500   :  { %5265 = vpow2.f32 %v3912_v42  ;;  %v3927_v14 = vmul.f32 1.442695, %v3926_v18  ;;  %v3941_v52 = vsub.f32 0.0, %v3940_v15  ;;  %v4008_v46 = vld [vmem:[#allocation7 + $0x290] sm:$0xff]  ;;  %v3740_v54 = vpop.f32.mrb[136].mxu0  ;;  %v4041_v26 = vld [vmem:[#allocation7 + $0x148] sm:$0xff] }
 0x501   :  { %v5258_v41 = vpop.eup %5257  ;;  %v3956_v56 = vsub.f32 0.0, %v3955_v3  ;;  %v3970_v62 = vadd.f32 %v8876_v59, %v3969_v13  ;;  %v3984_v0 = vadd.f32 %v3983_v38, %v3982_v20  ;;  %v3997_v63 = vadd.f32 %v3996_v17, %v3995_v32  ;;  %3766 = vst.msk [vmem:[#allocation7 + $0x2a0] sm:$0xff] %vm2687_vm3, %v3740_v54  ;;  %v3742_v29 = vpop.f32.mrb[137].mxu0  ;;  %v4069_v38 = vld [vmem:[#allocation7 + $0x1f8] sm:$0xff]  ;;  %v4043_v17 = vld [vmem:[#allocation7 + $0xa0] sm:$0xff] }
 0x502   :  { %v3854_v6 = vadd.f32 1.0, %v5258_v41  ;;  %5267 = vpow2.f32 %v3927_v14  ;;  %v3942_v50 = vmul.f32 1.442695, %v3941_v52  ;;  %v4010_v2 = vadd.f32 %v4009_v48, %v4008_v46  ;;  %v4023_v60 = vld [vmem:[#allocation7 + $0x240] sm:$0xff]  ;;  %v3592_v16 = vpop.f32.mrb[144].mxu1  ;;  %v4056_v14 = vld [vmem:[#allocation7 + $0xf8] sm:$0xff] }
 0x503   :  { %v5260_v53 = vpop.eup %5259  ;;  %v3957_v28 = vmul.f32 1.442695, %v3956_v56  ;;  %v3971_v49 = vsub.f32 0.0, %v3970_v62  ;;  %v3985_v58 = vadd.f32 %v8876_v59, %v3984_v0  ;;  %v3999_v36 = vadd.f32 %v3998_v4, %v3997_v63  ;;  %3614 = vst.msk [vmem:[#allocation7 + $0x250] sm:$0xff] %vm2687_vm3, %v3592_v16  ;;  %v3594_v37 = vpop.f32.mrb[145].mxu1  ;;  %v4071_v48 = vld [vmem:[#allocation7 + $0x150] sm:$0xff] }
 0x504   :  { %5269 = vrcp.f32 %v3854_v6  ;;  %v3869_v34 = vadd.f32 1.0, %v5260_v53  ;;  %v4012_v47 = vadd.f32 %v4011_v57, %v4010_v2  ;;  %v4025_v9 = vadd.f32 %v4024_v19, %v4023_v60  ;;  %v4038_v45 = vld [vmem:[#allocation7 + $0x298] sm:$0xff]  ;;  %v3745_v43 = vpop.f32.mrb[138].mxu0  ;;  %v4058_v6 = vld [vmem:[#allocation7 + $0x50] sm:$0xff]  ;;  %v4073_v53 = vld [vmem:[#allocation7 + $0xa8] sm:$0xff] }
 0x505   :  { %v5262_v40 = vpop.eup %5261  ;;  %5271 = vpow2.f32 %v3942_v50  ;;  %v3972_v10 = vmul.f32 1.442695, %v3971_v49  ;;  %v3986_v21 = vsub.f32 0.0, %v3985_v58  ;;  %v4000_v55 = vadd.f32 %v8876_v59, %v3999_v36  ;;  %3767 = vst.msk [vmem:[#allocation7 + $0x2a8] sm:$0xff] %vm2687_vm3, %v3745_v43  ;;  %v3747_v8 = vpop.f32.mrb[139].mxu0  ;;  %v4084_v57 = vld [vmem:[#allocation7 + $0x1a8] sm:$0xff] }
 0x506   :  { %5273 = vrcp.f32 %v3869_v34  ;;  %v3884_v1 = vadd.f32 1.0, %v5262_v40  ;;  %v4014_v51 = vadd.f32 %v4013_v39, %v4012_v47  ;;  %v4027_v22 = vadd.f32 %v4026_v30, %v4025_v9  ;;  %v4053_v31 = vld [vmem:[#allocation7 + $0x248] sm:$0xff]  ;;  %v3597_v5 = vpop.f32.mrb[146].mxu1  ;;  %v4097_v36 = vld [vmem:[#allocation7 + $0x200] sm:$0xff]  ;;  %v4099_v8 = vld [vmem:[#allocation7 + $0x158] sm:$0xff] }
 0x507   :  { %v5264_v33 = vpop.eup %5263  ;;  %5275 = vpow2.f32 %v3957_v28  ;;  %v3987_v44 = vmul.f32 1.442695, %v3986_v21  ;;  %v4001_v24 = vsub.f32 0.0, %v4000_v55  ;;  %v4040_v12 = vadd.f32 %v4039_v23, %v4038_v45  ;;  %3615 = vst.msk [vmem:[#allocation7 + $0x258] sm:$0xff] %vm2687_vm3, %v3597_v5  ;;  %v3599_v11 = vpop.f32.mrb[147].mxu1  ;;  %v4086_v40 = vld [vmem:[#allocation7 + $0x100] sm:$0xff] }
 0x508   :  { %5277 = vrcp.f32 %v3884_v1  ;;  %v3899_v42 = vadd.f32 1.0, %v5264_v33  ;;  %v4015_v18 = vadd.f32 %v8876_v59, %v4014_v51  ;;  %v4029_v15 = vadd.f32 %v4028_v7, %v4027_v22  ;;  %v4068_v35 = vld [vmem:[#allocation7 + $0x2a0] sm:$0xff]  ;;  %v3750_v25 = vpop.f32.mrb[140].mxu0  ;;  %v4110_v23 = vld [vmem:[#allocation7 + $0x1b0] sm:$0xff] }
 0x509   :  { %5279 = vpow2.f32 %v3972_v10  ;;  %v4002_v3 = vmul.f32 1.442695, %v4001_v24  ;;  %v4042_v13 = vadd.f32 %v4041_v26, %v4040_v12  ;;  %v4055_v20 = vadd.f32 %v4054_v61, %v4053_v31  ;;  %3768 = vst.msk [vmem:[#allocation7 + $0x2b0] sm:$0xff] %vm2687_vm3, %v3750_v25  ;;  %v3752_v32 = vpop.f32.mrb[141].mxu0 }
 0x50a   :  { %v5266_v27 = vpop.eup %5265  ;;  %5281 = vrcp.f32 %v3899_v42  ;;  %v4016_v52 = vsub.f32 0.0, %v4015_v18  ;;  %v4030_v46 = vadd.f32 %v8876_v59, %v4029_v15  ;;  %v4070_v54 = vadd.f32 %v4069_v38, %v4068_v35  ;;  %v3602_v41 = vpop.f32.mrb[148].mxu1  ;;  %v4083_v63 = vld [vmem:[#allocation7 + $0x250] sm:$0xff] }
 0x50b   :  { %v3914_v56 = vadd.f32 1.0, %v5266_v27  ;;  %5283 = vpow2.f32 %v3987_v44  ;;  %v4044_v62 = vadd.f32 %v4043_v17, %v4042_v13  ;;  %v4057_v0 = vadd.f32 %v4056_v14, %v4055_v20  ;;  %3616 = vst.msk [vmem:[#allocation7 + $0x260] sm:$0xff] %vm2687_vm3, %v3602_v41  ;;  %v3604_v29 = vpop.f32.mrb[149].mxu1 }
 0x50c   :  { %v5268_v4 = vpop.eup %5267  ;;  %5285 = vpow2.f32 %v4002_v3  ;;  %v4017_v50 = vmul.f32 1.442695, %v4016_v52  ;;  %v4031_v2 = vsub.f32 0.0, %v4030_v46  ;;  %v4072_v60 = vadd.f32 %v4071_v48, %v4070_v54  ;;  %v4096_v16 = vld [vmem:[#allocation7 + $0x2a8] sm:$0xff] }
 0x50d   :  { %5287 = vrcp.f32 %v3914_v56  ;;  %v3929_v19 = vadd.f32 1.0, %v5268_v4  ;;  %v4045_v28 = vadd.f32 %v8876_v59, %v4044_v62  ;;  %v4059_v49 = vadd.f32 %v4058_v6, %v4057_v0  ;;  %v4121_v3 = vld [vmem:[#allocation7 + $0x208] sm:$0xff] }
 0x50e   :  { %v5270_v58 = vpop.eup %5269  ;;  %5289 = vpow2.f32 %v4017_v50  ;;  %v4032_v37 = vmul.f32 1.442695, %v4031_v2  ;;  %v4074_v34 = vadd.f32 %v4073_v53, %v4072_v60  ;;  %v4085_v47 = vadd.f32 %v4084_v57, %v4083_v63  ;;  %v4109_v9 = vld [vmem:[#allocation7 + $0x258] sm:$0xff]  ;;  %v3755_v45 = vpop.f32.mrb[150].mxu1 }
 0x50f   :  { %v5272_v43 = vpop.eup %5271  ;;  %3857 = vst.msk [vmem:[%s9076_s9 + $0x30] sm:$0xff] %vm2687_vm3, %v5270_v58  ;;  %5291 = vrcp.f32 %v3929_v19  ;;  %v4046_v39 = vsub.f32 0.0, %v4045_v28  ;;  %v4060_v30 = vadd.f32 %v8876_v59, %v4059_v49  ;;  %v4098_v10 = vadd.f32 %v4097_v36, %v4096_v16  ;;  %3769 = vst.msk [vmem:[#allocation7 + $0x2b8] sm:$0xff] %vm2687_vm3, %v3755_v45  ;;  %v3757_v21 = vpop.f32.mrb[151].mxu1 }
 0x510   :  { %v5274_v55 = vpop.eup %5273  ;;  %v3944_v1 = vadd.f32 1.0, %v5272_v43  ;;  %5293 = vpow2.f32 %v4032_v37  ;;  %v4075_v51 = vadd.f32 %v8876_v59, %v4074_v34  ;;  %v4087_v22 = vadd.f32 %v4086_v40, %v4085_v47  ;;  %v4120_v61 = vld [vmem:[#allocation7 + $0x2b0] sm:$0xff] }
 0x511   :  { %v5276_v31 = vpop.eup %5275  ;;  %3872 = vst.msk [vmem:[%s9076_s9 + $0x38] sm:$0xff] %vm2687_vm3, %v5274_v55  ;;  %v4047_v5 = vmul.f32 1.442695, %v4046_v39  ;;  %v4061_v33 = vsub.f32 0.0, %v4060_v30  ;;  %v4100_v7 = vadd.f32 %v4099_v8, %v4098_v10  ;;  %v4111_v44 = vadd.f32 %v4110_v23, %v4109_v9 }
 0x512   :  { %v5278_v24 = vpop.eup %5277  ;;  %5295 = vrcp.f32 %v3944_v1  ;;  %v3959_v12 = vadd.f32 1.0, %v5276_v31  ;;  %v4076_v11 = vsub.f32 0.0, %v4075_v51  ;;  %v4088_v26 = vadd.f32 %v8876_v59, %v4087_v22  ;;  %v4131_v25 = vld [vmem:[#allocation7 + $0x260] sm:$0xff] }
 0x513   :  { %v5280_v42 = vpop.eup %5279  ;;  %3887 = vst.msk [vmem:[%s9076_s9 + $0x40] sm:$0xff] %vm2687_vm3, %v5278_v24  ;;  %5297 = vpow2.f32 %v4047_v5  ;;  %v4062_v18 = vmul.f32 1.442695, %v4061_v33  ;;  %v4101_v15 = vadd.f32 %v8876_v59, %v4100_v7  ;;  %v4112_v35 = vadd.f32 %v8876_v59, %v4111_v44 }
 0x514   :  { %v5282_v38 = vpop.eup %5281  ;;  %5299 = vrcp.f32 %v3959_v12  ;;  %v3974_v13 = vadd.f32 1.0, %v5280_v42  ;;  %v4077_v20 = vmul.f32 1.442695, %v4076_v11  ;;  %v4089_v32 = vsub.f32 0.0, %v4088_v26 }
 0x515   :  { %v5284_v27 = vpop.eup %5283  ;;  %3902 = vst.msk [vmem:[%s9076_s9 + $0x48] sm:$0xff] %vm2687_vm3, %v5282_v38  ;;  %5301 = vpow2.f32 %v4062_v18  ;;  %v4102_v17 = vsub.f32 0.0, %v4101_v15  ;;  %v4113_v14 = vsub.f32 0.0, %v4112_v35  ;;  %v4122_v52 = vadd.f32 %v4121_v3, %v4120_v61 }
 0x516   :  { %v5286_v46 = vpop.eup %5285  ;;  %5303 = vrcp.f32 %v3974_v13  ;;  %v3989_v54 = vadd.f32 1.0, %v5284_v27  ;;  %v4090_v41 = vmul.f32 1.442695, %v4089_v32  ;;  %v4132_v48 = vadd.f32 %v8876_v59, %v4131_v25  ;;  %v4140_v56 = vld [vmem:[#allocation7 + $0x2b8] sm:$0xff] }
 0x517   :  { %v5288_v62 = vpop.eup %5287  ;;  %v4004_v0 = vadd.f32 1.0, %v5286_v46  ;;  %5305 = vpow2.f32 %v4077_v20  ;;  %v4103_v29 = vmul.f32 1.442695, %v4102_v17  ;;  %v4123_v4 = vadd.f32 %v8876_v59, %v4122_v52 }
 0x518   :  { %v5290_v63 = vpop.eup %5289  ;;  %3917 = vst.msk [vmem:[%s9076_s9 + $0x50] sm:$0xff] %vm2687_vm3, %v5288_v62  ;;  %5307 = vrcp.f32 %v3989_v54  ;;  %v4141_v6 = vadd.f32 %v8876_v59, %v4140_v56  ;;  %v4133_v60 = vsub.f32 0.0, %v4132_v48  ;;  %v4114_v53 = vmul.f32 1.442695, %v4113_v14 }
 0x519   :  { %v5292_v50 = vpop.eup %5291  ;;  %5309 = vrcp.f32 %v4004_v0  ;;  %v4019_v2 = vadd.f32 1.0, %v5290_v63  ;;  %v4124_v57 = vsub.f32 0.0, %v4123_v4 }
 0x51a   :  { %v5294_v16 = vpop.eup %5293  ;;  %3932 = vst.msk [vmem:[%s9076_s9 + $0x58] sm:$0xff] %vm2687_vm3, %v5292_v50  ;;  %5311 = vpow2.f32 %v4090_v41  ;;  %v4142_v28 = vsub.f32 0.0, %v4141_v6  ;;  %v4134_v36 = vmul.f32 1.442695, %v4133_v60 }
 0x51b   :  { %5313 = vrcp.f32 %v4019_v2  ;;  %v4034_v19 = vadd.f32 1.0, %v5294_v16  ;;  %v4125_v58 = vmul.f32 1.442695, %v4124_v57 }
 0x51c   :  { %v5296_v49 = vpop.eup %5295  ;;  %5315 = vpow2.f32 %v4103_v29  ;;  %v4143_v9 = vmul.f32 1.442695, %v4142_v28 }
 0x51d   :  { %v5298_v59 = vpop.eup %5297  ;;  %3947 = vst.msk [vmem:[%s9076_s9 + $0x60] sm:$0xff] %vm2687_vm3, %v5296_v49  ;;  %5317 = vrcp.f32 %v4034_v19 }
 0x51e   :  { %v5300_v37 = vpop.eup %5299  ;;  %v4049_v34 = vadd.f32 1.0, %v5298_v59  ;;  %5319 = vpow2.f32 %v4114_v53 }
 0x51f   :  { %v5302_v47 = vpop.eup %5301  ;;  %3962 = vst.msk [vmem:[%s9076_s9 + $0x68] sm:$0xff] %vm2687_vm3, %v5300_v37  ;;  %5321 = vpow2.f32 %v4125_v58 }
 0x520   :  { %v5304_v45 = vpop.eup %5303  ;;  %5323 = vrcp.f32 %v4049_v34  ;;  %v4064_v43 = vadd.f32 1.0, %v5302_v47 }
 0x521   :  { %v5306_v40 = vpop.eup %5305  ;;  %3977 = vst.msk [vmem:[%s9076_s9 + $0x70] sm:$0xff] %vm2687_vm3, %v5304_v45  ;;  %5325 = vpow2.f32 %v4134_v36 }
 0x522   :  { %v5308_v39 = vpop.eup %5307  ;;  %5327 = vrcp.f32 %v4064_v43  ;;  %v4079_v30 = vadd.f32 1.0, %v5306_v40 }
 0x523   :  { %v5310_v10 = vpop.eup %5309  ;;  %3992 = vst.msk [vmem:[%s9076_s9 + $0x78] sm:$0xff] %vm2687_vm3, %v5308_v39  ;;  %5329 = vpow2.f32 %v4143_v9 }
 0x524   :  { %v5312_v21 = vpop.eup %5311  ;;  %4007 = vst.msk [vmem:[%s9076_s9 + $0x80] sm:$0xff] %vm2687_vm3, %v5310_v10  ;;  %5331 = vrcp.f32 %v4079_v30 }
 0x525   :  { %v5314_v55 = vpop.eup %5313  ;;  %v4092_v8 = vadd.f32 1.0, %v5312_v21 }
 0x526   :  { %v5316_v23 = vpop.eup %5315  ;;  %4022 = vst.msk [vmem:[%s9076_s9 + $0x88] sm:$0xff] %vm2687_vm3, %v5314_v55 }
 0x527   :  { %v5318_v1 = vpop.eup %5317  ;;  %5333 = vrcp.f32 %v4092_v8  ;;  %v4105_v51 = vadd.f32 1.0, %v5316_v23 }
 0x528   :  { %v5320_v22 = vpop.eup %5319  ;;  %4037 = vst.msk [vmem:[%s9076_s9 + $0x90] sm:$0xff] %vm2687_vm3, %v5318_v1 }
 0x529   :  { %v5322_v31 = vpop.eup %5321  ;;  %5335 = vrcp.f32 %v4105_v51  ;;  %v4116_v5 = vadd.f32 1.0, %v5320_v22 }
 0x52a   :  { %v5324_v33 = vpop.eup %5323  ;;  %v4127_v7 = vadd.f32 1.0, %v5322_v31 }
 0x52b   :  { %v5326_v44 = vpop.eup %5325  ;;  %4052 = vst.msk [vmem:[%s9076_s9 + $0x98] sm:$0xff] %vm2687_vm3, %v5324_v33  ;;  %5337 = vrcp.f32 %v4116_v5 }
 0x52c   :  { %v5328_v24 = vpop.eup %5327  ;;  %5339 = vrcp.f32 %v4127_v7  ;;  %v4136_v12 = vadd.f32 1.0, %v5326_v44 }
 0x52d   :  { %v5330_v11 = vpop.eup %5329  ;;  %4067 = vst.msk [vmem:[%s9076_s9 + $0xa0] sm:$0xff] %vm2687_vm3, %v5328_v24 }
 0x52e   :  { %v5332_v26 = vpop.eup %5331  ;;  %5341 = vrcp.f32 %v4136_v12  ;;  %v4145_v61 = vadd.f32 1.0, %v5330_v11 }
 0x52f   :  { %4082 = vst.msk [vmem:[%s9076_s9 + $0xa8] sm:$0xff] %vm2687_vm3, %v5332_v26 }
 0x530   :  { %5343 = vrcp.f32 %v4145_v61 }
 0x531   :  { %v5334_v42 = vpop.eup %5333 }
 0x532   :  { %4095 = vst.msk [vmem:[%s9076_s9 + $0xb0] sm:$0xff] %vm2687_vm3, %v5334_v42 }
 0x533   :  { %v5336_v18 = vpop.eup %5335 }
 0x534   :  { %4108 = vst.msk [vmem:[%s9076_s9 + $0xb8] sm:$0xff] %vm2687_vm3, %v5336_v18 }
 0x535   :  { %v5338_v15 = vpop.eup %5337 }
 0x536   :  { %v5340_v35 = vpop.eup %5339  ;;  %4119 = vst.msk [vmem:[%s9076_s9 + $0xc0] sm:$0xff] %vm2687_vm3, %v5338_v15 }
 0x537   :  { %4130 = vst.msk [vmem:[%s9076_s9 + $0xc8] sm:$0xff] %vm2687_vm3, %v5340_v35 }
 0x538   :  { %v5342_v25 = vpop.eup %5341 }
 0x539   :  { %4139 = vst.msk [vmem:[%s9076_s9 + $0xd0] sm:$0xff] %vm2687_vm3, %v5342_v25 }
 0x53a   :  { %v5344_v38 = vpop.eup %5343 }
 0x53b   :  { %4148 = vst.msk [vmem:[%s9076_s9 + $0xd8] sm:$0xff] %vm2687_vm3, %v5344_v38 }

</bundles_post_ra>
